<compile_context>
chip_gen: v5e
topology: v5e:2x2
jax: 0.10.0
libtpu: 0.0.40
codegen_flags: <defaults>
</compile_context>

<pallas_src>
import jax
import jax.numpy as jnp
from jax.experimental import pallas as pl
from jax.experimental.pallas import tpu as pltpu

# ---------------- scaled-down SearchNetwork hyper-parameters ----------------
# Original: C=16, steps=4, multiplier=4 -> prev_C = 256 (matches the hard-coded
# Conv3d(256, 256, (35, 4, 13))). Here C=8, steps=2, multiplier=2 -> prev_C = 64
# to keep the demo small; the year conv keeps the hard-coded kernel (35, 4, 13).
C = 8
STEM_MULT = 3
N_LAYERS = 3
STEPS = 2
MULTIPLIER = 2

EMB_PRIMITIVES = ("emb_linear", "emb_relu_linear", "emb_tanh_linear")
PRIMITIVES = ("none", "skip_connect", "conv_1x1x1", "relu_conv_1x1x1")
NUM_EMB_OPS = len(EMB_PRIMITIVES)
NUM_OPS = len(PRIMITIVES)
K_EDGES = sum(2 + i for i in range(STEPS))

N_TILE = 2048  # lane-dense row tile (multiple of 128) of the fused cell kernel


def cell_plan():
    """Channel bookkeeping exactly as in SearchNetwork.__init__."""
    plan = []
    curr_c = C
    pp = p = C * STEM_MULT
    for i in range(N_LAYERS):
        if i in (N_LAYERS // 3, 2 * N_LAYERS // 3):
            curr_c *= 2
            reduction = True
        else:
            reduction = False
        plan.append(dict(pp=pp, p=p, c=curr_c, reduction=reduction))
        pp, p = p, MULTIPLIER * curr_c
    return plan, p  # p == final prev_C


# ------------------------- weight folding / packing (JAX) --------------------
def _pack_weights(params, w_normal, w_reduce):
    """Alpha-fold + block-stack all cell weights, then pack every resident matrix
    into ONE lane-aligned (max_r, total_cols) bf16 slab (one BlockSpec, one DMA,
    one double-buffer) with static slice metadata for the kernel.

    Per cell: a block-diagonal preprocess weight (2c, pp+p), then per step ONE
    stacked weight (c, 2*n_states*c) whose per-state column blocks are
    [a_conv*W1^T + a_skip*I | a_reluconv*W2^T], matching the interleaved
    [state; relu(state)] scratch buffer the kernel maintains ('none' -> 0).
    """
    plan = params["plan"]
    mats = [params["emb_w"].reshape(NUM_EMB_OPS, C * STEM_MULT).T]      # (C_emb, 3)
    cell_meta = []
    for cell_idx, cp in enumerate(plan):
        cell_w = params["cells"][cell_idx]
        alphas = w_reduce if cp["reduction"] else w_normal               # (K_EDGES, NUM_OPS)
        c, pp, p = cp["c"], cp["pp"], cp["p"]
        # fused block-diagonal preprocess: [h0; h1] = W_pre @ [relu(s0); relu(s1)]
        pre = jnp.zeros((2 * c, pp + p), jnp.float32)
        pre = pre.at[:c, :pp].set(cell_w["pre0"].T)
        pre = pre.at[c:, pp:].set(cell_w["pre1"].T)
        pre_i = len(mats)
        mats.append(pre)
        eye = jnp.eye(c, dtype=jnp.float32)
        step_is = []
        offset, n_states = 0, 2
        for _step in range(STEPS):
            blocks = []
            for j in range(n_states):
                a = alphas[offset + j]     # (none, skip, conv, relu_conv)
                blocks.append(a[2] * cell_w["edge_w1"][offset + j].T + a[1] * eye)  # * state_j
                blocks.append(a[3] * cell_w["edge_w2"][offset + j].T)               # * relu(state_j)
            step_is.append(len(mats))
            mats.append(jnp.concatenate(blocks, axis=1))                 # (c, 2*n_states*c)
            offset += n_states
            n_states += 1
        cell_meta.append(dict(c=c, pre=pre_i, steps=step_is))

    # pack: every matrix starts at a 128-aligned column (lane-aligned static slices).
    max_r = max(int(m.shape[0]) for m in mats)
    offs, total = [], 0
    for m in mats:
        offs.append(total)
        total += -(-int(m.shape[1]) // 128) * 128
    packed = jnp.zeros((max_r, total), jnp.bfloat16)
    slices = []
    for m, off in zip(mats, offs):
        r, w = int(m.shape[0]), int(m.shape[1])
        packed = packed.at[:r, off:off + w].set(m.astype(jnp.bfloat16))
        slices.append((off, r, w))
    meta = dict(
        emb=slices[0],
        cells=[dict(c=cm["c"], pre=slices[cm["pre"]],
                    steps=[slices[i] for i in cm["steps"]]) for cm in cell_meta])
    return packed, meta


# ------------------------------- Pallas kernels ------------------------------
def _make_fused_cells_kernel(meta):
    """Embedding mixed-op + all N_LAYERS cells for one N_TILE column block.

    Layout: channels on sublanes, rows on lanes -> every activation is
    (channels, N_TILE), every store is lane-dense, every 1x1x1 conv is an MXU
    matmul.  All weights live in one VMEM-resident packed slab; the only HBM
    traffic per tile is x in / bf16 s1 out.
    """
    emb_off, emb_r, emb_c = meta["emb"]
    cells = meta["cells"]

    def kernel(emb_a_ref, x_ref, w_ref, out_ref, sb_ref):
        x = x_ref[...]                                                   # (1, NT) f32
        ew = w_ref[0:emb_r, emb_off:emb_off + emb_c].astype(jnp.float32)
        s = (emb_a_ref[0] * (ew[:, 0:1] * x)
             + emb_a_ref[1] * jnp.maximum(ew[:, 1:2] * x, 0.0)
             + emb_a_ref[2] * jnp.tanh(ew[:, 2:3] * x))                  # (C_emb, NT) f32

        s0 = s1 = s
        for cm in cells:
            c = cm["c"]
            poff, prow, pcol = cm["pre"]
            # fused block-diagonal ReLU-conv preprocess -> [h0; h1] in one matmul
            pre_in = jnp.concatenate(
                [jnp.maximum(s0, 0.0), jnp.maximum(s1, 0.0)],
                axis=0).astype(jnp.bfloat16)                             # (pp+p, NT)
            h01 = jnp.dot(w_ref[0:prow, poff:poff + pcol], pre_in,
                          preferred_element_type=jnp.float32)            # (2c, NT) f32
            h0, h1 = h01[:c], h01[c:]
            # interleaved [state_k ; relu(state_k)] scratch -> ONE matmul per step,
            # each state (and its relu) written exactly once (no O(n^2) concats).
            sb_ref[0:c, :] = h0.astype(jnp.bfloat16)
            sb_ref[c:2 * c, :] = jnp.maximum(h0, 0.0).astype(jnp.bfloat16)
            sb_ref[2 * c:3 * c, :] = h1.astype(jnp.bfloat16)
            sb_ref[3 * c:4 * c, :] = jnp.maximum(h1, 0.0).astype(jnp.bfloat16)
            states = [h0, h1]
            for t, (soff, srow, scol) in enumerate(cm["steps"]):
                n = 2 + t
                new_state = jnp.dot(w_ref[0:srow, soff:soff + scol],
                                    sb_ref[0:2 * n * c, :],
                                    preferred_element_type=jnp.float32)  # (c, NT) f32
                if t + 1 < STEPS:  # the last step's states are never re-read
                    sb_ref[2 * n * c:(2 * n + 1) * c, :] = new_state.astype(jnp.bfloat16)
                    sb_ref[(2 * n + 1) * c:(2 * n + 2) * c, :] = (
                        jnp.maximum(new_state, 0.0).astype(jnp.bfloat16))
                states.append(new_state)
            s0, s1 = s1, jnp.concatenate(states[-MULTIPLIER:], axis=0)

        out_ref[...] = s1.astype(out_ref.dtype)                          # (prev_c, NT) bf16

    return kernel


def _year_head_kernel(x_ref, w_ref, b_ref, o_ref, acc_ref):
    """year_layers Conv3d as a K-tiled full-volume contraction (bf16 stream,
    f32 accumulation); conv bias folded into the accumulator init."""
    @pl.when(pl.program_id(1) == 0)
    def _():
        acc_ref[...] = jnp.broadcast_to(b_ref[...], acc_ref.shape)

    acc_ref[...] += jnp.dot(x_ref[...], w_ref[...],
                            preferred_element_type=jnp.float32)

    @pl.when(pl.program_id(1) == pl.num_programs(1) - 1)
    def _():
        # AdaptiveAvgPool3d(1) over (1,1,1) spatial is identity -> emit (B, Cout).
        o_ref[...] = acc_ref[...]


# ------------------------------ pallas_call glue ------------------------------
def fused_cells(emb_a, xs_pad, w_packed, meta, prev_c, nt=N_TILE):
    n_pad = xs_pad.shape[1]
    max_c = max(cm["c"] for cm in meta["cells"])
    sb_rows = 2 * (2 + STEPS) * max_c
    return pl.pallas_call(
        _make_fused_cells_kernel(meta),
        out_shape=jax.ShapeDtypeStruct((prev_c, n_pad), jnp.bfloat16),
        grid=(n_pad // nt,),
        in_specs=[
            pl.BlockSpec(memory_space=pltpu.MemorySpace.SMEM),   # softmax(alpha_emb) scalars
            pl.BlockSpec((1, nt), lambda i: (0, i)),             # x rows on the lane axis
            pl.BlockSpec(w_packed.shape, lambda i: (0, 0)),      # packed weights, VMEM-resident
        ],
        out_specs=pl.BlockSpec((prev_c, nt), lambda i: (0, i)),
        scratch_shapes=[pltpu.VMEM((sb_rows, nt), jnp.bfloat16)],
        compiler_params=pltpu.CompilerParams(
            dimension_semantics=("parallel",),   # row tiles independent (megacore on v7x)
            vmem_limit_bytes=32 * 1024 * 1024),
    )(emb_a, xs_pad, w_packed)


def year_head(x_flat, w_flat, b):
    """(B, K) @ (K, Cout) + b, K-tiled bf16 weight stream with f32 accumulation."""
    B, K = x_flat.shape
    Cout = w_flat.shape[1]
    # Cout split: lets v7x's second TensorCore stream half the weight bytes when
    # the block stays a 128 multiple (production Cout=256); identity split here.
    cb = Cout // 2 if Cout % 256 == 0 else Cout
    n_co = Cout // cb
    # K tile: biggest divisor whose DOUBLE-BUFFERED bf16 weight block fits a
    # conservative budget (comfortably inside the 32 MiB scoped limit everywhere,
    # including v7x's 64 MiB physical VMEM per TC).
    weight_budget = 12 * 1024 * 1024
    tk = K
    if K % 128 == 0:
        for cand in (128 * 364, 128 * 182, 128 * 91, 128 * 35, 128 * 13, 128 * 7, 128):
            if K % cand == 0 and 2 * 2 * cand * cb <= weight_budget:
                tk = cand
                break
    nk = K // tk
    cost = pl.CostEstimate(flops=2 * B * K * Cout, transcendentals=0,
                           bytes_accessed=K * Cout * 2 + B * K * 2 + B * Cout * 4)
    return pl.pallas_call(
        _year_head_kernel,
        out_shape=jax.ShapeDtypeStruct((B, Cout), jnp.float32),
        grid=(n_co, nk),
        in_specs=[
            pl.BlockSpec((B, tk), lambda co, k: (0, k)),
            pl.BlockSpec((tk, cb), lambda co, k: (k, co)),
            pl.BlockSpec((1, cb), lambda co, k: (0, co)),
        ],
        out_specs=pl.BlockSpec((B, cb), lambda co, k: (0, co)),
        scratch_shapes=[pltpu.VMEM((B, cb), jnp.float32)],
        compiler_params=pltpu.CompilerParams(
            dimension_semantics=("parallel", "arbitrary"),
            vmem_limit_bytes=32 * 1024 * 1024),
        cost_estimate=cost,
    )(x_flat, w_flat, b)


# --------------------------------- forward -----------------------------------
def search_network_forward(x, params, nt=N_TILE):
    # x: (B, A, D, J, W) -- PyTorch forward() slices x[:, :, :, j, :] over dim 3 (J).
    B, A, D_, J, W = x.shape
    N = B * J * A * D_ * W
    n_pad = pl.cdiv(N, nt) * nt

    # All synthetic cell ops are pointwise over channels, so every J slice is
    # processed in one fused pass (identical result to the per-slice Python loop).
    # Lane-dense layout: rows on the lane axis -> x is (1, N_pad).
    xs = jnp.transpose(x, (0, 3, 1, 2, 4)).reshape(1, N)
    xs_pad = jnp.pad(xs, ((0, 0), (0, n_pad - N)))

    emb_a = jax.nn.softmax(params["alpha_emb"])                   # (3,) -> SMEM
    w_normal = jax.nn.softmax(params["alpha_normal"], axis=-1)
    w_reduce = jax.nn.softmax(params["alpha_reduce"], axis=-1)
    w_packed, meta = _pack_weights(params, w_normal, w_reduce)
    prev_c = MULTIPLIER * meta["cells"][-1]["c"]

    # One fused, row-tiled, weight-resident pass: x in, bf16 s1 out.
    s1_full = fused_cells(emb_a, xs_pad, w_packed, meta, prev_c, nt)
    s1 = s1_full[:, :N]                                           # (prev_c, N) bf16

    # torch.cat(s1_lst, dim=3) + year_layers Conv3d(prev_c, prev_c, (A, J*D, W),
    # stride=4, pad=0): output spatial (1,1,1) -> one full-volume contraction.
    # The spatial permutation lives in year_w (folded at init); only the cheap
    # prev_c <-> B swap remains at runtime, consuming the bf16 output directly.
    M = J * A * D_ * W
    x_year = s1.reshape(prev_c, B, M).transpose(1, 0, 2).reshape(B, prev_c * M)

    conv_out = year_head(x_year, params["year_w"], params["year_b"])   # (B, prev_c) f32
    # regressor: AdaptiveAvgPool3d(1) over (1,1,1) spatial is identity; Flatten;
    # Linear(prev_C, 1) -- trivial, left un-fused in plain JAX per review.
    logits = conv_out @ params["lin_w"] + params["lin_b"]              # (B, 1)
    return logits


# ------------------------------ parameter init -------------------------------
def init_params(key, A, D_, J, W):
    plan, prev_c = cell_plan()
    keys = jax.random.split(key, 8)
    params = {"plan": plan}
    params["alpha_emb"] = 0.001 * jax.random.normal(keys[0], (NUM_EMB_OPS,), jnp.float32)
    params["alpha_normal"] = 0.001 * jax.random.normal(keys[1], (K_EDGES, NUM_OPS), jnp.float32)
    params["alpha_reduce"] = 0.001 * jax.random.normal(keys[2], (K_EDGES, NUM_OPS), jnp.float32)
    params["emb_w"] = 0.1 * jax.random.normal(
        keys[3], (NUM_EMB_OPS, 1, C * STEM_MULT), jnp.float32)

    cells = []
    cell_keys = jax.random.split(keys[4], len(plan))
    for cp, k in zip(plan, cell_keys):
        k0, k1, k2, k3 = jax.random.split(k, 4)
        cells.append(dict(
            pre0=(1.0 / jnp.sqrt(cp["pp"])) *
                 jax.random.normal(k0, (cp["pp"], cp["c"]), jnp.float32),
            pre1=(1.0 / jnp.sqrt(cp["p"])) *
                 jax.random.normal(k1, (cp["p"], cp["c"]), jnp.float32),
            edge_w1=(1.0 / jnp.sqrt(cp["c"])) *
                    jax.random.normal(k2, (K_EDGES, cp["c"], cp["c"]), jnp.float32),
            edge_w2=(1.0 / jnp.sqrt(cp["c"])) *
                    jax.random.normal(k3, (K_EDGES, cp["c"], cp["c"]), jnp.float32),
        ))
    params["cells"] = cells

    K = prev_c * A * (J * D_) * W
    # PyTorch Conv3d weight layout (Cout, Cin, kD=A, kH=J*D, kW=W); the
    # (A, J*D, W) -> (J, A, D, W) permutation is folded in at init (one-time
    # host cost) so the runtime reshape is only the prev_c <-> B swap.  Stored
    # bf16 since the year conv is purely HBM-bandwidth bound.
    w5 = (1.0 / jnp.sqrt(K)) * jax.random.normal(
        keys[5], (prev_c, prev_c, A, J * D_, W), jnp.float32)
    w6 = w5.reshape(prev_c, prev_c, A, J, D_, W).transpose(0, 1, 3, 2, 4, 5)
    params["year_w"] = w6.reshape(prev_c, K).T.astype(jnp.bfloat16)       # (K, Cout)
    params["year_b"] = 0.01 * jax.random.normal(keys[6], (1, prev_c), jnp.float32)
    params["lin_w"] = (1.0 / jnp.sqrt(prev_c)) * jax.random.normal(
        keys[7], (prev_c, 1), jnp.float32)
    params["lin_b"] = jnp.zeros((1, 1), jnp.float32)
    return params, prev_c


if __name__ == "__main__":
    key = jax.random.PRNGKey(0)
    kx, kp = jax.random.split(key)
    # x matches the 5-D PyTorch input sliced along dim 3 in forward():
    # (B, A, D, J, W). year_layers' hard-coded kernel (35, 4, 13) implies
    # A=35, J*D=4, W=13 after the (spatial-preserving) cell stack.
    B, A, D_, J, W = 2, 35, 1, 4, 13
    x = jax.random.normal(kx, (B, A, D_, J, W), jnp.float32)
    params, prev_c = init_params(kp, A, D_, J, W)

    logits = search_network_forward(x, params)
    jax.block_until_ready(logits)
    assert logits.shape == (B, 1) and logits.dtype == jnp.float32
    assert bool(jnp.all(jnp.isfinite(logits)))
    print("KERNEL_OK")
</pallas_src>

<mosaic_0001>
module attributes {stable_mosaic.version = 11 : i64} {
  func.func @kernel(%arg0: i32, %arg1: memref<3xf32, #tpu.memory_space<smem>>, %arg2: memref<1x2048xf32, #tpu.memory_space<vmem>>, %arg3: memref<64x1408xbf16, #tpu.memory_space<vmem>>, %arg4: memref<64x2048xbf16, #tpu.memory_space<vmem>>, %arg5: memref<256x2048xbf16, #tpu.memory_space<vmem>>) attributes {dimension_semantics = [#tpu.dimension_semantics<parallel>], iteration_bounds = array<i64: 2>, scalar_prefetch = 0 : i64, scratch_operands = 1 : i64, tpu.core_type = #tpu.core_type<tc>, window_params = [{transform_indices = @transform_0, window_bounds = array<i64: 3>}, {transform_indices = @transform_1, window_bounds = array<i64: 1, 2048>}, {pipeline_mode = #tpu.pipeline_mode<synchronous>, transform_indices = @transform_2, window_bounds = array<i64: 64, 1408>}, {transform_indices = @transform_3, window_bounds = array<i64: 64, 2048>}]} {
    %c0 = arith.constant 0 : index
    %c0_0 = arith.constant 0 : index
    %0 = vector.load %arg2[%c0, %c0_0] : memref<1x2048xf32, #tpu.memory_space<vmem>>, vector<1x2048xf32>
    %c0_1 = arith.constant 0 : index
    %c0_2 = arith.constant 0 : index
    %1 = vector.load %arg3[%c0_1, %c0_2] : memref<64x1408xbf16, #tpu.memory_space<vmem>>, vector<24x3xbf16>
    %2 = arith.extf %1 : vector<24x3xbf16> to vector<24x3xf32>
    %c0_3 = arith.constant 0 : index
    %3 = memref.load %arg1[%c0_3] : memref<3xf32, #tpu.memory_space<smem>>
    %4 = vector.extract_strided_slice %2 {offsets = [0, 0], sizes = [24, 1], strides = [1, 1]} : vector<24x3xf32> to vector<24x1xf32>
    %5 = vector.broadcast %4 : vector<24x1xf32> to vector<24x2048xf32>
    %6 = vector.broadcast %0 : vector<1x2048xf32> to vector<24x2048xf32>
    %7 = arith.mulf %5, %6 : vector<24x2048xf32>
    %8 = vector.broadcast %3 : f32 to vector<24x2048xf32>
    %9 = arith.mulf %8, %7 : vector<24x2048xf32>
    %c1 = arith.constant 1 : index
    %10 = memref.load %arg1[%c1] : memref<3xf32, #tpu.memory_space<smem>>
    %11 = vector.extract_strided_slice %2 {offsets = [0, 1], sizes = [24, 1], strides = [1, 1]} : vector<24x3xf32> to vector<24x1xf32>
    %12 = vector.broadcast %11 : vector<24x1xf32> to vector<24x2048xf32>
    %13 = vector.broadcast %0 : vector<1x2048xf32> to vector<24x2048xf32>
    %14 = arith.mulf %12, %13 : vector<24x2048xf32>
    %cst = arith.constant 0.000000e+00 : f32
    %15 = vector.broadcast %cst : f32 to vector<24x2048xf32>
    %16 = arith.maximumf %14, %15 : vector<24x2048xf32>
    %17 = vector.broadcast %10 : f32 to vector<24x2048xf32>
    %18 = arith.mulf %17, %16 : vector<24x2048xf32>
    %19 = arith.addf %9, %18 : vector<24x2048xf32>
    %c2 = arith.constant 2 : index
    %20 = memref.load %arg1[%c2] : memref<3xf32, #tpu.memory_space<smem>>
    %21 = vector.extract_strided_slice %2 {offsets = [0, 2], sizes = [24, 1], strides = [1, 1]} : vector<24x3xf32> to vector<24x1xf32>
    %22 = vector.broadcast %21 : vector<24x1xf32> to vector<24x2048xf32>
    %23 = vector.broadcast %0 : vector<1x2048xf32> to vector<24x2048xf32>
    %24 = arith.mulf %22, %23 : vector<24x2048xf32>
    %25 = math.tanh %24 : vector<24x2048xf32>
    %26 = vector.broadcast %20 : f32 to vector<24x2048xf32>
    %27 = arith.mulf %26, %25 : vector<24x2048xf32>
    %28 = arith.addf %19, %27 : vector<24x2048xf32>
    %cst_4 = arith.constant 0.000000e+00 : f32
    %29 = vector.broadcast %cst_4 : f32 to vector<24x2048xf32>
    %30 = arith.maximumf %28, %29 : vector<24x2048xf32>
    %cst_5 = arith.constant 0.000000e+00 : f32
    %31 = vector.broadcast %cst_5 : f32 to vector<24x2048xf32>
    %32 = arith.maximumf %28, %31 : vector<24x2048xf32>
    %33 = tpu.concatenate %30, %32 in 0 : vector<24x2048xf32>, vector<24x2048xf32> -> vector<48x2048xf32>
    %34 = arith.truncf %33 : vector<48x2048xf32> to vector<48x2048xbf16>
    %c0_6 = arith.constant 0 : index
    %c128 = arith.constant 128 : index
    %35 = vector.load %arg3[%c0_6, %c128] : memref<64x1408xbf16, #tpu.memory_space<vmem>>, vector<16x48xbf16>
    %cst_7 = arith.constant dense<0.000000e+00> : vector<16x2048xf32>
    %36 = tpu.matmul %35, %34, %cst_7 {dimension_numbers = #tpu.dot_dimension_numbers<[1], [0], [0], [1], [0, 0, 1, 1], [], []>} : vector<16x48xbf16>, vector<48x2048xbf16>, vector<16x2048xf32> -> vector<16x2048xf32>
    %37 = vector.extract_strided_slice %36 {offsets = [0, 0], sizes = [8, 2048], strides = [1, 1]} : vector<16x2048xf32> to vector<8x2048xf32>
    %38 = vector.extract_strided_slice %36 {offsets = [8, 0], sizes = [8, 2048], strides = [1, 1]} : vector<16x2048xf32> to vector<8x2048xf32>
    %39 = arith.truncf %37 : vector<8x2048xf32> to vector<8x2048xbf16>
    %c0_8 = arith.constant 0 : index
    %c0_9 = arith.constant 0 : index
    %40 = vector.load %arg5[%c0_8, %c0_9] : memref<256x2048xbf16, #tpu.memory_space<vmem>>, vector<8x2048xbf16>
    tpu.vector_store %arg5[%c0_8, %c0_9], %39 {strides = array<i32>} : memref<256x2048xbf16, #tpu.memory_space<vmem>>, vector<8x2048xbf16>,
    %cst_10 = arith.constant 0.000000e+00 : f32
    %41 = vector.broadcast %cst_10 : f32 to vector<8x2048xf32>
    %42 = arith.maximumf %37, %41 : vector<8x2048xf32>
    %43 = arith.truncf %42 : vector<8x2048xf32> to vector<8x2048xbf16>
    %c8 = arith.constant 8 : index
    %c0_11 = arith.constant 0 : index
    %44 = vector.load %arg5[%c8, %c0_11] : memref<256x2048xbf16, #tpu.memory_space<vmem>>, vector<8x2048xbf16>
    tpu.vector_store %arg5[%c8, %c0_11], %43 {strides = array<i32>} : memref<256x2048xbf16, #tpu.memory_space<vmem>>, vector<8x2048xbf16>,
    %45 = arith.truncf %38 : vector<8x2048xf32> to vector<8x2048xbf16>
    %c16 = arith.constant 16 : index
    %c0_12 = arith.constant 0 : index
    %46 = vector.load %arg5[%c16, %c0_12] : memref<256x2048xbf16, #tpu.memory_space<vmem>>, vector<8x2048xbf16>
    tpu.vector_store %arg5[%c16, %c0_12], %45 {strides = array<i32>} : memref<256x2048xbf16, #tpu.memory_space<vmem>>, vector<8x2048xbf16>,
    %cst_13 = arith.constant 0.000000e+00 : f32
    %47 = vector.broadcast %cst_13 : f32 to vector<8x2048xf32>
    %48 = arith.maximumf %38, %47 : vector<8x2048xf32>
    %49 = arith.truncf %48 : vector<8x2048xf32> to vector<8x2048xbf16>
    %c24 = arith.constant 24 : index
    %c0_14 = arith.constant 0 : index
    %50 = vector.load %arg5[%c24, %c0_14] : memref<256x2048xbf16, #tpu.memory_space<vmem>>, vector<8x2048xbf16>
    tpu.vector_store %arg5[%c24, %c0_14], %49 {strides = array<i32>} : memref<256x2048xbf16, #tpu.memory_space<vmem>>, vector<8x2048xbf16>,
    %c0_15 = arith.constant 0 : index
    %c256 = arith.constant 256 : index
    %51 = vector.load %arg3[%c0_15, %c256] : memref<64x1408xbf16, #tpu.memory_space<vmem>>, vector<8x32xbf16>
    %c0_16 = arith.constant 0 : index
    %c0_17 = arith.constant 0 : index
    %52 = vector.load %arg5[%c0_16, %c0_17] : memref<256x2048xbf16, #tpu.memory_space<vmem>>, vector<32x2048xbf16>
    %cst_18 = arith.constant dense<0.000000e+00> : vector<8x2048xf32>
    %53 = tpu.matmul %51, %52, %cst_18 {dimension_numbers = #tpu.dot_dimension_numbers<[1], [0], [0], [1], [0, 0, 1, 1], [], []>} : vector<8x32xbf16>, vector<32x2048xbf16>, vector<8x2048xf32> -> vector<8x2048xf32>
    %54 = arith.truncf %53 : vector<8x2048xf32> to vector<8x2048xbf16>
    %c32 = arith.constant 32 : index
    %c0_19 = arith.constant 0 : index
    %55 = vector.load %arg5[%c32, %c0_19] : memref<256x2048xbf16, #tpu.memory_space<vmem>>, vector<8x2048xbf16>
    tpu.vector_store %arg5[%c32, %c0_19], %54 {strides = array<i32>} : memref<256x2048xbf16, #tpu.memory_space<vmem>>, vector<8x2048xbf16>,
    %cst_20 = arith.constant 0.000000e+00 : f32
    %56 = vector.broadcast %cst_20 : f32 to vector<8x2048xf32>
    %57 = arith.maximumf %53, %56 : vector<8x2048xf32>
    %58 = arith.truncf %57 : vector<8x2048xf32> to vector<8x2048xbf16>
    %c40 = arith.constant 40 : index
    %c0_21 = arith.constant 0 : index
    %59 = vector.load %arg5[%c40, %c0_21] : memref<256x2048xbf16, #tpu.memory_space<vmem>>, vector<8x2048xbf16>
    tpu.vector_store %arg5[%c40, %c0_21], %58 {strides = array<i32>} : memref<256x2048xbf16, #tpu.memory_space<vmem>>, vector<8x2048xbf16>,
    %c0_22 = arith.constant 0 : index
    %c384 = arith.constant 384 : index
    %60 = vector.load %arg3[%c0_22, %c384] : memref<64x1408xbf16, #tpu.memory_space<vmem>>, vector<8x48xbf16>
    %c0_23 = arith.constant 0 : index
    %c0_24 = arith.constant 0 : index
    %61 = vector.load %arg5[%c0_23, %c0_24] : memref<256x2048xbf16, #tpu.memory_space<vmem>>, vector<48x2048xbf16>
    %cst_25 = arith.constant dense<0.000000e+00> : vector<8x2048xf32>
    %62 = tpu.matmul %60, %61, %cst_25 {dimension_numbers = #tpu.dot_dimension_numbers<[1], [0], [0], [1], [0, 0, 1, 1], [], []>} : vector<8x48xbf16>, vector<48x2048xbf16>, vector<8x2048xf32> -> vector<8x2048xf32>
    %63 = tpu.concatenate %53, %62 in 0 : vector<8x2048xf32>, vector<8x2048xf32> -> vector<16x2048xf32>
    %cst_26 = arith.constant 0.000000e+00 : f32
    %64 = vector.broadcast %cst_26 : f32 to vector<24x2048xf32>
    %65 = arith.maximumf %28, %64 : vector<24x2048xf32>
    %cst_27 = arith.constant 0.000000e+00 : f32
    %66 = vector.broadcast %cst_27 : f32 to vector<16x2048xf32>
    %67 = arith.maximumf %63, %66 : vector<16x2048xf32>
    %68 = tpu.concatenate %65, %67 in 0 : vector<24x2048xf32>, vector<16x2048xf32> -> vector<40x2048xf32>
    %69 = arith.truncf %68 : vector<40x2048xf32> to vector<40x2048xbf16>
    %c0_28 = arith.constant 0 : index
    %c512 = arith.constant 512 : index
    %70 = vector.load %arg3[%c0_28, %c512] : memref<64x1408xbf16, #tpu.memory_space<vmem>>, vector<32x40xbf16>
    %cst_29 = arith.constant dense<0.000000e+00> : vector<32x2048xf32>
    %71 = tpu.matmul %70, %69, %cst_29 {dimension_numbers = #tpu.dot_dimension_numbers<[1], [0], [0], [1], [0, 0, 1, 1], [], []>} : vector<32x40xbf16>, vector<40x2048xbf16>, vector<32x2048xf32> -> vector<32x2048xf32>
    %72 = vector.extract_strided_slice %71 {offsets = [0, 0], sizes = [16, 2048], strides = [1, 1]} : vector<32x2048xf32> to vector<16x2048xf32>
    %73 = vector.extract_strided_slice %71 {offsets = [16, 0], sizes = [16, 2048], strides = [1, 1]} : vector<32x2048xf32> to vector<16x2048xf32>
    %74 = arith.truncf %72 : vector<16x2048xf32> to vector<16x2048xbf16>
    %c0_30 = arith.constant 0 : index
    %c0_31 = arith.constant 0 : index
    %75 = vector.load %arg5[%c0_30, %c0_31] : memref<256x2048xbf16, #tpu.memory_space<vmem>>, vector<16x2048xbf16>
    tpu.vector_store %arg5[%c0_30, %c0_31], %74 {strides = array<i32>} : memref<256x2048xbf16, #tpu.memory_space<vmem>>, vector<16x2048xbf16>,
    %cst_32 = arith.constant 0.000000e+00 : f32
    %76 = vector.broadcast %cst_32 : f32 to vector<16x2048xf32>
    %77 = arith.maximumf %72, %76 : vector<16x2048xf32>
    %78 = arith.truncf %77 : vector<16x2048xf32> to vector<16x2048xbf16>
    %c16_33 = arith.constant 16 : index
    %c0_34 = arith.constant 0 : index
    %79 = vector.load %arg5[%c16_33, %c0_34] : memref<256x2048xbf16, #tpu.memory_space<vmem>>, vector<16x2048xbf16>
    tpu.vector_store %arg5[%c16_33, %c0_34], %78 {strides = array<i32>} : memref<256x2048xbf16, #tpu.memory_space<vmem>>, vector<16x2048xbf16>,
    %80 = arith.truncf %73 : vector<16x2048xf32> to vector<16x2048xbf16>
    %c32_35 = arith.constant 32 : index
    %c0_36 = arith.constant 0 : index
    %81 = vector.load %arg5[%c32_35, %c0_36] : memref<256x2048xbf16, #tpu.memory_space<vmem>>, vector<16x2048xbf16>
    tpu.vector_store %arg5[%c32_35, %c0_36], %80 {strides = array<i32>} : memref<256x2048xbf16, #tpu.memory_space<vmem>>, vector<16x2048xbf16>,
    %cst_37 = arith.constant 0.000000e+00 : f32
    %82 = vector.broadcast %cst_37 : f32 to vector<16x2048xf32>
    %83 = arith.maximumf %73, %82 : vector<16x2048xf32>
    %84 = arith.truncf %83 : vector<16x2048xf32> to vector<16x2048xbf16>
    %c48 = arith.constant 48 : index
    %c0_38 = arith.constant 0 : index
    %85 = vector.load %arg5[%c48, %c0_38] : memref<256x2048xbf16, #tpu.memory_space<vmem>>, vector<16x2048xbf16>
    tpu.vector_store %arg5[%c48, %c0_38], %84 {strides = array<i32>} : memref<256x2048xbf16, #tpu.memory_space<vmem>>, vector<16x2048xbf16>,
    %c0_39 = arith.constant 0 : index
    %c640 = arith.constant 640 : index
    %86 = vector.load %arg3[%c0_39, %c640] : memref<64x1408xbf16, #tpu.memory_space<vmem>>, vector<16x64xbf16>
    %c0_40 = arith.constant 0 : index
    %c0_41 = arith.constant 0 : index
    %87 = vector.load %arg5[%c0_40, %c0_41] : memref<256x2048xbf16, #tpu.memory_space<vmem>>, vector<64x2048xbf16>
    %cst_42 = arith.constant dense<0.000000e+00> : vector<16x2048xf32>
    %88 = tpu.matmul %86, %87, %cst_42 {dimension_numbers = #tpu.dot_dimension_numbers<[1], [0], [0], [1], [0, 0, 1, 1], [], []>} : vector<16x64xbf16>, vector<64x2048xbf16>, vector<16x2048xf32> -> vector<16x2048xf32>
    %89 = arith.truncf %88 : vector<16x2048xf32> to vector<16x2048xbf16>
    %c64 = arith.constant 64 : index
    %c0_43 = arith.constant 0 : index
    %90 = vector.load %arg5[%c64, %c0_43] : memref<256x2048xbf16, #tpu.memory_space<vmem>>, vector<16x2048xbf16>
    tpu.vector_store %arg5[%c64, %c0_43], %89 {strides = array<i32>} : memref<256x2048xbf16, #tpu.memory_space<vmem>>, vector<16x2048xbf16>,
    %cst_44 = arith.constant 0.000000e+00 : f32
    %91 = vector.broadcast %cst_44 : f32 to vector<16x2048xf32>
    %92 = arith.maximumf %88, %91 : vector<16x2048xf32>
    %93 = arith.truncf %92 : vector<16x2048xf32> to vector<16x2048xbf16>
    %c80 = arith.constant 80 : index
    %c0_45 = arith.constant 0 : index
    %94 = vector.load %arg5[%c80, %c0_45] : memref<256x2048xbf16, #tpu.memory_space<vmem>>, vector<16x2048xbf16>
    tpu.vector_store %arg5[%c80, %c0_45], %93 {strides = array<i32>} : memref<256x2048xbf16, #tpu.memory_space<vmem>>, vector<16x2048xbf16>,
    %c0_46 = arith.constant 0 : index
    %c768 = arith.constant 768 : index
    %95 = vector.load %arg3[%c0_46, %c768] : memref<64x1408xbf16, #tpu.memory_space<vmem>>, vector<16x96xbf16>
    %c0_47 = arith.constant 0 : index
    %c0_48 = arith.constant 0 : index
    %96 = vector.load %arg5[%c0_47, %c0_48] : memref<256x2048xbf16, #tpu.memory_space<vmem>>, vector<96x2048xbf16>
    %cst_49 = arith.constant dense<0.000000e+00> : vector<16x2048xf32>
    %97 = tpu.matmul %95, %96, %cst_49 {dimension_numbers = #tpu.dot_dimension_numbers<[1], [0], [0], [1], [0, 0, 1, 1], [], []>} : vector<16x96xbf16>, vector<96x2048xbf16>, vector<16x2048xf32> -> vector<16x2048xf32>
    %98 = tpu.concatenate %88, %97 in 0 : vector<16x2048xf32>, vector<16x2048xf32> -> vector<32x2048xf32>
    %cst_50 = arith.constant 0.000000e+00 : f32
    %99 = vector.broadcast %cst_50 : f32 to vector<16x2048xf32>
    %100 = arith.maximumf %63, %99 : vector<16x2048xf32>
    %cst_51 = arith.constant 0.000000e+00 : f32
    %101 = vector.broadcast %cst_51 : f32 to vector<32x2048xf32>
    %102 = arith.maximumf %98, %101 : vector<32x2048xf32>
    %103 = tpu.concatenate %100, %102 in 0 : vector<16x2048xf32>, vector<32x2048xf32> -> vector<48x2048xf32>
    %104 = arith.truncf %103 : vector<48x2048xf32> to vector<48x2048xbf16>
    %c0_52 = arith.constant 0 : index
    %c896 = arith.constant 896 : index
    %105 = vector.load %arg3[%c0_52, %c896] : memref<64x1408xbf16, #tpu.memory_space<vmem>>, vector<64x48xbf16>
    %cst_53 = arith.constant dense<0.000000e+00> : vector<64x2048xf32>
    %106 = tpu.matmul %105, %104, %cst_53 {dimension_numbers = #tpu.dot_dimension_numbers<[1], [0], [0], [1], [0, 0, 1, 1], [], []>} : vector<64x48xbf16>, vector<48x2048xbf16>, vector<64x2048xf32> -> vector<64x2048xf32>
    %107 = vector.extract_strided_slice %106 {offsets = [0, 0], sizes = [32, 2048], strides = [1, 1]} : vector<64x2048xf32> to vector<32x2048xf32>
    %108 = vector.extract_strided_slice %106 {offsets = [32, 0], sizes = [32, 2048], strides = [1, 1]} : vector<64x2048xf32> to vector<32x2048xf32>
    %109 = arith.truncf %107 : vector<32x2048xf32> to vector<32x2048xbf16>
    %c0_54 = arith.constant 0 : index
    %c0_55 = arith.constant 0 : index
    %110 = vector.load %arg5[%c0_54, %c0_55] : memref<256x2048xbf16, #tpu.memory_space<vmem>>, vector<32x2048xbf16>
    tpu.vector_store %arg5[%c0_54, %c0_55], %109 {strides = array<i32>} : memref<256x2048xbf16, #tpu.memory_space<vmem>>, vector<32x2048xbf16>,
    %cst_56 = arith.constant 0.000000e+00 : f32
    %111 = vector.broadcast %cst_56 : f32 to vector<32x2048xf32>
    %112 = arith.maximumf %107, %111 : vector<32x2048xf32>
    %113 = arith.truncf %112 : vector<32x2048xf32> to vector<32x2048xbf16>
    %c32_57 = arith.constant 32 : index
    %c0_58 = arith.constant 0 : index
    %114 = vector.load %arg5[%c32_57, %c0_58] : memref<256x2048xbf16, #tpu.memory_space<vmem>>, vector<32x2048xbf16>
    tpu.vector_store %arg5[%c32_57, %c0_58], %113 {strides = array<i32>} : memref<256x2048xbf16, #tpu.memory_space<vmem>>, vector<32x2048xbf16>,
    %115 = arith.truncf %108 : vector<32x2048xf32> to vector<32x2048xbf16>
    %c64_59 = arith.constant 64 : index
    %c0_60 = arith.constant 0 : index
    %116 = vector.load %arg5[%c64_59, %c0_60] : memref<256x2048xbf16, #tpu.memory_space<vmem>>, vector<32x2048xbf16>
    tpu.vector_store %arg5[%c64_59, %c0_60], %115 {strides = array<i32>} : memref<256x2048xbf16, #tpu.memory_space<vmem>>, vector<32x2048xbf16>,
    %cst_61 = arith.constant 0.000000e+00 : f32
    %117 = vector.broadcast %cst_61 : f32 to vector<32x2048xf32>
    %118 = arith.maximumf %108, %117 : vector<32x2048xf32>
    %119 = arith.truncf %118 : vector<32x2048xf32> to vector<32x2048xbf16>
    %c96 = arith.constant 96 : index
    %c0_62 = arith.constant 0 : index
    %120 = vector.load %arg5[%c96, %c0_62] : memref<256x2048xbf16, #tpu.memory_space<vmem>>, vector<32x2048xbf16>
    tpu.vector_store %arg5[%c96, %c0_62], %119 {strides = array<i32>} : memref<256x2048xbf16, #tpu.memory_space<vmem>>, vector<32x2048xbf16>,
    %c0_63 = arith.constant 0 : index
    %c1024 = arith.constant 1024 : index
    %121 = vector.load %arg3[%c0_63, %c1024] : memref<64x1408xbf16, #tpu.memory_space<vmem>>, vector<32x128xbf16>
    %c0_64 = arith.constant 0 : index
    %c0_65 = arith.constant 0 : index
    %122 = vector.load %arg5[%c0_64, %c0_65] : memref<256x2048xbf16, #tpu.memory_space<vmem>>, vector<128x2048xbf16>
    %cst_66 = arith.constant dense<0.000000e+00> : vector<32x2048xf32>
    %123 = tpu.matmul %121, %122, %cst_66 {dimension_numbers = #tpu.dot_dimension_numbers<[1], [0], [0], [1], [0, 0, 1, 1], [], []>} : vector<32x128xbf16>, vector<128x2048xbf16>, vector<32x2048xf32> -> vector<32x2048xf32>
    %124 = arith.truncf %123 : vector<32x2048xf32> to vector<32x2048xbf16>
    %c128_67 = arith.constant 128 : index
    %c0_68 = arith.constant 0 : index
    %125 = vector.load %arg5[%c128_67, %c0_68] : memref<256x2048xbf16, #tpu.memory_space<vmem>>, vector<32x2048xbf16>
    tpu.vector_store %arg5[%c128_67, %c0_68], %124 {strides = array<i32>} : memref<256x2048xbf16, #tpu.memory_space<vmem>>, vector<32x2048xbf16>,
    %cst_69 = arith.constant 0.000000e+00 : f32
    %126 = vector.broadcast %cst_69 : f32 to vector<32x2048xf32>
    %127 = arith.maximumf %123, %126 : vector<32x2048xf32>
    %128 = arith.truncf %127 : vector<32x2048xf32> to vector<32x2048xbf16>
    %c160 = arith.constant 160 : index
    %c0_70 = arith.constant 0 : index
    %129 = vector.load %arg5[%c160, %c0_70] : memref<256x2048xbf16, #tpu.memory_space<vmem>>, vector<32x2048xbf16>
    tpu.vector_store %arg5[%c160, %c0_70], %128 {strides = array<i32>} : memref<256x2048xbf16, #tpu.memory_space<vmem>>, vector<32x2048xbf16>,
    %c0_71 = arith.constant 0 : index
    %c1152 = arith.constant 1152 : index
    %130 = vector.load %arg3[%c0_71, %c1152] : memref<64x1408xbf16, #tpu.memory_space<vmem>>, vector<32x192xbf16>
    %c0_72 = arith.constant 0 : index
    %c0_73 = arith.constant 0 : index
    %131 = vector.load %arg5[%c0_72, %c0_73] : memref<256x2048xbf16, #tpu.memory_space<vmem>>, vector<192x2048xbf16>
    %cst_74 = arith.constant dense<0.000000e+00> : vector<32x2048xf32>
    %132 = tpu.matmul %130, %131, %cst_74 {dimension_numbers = #tpu.dot_dimension_numbers<[1], [0], [0], [1], [0, 0, 1, 1], [], []>} : vector<32x192xbf16>, vector<192x2048xbf16>, vector<32x2048xf32> -> vector<32x2048xf32>
    %133 = tpu.concatenate %123, %132 in 0 : vector<32x2048xf32>, vector<32x2048xf32> -> vector<64x2048xf32>
    %134 = arith.truncf %133 : vector<64x2048xf32> to vector<64x2048xbf16>
    %c0_75 = arith.constant 0 : index
    %c0_76 = arith.constant 0 : index
    %135 = vector.load %arg4[%c0_75, %c0_76] : memref<64x2048xbf16, #tpu.memory_space<vmem>>, vector<64x2048xbf16>
    tpu.vector_store %arg4[%c0_75, %c0_76], %134 {strides = array<i32>} : memref<64x2048xbf16, #tpu.memory_space<vmem>>, vector<64x2048xbf16>,
    return
  }
  func.func @transform_0(%arg0: i32) -> i32 {
    %c0_i32 = arith.constant 0 : i32
    %c0_i32_0 = arith.constant 0 : i32
    return %c0_i32 : i32
  }
  func.func @transform_1(%arg0: i32) -> (i32, i32) {
    %c0_i32 = arith.constant 0 : i32
    %c0_i32_0 = arith.constant 0 : i32
    return %c0_i32, %arg0 : i32, i32
  }
  func.func @transform_2(%arg0: i32) -> (i32, i32) {
    %c0_i32 = arith.constant 0 : i32
    %c0_i32_0 = arith.constant 0 : i32
    %c0_i32_1 = arith.constant 0 : i32
    return %c0_i32, %c0_i32_0 : i32, i32
  }
  func.func @transform_3(%arg0: i32) -> (i32, i32) {
    %c0_i32 = arith.constant 0 : i32
    %c0_i32_0 = arith.constant 0 : i32
    return %c0_i32, %arg0 : i32, i32
  }
}

</mosaic_0001>

<bundles_post_ra>
// kernel: tpu_custom_call.1
= control target key start
LH: loop header
LB: loop body
LE: loop exit
PB: predicated region body
PF: predicated region fallthrough
CT: control target
= control target key end

     0   :  { %8 = vsyncpa [#allocation6], 0  ;;  %s14018_s0 = inlined_call_operand.hbm [shape: f32[3], index: 0, kind: input, shape index: {}]   ;;  %s14019_s1 = inlined_call_operand.hbm [shape: f32[1,4096], index: 1, kind: input, shape index: {}]   ;;  %s14020_s2 = inlined_call_operand.hbm [shape: bf16[64,1408], index: 2, kind: input, shape index: {}]   ;;  %s14021_s3 = inlined_call_operand.hbm [shape: bf16[64,4096], index: 3, kind: output, shape index: {}]  }
   0x1   :  { %9 = vsyncpa [#allocation4], 0 }
   0x2   :  { %11 = vsyncpa [#allocation4 + $0x1], 0 }
   0x3   :  { %12 = vsyncpa [#allocation9], 0 }
   0x4   :  { %13 = vsyncpa [#allocation5], 0 }
   0x5   :  { %15 = vsyncpa [#allocation5 + $0x1], 0  ;;  %s12029_s12 = smov 0   ;;  %s12031_s13 = smov 0  }
   0x6   :  { %s12033_s14 = smov 0   ;;  %s12035_s15 = smov 0  }
   0x7 LB: > { %s12050_s16 = sadd.s32 4294967295, %s11997_s15   ;;  %s8552_s17 = sadd.s32 4294967294, %s11997_s15   ;;  %s11997_s15 = sphi %s12035_s15, %s14178_s15   ;;  %s11993_s14 = sphi %s12033_s14, %s14177_s14   ;;  %s11989_s13 = sphi %s12031_s13, %s14176_s13   ;;  %s11985_s12 = sphi %s12029_s12, %s14175_s12  }
   0x8   : > { %p62_p0 = scmp.ne.s32.totalorder %s11989_s13, %s11985_s12  ;;  %p63_p1 = scmp.eq.s32.totalorder %s12050_s16, 0 }
   0x9   : > { %p107_p2 = scmp.eq.s32.totalorder %s12050_s16, 1  ;;  %p113_p3 = scmp.eq.s32.totalorder %s8552_s17, 1 }
   0xa   : > { %p12059_p4 = por %p63_p1, %p62_p0  ;;  %p8553_p5 = scmp.ge.s32.totalorder %s11997_s15, 1 }
   0xb   : > { %p12064_p6 = por %p113_p3, %p62_p0  ;;  %p120_p7 = scmp.lt.s32.totalorder %s11997_s15, 3 }
   0xc   : > { %s132_s22 = sshll.u32 %s14018_s0, 4  ;;  %s141_s26 = sshll.u32 %s14020_s2, 4  ;;  %s133_s22 = int_to_ptr.hbm [resolvable:$true] %s132_s22  ;;  %s142_s26 = int_to_ptr.hbm [resolvable:$true] %s141_s26 }
   0xd   : > { %p12072_p8 = pnand %p8553_p5, %p120_p7  ;;  %s11999_s27 = smov [#allocation8]  }
   0xe   : > { %s143_s28 = sshll.u32 %s11999_s27, 4  ;;  %s12000_s29 = smov [#allocation3]   ;;  %s144_s28 = int_to_ptr.vmem [resolvable:$true] %s143_s28 }
   0xf   : > { %p11667_p10 = pneg %p12072_p8  ;;  %s12001_s30 = smov 704  }
  0x10   : > { %s12002_s4 = smov 44   ;;  %s12085_s5 = sadd.s32 1, %s11997_s15  }
  0x11   : > { %p11668_p11 = pnand %p11667_p10, %p63_p1  ;;  %s46_s6 = ssub.s32 %s11997_s15, %s12085_s5 }
  0x12   : > { %p47_p12 = scmp.eq.s32.totalorder %s46_s6, 0  ;;  %s49_s7 = sadd.s32 1, %s11993_s14 }
  0x13   : > { %11670 = dma.hbm_to_smem (!%p11668_p11), %s133_s22, 16, %s12000_s29, [#allocation6]  }
  0x14   : > { %11673 = dma.hbm_to_vmem [thread:$0]  (!%p11668_p11), %s142_s26, 5632, %s144_s28, [#allocation9], %s12001_s30, %s12001_s30, %s12002_s4  }
  0x15   : > { %p56_p13 = scmp.ne.s32.totalorder %s11993_s14, %s11989_s13  ;;  %p57_p0 = scmp.eq.s32.totalorder %s11997_s15, 0 }
  0x16   : > { %s12094_s8 = scalar_select %p47_p12, %s11993_s14, %s49_s7  }
  0x17   : > { %p58_p3 = por %p57_p0, %p56_p13  ;;  %p12098_p5 = por %p107_p2, %p56_p13 }
  0x18   : > { %p11684_p7 = scmp.lt.s32.totalorder %s11997_s15, 2  ;;  %s157_s10 = sand.u32 1, %s11993_s14  }
  0x19   : > { %s8557_s11 = sshll.u32 %s157_s10, 4  ;;  %s8558_s17 = sshll.u32 %s11997_s15, 4 }
  0x1a   : > { %s165_s22 = scalar_lea.hbm %s14019_s1, %s8558_s17  ;;  %s161_s24 = scalar_lea.vmem [#allocation7], %s8557_s11 }
  0x1b   : > { %s169_s25 = sshll.u32 %s161_s24, 4  ;;  %s167_s26 = sshll.u32 %s165_s22, 4  ;;  %s170_s25 = int_to_ptr.vmem [resolvable:$true] %s169_s25  ;;  %s168_s26 = int_to_ptr.hbm [resolvable:$true] %s167_s26 }
  0x1c   : > { %p12108_p10 = pnand %p11684_p7, %p58_p3  ;;  %s158_s28 = scalar_lea.sflag [#allocation4], %s157_s10 }
  0x1d   : > { %s11893_s29 = sshra.s32 %s168_s26, 4  ;;  %s11900_s7 = scalar_lea.hbm %s14019_s1, 32  ;;  %s11894_s29 = int_to_ptr.hbm [resolvable:$true] %s11893_s29 }
  0x1e   : > { %s11895_s30 = scalar_lea.hbm %s11894_s29, 16  ;;  %p11897_p11 = pneg %p12108_p10 }
  0x1f   : > { %p11896_p2 = scmp.ne.s32.totalorder %s11894_s29, %s11895_s30  ;;  %p11901_p0 = scmp.lt.s32.totalorder %s11894_s29, %s14019_s1 }
  0x20   : > { %p11902_p3 = scmp.lt.s32.totalorder %s11900_s7, %s11895_s30 }
  0x21   : > { %p11898_p12 = pnand %p11897_p11, %p11896_p2 }
  0x22   : > { %p11903_p7 = por %p11902_p3, %p11901_p0 }
  0x23   : > { %p11899_p13 = pneg %p11898_p12 }
  0x25   : > { %p11904_p9 = pnand %p11903_p7, %p11899_p13 }
  0x27   : > { %11907 = shalt.err (!%p11904_p9)
}
  0x28   : > { %11677 = dma.hbm_to_vmem [thread:$0]  (!%p12108_p10), %s168_s26, 256, %s170_s25, %s158_s28  }
  0x29   : > { %178 = sbr.rel (%p12072_p8) target bundleno = 2064 (0x810), region = 32 }
  0x2e   : > { %11968 = dma.done.wait (%p63_p1), [#allocation6], 16  }
  0x2f   : > { %11970 = vsyncadd (%p63_p1), [#allocation6], 4294967280  ;;  %s12129_s10 = sand.u32 1, %s11989_s13  }
  0x30   : > { %s8561_s20 = sshll.u32 %s12129_s10, 4  ;;  %s186_s21 = scalar_lea.sflag [#allocation4], %s12129_s10 }
  0x31   : > { %s12133_s22 = scalar_lea.vmem [#allocation7], %s8561_s20 }
  0x32   : > { %11972 = dma.done.wait (%p12059_p4), %s186_s21, 256  }
  0x33   : > { %11974 = vsyncadd (%p12059_p4), %s186_s21, 4294967040 }
  0x34   : > { %11976 = dma.done.wait (%p63_p1), [#allocation9], 5632  }
  0x35   : > { %11978 = vsyncadd (%p63_p1), [#allocation9], 4294961664 }
  0x36   : > { %200 = sfence }
  0x37   : > { %v225_v0 = vld [vmem:[#allocation8 + $0x2c] sm:$0xf]  ;;  %v226_v1 = vld [vmem:[#allocation8 + $0x58] sm:$0xf]  ;;  %v12003_v2 = vmov 2   ;;  %v12004_v7 = vmov 1  }
  0x38   : > { %11730 = vset.pattern.permute.xlu0 %v12003_v2  ;;  %v228_v3 = vunpack.c.l.bf16 %v225_v0  ;;  %v229_v4 = vunpack.c.l.bf16 %v226_v1  ;;  %11742 = vset.pattern.permute.xlu1 %v12003_v2  ;;  %v224_v5 = vld [vmem:[#allocation8] sm:$0xf]  ;;  %v12005_v9 = vmov 0   ;;  %s230_s18 = sld [smem:[#allocation3]]  ;;  %vm892_vm0 = vcmask 392192   ;;  %s8563_s25 = sshll.u32 %s12129_s10, 9 }
  0x39   : > { %v227_v6 = vunpack.c.l.bf16 %v224_v5  ;;  %11749 = vset.pattern.permute.xlu2 %v12004_v7  ;;  %s8564_s23 = sld [smem:[#allocation3 + $0x1]]  ;;  %v12146_v11 = vld [vmem:[%s12133_s22] sm:$0xff]  ;;  %vm1409_vm1 = vcmask 261120   ;;  %vm2238_vm2 = vcmask 1043456   ;;  %vm2231_vm3 = vcmask 326656   ;;  %s13766_s26 = scalar_lea.vmem [#allocation10], %s8563_s25 }
  0x3a   : > { %v11731_v8 = vpack.i.bf16 %v229_v4, %v228_v3  ;;  %s8565_s24 = sld [smem:[#allocation3 + $0x2]]  ;;  %v12149_v12 = vperm.slane %v12146_v11, 0  ;;  %v12152_v13 = vperm.slane %v12146_v11, 1  ;;  %v12157_v15 = vperm.slane %v12146_v11, 2  ;;  %s11654_s27 = sshll.u32 %s12050_s16, 6 }
  0x3b   : > { %585 = vperm.xlu1 %11742, %v227_v6   ;;  %379 = vperm.xlu2 %11749, %v227_v6   ;;  %v12176_v26 = vperm.slane %v12146_v11, 3  ;;  %v12191_v38 = vperm.slane %v12146_v11, 4  ;;  %v12200_v42 = vperm.slane %v12146_v11, 5  ;;  %v12261_v3 = vperm.slane %v12146_v11, 6  ;;  %s8453_s30 = scalar_lea.hbm %s14021_s3, %s11654_s27  ;;  %s8454_s4 = sshll.u32 %s13766_s26, 4  ;;  %s8455_s4 = int_to_ptr.vmem [resolvable:$true] %s8454_s4 }
  0x3c   : > { %11732 = vperm.xlu0 %11730, %v11731_v8   ;;  %vm3174_vm4 = vcmask 523264   ;;  %vm4081_vm5 = vcmask 785408   ;;  %s8456_s6 = sshll.u32 %s8453_s30, 4  ;;  %s8442_s16 = scalar_lea.sflag [#allocation5], %s12129_s10  ;;  %s8457_s6 = int_to_ptr.hbm [resolvable:$true] %s8456_s6 }
  0x3d   : > { %s11937_s7 = sshra.s32 %s8457_s6, 4  ;;  %s11943_s21 = scalar_lea.hbm %s14021_s3, 1024  ;;  %s11938_s7 = int_to_ptr.hbm [resolvable:$true] %s11937_s7 }
  0x3e   : > { %v12163_v18 = vstv %s230_s18  ;;  %s11939_s11 = scalar_lea.hbm %s11938_s7, 512  ;;  %p11944_p9 = scmp.lt.s32.totalorder %s11938_s7, %s14021_s3 }
  0x3f   : > { %v12165_v19 = vstv %s8564_s23  ;;  %p11940_p1 = scmp.ne.s32.totalorder %s11938_s7, %s11939_s11  ;;  %p11945_p10 = scmp.lt.s32.totalorder %s11943_s21, %s11939_s11 }
  0x40   : > { %v12173_v25 = vstv %s8565_s24 }
  0x41   : > { %p11941_p4 = pnand %p11940_p1, %p12098_p5  ;;  %p11946_p2 = por %p11945_p10, %p11944_p9 }
  0x43   : > { %11743 = vset.pattern.permute.xlu1 %v12005_v9  ;;  %11750 = vset.pattern.permute.xlu2 %v12005_v9  ;;  %p11942_p8 = pneg %p11941_p4 }
  0x44   : > { %11736 = vset.pattern.permute.xlu0 %v12004_v7  ;;  %11745 = vperm.xlu1 %11743, %v11731_v8  }
  0x45   : > { %11738 = vperm.xlu0 %11736, %v11731_v8   ;;  %233 = vperm.xlu2 %11750, %v227_v6   ;;  %p11947_p11 = pnand %p11946_p2, %p11942_p8 }
  0x4d   : > { %11751 = vset.pattern.permute.xlu0 %v12003_v2 }
  0x95   : > { %v12143_v10 = vpop.permute.xlu2 %379 }
  0x96   : > { %v390_v16 = vmul.f32 %v12143_v10, %v12149_v12  ;;  %v391_v17 = vmul.f32 %v12143_v10, %v12152_v13  ;;  %v392_v20 = vmul.f32 %v12143_v10, %v12157_v15  ;;  %v393_v41 = vmul.f32 %v12143_v10, %v12176_v26 }
  0x98   : > { %v438_v22 = vmax.f32 %v390_v16, 0.0  ;;  %v439_v24 = vmax.f32 %v391_v17, 0.0  ;;  %v440_v28 = vmax.f32 %v392_v20, 0.0  ;;  %v441_v56 = vmax.f32 %v393_v41, 0.0 }
  0x9a   : > { %v487_v31 = vmul.f32 %v12165_v19, %v438_v22  ;;  %v488_v33 = vmul.f32 %v12165_v19, %v439_v24  ;;  %v489_v37 = vmul.f32 %v12165_v19, %v440_v28  ;;  %v490_v60 = vmul.f32 %v12165_v19, %v441_v56 }
  0x9f   : > { %v12154_v14 = vpop.permute.xlu2 %233 }
  0xa0   : > { %v280_v21 = vmul.f32 %v12149_v12, %v12154_v14  ;;  %v281_v23 = vmul.f32 %v12152_v13, %v12154_v14  ;;  %v282_v27 = vmul.f32 %v12157_v15, %v12154_v14  ;;  %v283_v45 = vmul.f32 %v12176_v26, %v12154_v14 }
  0xa2   : > { %v329_v30 = vmul.f32 %v12163_v18, %v280_v21  ;;  %v330_v32 = vmul.f32 %v12163_v18, %v281_v23  ;;  %v331_v36 = vmul.f32 %v12163_v18, %v282_v27  ;;  %v332_v58 = vmul.f32 %v12163_v18, %v283_v45 }
  0xa4   : > { %v12202_v43 = vadd.f32 %v487_v31, %v329_v30  ;;  %v12216_v49 = vadd.f32 %v488_v33, %v330_v32  ;;  %v12222_v52 = vadd.f32 %v489_v37, %v331_v36  ;;  %v12274_v16 = vadd.f32 %v490_v60, %v332_v58 }
  0xad   : > { %v12180_v29 = vpop.permute.xlu1 %585 }
  0xae   : > { %v11733_v34 = vpop.permute.xlu0 %11732  ;;  %v596_v35 = vmul.f32 %v12180_v29, %v12149_v12  ;;  %v12206_v44 = vmul.f32 %v12180_v29, %v12152_v13  ;;  %v12226_v53 = vmul.f32 %v12180_v29, %v12157_v15  ;;  %v12241_v59 = vmul.f32 %v12180_v29, %v12176_v26 }
  0xaf   : > { %v12193_v39 = vunpack.i.h.bf16 %v11733_v34  ;;  %v12195_v40 = vunpack.i.l.bf16 %v11733_v34 }
  0xb0   : > { %11752 = vtanh.f32 %v596_v35 }
  0xb1   : > { %v612_v46 = vmul.f32 %v12195_v40, %v12149_v12  ;;  %v628_v47 = vmul.f32 %v12193_v39, %v12149_v12  ;;  %v613_v48 = vmul.f32 %v12195_v40, %v12152_v13  ;;  %v629_v50 = vmul.f32 %v12193_v39, %v12152_v13 }
  0xb2   : > { %v614_v51 = vmul.f32 %v12195_v40, %v12157_v15  ;;  %v630_v54 = vmul.f32 %v12193_v39, %v12157_v15  ;;  %v12232_v55 = vmul.f32 %v12195_v40, %v12176_v26  ;;  %v12236_v57 = vmul.f32 %v12193_v39, %v12176_v26 }
  0xb3   : > { %11754 = vtanh.f32 %v612_v46  ;;  %v12246_v61 = vmul.f32 %v12195_v40, %v12191_v38  ;;  %v12250_v62 = vmul.f32 %v12193_v39, %v12191_v38  ;;  %v12254_v1 = vmul.f32 %v12195_v40, %v12200_v42 }
  0xb4   : > { %11756 = vtanh.f32 %v628_v47  ;;  %v12258_v2 = vmul.f32 %v12193_v39, %v12200_v42 }
  0xb5   : > { %11758 = vtanh.f32 %v613_v48 }
  0xb6   : > { %v11753_v63 = vpop.eup %11752  ;;  %v11746_v0 = vpop.permute.xlu1 %11745  ;;  %11760 = vtanh.f32 %v629_v50 }
  0xb7   : > { %v11739_v4 = vpop.permute.xlu0 %11738  ;;  %v12263_v5 = vunpack.i.h.bf16 %v11746_v0  ;;  %v12265_v6 = vunpack.i.l.bf16 %v11746_v0  ;;  %11762 = vtanh.f32 %v614_v51  ;;  %v12268_v7 = vmul.f32 %v11753_v63, %v12173_v25 }
  0xb8   : > { %v12270_v8 = vunpack.i.h.bf16 %v11739_v4  ;;  %v12272_v9 = vunpack.i.l.bf16 %v11739_v4  ;;  %11764 = vtanh.f32 %v630_v54 }
  0xb9   : > { %v11755_v17 = vpop.eup %11754  ;;  %v296_v20 = vmul.f32 %v12265_v6, %v12149_v12  ;;  %v312_v21 = vmul.f32 %v12263_v5, %v12149_v12  ;;  %v297_v22 = vmul.f32 %v12265_v6, %v12152_v13  ;;  %v313_v23 = vmul.f32 %v12263_v5, %v12152_v13 }
  0xba   : > { %v11757_v24 = vpop.eup %11756  ;;  %v406_v27 = vmul.f32 %v12272_v9, %v12149_v12  ;;  %v422_v28 = vmul.f32 %v12270_v8, %v12149_v12  ;;  %v709_v30 = vmul.f32 %v11755_v17, %v12173_v25  ;;  %v407_v31 = vmul.f32 %v12272_v9, %v12152_v13 }
  0xbb   : > { %v11759_v32 = vpop.eup %11758  ;;  %v345_v33 = vmul.f32 %v12163_v18, %v296_v20  ;;  %v361_v34 = vmul.f32 %v12163_v18, %v312_v21  ;;  %v725_v35 = vmul.f32 %v11757_v24, %v12173_v25  ;;  %v346_v36 = vmul.f32 %v12163_v18, %v297_v22 }
  0xbc   : > { %v11761_v37 = vpop.eup %11760  ;;  %v454_v41 = vmax.f32 %v406_v27, 0.0  ;;  %v470_v45 = vmax.f32 %v422_v28, 0.0  ;;  %v362_v46 = vmul.f32 %v12163_v18, %v313_v23  ;;  %v423_v12 = vmul.f32 %v12270_v8, %v12152_v13 }
  0xbd   : > { %v11763_v47 = vpop.eup %11762  ;;  %v455_v48 = vmax.f32 %v407_v31, 0.0  ;;  %v710_v50 = vmul.f32 %v11759_v32, %v12173_v25  ;;  %v726_v51 = vmul.f32 %v11761_v37, %v12173_v25  ;;  %v298_v54 = vmul.f32 %v12265_v6, %v12157_v15 }
  0xbe   : > { %v11765_v56 = vpop.eup %11764  ;;  %v503_v58 = vmul.f32 %v12165_v19, %v454_v41  ;;  %v519_v60 = vmul.f32 %v12165_v19, %v470_v45  ;;  %v471_v63 = vmax.f32 %v423_v12, 0.0  ;;  %v314_v0 = vmul.f32 %v12263_v5, %v12157_v15 }
  0xbf   : > { %v504_v13 = vmul.f32 %v12165_v19, %v455_v48  ;;  %v347_v4 = vmul.f32 %v12163_v18, %v298_v54  ;;  %v408_v17 = vmul.f32 %v12272_v9, %v12157_v15  ;;  %v424_v20 = vmul.f32 %v12270_v8, %v12157_v15 }
  0xc0   : > { %v551_v21 = vadd.f32 %v503_v58, %v345_v33  ;;  %v567_v22 = vadd.f32 %v519_v60, %v361_v34  ;;  %v520_v23 = vmul.f32 %v12165_v19, %v471_v63  ;;  %v363_v24 = vmul.f32 %v12163_v18, %v314_v0 }
  0xc1   : > { %v552_v27 = vadd.f32 %v504_v13, %v346_v36  ;;  %v456_v28 = vmax.f32 %v408_v17, 0.0  ;;  %v472_v31 = vmax.f32 %v424_v20, 0.0  ;;  %v711_v32 = vmul.f32 %v11763_v47, %v12173_v25 }
  0xc2   : > { %v757_v37 = vadd.f32 %v709_v30, %v551_v21  ;;  %v773_v41 = vadd.f32 %v725_v35, %v567_v22  ;;  %v568_v45 = vadd.f32 %v520_v23, %v362_v46  ;;  %v727_v12 = vmul.f32 %v11765_v56, %v12173_v25 }
  0xc3   : > { %v12316_v48 = vadd.f32 %v710_v50, %v552_v27  ;;  %v505_v15 = vmul.f32 %v12165_v19, %v456_v28  ;;  %v521_v33 = vmul.f32 %v12165_v19, %v472_v31  ;;  %v299_v34 = vmul.f32 %v12265_v6, %v12176_v26 }
  0xc4   : > { %v805_v54 = vmax.f32 %v757_v37, 0.0  ;;  %v12322_v36 = vmax.f32 %v773_v41, 0.0  ;;  %v774_v58 = vadd.f32 %v726_v51, %v568_v45  ;;  %v315_v30 = vmul.f32 %v12263_v5, %v12176_v26 }
  0xc5   : > { %v806_v35 = vmax.f32 %v12316_v48, 0.0  ;;  %v553_v46 = vadd.f32 %v505_v15, %v347_v4  ;;  %v569_v47 = vadd.f32 %v521_v33, %v363_v24  ;;  %v348_v50 = vmul.f32 %v12163_v18, %v299_v34 }
  0xc6   : > { %v869_v56 = vpack.c.bf16 %v12322_v36, %v805_v54  ;;  %v12329_v60 = vmax.f32 %v774_v58, 0.0  ;;  %v364_v63 = vmul.f32 %v12163_v18, %v315_v30  ;;  %v409_v0 = vmul.f32 %v12272_v9, %v12176_v26 }
  0xc7   : > { %v12334_v13 = vadd.f32 %v711_v32, %v553_v46  ;;  %v775_v51 = vadd.f32 %v727_v12, %v569_v47  ;;  %v425_v17 = vmul.f32 %v12270_v8, %v12176_v26  ;;  %11766 = vtanh.f32 %v12232_v55 }
  0xc8   : > { %901 = vmatpush.bf16.msra.mxu0 %v869_v56  ;;  %v870_v4 = vpack.c.bf16 %v12329_v60, %v806_v35  ;;  %v457_v20 = vmax.f32 %v409_v0, 0.0  ;;  %11768 = vtanh.f32 %v12236_v57  ;;  %v741_v21 = vadd.f32 %v12268_v7, %v12202_v43 }
  0xc9   : > { %v807_v22 = vmax.f32 %v12334_v13, 0.0  ;;  %v12346_v23 = vmax.f32 %v775_v51, 0.0  ;;  %v473_v24 = vmax.f32 %v425_v17, 0.0  ;;  %11770 = vtanh.f32 %v12206_v44 }
  0xca   : > { %915 = vmatpush.bf16.msra.mxu1 %v870_v4  ;;  %v506_v26 = vmul.f32 %v12165_v19, %v457_v20  ;;  %v789_v55 = vmax.f32 %v741_v21, 0.0  ;;  %11772 = vtanh.f32 %v12226_v53  ;;  %v300_v27 = vmul.f32 %v12265_v6, %v12191_v38 }
  0xcb   : > { %v871_v43 = vpack.c.bf16 %v12346_v23, %v807_v22  ;;  %v522_v57 = vmul.f32 %v12165_v19, %v473_v24  ;;  %11774 = vtanh.f32 %v12241_v59  ;;  %v316_v44 = vmul.f32 %v12263_v5, %v12191_v38 }
  0xcc   : > { %v554_v7 = vadd.f32 %v506_v26, %v348_v50  ;;  %v853_v28 = vpack.c.bf16 %v789_v55, %v12322_v36  ;;  %v12361_v31 = vpack.c.bf16 %v805_v54, %v789_v55  ;;  %v349_v53 = vmul.f32 %v12163_v18, %v300_v27 }
  0xcd   : > { %v11767_v32 = vpop.eup %11766  ;;  %929 = vmatpush.bf16.msra.mxu2 %v871_v43  ;;  %v570_v37 = vadd.f32 %v522_v57, %v364_v63  ;;  %v365_v41 = vmul.f32 %v12163_v18, %v316_v44  ;;  %v410_v45 = vmul.f32 %v12272_v9, %v12191_v38  ;;  %v426_v59 = vmul.f32 %v12270_v8, %v12191_v38 }
  0xce   : > { %v11769_v12 = vpop.eup %11768  ;;  %v712_v15 = vmul.f32 %v11767_v32, %v12173_v25  ;;  %902 = vmatpush.bf16.msra.mxu0 %v853_v28  ;;  %11776 = vtanh.f32 %v12246_v61  ;;  %v301_v33 = vmul.f32 %v12265_v6, %v12200_v42  ;;  %v317_v34 = vmul.f32 %v12263_v5, %v12200_v42 }
  0xcf   : > { %v11771_v54 = vpop.eup %11770  ;;  %v728_v58 = vmul.f32 %v11769_v12, %v12173_v25  ;;  %v458_v30 = vmax.f32 %v410_v45, 0.0  ;;  %v474_v46 = vmax.f32 %v426_v59, 0.0  ;;  %11778 = vtanh.f32 %v12250_v62 }
  0xd0   : > { %v11773_v47 = vpop.eup %11772  ;;  %v760_v50 = vadd.f32 %v712_v15, %v554_v7  ;;  %v694_v56 = vmul.f32 %v11771_v54, %v12173_v25  ;;  %v350_v63 = vmul.f32 %v12163_v18, %v301_v33  ;;  %v366_v61 = vmul.f32 %v12163_v18, %v317_v34 }
  0xd1   : > { %v11775_v0 = vpop.eup %11774  ;;  %v776_v51 = vadd.f32 %v728_v58, %v570_v37  ;;  %v695_v17 = vmul.f32 %v11773_v47, %v12173_v25  ;;  %v507_v4 = vmul.f32 %v12165_v19, %v458_v30  ;;  %v523_v20 = vmul.f32 %v12165_v19, %v474_v46 }
  0xd2   : > { %v808_v21 = vmax.f32 %v760_v50, 0.0  ;;  %v742_v24 = vadd.f32 %v694_v56, %v12216_v49  ;;  %v696_v62 = vmul.f32 %v11775_v0, %v12173_v25  ;;  %903 = vmatpush.bf16.msra.mxu0 %v12361_v31  ;;  %v411_v26 = vmul.f32 %v12272_v9, %v12200_v42 }
  0xd3   : > { %v12388_v55 = vmax.f32 %v776_v51, 0.0  ;;  %v743_v27 = vadd.f32 %v695_v17, %v12222_v52  ;;  %v555_v43 = vadd.f32 %v507_v4, %v349_v53  ;;  %v571_v57 = vadd.f32 %v523_v20, %v365_v41  ;;  %v8568_v20 = vld [vmem:[#allocation8 + $0x4] sm:$0xf] }
  0xd4   : > { %v11777_v44 = vpop.eup %11776  ;;  %v790_v7 = vmax.f32 %v742_v24, 0.0  ;;  %v744_v28 = vadd.f32 %v696_v62, %v12274_v16  ;;  %v427_v49 = vmul.f32 %v12270_v8, %v12200_v42  ;;  %v459_v32 = vmax.f32 %v411_v26, 0.0 }
  0xd5   : > { %v11779_v37 = vpop.eup %11778  ;;  %v872_v45 = vpack.c.bf16 %v12388_v55, %v808_v21  ;;  %v791_v59 = vmax.f32 %v743_v27, 0.0  ;;  %v713_v12 = vmul.f32 %v11777_v44, %v12173_v25  ;;  %11780 = vtanh.f32 %v12254_v1 }
  0xd6   : > { %v854_v52 = vpack.c.bf16 %v790_v7, %v12329_v60  ;;  %v792_v53 = vmax.f32 %v744_v28, 0.0  ;;  %v12400_v41 = vpack.c.bf16 %v806_v35, %v790_v7  ;;  %v729_v16 = vmul.f32 %v11779_v37, %v12173_v25 }
  0xd7   : > { %943 = vmatpush.bf16.msra.mxu3 %v872_v45  ;;  %v855_v15 = vpack.c.bf16 %v791_v59, %v12346_v23  ;;  %v12406_v33 = vpack.c.bf16 %v807_v22, %v791_v59  ;;  %v12408_v34 = vadd.f32 %v713_v12, %v555_v43  ;;  %v475_v54 = vmax.f32 %v427_v49, 0.0 }
  0xd8   : > { %916 = vmatpush.bf16.msra.mxu1 %v854_v52  ;;  %v856_v1 = vpack.c.bf16 %v792_v53, %v12388_v55  ;;  %v12411_v58 = vpack.c.bf16 %v808_v21, %v792_v53  ;;  %v777_v48 = vadd.f32 %v729_v16, %v571_v57  ;;  %v508_v35 = vmul.f32 %v12165_v19, %v459_v32  ;;  %v11079_v21 = vld [vmem:[#allocation8 + $0x2c] sm:$0xf0] }
  0xd9   : > { %930 = vmatpush.bf16.msra.mxu2 %v855_v15  ;;  %v809_v30 = vmax.f32 %v12408_v34, 0.0  ;;  %v524_v46 = vmul.f32 %v12165_v19, %v475_v54  ;;  %11782 = vtanh.f32 %v12258_v2  ;;  %v302_v13 = vmul.f32 %v12265_v6, %v12261_v3 }
  0xda   : > { %v12419_v22 = vmax.f32 %v777_v48, 0.0  ;;  %v556_v47 = vadd.f32 %v508_v35, %v350_v63  ;;  %v318_v50 = vmul.f32 %v12263_v5, %v12261_v3  ;;  %v412_v56 = vmul.f32 %v12272_v9, %v12261_v3 }
  0xdb   : > { %v11781_v0 = vpop.eup %11780  ;;  %944 = vmatpush.bf16.msra.mxu3 %v856_v1  ;;  %v572_v51 = vadd.f32 %v524_v46, %v366_v61  ;;  %v351_v17 = vmul.f32 %v12163_v18, %v302_v13  ;;  %v428_v2 = vmul.f32 %v12270_v8, %v12261_v3  ;;  %v618_v4 = vmul.f32 %v12195_v40, %v12261_v3 }
  0xdc   : > { %917 = vmatpush.bf16.msra.mxu1 %v12400_v41  ;;  %v873_v63 = vpack.c.bf16 %v12419_v22, %v809_v30  ;;  %v714_v24 = vmul.f32 %v11781_v0, %v12173_v25  ;;  %v367_v61 = vmul.f32 %v12163_v18, %v318_v50  ;;  %v460_v62 = vmax.f32 %v412_v56, 0.0 }
  0xdd   : > { %931 = vmatpush.bf16.msra.mxu2 %v12406_v33  ;;  %v476_v26 = vmax.f32 %v428_v2, 0.0  ;;  %v634_v27 = vmul.f32 %v12193_v39, %v12261_v3  ;;  %11784 = vtanh.f32 %v618_v4  ;;  %v12440_v43 = vperm.slane %v12146_v11, 7 }
  0xde   : > { %957 = vmatpush.bf16.msrb.mxu0 %v873_v63  ;;  %v12442_v57 = vadd.f32 %v714_v24, %v556_v47  ;;  %v509_v44 = vmul.f32 %v12165_v19, %v460_v62  ;;  %v12445_v7 = vor.u32 %v11079_v21, %v8568_v20  ;;  %v284_v47 = vmul.f32 %v12191_v38, %v12154_v14 }
  0xdf   : > { %v11783_v28 = vpop.eup %11782  ;;  %945 = vmatpush.bf16.msra.mxu3 %v12411_v58  ;;  %v525_v49 = vmul.f32 %v12165_v19, %v476_v26  ;;  %11786 = vtanh.f32 %v634_v27  ;;  %v303_v32 = vmul.f32 %v12265_v6, %v12440_v43  ;;  %v319_v11 = vmul.f32 %v12263_v5, %v12440_v43 }
  0xe0   : > { %v730_v37 = vmul.f32 %v11783_v28, %v12173_v25  ;;  %v810_v45 = vmax.f32 %v12442_v57, 0.0  ;;  %v557_v59 = vadd.f32 %v509_v44, %v351_v17  ;;  %v413_v12 = vmul.f32 %v12272_v9, %v12440_v43  ;;  %8570 = vmatmul.msk.bf16.vlgmr.msra.gmra.mxu0 %vm892_vm0, %v12445_v7  ;;  %8571 = vmatmul.msk.bf16.vlgmr.msra.gmra.mxu1 %vm892_vm0, %v12445_v7 }
  0xe1   : > { %v573_v52 = vadd.f32 %v525_v49, %v367_v61  ;;  %v352_v53 = vmul.f32 %v12163_v18, %v303_v32  ;;  %v368_v16 = vmul.f32 %v12163_v18, %v319_v11  ;;  %v429_v15 = vmul.f32 %v12270_v8, %v12440_v43  ;;  %8572 = vmatmul.msk.bf16.vlgmr.msra.gmra.mxu2 %vm892_vm0, %v12445_v7 }
  0xe2   : > { %v778_v54 = vadd.f32 %v730_v37, %v572_v51  ;;  %v461_v1 = vmax.f32 %v413_v12, 0.0  ;;  %v619_v48 = vmul.f32 %v12195_v40, %v12440_v43  ;;  %v635_v35 = vmul.f32 %v12193_v39, %v12440_v43  ;;  %8573 = vmatmul.msk.bf16.vlgmr.msra.gmra.mxu3 %vm892_vm0, %v12445_v7 }
  0xe3   : > { %v11785_v46 = vpop.eup %11784  ;;  %v477_v13 = vmax.f32 %v429_v15, 0.0  ;;  %v394_v50 = vmul.f32 %v12143_v10, %v12191_v38  ;;  %v600_v56 = vmul.f32 %v12180_v29, %v12191_v38  ;;  %v333_v20 = vmul.f32 %v12163_v18, %v284_v47 }
  0xe4   : > { %v12479_v0 = vmax.f32 %v778_v54, 0.0  ;;  %v715_v51 = vmul.f32 %v11785_v46, %v12173_v25  ;;  %v510_v17 = vmul.f32 %v12165_v19, %v461_v1  ;;  %11788 = vtanh.f32 %v619_v48 }
  0xe5   : > { %v11787_v2 = vpop.eup %11786  ;;  %v526_v4 = vmul.f32 %v12165_v19, %v477_v13  ;;  %11790 = vtanh.f32 %v635_v35  ;;  %v442_v21 = vmax.f32 %v394_v50, 0.0  ;;  %v285_v27 = vmul.f32 %v12200_v42, %v12154_v14  ;;  %v12518_v50 = vld [vmem:[%s12133_s22 + $0x8] sm:$0xff] }
  0xe6   : > { %v874_v63 = vpack.c.bf16 %v12479_v0, %v810_v45  ;;  %v731_v38 = vmul.f32 %v11787_v2, %v12173_v25  ;;  %v12489_v24 = vadd.f32 %v715_v51, %v557_v59  ;;  %v558_v61 = vadd.f32 %v510_v17, %v352_v53 }
  0xe7   : > { %v574_v62 = vadd.f32 %v526_v4, %v368_v16  ;;  %v491_v26 = vmul.f32 %v12165_v19, %v442_v21  ;;  %11792 = vtanh.f32 %v600_v56  ;;  %v395_v49 = vmul.f32 %v12143_v10, %v12200_v42 }
  0xe8   : > { %971 = vmatpush.bf16.msrb.mxu1 %v874_v63  ;;  %v779_v44 = vadd.f32 %v731_v38, %v573_v52  ;;  %v811_v28 = vmax.f32 %v12489_v24, 0.0  ;;  %v601_v32 = vmul.f32 %v12180_v29, %v12200_v42  ;;  %v334_v37 = vmul.f32 %v12163_v18, %v285_v27 }
  0xe9   : > { %v539_v11 = vadd.f32 %v491_v26, %v333_v20  ;;  %v286_v59 = vmul.f32 %v12261_v3, %v12154_v14  ;;  %v396_v12 = vmul.f32 %v12143_v10, %v12261_v3  ;;  %v443_v16 = vmax.f32 %v395_v49, 0.0 }
  0xea   : > { %v11789_v53 = vpop.eup %11788  ;;  %v12504_v52 = vmax.f32 %v779_v44, 0.0  ;;  %11794 = vtanh.f32 %v601_v32  ;;  %v602_v15 = vmul.f32 %v12180_v29, %v12261_v3  ;;  %v287_v35 = vmul.f32 %v12440_v43, %v12154_v14 }
  0xeb   : > { %v11791_v54 = vpop.eup %11790  ;;  %v716_v42 = vmul.f32 %v11789_v53, %v12173_v25  ;;  %v335_v1 = vmul.f32 %v12163_v18, %v286_v59  ;;  %v444_v48 = vmax.f32 %v396_v12, 0.0  ;;  %v492_v47 = vmul.f32 %v12165_v19, %v443_v16 }
  0xec   : > { %v875_v46 = vpack.c.bf16 %v12504_v52, %v811_v28  ;;  %v732_v13 = vmul.f32 %v11791_v54, %v12173_v25  ;;  %11796 = vtanh.f32 %v602_v15  ;;  %v397_v17 = vmul.f32 %v12143_v10, %v12440_v43 }
  0xed   : > { %v11793_v3 = vpop.eup %11792  ;;  %v12520_v56 = vadd.f32 %v716_v42, %v558_v61  ;;  %v493_v51 = vmul.f32 %v12165_v19, %v444_v48  ;;  %v336_v20 = vmul.f32 %v12163_v18, %v287_v35  ;;  %v603_v21 = vmul.f32 %v12180_v29, %v12440_v43 }
  0xee   : > { %985 = vmatpush.bf16.msrb.mxu2 %v875_v46  ;;  %v780_v2 = vadd.f32 %v732_v13, %v574_v62  ;;  %v697_v4 = vmul.f32 %v11793_v3, %v12173_v25  ;;  %v540_v38 = vadd.f32 %v492_v47, %v334_v37  ;;  %v445_v26 = vmax.f32 %v397_v17, 0.0 }
  0xef   : > { %v812_v63 = vmax.f32 %v12520_v56, 0.0  ;;  %v12531_v61 = vperm.slane %v12518_v50, 0  ;;  %v541_v32 = vadd.f32 %v493_v51, %v335_v1  ;;  %11798 = vtanh.f32 %v603_v21 }
  0xf0   : > { %v11795_v27 = vpop.eup %11794  ;;  %v12533_v44 = vmax.f32 %v780_v2, 0.0  ;;  %v745_v49 = vadd.f32 %v697_v4, %v539_v11  ;;  %v494_v59 = vmul.f32 %v12165_v19, %v445_v26  ;;  %v12550_v48 = vperm.slane %v12518_v50, 1 }
  0xf1   : > { %v698_v62 = vmul.f32 %v11795_v27, %v12173_v25  ;;  %v304_v43 = vmul.f32 %v12265_v6, %v12531_v61  ;;  %v320_v37 = vmul.f32 %v12263_v5, %v12531_v61  ;;  %v414_v11 = vmul.f32 %v12272_v9, %v12531_v61 }
  0xf2   : > { %v11797_v12 = vpop.eup %11796  ;;  %v876_v53 = vpack.c.bf16 %v12533_v44, %v812_v63  ;;  %v793_v16 = vmax.f32 %v745_v49, 0.0  ;;  %v430_v15 = vmul.f32 %v12270_v8, %v12531_v61  ;;  %v542_v1 = vadd.f32 %v494_v59, %v336_v20 }
  0xf3   : > { %v746_v54 = vadd.f32 %v698_v62, %v540_v38  ;;  %v699_v42 = vmul.f32 %v11797_v12, %v12173_v25  ;;  %v353_v13 = vmul.f32 %v12163_v18, %v304_v43  ;;  %v462_v47 = vmax.f32 %v414_v11, 0.0 }
  0xf4   : > { %999 = vmatpush.bf16.msrb.mxu3 %v876_v53  ;;  %v857_v35 = vpack.c.bf16 %v793_v16, %v12419_v22  ;;  %v12555_v46 = vpack.c.bf16 %v809_v30, %v793_v16  ;;  %v478_v17 = vmax.f32 %v430_v15, 0.0  ;;  %v620_v2 = vmul.f32 %v12195_v40, %v12531_v61 }
  0xf5   : > { %v794_v3 = vmax.f32 %v746_v54, 0.0  ;;  %v747_v51 = vadd.f32 %v699_v42, %v541_v32  ;;  %v11799_v4 = vpop.eup %11798  ;;  %v369_v20 = vmul.f32 %v12163_v18, %v320_v37  ;;  %v511_v21 = vmul.f32 %v12165_v19, %v462_v47 }
  0xf6   : > { %958 = vmatpush.bf16.msrb.mxu0 %v857_v35  ;;  %v636_v34 = vmul.f32 %v12193_v39, %v12531_v61  ;;  %v305_v30 = vmul.f32 %v12265_v6, %v12550_v48  ;;  %v700_v27 = vmul.f32 %v11799_v4, %v12173_v25  ;;  %v321_v49 = vmul.f32 %v12263_v5, %v12550_v48 }
  0xf7   : > { %v858_v38 = vpack.c.bf16 %v794_v3, %v12479_v0  ;;  %v795_v26 = vmax.f32 %v747_v51, 0.0  ;;  %v12572_v32 = vpack.c.bf16 %v810_v45, %v794_v3  ;;  %v527_v62 = vmul.f32 %v12165_v19, %v478_v17 }
  0xf8   : > { %v559_v59 = vadd.f32 %v511_v21, %v353_v13  ;;  %11800 = vtanh.f32 %v620_v2  ;;  %v748_v37 = vadd.f32 %v700_v27, %v542_v1  ;;  %v354_v12 = vmul.f32 %v12163_v18, %v305_v30 }
  0xf9   : > { %972 = vmatpush.bf16.msrb.mxu1 %v858_v38  ;;  %v859_v43 = vpack.c.bf16 %v795_v26, %v12504_v52  ;;  %11802 = vtanh.f32 %v636_v34  ;;  %v12580_v53 = vpack.c.bf16 %v811_v28, %v795_v26  ;;  %v575_v57 = vadd.f32 %v527_v62, %v369_v20 }
  0xfa   : > { %959 = vmatpush.bf16.msrb.mxu0 %v12555_v46  ;;  %v415_v45 = vmul.f32 %v12272_v9, %v12550_v48  ;;  %v431_v16 = vmul.f32 %v12270_v8, %v12550_v48  ;;  %v796_v11 = vmax.f32 %v748_v37, 0.0  ;;  %v621_v15 = vmul.f32 %v12195_v40, %v12550_v48 }
  0xfb   : > { %986 = vmatpush.bf16.msrb.mxu2 %v859_v43  ;;  %v637_v54 = vmul.f32 %v12193_v39, %v12550_v48  ;;  %v12591_v42 = vperm.slane %v12518_v50, 2  ;;  %v370_v24 = vmul.f32 %v12163_v18, %v321_v49  ;;  %v12596_v35 = vmul.f32 %v12531_v61, %v12154_v14 }
  0xfc   : > { %v463_v28 = vmax.f32 %v415_v45, 0.0  ;;  %v479_v1 = vmax.f32 %v431_v16, 0.0  ;;  %v860_v13 = vpack.c.bf16 %v796_v11, %v12533_v44  ;;  %v12602_v47 = vpack.c.bf16 %v812_v63, %v796_v11 }
  0xfd   : > { %973 = vmatpush.bf16.msrb.mxu1 %v12572_v32  ;;  %11804 = vtanh.f32 %v621_v15  ;;  %v306_v3 = vmul.f32 %v12265_v6, %v12591_v42  ;;  %8574 = vmatmul.msk.bf16.vlgmr.msrb.gmra.mxu0 %vm892_vm0, %v12445_v7  ;;  %v322_v4 = vmul.f32 %v12263_v5, %v12591_v42  ;;  %v416_v21 = vmul.f32 %v12272_v9, %v12591_v42 }
  0xfe   : > { %v11801_v51 = vpop.eup %11800  ;;  %v512_v17 = vmul.f32 %v12165_v19, %v463_v28  ;;  %v528_v2 = vmul.f32 %v12165_v19, %v479_v1  ;;  %11806 = vtanh.f32 %v637_v54  ;;  %1000 = vmatpush.bf16.msrb.mxu3 %v860_v13  ;;  %v12618_v34 = vperm.slane %v12518_v50, 3 }
  0xff   : > { %v11803_v20 = vpop.eup %11802  ;;  %987 = vmatpush.bf16.msrb.mxu2 %v12580_v53  ;;  %v717_v56 = vmul.f32 %v11801_v51, %v12173_v25  ;;  %v355_v63 = vmul.f32 %v12163_v18, %v306_v3  ;;  %v12624_v27 = vperm.slane %v12518_v50, 4  ;;  %v432_v62 = vmul.f32 %v12270_v8, %v12591_v42 }
 0x100   : > { %v733_v30 = vmul.f32 %v11803_v20, %v12173_v25  ;;  %v560_v38 = vadd.f32 %v512_v17, %v354_v12  ;;  %v576_v26 = vadd.f32 %v528_v2, %v370_v24  ;;  %8575 = vmatmul.msk.bf16.vlgmr.msrb.gmra.mxu1 %vm892_vm0, %v12445_v7  ;;  %v464_v43 = vmax.f32 %v416_v21, 0.0 }
 0x101   : > { %v12626_v49 = vadd.f32 %v717_v56, %v559_v59  ;;  %v622_v37 = vmul.f32 %v12195_v40, %v12591_v42  ;;  %v638_v12 = vmul.f32 %v12193_v39, %v12591_v42  ;;  %v307_v16 = vmul.f32 %v12265_v6, %v12618_v34 }
 0x102   : > { %v781_v45 = vadd.f32 %v733_v30, %v575_v57  ;;  %v323_v11 = vmul.f32 %v12263_v5, %v12618_v34  ;;  %8576 = vmatmul.msk.bf16.vlgmr.msrb.gmra.mxu2 %vm892_vm0, %v12445_v7  ;;  %1001 = vmatpush.bf16.msrb.mxu3 %v12602_v47  ;;  %v480_v54 = vmax.f32 %v432_v62, 0.0  ;;  %v513_v57 = vmul.f32 %v12165_v19, %v464_v43 }
 0x103   : > { %v11805_v59 = vpop.eup %11804  ;;  %v813_v15 = vmax.f32 %v12626_v49, 0.0  ;;  %11808 = vtanh.f32 %v622_v37  ;;  %v371_v13 = vmul.f32 %v12163_v18, %v322_v4  ;;  %v356_v2 = vmul.f32 %v12163_v18, %v307_v16 }
 0x104   : > { %v11807_v24 = vpop.eup %11806  ;;  %v12643_v28 = vmax.f32 %v781_v45, 0.0  ;;  %v718_v1 = vmul.f32 %v11805_v59, %v12173_v25  ;;  %11810 = vtanh.f32 %v638_v12  ;;  %v529_v51 = vmul.f32 %v12165_v19, %v480_v54 }
 0x105   : > { %v734_v3 = vmul.f32 %v11807_v24, %v12173_v25  ;;  %v561_v17 = vadd.f32 %v513_v57, %v355_v63  ;;  %v417_v21 = vmul.f32 %v12272_v9, %v12618_v34  ;;  %v433_v4 = vmul.f32 %v12270_v8, %v12618_v34  ;;  %8577 = vmatmul.msk.bf16.vlgmr.msrb.gmra.mxu3 %vm892_vm0, %v12445_v7 }
 0x106   : > { %v877_v20 = vpack.c.bf16 %v12643_v28, %v813_v15  ;;  %v12653_v56 = vadd.f32 %v718_v1, %v560_v38  ;;  %v372_v63 = vmul.f32 %v12163_v18, %v323_v11  ;;  %v623_v62 = vmul.f32 %v12195_v40, %v12618_v34 }
 0x107   : > { %v782_v30 = vadd.f32 %v734_v3, %v576_v26  ;;  %v639_v43 = vmul.f32 %v12193_v39, %v12618_v34  ;;  %v577_v37 = vadd.f32 %v529_v51, %v371_v13  ;;  %v465_v45 = vmax.f32 %v417_v21, 0.0 }
 0x108   : > { %1013 = vmatpush.bf16.msra.mxu0 %v877_v20  ;;  %v814_v38 = vmax.f32 %v12653_v56, 0.0  ;;  %v481_v12 = vmax.f32 %v433_v4, 0.0  ;;  %11812 = vtanh.f32 %v623_v62  ;;  %v398_v26 = vmul.f32 %v12143_v10, %v12531_v61 }
 0x109   : > { %v11809_v16 = vpop.eup %11808  ;;  %v12667_v59 = vmax.f32 %v782_v30, 0.0  ;;  %v604_v11 = vmul.f32 %v12180_v29, %v12531_v61  ;;  %v514_v24 = vmul.f32 %v12165_v19, %v465_v45  ;;  %11814 = vtanh.f32 %v639_v43 }
 0x10a   : > { %v11811_v54 = vpop.eup %11810  ;;  %v719_v57 = vmul.f32 %v11809_v16, %v12173_v25  ;;  %v530_v1 = vmul.f32 %v12165_v19, %v481_v12  ;;  %v446_v51 = vmax.f32 %v398_v26, 0.0  ;;  %v337_v61 = vmul.f32 %v12163_v18, %v12596_v35 }
 0x10b   : > { %v878_v13 = vpack.c.bf16 %v12667_v59, %v814_v38  ;;  %v735_v3 = vmul.f32 %v11811_v54, %v12173_v25  ;;  %11816 = vtanh.f32 %v604_v11  ;;  %v562_v21 = vadd.f32 %v514_v24, %v356_v2 }
 0x10c   : > { %v12680_v20 = vadd.f32 %v719_v57, %v561_v17  ;;  %v289_v4 = vmul.f32 %v12550_v48, %v12154_v14  ;;  %v495_v62 = vmul.f32 %v12165_v19, %v446_v51  ;;  %v399_v43 = vmul.f32 %v12143_v10, %v12550_v48 }
 0x10d   : > { %1027 = vmatpush.bf16.msra.mxu1 %v878_v13  ;;  %v783_v30 = vadd.f32 %v735_v3, %v577_v37  ;;  %v605_v45 = vmul.f32 %v12180_v29, %v12550_v48  ;;  %v578_v12 = vadd.f32 %v530_v1, %v372_v63  ;;  %v290_v2 = vmul.f32 %v12591_v42, %v12154_v14 }
 0x10e   : > { %v815_v17 = vmax.f32 %v12680_v20, 0.0  ;;  %v400_v35 = vmul.f32 %v12143_v10, %v12591_v42  ;;  %v11813_v16 = vpop.eup %11812  ;;  %v338_v37 = vmul.f32 %v12163_v18, %v289_v4  ;;  %v447_v11 = vmax.f32 %v399_v43, 0.0 }
 0x10f   : > { %v12696_v26 = vmax.f32 %v783_v30, 0.0  ;;  %11818 = vtanh.f32 %v605_v45  ;;  %v11815_v54 = vpop.eup %11814  ;;  %v720_v57 = vmul.f32 %v11813_v16, %v12173_v25  ;;  %v543_v48 = vadd.f32 %v495_v62, %v337_v61 }
 0x110   : > { %v448_v24 = vmax.f32 %v400_v35, 0.0  ;;  %v606_v63 = vmul.f32 %v12180_v29, %v12591_v42  ;;  %v736_v3 = vmul.f32 %v11815_v54, %v12173_v25  ;;  %v496_v51 = vmul.f32 %v12165_v19, %v447_v11 }
 0x111   : > { %v11817_v1 = vpop.eup %11816  ;;  %v879_v13 = vpack.c.bf16 %v12696_v26, %v815_v17  ;;  %v291_v4 = vmul.f32 %v12618_v34, %v12154_v14  ;;  %v12709_v30 = vadd.f32 %v720_v57, %v562_v21  ;;  %v339_v62 = vmul.f32 %v12163_v18, %v290_v2 }
 0x112   : > { %v701_v61 = vmul.f32 %v11817_v1, %v12173_v25  ;;  %11820 = vtanh.f32 %v606_v63  ;;  %v784_v42 = vadd.f32 %v736_v3, %v578_v12  ;;  %v544_v43 = vadd.f32 %v496_v51, %v338_v37 }
 0x113   : > { %1041 = vmatpush.bf16.msra.mxu2 %v879_v13  ;;  %v497_v45 = vmul.f32 %v12165_v19, %v448_v24  ;;  %v401_v35 = vmul.f32 %v12143_v10, %v12618_v34  ;;  %v816_v16 = vmax.f32 %v12709_v30, 0.0  ;;  %v340_v54 = vmul.f32 %v12163_v18, %v291_v4 }
 0x114   : > { %v749_v11 = vadd.f32 %v701_v61, %v543_v48  ;;  %v607_v21 = vmul.f32 %v12180_v29, %v12618_v34  ;;  %v12720_v1 = vmax.f32 %v784_v42, 0.0  ;;  %v308_v12 = vmul.f32 %v12265_v6, %v12624_v27 }
 0x115   : > { %v11819_v57 = vpop.eup %11818  ;;  %v449_v2 = vmax.f32 %v401_v35, 0.0  ;;  %v324_v37 = vmul.f32 %v12263_v5, %v12624_v27  ;;  %v418_v48 = vmul.f32 %v12272_v9, %v12624_v27  ;;  %v545_v13 = vadd.f32 %v497_v45, %v339_v62 }
 0x116   : > { %v797_v24 = vmax.f32 %v749_v11, 0.0  ;;  %v702_v63 = vmul.f32 %v11819_v57, %v12173_v25  ;;  %11822 = vtanh.f32 %v607_v21  ;;  %v880_v34 = vpack.c.bf16 %v12720_v1, %v816_v16 }
 0x117   : > { %v498_v3 = vmul.f32 %v12165_v19, %v449_v2  ;;  %v357_v51 = vmul.f32 %v12163_v18, %v308_v12  ;;  %v373_v35 = vmul.f32 %v12163_v18, %v324_v37  ;;  %v434_v11 = vmul.f32 %v12270_v8, %v12624_v27 }
 0x118   : > { %v11821_v4 = vpop.eup %11820  ;;  %v861_v61 = vpack.c.bf16 %v797_v24, %v12643_v28  ;;  %v750_v42 = vadd.f32 %v702_v63, %v544_v43  ;;  %1055 = vmatpush.bf16.msra.mxu3 %v880_v34  ;;  %v12741_v57 = vpack.c.bf16 %v813_v15, %v797_v24  ;;  %v466_v62 = vmax.f32 %v418_v48, 0.0 }
 0x119   : > { %v703_v21 = vmul.f32 %v11821_v4, %v12173_v25  ;;  %v624_v45 = vmul.f32 %v12195_v40, %v12624_v27  ;;  %v546_v12 = vadd.f32 %v498_v3, %v340_v54  ;;  %v482_v43 = vmax.f32 %v434_v11, 0.0 }
 0x11a   : > { %1014 = vmatpush.bf16.msra.mxu0 %v861_v61  ;;  %v798_v2 = vmax.f32 %v750_v42, 0.0  ;;  %v640_v37 = vmul.f32 %v12193_v39, %v12624_v27  ;;  %v515_v34 = vmul.f32 %v12165_v19, %v466_v62  ;;  %v12749_v4 = vperm.slane %v12518_v50, 5 }
 0x11b   : > { %v751_v63 = vadd.f32 %v703_v21, %v545_v13  ;;  %11824 = vtanh.f32 %v624_v45  ;;  %v531_v54 = vmul.f32 %v12165_v19, %v482_v43 }
 0x11c   : > { %v11823_v49 = vpop.eup %11822  ;;  %v862_v15 = vpack.c.bf16 %v798_v2, %v12667_v59  ;;  %v12754_v24 = vpack.c.bf16 %v814_v38, %v798_v2  ;;  %11826 = vtanh.f32 %v640_v37  ;;  %v563_v13 = vadd.f32 %v515_v34, %v357_v51 }
 0x11d   : > { %v799_v48 = vmax.f32 %v751_v63, 0.0  ;;  %v704_v3 = vmul.f32 %v11823_v49, %v12173_v25  ;;  %v309_v61 = vmul.f32 %v12265_v6, %v12749_v4  ;;  %v579_v42 = vadd.f32 %v531_v54, %v373_v35 }
 0x11e   : > { %1028 = vmatpush.bf16.msra.mxu1 %v862_v15  ;;  %1015 = vmatpush.bf16.msra.mxu0 %v12741_v57  ;;  %v325_v11 = vmul.f32 %v12263_v5, %v12749_v4  ;;  %v419_v56 = vmul.f32 %v12272_v9, %v12749_v4  ;;  %v12766_v38 = vperm.slane %v12518_v50, 6  ;;  %v435_v2 = vmul.f32 %v12270_v8, %v12749_v4 }
 0x11f   : > { %v863_v21 = vpack.c.bf16 %v799_v48, %v12696_v26  ;;  %v752_v62 = vadd.f32 %v704_v3, %v546_v12  ;;  %v12771_v51 = vpack.c.bf16 %v815_v17, %v799_v48  ;;  %v358_v45 = vmul.f32 %v12163_v18, %v309_v61 }
 0x120   : > { %v374_v35 = vmul.f32 %v12163_v18, %v325_v11  ;;  %v467_v43 = vmax.f32 %v419_v56, 0.0  ;;  %v625_v37 = vmul.f32 %v12195_v40, %v12749_v4  ;;  %v641_v12 = vmul.f32 %v12193_v39, %v12749_v4 }
 0x121   : > { %v11825_v63 = vpop.eup %11824  ;;  %1042 = vmatpush.bf16.msra.mxu2 %v863_v21  ;;  %v800_v34 = vmax.f32 %v752_v62, 0.0  ;;  %v310_v20 = vmul.f32 %v12265_v6, %v12766_v38  ;;  %v326_v17 = vmul.f32 %v12263_v5, %v12766_v38  ;;  %8578 = vmatmul.msk.bf16.vlgmr.msra.gmra.mxu0 %vm892_vm0, %v12445_v7  ;;  %v483_v54 = vmax.f32 %v435_v2, 0.0 }
 0x122   : > { %v11827_v49 = vpop.eup %11826  ;;  %1029 = vmatpush.bf16.msra.mxu1 %v12754_v24  ;;  %v721_v15 = vmul.f32 %v11825_v63, %v12173_v25  ;;  %v516_v48 = vmul.f32 %v12165_v19, %v467_v43  ;;  %11828 = vtanh.f32 %v625_v37  ;;  %v420_v30 = vmul.f32 %v12272_v9, %v12766_v38 }
 0x123   : > { %v864_v3 = vpack.c.bf16 %v800_v34, %v12720_v1  ;;  %v12793_v61 = vpack.c.bf16 %v816_v16, %v800_v34  ;;  %v737_v11 = vmul.f32 %v11827_v49, %v12173_v25  ;;  %11830 = vtanh.f32 %v641_v12 }
 0x124   : > { %v12796_v56 = vadd.f32 %v721_v15, %v563_v13  ;;  %v532_v21 = vmul.f32 %v12165_v19, %v483_v54  ;;  %v564_v62 = vadd.f32 %v516_v48, %v358_v45  ;;  %v359_v63 = vmul.f32 %v12163_v18, %v310_v20 }
 0x125   : > { %1056 = vmatpush.bf16.msra.mxu3 %v864_v3  ;;  %1043 = vmatpush.bf16.msra.mxu2 %v12771_v51  ;;  %v785_v2 = vadd.f32 %v737_v11, %v579_v42  ;;  %v375_v43 = vmul.f32 %v12163_v18, %v326_v17  ;;  %v12805_v16 = vperm.slane %v12518_v50, 7  ;;  %v436_v45 = vmul.f32 %v12270_v8, %v12766_v38 }
 0x126   : > { %v817_v13 = vmax.f32 %v12796_v56, 0.0  ;;  %v580_v37 = vadd.f32 %v532_v21, %v374_v35  ;;  %v626_v34 = vmul.f32 %v12195_v40, %v12766_v38  ;;  %8579 = vmatmul.msk.bf16.vlgmr.msra.gmra.mxu1 %vm892_vm0, %v12445_v7  ;;  %v468_v12 = vmax.f32 %v420_v30, 0.0 }
 0x127   : > { %v12814_v42 = vmax.f32 %v785_v2, 0.0  ;;  %v642_v20 = vmul.f32 %v12193_v39, %v12766_v38  ;;  %v311_v50 = vmul.f32 %v12265_v6, %v12805_v16  ;;  %v484_v35 = vmax.f32 %v436_v45, 0.0 }
 0x128   : > { %v11829_v17 = vpop.eup %11828  ;;  %11832 = vtanh.f32 %v626_v34  ;;  %v327_v49 = vmul.f32 %v12263_v5, %v12805_v16  ;;  %v421_v15 = vmul.f32 %v12272_v9, %v12805_v16  ;;  %8580 = vmatmul.msk.bf16.vlgmr.msra.gmra.mxu2 %vm892_vm0, %v12445_v7  ;;  %v517_v3 = vmul.f32 %v12165_v19, %v468_v12 }
 0x129   : > { %v11831_v54 = vpop.eup %11830  ;;  %1057 = vmatpush.bf16.msra.mxu3 %v12793_v61  ;;  %v881_v48 = vpack.c.bf16 %v12814_v42, %v817_v13  ;;  %v722_v6 = vmul.f32 %v11829_v17, %v12173_v25  ;;  %11834 = vtanh.f32 %v642_v20  ;;  %v533_v11 = vmul.f32 %v12165_v19, %v484_v35 }
 0x12a   : > { %v738_v5 = vmul.f32 %v11831_v54, %v12173_v25  ;;  %v360_v9 = vmul.f32 %v12163_v18, %v311_v50  ;;  %v376_v2 = vmul.f32 %v12163_v18, %v327_v49  ;;  %v437_v30 = vmul.f32 %v12270_v8, %v12805_v16 }
 0x12b   : > { %1069 = vmatpush.bf16.msrb.mxu0 %v881_v48  ;;  %v12835_v21 = vadd.f32 %v722_v6, %v564_v62  ;;  %v469_v45 = vmax.f32 %v421_v15, 0.0  ;;  %v565_v17 = vadd.f32 %v517_v3, %v359_v63  ;;  %v627_v12 = vmul.f32 %v12195_v40, %v12805_v16 }
 0x12c   : > { %v786_v34 = vadd.f32 %v738_v5, %v580_v37  ;;  %v643_v20 = vmul.f32 %v12193_v39, %v12805_v16  ;;  %8581 = vmatmul.msk.bf16.vlgmr.msra.gmra.mxu3 %vm892_vm0, %v12445_v7  ;;  %v581_v50 = vadd.f32 %v533_v11, %v375_v43  ;;  %v485_v35 = vmax.f32 %v437_v30, 0.0 }
 0x12d   : > { %v818_v62 = vmax.f32 %v12835_v21, 0.0  ;;  %v292_v49 = vmul.f32 %v12624_v27, %v12154_v14  ;;  %11836 = vtanh.f32 %v627_v12  ;;  %v402_v40 = vmul.f32 %v12143_v10, %v12624_v27 }
 0x12e   : > { %v11833_v8 = vpop.eup %11832  ;;  %v12849_v15 = vmax.f32 %v786_v34, 0.0  ;;  %v608_v39 = vmul.f32 %v12180_v29, %v12624_v27  ;;  %v518_v54 = vmul.f32 %v12165_v19, %v469_v45  ;;  %v534_v43 = vmul.f32 %v12165_v19, %v485_v35 }
 0x12f   : > { %v11835_v63 = vpop.eup %11834  ;;  %v723_v37 = vmul.f32 %v11833_v8, %v12173_v25  ;;  %11838 = vtanh.f32 %v643_v20  ;;  %v450_v3 = vmax.f32 %v402_v40, 0.0  ;;  %v341_v11 = vmul.f32 %v12163_v18, %v292_v49 }
 0x130   : > { %v882_v48 = vpack.c.bf16 %v12849_v15, %v818_v62  ;;  %v739_v6 = vmul.f32 %v11835_v63, %v12173_v25  ;;  %11840 = vtanh.f32 %v608_v39  ;;  %v293_v27 = vmul.f32 %v12749_v4, %v12154_v14 }
 0x131   : > { %v12862_v5 = vadd.f32 %v723_v37, %v565_v17  ;;  %v499_v45 = vmul.f32 %v12165_v19, %v450_v3  ;;  %v403_v34 = vmul.f32 %v12143_v10, %v12749_v4  ;;  %v609_v12 = vmul.f32 %v12180_v29, %v12749_v4 }
 0x132   : > { %1083 = vmatpush.bf16.msrb.mxu1 %v882_v48  ;;  %v787_v30 = vadd.f32 %v739_v6, %v581_v50  ;;  %v566_v17 = vadd.f32 %v518_v54, %v360_v9  ;;  %v582_v35 = vadd.f32 %v534_v43, %v376_v2  ;;  %v404_v49 = vmul.f32 %v12143_v10, %v12766_v38 }
 0x133   : > { %v819_v20 = vmax.f32 %v12862_v5, 0.0  ;;  %v11837_v8 = vpop.eup %11836  ;;  %v451_v39 = vmax.f32 %v403_v34, 0.0  ;;  %11842 = vtanh.f32 %v609_v12  ;;  %v294_v50 = vmul.f32 %v12766_v38, %v12154_v14 }
 0x134   : > { %v12875_v40 = vmax.f32 %v787_v30, 0.0  ;;  %v724_v37 = vmul.f32 %v11837_v8, %v12173_v25  ;;  %v342_v4 = vmul.f32 %v12163_v18, %v293_v27  ;;  %v452_v48 = vmax.f32 %v404_v49, 0.0 }
 0x135   : > { %v11839_v63 = vpop.eup %11838  ;;  %v610_v9 = vmul.f32 %v12180_v29, %v12766_v38  ;;  %v547_v43 = vadd.f32 %v499_v45, %v341_v11  ;;  %v500_v6 = vmul.f32 %v12165_v19, %v451_v39  ;;  %v295_v34 = vmul.f32 %v12805_v16, %v12154_v14 }
 0x136   : > { %14086 = vst [vmem:[#allocation15_spill] sm:$0xff] %v12875_v40  ;;  %v883_v2 = vpack.c.bf16 %v12875_v40, %v819_v20  ;;  %v740_v54 = vmul.f32 %v11839_v63, %v12173_v25  ;;  %v11841_v3 = vpop.eup %11840  ;;  %v772_v30 = vadd.f32 %v724_v37, %v566_v17  ;;  %v405_v27 = vmul.f32 %v12143_v10, %v12805_v16 }
 0x137   : > { %11844 = vtanh.f32 %v610_v9  ;;  %v705_v12 = vmul.f32 %v11841_v3, %v12173_v25  ;;  %v343_v49 = vmul.f32 %v12163_v18, %v294_v50  ;;  %v501_v8 = vmul.f32 %v12165_v19, %v452_v48 }
 0x138   : > { %1097 = vmatpush.bf16.msrb.mxu2 %v883_v2  ;;  %v788_v38 = vadd.f32 %v740_v54, %v582_v35  ;;  %v820_v11 = vmax.f32 %v772_v30, 0.0  ;;  %v548_v45 = vadd.f32 %v500_v6, %v342_v4  ;;  %v453_v39 = vmax.f32 %v405_v27, 0.0 }
 0x139   : > { %v611_v17 = vmul.f32 %v12180_v29, %v12805_v16  ;;  %v11843_v63 = vpop.eup %11842  ;;  %v753_v14 = vadd.f32 %v705_v12, %v547_v43  ;;  %v344_v35 = vmul.f32 %v12163_v18, %v295_v34  ;;  %v549_v2 = vadd.f32 %v501_v8, %v343_v49 }
 0x13a   : > { %v12897_v37 = vmax.f32 %v788_v38, 0.0  ;;  %v706_v10 = vmul.f32 %v11843_v63, %v12173_v25  ;;  %v502_v48 = vmul.f32 %v12165_v19, %v453_v39 }
 0x13b   : > { %11846 = vtanh.f32 %v611_v17  ;;  %v801_v50 = vmax.f32 %v753_v14, 0.0 }
 0x13c   : > { %14087 = vst [vmem:[#allocation16_spill] sm:$0xff] %v12897_v37  ;;  %v884_v9 = vpack.c.bf16 %v12897_v37, %v820_v11  ;;  %v754_v54 = vadd.f32 %v706_v10, %v548_v45  ;;  %v550_v3 = vadd.f32 %v502_v48, %v344_v35 }
 0x13d   : > { %v11845_v4 = vpop.eup %11844  ;;  %v865_v29 = vpack.c.bf16 %v801_v50, %v12814_v42  ;;  %v12909_v19 = vpack.c.bf16 %v817_v13, %v801_v50 }
 0x13e   : > { %1111 = vmatpush.bf16.msrb.mxu3 %v884_v9  ;;  %v707_v16 = vmul.f32 %v11845_v4, %v12173_v25  ;;  %v802_v6 = vmax.f32 %v754_v54, 0.0 }
 0x13f   : > { %1070 = vmatpush.bf16.msrb.mxu0 %v865_v29 }
 0x140   : > { %v755_v43 = vadd.f32 %v707_v16, %v549_v2  ;;  %v866_v18 = vpack.c.bf16 %v802_v6, %v12849_v15  ;;  %v12915_v49 = vpack.c.bf16 %v818_v62, %v802_v6 }
 0x141   : > { %v11847_v30 = vpop.eup %11846 }
 0x142   : > { %v803_v34 = vmax.f32 %v755_v43, 0.0  ;;  %v708_v27 = vmul.f32 %v11847_v30, %v12173_v25  ;;  %1084 = vmatpush.bf16.msrb.mxu1 %v866_v18 }
 0x143   : > { %1071 = vmatpush.bf16.msrb.mxu0 %v12909_v19 }
 0x144   : > { %v867_v38 = vpack.c.bf16 %v803_v34, %v12875_v40  ;;  %v756_v12 = vadd.f32 %v708_v27, %v550_v3  ;;  %v12923_v56 = vpack.c.bf16 %v819_v20, %v803_v34 }
 0x146   : > { %1098 = vmatpush.bf16.msrb.mxu2 %v867_v38  ;;  %v804_v8 = vmax.f32 %v756_v12, 0.0  ;;  %1085 = vmatpush.bf16.msrb.mxu1 %v12915_v49  ;;  %14088 = vst [vmem:[#allocation17_spill] sm:$0xff] %v12923_v56 }
 0x147   : > { %8582 = vmatmul.msk.bf16.vlgmr.msrb.gmra.mxu0 %vm892_vm0, %v12445_v7 }
 0x148   : > { %v868_v25 = vpack.c.bf16 %v804_v8, %v12897_v37  ;;  %v12928_v13 = vpack.c.bf16 %v820_v11, %v804_v8 }
 0x149   : > { %8583 = vmatmul.msk.bf16.vlgmr.msrb.gmra.mxu1 %vm892_vm0, %v12445_v7 }
 0x14a   : > { %1112 = vmatpush.bf16.msrb.mxu3 %v868_v25  ;;  %1099 = vmatpush.bf16.msrb.mxu2 %v12923_v56  ;;  %14089 = vst [vmem:[#allocation18_spill] sm:$0xff] %v12928_v13 }
 0x14d   : > { %8584 = vmatmul.msk.bf16.vlgmr.msrb.gmra.mxu2 %vm892_vm0, %v12445_v7 }
 0x14e   : > { %1113 = vmatpush.bf16.msrb.mxu3 %v12928_v13 }
 0x151   : > { %8585 = vmatmul.msk.bf16.vlgmr.msrb.gmra.mxu3 %vm892_vm0, %v12445_v7 }
 0x15d   : > { %v905_v21 = vpop.f32.mrf.mxu0  ;;  %v919_v62 = vpop.f32.mrf.mxu1 }
 0x15e   : > { %v1136_v5 = vmax.f32 %v905_v21, 0.0  ;;  %v1120_v20 = vpack.c.bf16 %v919_v62, %v905_v21  ;;  %v1137_v45 = vmax.f32 %v919_v62, 0.0 }
 0x160   : > { %1128 = vst [vmem:[#allocation2] sm:$0xff] %v1120_v20  ;;  %v1152_v39 = vpack.c.bf16 %v1137_v45, %v1136_v5 }
 0x162   : > { %1160 = vst [vmem:[#allocation2 + $0x40] sm:$0xff] %v1152_v39 }
 0x164   : > { %v933_v17 = vpop.f32.mrf.mxu2 }
 0x165   : > { %v1138_v63 = vmax.f32 %v933_v17, 0.0  ;;  %v947_v11 = vpop.f32.mrf.mxu3  ;;  %v907_v14 = vpop.f32.mrf.mxu0 }
 0x166   : > { %v1121_v10 = vpack.c.bf16 %v947_v11, %v933_v17  ;;  %v1139_v35 = vmax.f32 %v947_v11, 0.0  ;;  %v1184_v9 = vmax.f32 %v907_v14, 0.0  ;;  %v921_v50 = vpop.f32.mrf.mxu1 }
 0x167   : > { %v1168_v2 = vpack.c.bf16 %v921_v50, %v907_v14  ;;  %v1185_v48 = vmax.f32 %v921_v50, 0.0  ;;  %v8588_v34 = vld [vmem:[#allocation2] sm:$0xf]  ;;  %v11080_v38 = vld [vmem:[#allocation2 + $0x4] sm:$0xf] }
 0x168   : > { %1129 = vst [vmem:[#allocation2 + $0x8] sm:$0xff] %v1121_v10  ;;  %v1153_v7 = vpack.c.bf16 %v1139_v35, %v1138_v63  ;;  %v12935_v35 = vld [vmem:[#allocation8 + $0x8] sm:$0xf] }
 0x169   : > { %1176 = vst [vmem:[#allocation2 + $0x80] sm:$0xff] %v1168_v2  ;;  %v1200_v4 = vpack.c.bf16 %v1185_v48, %v1184_v9  ;;  %v11088_v27 = vld [vmem:[#allocation2 + $0x3c] sm:$0xf0]  ;;  %v8590_v12 = vld [vmem:[#allocation2 + $0x40] sm:$0xf0] }
 0x16a   : > { %1161 = vst [vmem:[#allocation2 + $0x48] sm:$0xff] %v1153_v7  ;;  %v8589_v5 = vor.u32 %v11088_v27, %v8588_v34  ;;  %v8593_v20 = vor.u32 %v11080_v38, %v8590_v12 }
 0x16b   : > { %1208 = vst [vmem:[#allocation2 + $0xc0] sm:$0xff] %v1200_v4 }
 0x16c   : > { %v935_v54 = vpop.f32.mrf.mxu2 }
 0x16d   : > { %v1186_v29 = vmax.f32 %v935_v54, 0.0  ;;  %v949_v16 = vpop.f32.mrf.mxu3 }
 0x16e   : > { %v1169_v6 = vpack.c.bf16 %v949_v16, %v935_v54  ;;  %v1187_v43 = vmax.f32 %v949_v16, 0.0 }
 0x16f   : > { %v11081_v12 = vld [vmem:[#allocation2 + $0xc] sm:$0xf] }
 0x170   : > { %1177 = vst [vmem:[#allocation2 + $0x88] sm:$0xff] %v1169_v6  ;;  %v1201_v3 = vpack.c.bf16 %v1187_v43, %v1186_v29  ;;  %v8652_v30 = vld [vmem:[#allocation2 + $0x80] sm:$0xf]  ;;  %v11096_v18 = vld [vmem:[#allocation2 + $0x84] sm:$0xf] }
 0x171   : > { %v11089_v34 = vld [vmem:[#allocation2 + $0x44] sm:$0xf0] }
 0x172   : > { %1209 = vst [vmem:[#allocation2 + $0xc8] sm:$0xff] %v1201_v3  ;;  %v11104_v8 = vld [vmem:[#allocation2 + $0xbc] sm:$0xf0]  ;;  %v8654_v25 = vld [vmem:[#allocation2 + $0xc0] sm:$0xf0] }
 0x173   : > { %v8653_v21 = vor.u32 %v11104_v8, %v8652_v30  ;;  %v8657_v62 = vor.u32 %v11096_v18, %v8654_v25  ;;  %v8596_v18 = vld [vmem:[#allocation2 + $0x8] sm:$0xf]  ;;  %v8598_v8 = vld [vmem:[#allocation2 + $0x48] sm:$0xf0] }
 0x174   : > { %v8597_v38 = vor.u32 %v11089_v34, %v8596_v18 }
 0x175   : > { %1419 = vmatpush.bf16.msra.mxu0 %v8653_v21  ;;  %1432 = vmatpush.bf16.msra.mxu1 %v8657_v62  ;;  %v8601_v62 = vor.u32 %v11081_v12, %v8598_v8 }
 0x177   : > { %v8660_v45 = vld [vmem:[#allocation2 + $0x88] sm:$0xf]  ;;  %v11097_v17 = vld [vmem:[#allocation2 + $0x8c] sm:$0xf] }
 0x179   : > { %1420 = vmatpush.bf16.msra.mxu0 %v8589_v5  ;;  %1433 = vmatpush.bf16.msra.mxu1 %v8593_v20  ;;  %v11105_v39 = vld [vmem:[#allocation2 + $0xc4] sm:$0xf0]  ;;  %v8662_v63 = vld [vmem:[#allocation2 + $0xc8] sm:$0xf0] }
 0x17a   : > { %v961_v11 = vpop.f32.mrf.mxu0  ;;  %v8661_v14 = vor.u32 %v11105_v39, %v8660_v45  ;;  %v8665_v10 = vor.u32 %v11097_v17, %v8662_v63 }
 0x17b   : > { %v1140_v9 = vmax.f32 %v961_v11, 0.0 }
 0x17c   : > { %1445 = vmatpush.bf16.msra.mxu2 %v8661_v14  ;;  %1458 = vmatpush.bf16.msra.mxu3 %v8665_v10 }
 0x17d   : > { %v975_v50 = vpop.f32.mrf.mxu1  ;;  %8714 = vmatmul.msk.bf16.vlgmr.msra.gmra.mxu0 %vm1409_vm1, %v12935_v35  ;;  %8715 = vmatmul.msk.bf16.vlgmr.msra.gmra.mxu1 %vm1409_vm1, %v12935_v35 }
 0x17e   : > { %v1122_v2 = vpack.c.bf16 %v975_v50, %v961_v11  ;;  %v1141_v48 = vmax.f32 %v975_v50, 0.0 }
 0x180   : > { %1130 = vst [vmem:[#allocation2 + $0x10] sm:$0xff] %v1122_v2  ;;  %v1154_v7 = vpack.c.bf16 %v1141_v48, %v1140_v9  ;;  %1446 = vmatpush.bf16.msra.mxu2 %v8597_v38  ;;  %1459 = vmatpush.bf16.msra.mxu3 %v8601_v62 }
 0x182   : > { %1162 = vst [vmem:[#allocation2 + $0x50] sm:$0xff] %v1154_v7  ;;  %v963_v4 = vpop.f32.mrf.mxu0 }
 0x183   : > { %v1188_v54 = vmax.f32 %v963_v4, 0.0  ;;  %8716 = vmatmul.msk.bf16.vlgmr.msra.gmra.mxu2 %vm1409_vm1, %v12935_v35  ;;  %8717 = vmatmul.msk.bf16.vlgmr.msra.gmra.mxu3 %vm1409_vm1, %v12935_v35 }
 0x185   : > { %v989_v29 = vpop.f32.mrf.mxu2  ;;  %v977_v16 = vpop.f32.mrf.mxu1 }
 0x186   : > { %v1170_v6 = vpack.c.bf16 %v977_v16, %v963_v4  ;;  %v1189_v43 = vmax.f32 %v977_v16, 0.0  ;;  %v1142_v3 = vmax.f32 %v989_v29, 0.0 }
 0x187   : > { %v8604_v48 = vld [vmem:[#allocation2 + $0x10] sm:$0xf] }
 0x188   : > { %1178 = vst [vmem:[#allocation2 + $0x90] sm:$0xff] %v1170_v6  ;;  %v1202_v30 = vpack.c.bf16 %v1189_v43, %v1188_v54  ;;  %v1003_v27 = vpop.f32.mrf.mxu3  ;;  %v11082_v54 = vld [vmem:[#allocation2 + $0x14] sm:$0xf] }
 0x189   : > { %v1123_v25 = vpack.c.bf16 %v1003_v27, %v989_v29  ;;  %v1143_v21 = vmax.f32 %v1003_v27, 0.0  ;;  %v11090_v4 = vld [vmem:[#allocation2 + $0x4c] sm:$0xf0]  ;;  %v8606_v16 = vld [vmem:[#allocation2 + $0x50] sm:$0xf0] }
 0x18a   : > { %1210 = vst [vmem:[#allocation2 + $0xd0] sm:$0xff] %v1202_v30  ;;  %v8605_v29 = vor.u32 %v11090_v4, %v8604_v48  ;;  %v8609_v6 = vor.u32 %v11082_v54, %v8606_v16 }
 0x18b   : > { %1131 = vst [vmem:[#allocation2 + $0x18] sm:$0xff] %v1123_v25  ;;  %v1155_v5 = vpack.c.bf16 %v1143_v21, %v1142_v3 }
 0x18d   : > { %v991_v20 = vpop.f32.mrf.mxu2  ;;  %1163 = vst [vmem:[#allocation2 + $0x58] sm:$0xff] %v1155_v5 }
 0x18e   : > { %v1190_v45 = vmax.f32 %v991_v20, 0.0 }
 0x18f   : > { %v8668_v14 = vld [vmem:[#allocation2 + $0x90] sm:$0xf]  ;;  %v11098_v50 = vld [vmem:[#allocation2 + $0x94] sm:$0xf] }
 0x190   : > { %v1005_v39 = vpop.f32.mrf.mxu3 }
 0x191   : > { %v1171_v17 = vpack.c.bf16 %v1005_v39, %v991_v20  ;;  %v1191_v63 = vmax.f32 %v1005_v39, 0.0  ;;  %v11106_v10 = vld [vmem:[#allocation2 + $0xcc] sm:$0xf0]  ;;  %v8670_v2 = vld [vmem:[#allocation2 + $0xd0] sm:$0xf0] }
 0x192   : > { %v8669_v9 = vor.u32 %v11106_v10, %v8668_v14  ;;  %v8673_v7 = vor.u32 %v11098_v50, %v8670_v2  ;;  %v11083_v10 = vld [vmem:[#allocation2 + $0x1c] sm:$0xf] }
 0x193   : > { %1179 = vst [vmem:[#allocation2 + $0x98] sm:$0xff] %v1171_v17  ;;  %v1203_v11 = vpack.c.bf16 %v1191_v63, %v1190_v45 }
 0x194   : > { %1471 = vmatpush.bf16.msrb.mxu0 %v8669_v9  ;;  %1484 = vmatpush.bf16.msrb.mxu1 %v8673_v7  ;;  %v11091_v14 = vld [vmem:[#allocation2 + $0x54] sm:$0xf0]  ;;  %v8614_v48 = vld [vmem:[#allocation2 + $0x58] sm:$0xf0] }
 0x195   : > { %1211 = vst [vmem:[#allocation2 + $0xd8] sm:$0xff] %v1203_v11  ;;  %v8612_v11 = vld [vmem:[#allocation2 + $0x18] sm:$0xf]  ;;  %v8617_v4 = vor.u32 %v11083_v10, %v8614_v48 }
 0x196   : > { %v8613_v2 = vor.u32 %v11091_v14, %v8612_v11 }
 0x198   : > { %1472 = vmatpush.bf16.msrb.mxu0 %v8605_v29  ;;  %1485 = vmatpush.bf16.msrb.mxu1 %v8609_v6 }
 0x19a   : > { %v8676_v43 = vld [vmem:[#allocation2 + $0x98] sm:$0xf]  ;;  %v11099_v3 = vld [vmem:[#allocation2 + $0x9c] sm:$0xf] }
 0x19b   : > { %8718 = vmatmul.msk.bf16.vlgmr.msrb.gmra.mxu0 %vm1409_vm1, %v12935_v35  ;;  %8719 = vmatmul.msk.bf16.vlgmr.msrb.gmra.mxu1 %vm1409_vm1, %v12935_v35 }
 0x19c   : > { %v11107_v30 = vld [vmem:[#allocation2 + $0xd4] sm:$0xf0]  ;;  %v8678_v18 = vld [vmem:[#allocation2 + $0xd8] sm:$0xf0] }
 0x19d   : > { %v8677_v27 = vor.u32 %v11107_v30, %v8676_v43  ;;  %v8681_v38 = vor.u32 %v11099_v3, %v8678_v18 }
 0x19e   : > { %v1017_v34 = vpop.f32.mrf.mxu0 }
 0x19f   : > { %1497 = vmatpush.bf16.msrb.mxu2 %v8677_v27  ;;  %1510 = vmatpush.bf16.msrb.mxu3 %v8681_v38  ;;  %v1144_v12 = vmax.f32 %v1017_v34, 0.0 }
 0x1a3   : > { %v1031_v8 = vpop.f32.mrf.mxu1  ;;  %1498 = vmatpush.bf16.msrb.mxu2 %v8613_v2  ;;  %1511 = vmatpush.bf16.msrb.mxu3 %v8617_v4 }
 0x1a4   : > { %v1124_v25 = vpack.c.bf16 %v1031_v8, %v1017_v34  ;;  %v1145_v21 = vmax.f32 %v1031_v8, 0.0 }
 0x1a6   : > { %1132 = vst [vmem:[#allocation2 + $0x20] sm:$0xff] %v1124_v25  ;;  %v1156_v62 = vpack.c.bf16 %v1145_v21, %v1144_v12  ;;  %v1019_v5 = vpop.f32.mrf.mxu0  ;;  %8720 = vmatmul.msk.bf16.vlgmr.msrb.gmra.mxu2 %vm1409_vm1, %v12935_v35  ;;  %8721 = vmatmul.msk.bf16.vlgmr.msrb.gmra.mxu3 %vm1409_vm1, %v12935_v35 }
 0x1a7   : > { %v1192_v20 = vmax.f32 %v1019_v5, 0.0 }
 0x1a8   : > { %1164 = vst [vmem:[#allocation2 + $0x60] sm:$0xff] %v1156_v62 }
 0x1ab   : > { %v1045_v45 = vpop.f32.mrf.mxu2  ;;  %v1033_v39 = vpop.f32.mrf.mxu1 }
 0x1ac   : > { %v1172_v17 = vpack.c.bf16 %v1033_v39, %v1019_v5  ;;  %v1193_v63 = vmax.f32 %v1033_v39, 0.0  ;;  %v1146_v9 = vmax.f32 %v1045_v45, 0.0 }
 0x1ad   : > { %v8620_v21 = vld [vmem:[#allocation2 + $0x20] sm:$0xf] }
 0x1ae   : > { %1180 = vst [vmem:[#allocation2 + $0xa0] sm:$0xff] %v1172_v17  ;;  %v1204_v50 = vpack.c.bf16 %v1193_v63, %v1192_v20  ;;  %v11084_v20 = vld [vmem:[#allocation2 + $0x24] sm:$0xf] }
 0x1af   : > { %v1059_v7 = vpop.f32.mrf.mxu3  ;;  %v11092_v5 = vld [vmem:[#allocation2 + $0x5c] sm:$0xf0] }
 0x1b0   : > { %v1125_v54 = vpack.c.bf16 %v1059_v7, %v1045_v45  ;;  %v1147_v29 = vmax.f32 %v1059_v7, 0.0  ;;  %1212 = vst [vmem:[#allocation2 + $0xe0] sm:$0xff] %v1204_v50  ;;  %v8622_v45 = vld [vmem:[#allocation2 + $0x60] sm:$0xf0]  ;;  %v8621_v39 = vor.u32 %v11092_v5, %v8620_v21 }
 0x1b1   : > { %v8625_v17 = vor.u32 %v11084_v20, %v8622_v45 }
 0x1b2   : > { %1133 = vst [vmem:[#allocation2 + $0x28] sm:$0xff] %v1125_v54  ;;  %v1157_v16 = vpack.c.bf16 %v1147_v29, %v1146_v9 }
 0x1b3   : > { %v1047_v6 = vpop.f32.mrf.mxu2 }
 0x1b4   : > { %1165 = vst [vmem:[#allocation2 + $0x68] sm:$0xff] %v1157_v16  ;;  %v1194_v43 = vmax.f32 %v1047_v6, 0.0 }
 0x1b5   : > { %v8684_v34 = vld [vmem:[#allocation2 + $0xa0] sm:$0xf]  ;;  %v11100_v38 = vld [vmem:[#allocation2 + $0xa4] sm:$0xf] }
 0x1b7   : > { %v1061_v3 = vpop.f32.mrf.mxu3  ;;  %v11108_v27 = vld [vmem:[#allocation2 + $0xdc] sm:$0xf0]  ;;  %v8686_v25 = vld [vmem:[#allocation2 + $0xe0] sm:$0xf0] }
 0x1b8   : > { %v1173_v30 = vpack.c.bf16 %v1061_v3, %v1047_v6  ;;  %v1195_v18 = vmax.f32 %v1061_v3, 0.0  ;;  %v8685_v8 = vor.u32 %v11108_v27, %v8684_v34  ;;  %v8689_v62 = vor.u32 %v11100_v38, %v8686_v25 }
 0x1b9   : > { %v8628_v14 = vld [vmem:[#allocation2 + $0x28] sm:$0xf]  ;;  %v11085_v9 = vld [vmem:[#allocation2 + $0x2c] sm:$0xf] }
 0x1ba   : > { %1181 = vst [vmem:[#allocation2 + $0xa8] sm:$0xff] %v1173_v30  ;;  %v1205_v12 = vpack.c.bf16 %v1195_v18, %v1194_v43  ;;  %1523 = vmatpush.bf16.msra.mxu0 %v8685_v8  ;;  %1536 = vmatpush.bf16.msra.mxu1 %v8689_v62 }
 0x1bb   : > { %v11093_v10 = vld [vmem:[#allocation2 + $0x64] sm:$0xf0]  ;;  %v8630_v48 = vld [vmem:[#allocation2 + $0x68] sm:$0xf0] }
 0x1bc   : > { %1213 = vst [vmem:[#allocation2 + $0xe8] sm:$0xff] %v1205_v12  ;;  %v8629_v29 = vor.u32 %v11093_v10, %v8628_v14  ;;  %v8633_v16 = vor.u32 %v11085_v9, %v8630_v48 }
 0x1be   : > { %1524 = vmatpush.bf16.msra.mxu0 %v8621_v39  ;;  %1537 = vmatpush.bf16.msra.mxu1 %v8625_v17 }
 0x1c1   : > { %v8692_v63 = vld [vmem:[#allocation2 + $0xa8] sm:$0xf]  ;;  %v11101_v11 = vld [vmem:[#allocation2 + $0xac] sm:$0xf]  ;;  %8722 = vmatmul.msk.bf16.vlgmr.msra.gmra.mxu0 %vm1409_vm1, %v12935_v35  ;;  %8723 = vmatmul.msk.bf16.vlgmr.msra.gmra.mxu1 %vm1409_vm1, %v12935_v35 }
 0x1c3   : > { %v11109_v50 = vld [vmem:[#allocation2 + $0xe4] sm:$0xf0]  ;;  %v8694_v2 = vld [vmem:[#allocation2 + $0xe8] sm:$0xf0] }
 0x1c4   : > { %v1073_v7 = vpop.f32.mrf.mxu0  ;;  %v8693_v4 = vor.u32 %v11109_v50, %v8692_v63  ;;  %v8697_v54 = vor.u32 %v11101_v11, %v8694_v2 }
 0x1c5   : > { %v1148_v6 = vmax.f32 %v1073_v7, 0.0 }
 0x1c6   : > { %1549 = vmatpush.bf16.msra.mxu2 %v8693_v4  ;;  %1562 = vmatpush.bf16.msra.mxu3 %v8697_v54  ;;  %v1087_v43 = vpop.f32.mrf.mxu1 }
 0x1c7   : > { %v1126_v3 = vpack.c.bf16 %v1087_v43, %v1073_v7  ;;  %v1149_v30 = vmax.f32 %v1087_v43, 0.0 }
 0x1c9   : > { %1134 = vst [vmem:[#allocation2 + $0x30] sm:$0xff] %v1126_v3  ;;  %v1158_v18 = vpack.c.bf16 %v1149_v30, %v1148_v6 }
 0x1ca   : > { %1550 = vmatpush.bf16.msra.mxu2 %v8629_v29  ;;  %1563 = vmatpush.bf16.msra.mxu3 %v8633_v16 }
 0x1cb   : > { %1166 = vst [vmem:[#allocation2 + $0x70] sm:$0xff] %v1158_v18 }
 0x1cc   : > { %v1075_v34 = vpop.f32.mrf.mxu0 }
 0x1cd   : > { %8724 = vmatmul.msk.bf16.vlgmr.msra.gmra.mxu2 %vm1409_vm1, %v12935_v35  ;;  %8725 = vmatmul.msk.bf16.vlgmr.msra.gmra.mxu3 %vm1409_vm1, %v12935_v35  ;;  %v1196_v27 = vmax.f32 %v1075_v34, 0.0 }
 0x1ce   : > { %v1089_v12 = vpop.f32.mrf.mxu1 }
 0x1cf   : > { %v1174_v8 = vpack.c.bf16 %v1089_v12, %v1075_v34  ;;  %v1197_v25 = vmax.f32 %v1089_v12, 0.0 }
 0x1d0   : > { %v1101_v38 = vpop.f32.mrf.mxu2  ;;  %v8636_v14 = vld [vmem:[#allocation2 + $0x30] sm:$0xf]  ;;  %v11086_v50 = vld [vmem:[#allocation2 + $0x34] sm:$0xf] }
 0x1d1   : > { %v1150_v21 = vmax.f32 %v1101_v38, 0.0  ;;  %1182 = vst [vmem:[#allocation2 + $0xb0] sm:$0xff] %v1174_v8  ;;  %v1206_v62 = vpack.c.bf16 %v1197_v25, %v1196_v27 }
 0x1d2   : > { %v11094_v9 = vld [vmem:[#allocation2 + $0x6c] sm:$0xf0]  ;;  %v8638_v4 = vld [vmem:[#allocation2 + $0x70] sm:$0xf0] }
 0x1d3   : > { %1214 = vst [vmem:[#allocation2 + $0xf0] sm:$0xff] %v1206_v62  ;;  %v8637_v3 = vor.u32 %v11094_v9, %v8636_v14  ;;  %v8641_v30 = vor.u32 %v11086_v50, %v8638_v4 }
 0x1d4   : > { %v1115_v5 = vpop.f32.mrf.mxu3 }
 0x1d5   : > { %v1127_v20 = vpack.c.bf16 %v1115_v5, %v1101_v38  ;;  %v1151_v45 = vmax.f32 %v1115_v5, 0.0 }
 0x1d7   : > { %1135 = vst [vmem:[#allocation2 + $0x38] sm:$0xff] %v1127_v20  ;;  %v1159_v39 = vpack.c.bf16 %v1151_v45, %v1150_v21 }
 0x1d8   : > { %v1103_v17 = vpop.f32.mrf.mxu2  ;;  %v8700_v63 = vld [vmem:[#allocation2 + $0xb0] sm:$0xf]  ;;  %v11102_v11 = vld [vmem:[#allocation2 + $0xb4] sm:$0xf] }
 0x1d9   : > { %1167 = vst [vmem:[#allocation2 + $0x78] sm:$0xff] %v1159_v39  ;;  %v1198_v10 = vmax.f32 %v1103_v17, 0.0 }
 0x1da   : > { %v11110_v48 = vld [vmem:[#allocation2 + $0xec] sm:$0xf0]  ;;  %v8702_v7 = vld [vmem:[#allocation2 + $0xf0] sm:$0xf0] }
 0x1db   : > { %v8701_v16 = vor.u32 %v11110_v48, %v8700_v63  ;;  %v8705_v6 = vor.u32 %v11102_v11, %v8702_v7 }
 0x1dc   : > { %v1117_v2 = vpop.f32.mrf.mxu3 }
 0x1dd   : > { %v1175_v54 = vpack.c.bf16 %v1117_v2, %v1103_v17  ;;  %v1199_v29 = vmax.f32 %v1117_v2, 0.0  ;;  %1575 = vmatpush.bf16.msrb.mxu0 %v8701_v16  ;;  %1588 = vmatpush.bf16.msrb.mxu1 %v8705_v6  ;;  %v11136_v16 = vld [vmem:[#allocation2 + $0xbc] sm:$0xf0]  ;;  %v11128_v6 = vld [vmem:[#allocation2 + $0x84] sm:$0xf] }
 0x1de   : > { %v8644_v27 = vld [vmem:[#allocation2 + $0x38] sm:$0xf]  ;;  %v11087_v12 = vld [vmem:[#allocation2 + $0x3c] sm:$0xf] }
 0x1df   : > { %1183 = vst [vmem:[#allocation2 + $0xb8] sm:$0xff] %v1175_v54  ;;  %v1207_v43 = vpack.c.bf16 %v1199_v29, %v1198_v10  ;;  %v8796_v29 = vld [vmem:[#allocation2 + $0x80] sm:$0xf] }
 0x1e0   : > { %v11095_v38 = vld [vmem:[#allocation2 + $0x74] sm:$0xf0]  ;;  %v8646_v21 = vld [vmem:[#allocation2 + $0x78] sm:$0xf0] }
 0x1e1   : > { %1215 = vst [vmem:[#allocation2 + $0xf8] sm:$0xff] %v1207_v43  ;;  %1576 = vmatpush.bf16.msrb.mxu0 %v8637_v3  ;;  %1589 = vmatpush.bf16.msrb.mxu1 %v8641_v30  ;;  %v8645_v20 = vor.u32 %v11095_v38, %v8644_v27  ;;  %v8649_v45 = vor.u32 %v11087_v12, %v8646_v21  ;;  %v8798_v43 = vld [vmem:[#allocation2 + $0xc0] sm:$0xf0]  ;;  %v12975_v21 = vld [vmem:[#allocation8 + $0xc] sm:$0xf] }
 0x1e2   : > { %v8797_v3 = vor.u32 %v11136_v16, %v8796_v29  ;;  %v8801_v30 = vor.u32 %v11128_v6, %v8798_v43  ;;  %v11112_v27 = vld [vmem:[#allocation2 + $0x4] sm:$0xf]  ;;  %v11137_v43 = vld [vmem:[#allocation2 + $0xc4] sm:$0xf0] }
 0x1e3   : > { %v8734_v38 = vld [vmem:[#allocation2 + $0x40] sm:$0xf0] }
 0x1e4   : > { %8726 = vmatmul.msk.bf16.vlgmr.msrb.gmra.mxu0 %vm1409_vm1, %v12935_v35  ;;  %8727 = vmatmul.msk.bf16.vlgmr.msrb.gmra.mxu1 %vm1409_vm1, %v12935_v35 }
 0x1e6   : > { %v8708_v18 = vld [vmem:[#allocation2 + $0xb8] sm:$0xf]  ;;  %v11103_v34 = vld [vmem:[#allocation2 + $0xbc] sm:$0xf] }
 0x1e8   : > { %v11111_v8 = vld [vmem:[#allocation2 + $0xf4] sm:$0xf0]  ;;  %v8710_v25 = vld [vmem:[#allocation2 + $0xf8] sm:$0xf0] }
 0x1e9   : > { %v8709_v62 = vor.u32 %v11111_v8, %v8708_v18  ;;  %v8713_v5 = vor.u32 %v11103_v34, %v8710_v25  ;;  %v8732_v18 = vld [vmem:[#allocation2] sm:$0xf]  ;;  %v8737_v8 = vor.u32 %v11112_v27, %v8734_v38 }
 0x1ea   : > { %v11120_v34 = vld [vmem:[#allocation2 + $0x3c] sm:$0xf0] }
 0x1eb   : > { %1601 = vmatpush.bf16.msrb.mxu2 %v8709_v62  ;;  %1614 = vmatpush.bf16.msrb.mxu3 %v8713_v5  ;;  %v8733_v12 = vor.u32 %v11120_v34, %v8732_v18  ;;  %v11129_v18 = vld [vmem:[#allocation2 + $0x8c] sm:$0xf] }
 0x1ef   : > { %1602 = vmatpush.bf16.msrb.mxu2 %v8645_v20  ;;  %1615 = vmatpush.bf16.msrb.mxu3 %v8649_v45 }
 0x1f2   : > { %8728 = vmatmul.msk.bf16.vlgmr.msrb.gmra.mxu2 %vm1409_vm1, %v12935_v35  ;;  %8729 = vmatmul.msk.bf16.vlgmr.msrb.gmra.mxu3 %vm1409_vm1, %v12935_v35 }
 0x1fa   : > { %v1422_v39 = vpop.f32.mrf.mxu0  ;;  %v1435_v17 = vpop.f32.mrf.mxu1 }
 0x1fb   : > { %v12969_v63 = vmax.f32 %v1422_v39, 0.0  ;;  %v1621_v11 = vpack.c.bf16 %v1435_v17, %v1422_v39  ;;  %v12971_v14 = vmax.f32 %v1435_v17, 0.0 }
 0x1fd   : > { %1629 = vst [vmem:[#allocation2 + $0x100] sm:$0xff] %v1621_v11  ;;  %v1653_v10 = vpack.c.bf16 %v12971_v14, %v12969_v63 }
 0x1ff   : > { %1661 = vst [vmem:[#allocation2 + $0x140] sm:$0xff] %v1653_v10 }
 0x202   : > { %v1424_v9 = vpop.f32.mrf.mxu0  ;;  %v1437_v50 = vpop.f32.mrf.mxu1 }
 0x204   : > { %v8860_v2 = vld [vmem:[#allocation2 + $0x100] sm:$0xf]  ;;  %v11144_v48 = vld [vmem:[#allocation2 + $0x104] sm:$0xf] }
 0x206   : > { %v11152_v7 = vld [vmem:[#allocation2 + $0x13c] sm:$0xf0]  ;;  %v8862_v4 = vld [vmem:[#allocation2 + $0x140] sm:$0xf0]  ;;  %v1448_v25 = vpop.f32.mrf.mxu2  ;;  %v1461_v5 = vpop.f32.mrf.mxu3 }
 0x207   : > { %v8861_v54 = vor.u32 %v11152_v7, %v8860_v2  ;;  %v8865_v35 = vor.u32 %v11144_v48, %v8862_v4  ;;  %v12977_v62 = vmax.f32 %v1448_v25, 0.0  ;;  %v1622_v20 = vpack.c.bf16 %v1461_v5, %v1448_v25  ;;  %v8742_v25 = vld [vmem:[#allocation2 + $0x48] sm:$0xf0] }
 0x208   : > { %v12979_v45 = vmax.f32 %v1461_v5, 0.0  ;;  %v8740_v5 = vld [vmem:[#allocation2 + $0x8] sm:$0xf] }
 0x209   : > { %1966 = vmatpush.bf16.msra.mxu0 %v8861_v54  ;;  %1979 = vmatpush.bf16.msra.mxu1 %v8865_v35  ;;  %1630 = vst [vmem:[#allocation2 + $0x108] sm:$0xff] %v1622_v20 }
 0x20a   : > { %v1654_v39 = vpack.c.bf16 %v12979_v45, %v12977_v62 }
 0x20c   : > { %1662 = vst [vmem:[#allocation2 + $0x148] sm:$0xff] %v1654_v39 }
 0x20d   : > { %1967 = vmatpush.bf16.msra.mxu0 %v8797_v3  ;;  %1980 = vmatpush.bf16.msra.mxu1 %v8801_v30  ;;  %v8806_v3 = vld [vmem:[#allocation2 + $0xc8] sm:$0xf0]  ;;  %v8804_v30 = vld [vmem:[#allocation2 + $0x88] sm:$0xf] }
 0x20e   : > { %v1450_v17 = vpop.f32.mrf.mxu2  ;;  %v1463_v11 = vpop.f32.mrf.mxu3  ;;  %v8805_v27 = vor.u32 %v11137_v43, %v8804_v30  ;;  %v8809_v38 = vor.u32 %v11129_v18, %v8806_v3  ;;  %v8748_v3 = vld [vmem:[#allocation2 + $0x10] sm:$0xf]  ;;  %v11114_v18 = vld [vmem:[#allocation2 + $0x14] sm:$0xf] }
 0x20f   : > { %v11113_v17 = vld [vmem:[#allocation2 + $0xc] sm:$0xf]  ;;  %v11122_v30 = vld [vmem:[#allocation2 + $0x4c] sm:$0xf0] }
 0x210   : > { %v8868_v7 = vld [vmem:[#allocation2 + $0x108] sm:$0xf]  ;;  %v11145_v54 = vld [vmem:[#allocation2 + $0x10c] sm:$0xf] }
 0x211   : > { %1968 = vmatpush.bf16.msra.mxu0 %v8733_v12  ;;  %1981 = vmatpush.bf16.msra.mxu1 %v8737_v8  ;;  %v11121_v8 = vld [vmem:[#allocation2 + $0x44] sm:$0xf0] }
 0x212   : > { %v8741_v11 = vor.u32 %v11121_v8, %v8740_v5 }
 0x213   : > { %v11153_v4 = vld [vmem:[#allocation2 + $0x144] sm:$0xf0]  ;;  %v8870_v35 = vld [vmem:[#allocation2 + $0x148] sm:$0xf0] }
 0x214   : > { %8922 = vmatmul.msk.bf16.vlgmr.msra.gmra.mxu0 %vm892_vm0, %v12975_v21  ;;  %8923 = vmatmul.msk.bf16.vlgmr.msra.gmra.mxu1 %vm892_vm0, %v12975_v21  ;;  %v8869_v16 = vor.u32 %v11153_v4, %v8868_v7  ;;  %v8873_v6 = vor.u32 %v11145_v54, %v8870_v35  ;;  %v8812_v54 = vld [vmem:[#allocation2 + $0x90] sm:$0xf] }
 0x215   : > { %v11138_v35 = vld [vmem:[#allocation2 + $0xcc] sm:$0xf0] }
 0x216   : > { %1992 = vmatpush.bf16.msra.mxu2 %v8869_v16  ;;  %2005 = vmatpush.bf16.msra.mxu3 %v8873_v6  ;;  %v8814_v16 = vld [vmem:[#allocation2 + $0xd0] sm:$0xf0]  ;;  %v8813_v6 = vor.u32 %v11138_v35, %v8812_v54 }
 0x218   : > { %v1474_v10 = vpop.f32.mrf.mxu0  ;;  %v1487_v50 = vpop.f32.mrf.mxu1 }
 0x219   : > { %v12987_v9 = vmax.f32 %v1474_v10, 0.0  ;;  %v1623_v2 = vpack.c.bf16 %v1487_v50, %v1474_v10  ;;  %v12989_v48 = vmax.f32 %v1487_v50, 0.0  ;;  %v8745_v10 = vor.u32 %v11113_v17, %v8742_v25 }
 0x21a   : > { %1993 = vmatpush.bf16.msra.mxu2 %v8805_v27  ;;  %2006 = vmatpush.bf16.msra.mxu3 %v8809_v38  ;;  %v8749_v27 = vor.u32 %v11122_v30, %v8748_v3  ;;  %v8820_v30 = vld [vmem:[#allocation2 + $0x98] sm:$0xf] }
 0x21b   : > { %1631 = vst [vmem:[#allocation2 + $0x110] sm:$0xff] %v1623_v2  ;;  %v1655_v29 = vpack.c.bf16 %v12989_v48, %v12987_v9 }
 0x21d   : > { %1663 = vst [vmem:[#allocation2 + $0x150] sm:$0xff] %v1655_v29  ;;  %v11130_v29 = vld [vmem:[#allocation2 + $0x94] sm:$0xf] }
 0x21e   : > { %1994 = vmatpush.bf16.msra.mxu2 %v8741_v11  ;;  %2007 = vmatpush.bf16.msra.mxu3 %v8745_v10  ;;  %v8817_v43 = vor.u32 %v11130_v29, %v8814_v16 }
 0x220   : > { %v1476_v34 = vpop.f32.mrf.mxu0  ;;  %v1489_v12 = vpop.f32.mrf.mxu1 }
 0x221   : > { %8924 = vmatmul.msk.bf16.vlgmr.msra.gmra.mxu2 %vm892_vm0, %v12975_v21  ;;  %8925 = vmatmul.msk.bf16.vlgmr.msra.gmra.mxu3 %vm892_vm0, %v12975_v21  ;;  %v8750_v34 = vld [vmem:[#allocation2 + $0x50] sm:$0xf0] }
 0x222   : > { %v8876_v20 = vld [vmem:[#allocation2 + $0x110] sm:$0xf]  ;;  %v11146_v39 = vld [vmem:[#allocation2 + $0x114] sm:$0xf]  ;;  %v8753_v38 = vor.u32 %v11114_v18, %v8750_v34  ;;  %v11139_v18 = vld [vmem:[#allocation2 + $0xd4] sm:$0xf0] }
 0x223   : > { %v11131_v34 = vld [vmem:[#allocation2 + $0x9c] sm:$0xf] }
 0x224   : > { %v11154_v50 = vld [vmem:[#allocation2 + $0x14c] sm:$0xf0]  ;;  %v8878_v2 = vld [vmem:[#allocation2 + $0x150] sm:$0xf0] }
 0x225   : > { %v8877_v7 = vor.u32 %v11154_v50, %v8876_v20  ;;  %v8881_v4 = vor.u32 %v11146_v39, %v8878_v2 }
 0x227   : > { %2018 = vmatpush.bf16.msrb.mxu0 %v8877_v7  ;;  %2031 = vmatpush.bf16.msrb.mxu1 %v8881_v4 }
 0x229   : > { %v1500_v12 = vpop.f32.mrf.mxu2  ;;  %v1513_v25 = vpop.f32.mrf.mxu3 }
 0x22a   : > { %v13001_v8 = vmax.f32 %v1500_v12, 0.0  ;;  %v1624_v5 = vpack.c.bf16 %v1513_v25, %v1500_v12  ;;  %v13003_v20 = vmax.f32 %v1513_v25, 0.0  ;;  %v8821_v12 = vor.u32 %v11139_v18, %v8820_v30  ;;  %v11132_v30 = vld [vmem:[#allocation2 + $0xa4] sm:$0xf] }
 0x22b   : > { %2019 = vmatpush.bf16.msrb.mxu0 %v8813_v6  ;;  %2032 = vmatpush.bf16.msrb.mxu1 %v8817_v43  ;;  %v8830_v18 = vld [vmem:[#allocation2 + $0xe0] sm:$0xf0] }
 0x22c   : > { %14090 = vst [vmem:[#allocation19_spill] sm:$0xff] %v13001_v8  ;;  %v1656_v39 = vpack.c.bf16 %v13003_v20, %v13001_v8 }
 0x22d   : > { %14091 = vst [vmem:[#allocation20_spill] sm:$0xff] %v13003_v20 }
 0x22e   : > { %1632 = vst [vmem:[#allocation2 + $0x118] sm:$0xff] %v1624_v5  ;;  %v8756_v5 = vld [vmem:[#allocation2 + $0x18] sm:$0xf] }
 0x22f   : > { %2020 = vmatpush.bf16.msrb.mxu0 %v8749_v27  ;;  %2033 = vmatpush.bf16.msrb.mxu1 %v8753_v38  ;;  %1664 = vst [vmem:[#allocation2 + $0x158] sm:$0xff] %v1656_v39  ;;  %v8822_v27 = vld [vmem:[#allocation2 + $0xd8] sm:$0xf0] }
 0x230   : > { %v8825_v25 = vor.u32 %v11131_v34, %v8822_v27 }
 0x231   : > { %v1502_v17 = vpop.f32.mrf.mxu2  ;;  %v1515_v11 = vpop.f32.mrf.mxu3 }
 0x232   : > { %8926 = vmatmul.msk.bf16.vlgmr.msrb.gmra.mxu0 %vm892_vm0, %v12975_v21  ;;  %8927 = vmatmul.msk.bf16.vlgmr.msrb.gmra.mxu1 %vm892_vm0, %v12975_v21  ;;  %v11123_v17 = vld [vmem:[#allocation2 + $0x54] sm:$0xf0]  ;;  %v11115_v11 = vld [vmem:[#allocation2 + $0x1c] sm:$0xf] }
 0x235   : > { %v8884_v7 = vld [vmem:[#allocation2 + $0x118] sm:$0xf]  ;;  %v11147_v4 = vld [vmem:[#allocation2 + $0x11c] sm:$0xf] }
 0x236   : > { %v11155_v29 = vld [vmem:[#allocation2 + $0x154] sm:$0xf0]  ;;  %v8886_v16 = vld [vmem:[#allocation2 + $0x158] sm:$0xf0] }
 0x237   : > { %v8885_v43 = vor.u32 %v11155_v29, %v8884_v7  ;;  %v8889_v3 = vor.u32 %v11147_v4, %v8886_v16  ;;  %v8757_v4 = vor.u32 %v11123_v17, %v8756_v5  ;;  %v8764_v17 = vld [vmem:[#allocation2 + $0x20] sm:$0xf] }
 0x239   : > { %2044 = vmatpush.bf16.msrb.mxu2 %v8885_v43  ;;  %2057 = vmatpush.bf16.msrb.mxu3 %v8889_v3  ;;  %v8828_v43 = vld [vmem:[#allocation2 + $0xa0] sm:$0xf] }
 0x23a   : > { %v11140_v3 = vld [vmem:[#allocation2 + $0xdc] sm:$0xf0] }
 0x23b   : > { %v8829_v5 = vor.u32 %v11140_v3, %v8828_v43 }
 0x23d   : > { %2045 = vmatpush.bf16.msrb.mxu2 %v8821_v12  ;;  %2058 = vmatpush.bf16.msrb.mxu3 %v8825_v25 }
 0x23e   : > { %v1526_v10 = vpop.f32.mrf.mxu0  ;;  %v1539_v2 = vpop.f32.mrf.mxu1 }
 0x23f   : > { %v13007_v50 = vmax.f32 %v1526_v10, 0.0  ;;  %v1625_v54 = vpack.c.bf16 %v1539_v2, %v1526_v10  ;;  %v13009_v35 = vmax.f32 %v1539_v2, 0.0  ;;  %v8758_v10 = vld [vmem:[#allocation2 + $0x58] sm:$0xf0] }
 0x241   : > { %1633 = vst [vmem:[#allocation2 + $0x120] sm:$0xff] %v1625_v54  ;;  %v1657_v6 = vpack.c.bf16 %v13009_v35, %v13007_v50  ;;  %v8761_v54 = vor.u32 %v11115_v11, %v8758_v10  ;;  %2046 = vmatpush.bf16.msrb.mxu2 %v8757_v4  ;;  %v11124_v11 = vld [vmem:[#allocation2 + $0x5c] sm:$0xf0]  ;;  %v11116_v10 = vld [vmem:[#allocation2 + $0x24] sm:$0xf] }
 0x243   : > { %1665 = vst [vmem:[#allocation2 + $0x160] sm:$0xff] %v1657_v6  ;;  %2059 = vmatpush.bf16.msrb.mxu3 %v8761_v54 }
 0x244   : > { %8928 = vmatmul.msk.bf16.vlgmr.msrb.gmra.mxu2 %vm892_vm0, %v12975_v21 }
 0x246   : > { %v1528_v38 = vpop.f32.mrf.mxu0  ;;  %v1541_v39 = vpop.f32.mrf.mxu1  ;;  %8929 = vmatmul.msk.bf16.vlgmr.msrb.gmra.mxu3 %vm892_vm0, %v12975_v21 }
 0x247   : > { %v8833_v39 = vor.u32 %v11132_v30, %v8830_v18 }
 0x248   : > { %v8892_v2 = vld [vmem:[#allocation2 + $0x120] sm:$0xf]  ;;  %v11148_v7 = vld [vmem:[#allocation2 + $0x124] sm:$0xf] }
 0x24a   : > { %v11156_v29 = vld [vmem:[#allocation2 + $0x15c] sm:$0xf0]  ;;  %v8894_v16 = vld [vmem:[#allocation2 + $0x160] sm:$0xf0] }
 0x24b   : > { %v8893_v13 = vor.u32 %v11156_v29, %v8892_v2  ;;  %v8897_v6 = vor.u32 %v11148_v7, %v8894_v16  ;;  %v8766_v2 = vld [vmem:[#allocation2 + $0x60] sm:$0xf0]  ;;  %v8765_v7 = vor.u32 %v11124_v11, %v8764_v17  ;;  %v8772_v11 = vld [vmem:[#allocation2 + $0x28] sm:$0xf] }
 0x24c   : > { %v8769_v4 = vor.u32 %v11116_v10, %v8766_v2  ;;  %v11117_v10 = vld [vmem:[#allocation2 + $0x2c] sm:$0xf] }
 0x24d   : > { %2070 = vmatpush.bf16.msra.mxu0 %v8893_v13  ;;  %2083 = vmatpush.bf16.msra.mxu1 %v8897_v6  ;;  %v8774_v2 = vld [vmem:[#allocation2 + $0x68] sm:$0xf0] }
 0x250   : > { %v1552_v34 = vpop.f32.mrf.mxu2  ;;  %v1565_v27 = vpop.f32.mrf.mxu3 }
 0x251   : > { %v13013_v38 = vmax.f32 %v1552_v34, 0.0  ;;  %v1626_v12 = vpack.c.bf16 %v1565_v27, %v1552_v34  ;;  %v13015_v25 = vmax.f32 %v1565_v27, 0.0  ;;  %2071 = vmatpush.bf16.msra.mxu0 %v8829_v5  ;;  %2084 = vmatpush.bf16.msra.mxu1 %v8833_v39  ;;  %v8836_v34 = vld [vmem:[#allocation2 + $0xa8] sm:$0xf]  ;;  %v8838_v5 = vld [vmem:[#allocation2 + $0xe8] sm:$0xf0] }
 0x252   : > { %v11141_v27 = vld [vmem:[#allocation2 + $0xe4] sm:$0xf0] }
 0x253   : > { %14092 = vst [vmem:[#allocation21_spill] sm:$0xff] %v13013_v38  ;;  %v1658_v13 = vpack.c.bf16 %v13015_v25, %v13013_v38  ;;  %v8837_v39 = vor.u32 %v11141_v27, %v8836_v34 }
 0x254   : > { %14093 = vst [vmem:[#allocation22_spill] sm:$0xff] %v13015_v25 }
 0x255   : > { %1634 = vst [vmem:[#allocation2 + $0x128] sm:$0xff] %v1626_v12  ;;  %2072 = vmatpush.bf16.msra.mxu0 %v8765_v7  ;;  %2085 = vmatpush.bf16.msra.mxu1 %v8769_v4  ;;  %v11133_v12 = vld [vmem:[#allocation2 + $0xac] sm:$0xf] }
 0x256   : > { %1666 = vst [vmem:[#allocation2 + $0x168] sm:$0xff] %v1658_v13  ;;  %v8841_v17 = vor.u32 %v11133_v12, %v8838_v5  ;;  %v11125_v13 = vld [vmem:[#allocation2 + $0x64] sm:$0xf0] }
 0x258   : > { %v1554_v54 = vpop.f32.mrf.mxu2  ;;  %v1567_v29 = vpop.f32.mrf.mxu3  ;;  %8930 = vmatmul.msk.bf16.vlgmr.msra.gmra.mxu0 %vm892_vm0, %v12975_v21  ;;  %8931 = vmatmul.msk.bf16.vlgmr.msra.gmra.mxu1 %vm892_vm0, %v12975_v21 }
 0x25c   : > { %v8900_v16 = vld [vmem:[#allocation2 + $0x128] sm:$0xf]  ;;  %v11149_v6 = vld [vmem:[#allocation2 + $0x12c] sm:$0xf] }
 0x25d   : > { %v11157_v43 = vld [vmem:[#allocation2 + $0x164] sm:$0xf0]  ;;  %v8902_v3 = vld [vmem:[#allocation2 + $0x168] sm:$0xf0] }
 0x25e   : > { %v8901_v30 = vor.u32 %v11157_v43, %v8900_v16  ;;  %v8905_v18 = vor.u32 %v11149_v6, %v8902_v3  ;;  %v8773_v6 = vor.u32 %v11125_v13, %v8772_v11  ;;  %v8777_v43 = vor.u32 %v11117_v10, %v8774_v2  ;;  %v8844_v11 = vld [vmem:[#allocation2 + $0xb0] sm:$0xf]  ;;  %v11134_v10 = vld [vmem:[#allocation2 + $0xb4] sm:$0xf] }
 0x25f   : > { %v11142_v13 = vld [vmem:[#allocation2 + $0xec] sm:$0xf0]  ;;  %v8846_v2 = vld [vmem:[#allocation2 + $0xf0] sm:$0xf0] }
 0x260   : > { %2096 = vmatpush.bf16.msra.mxu2 %v8901_v30  ;;  %2109 = vmatpush.bf16.msra.mxu3 %v8905_v18 }
 0x261   : > { %v1578_v7 = vpop.f32.mrf.mxu0  ;;  %v1591_v4 = vpop.f32.mrf.mxu1 }
 0x262   : > { %v13027_v54 = vmax.f32 %v1578_v7, 0.0  ;;  %v1627_v29 = vpack.c.bf16 %v1591_v4, %v1578_v7  ;;  %v13029_v16 = vmax.f32 %v1591_v4, 0.0  ;;  %v8845_v7 = vor.u32 %v11142_v13, %v8844_v11 }
 0x263   : > { %v8849_v4 = vor.u32 %v11134_v10, %v8846_v2 }
 0x264   : > { %2097 = vmatpush.bf16.msra.mxu2 %v8837_v39  ;;  %2110 = vmatpush.bf16.msra.mxu3 %v8841_v17  ;;  %14094 = vst [vmem:[#allocation23_spill] sm:$0xff] %v13027_v54  ;;  %v1659_v3 = vpack.c.bf16 %v13029_v16, %v13027_v54 }
 0x265   : > { %14095 = vst [vmem:[#allocation24_spill] sm:$0xff] %v13029_v16 }
 0x266   : > { %1635 = vst [vmem:[#allocation2 + $0x130] sm:$0xff] %v1627_v29  ;;  %v8780_v29 = vld [vmem:[#allocation2 + $0x30] sm:$0xf] }
 0x267   : > { %1667 = vst [vmem:[#allocation2 + $0x170] sm:$0xff] %v1659_v3  ;;  %v11126_v3 = vld [vmem:[#allocation2 + $0x6c] sm:$0xf0] }
 0x268   : > { %2098 = vmatpush.bf16.msra.mxu2 %v8773_v6  ;;  %2111 = vmatpush.bf16.msra.mxu3 %v8777_v43 }
 0x269   : > { %v1580_v30 = vpop.f32.mrf.mxu0  ;;  %v1593_v18 = vpop.f32.mrf.mxu1 }
 0x26a   : > { %v11118_v30 = vld [vmem:[#allocation2 + $0x34] sm:$0xf] }
 0x26b   : > { %8932 = vmatmul.msk.bf16.vlgmr.msra.gmra.mxu2 %vm892_vm0, %v12975_v21  ;;  %8933 = vmatmul.msk.bf16.vlgmr.msra.gmra.mxu3 %vm892_vm0, %v12975_v21  ;;  %v8782_v18 = vld [vmem:[#allocation2 + $0x70] sm:$0xf0] }
 0x26d   : > { %v8908_v34 = vld [vmem:[#allocation2 + $0x130] sm:$0xf]  ;;  %v11150_v27 = vld [vmem:[#allocation2 + $0x134] sm:$0xf] }
 0x26e   : > { %v11158_v12 = vld [vmem:[#allocation2 + $0x16c] sm:$0xf0]  ;;  %v8910_v5 = vld [vmem:[#allocation2 + $0x170] sm:$0xf0] }
 0x26f   : > { %v8909_v39 = vor.u32 %v11158_v12, %v8908_v34  ;;  %v8913_v17 = vor.u32 %v11150_v27, %v8910_v5  ;;  %v8781_v27 = vor.u32 %v11126_v3, %v8780_v29  ;;  %v8785_v12 = vor.u32 %v11118_v30, %v8782_v18  ;;  %v11135_v29 = vld [vmem:[#allocation2 + $0xbc] sm:$0xf]  ;;  %v8788_v30 = vld [vmem:[#allocation2 + $0x38] sm:$0xf] }
 0x270   : > { %v11127_v18 = vld [vmem:[#allocation2 + $0x74] sm:$0xf0] }
 0x271   : > { %2122 = vmatpush.bf16.msrb.mxu0 %v8909_v39  ;;  %2135 = vmatpush.bf16.msrb.mxu1 %v8913_v17 }
 0x275   : > { %v1604_v6 = vpop.f32.mrf.mxu2  ;;  %v1617_v43 = vpop.f32.mrf.mxu3  ;;  %2123 = vmatpush.bf16.msrb.mxu0 %v8845_v7  ;;  %2136 = vmatpush.bf16.msrb.mxu1 %v8849_v4  ;;  %v8852_v7 = vld [vmem:[#allocation2 + $0xb8] sm:$0xf] }
 0x276   : > { %v13037_v56 = vmax.f32 %v1604_v6, 0.0  ;;  %v1628_v37 = vpack.c.bf16 %v1617_v43, %v1604_v6  ;;  %v13039_v40 = vmax.f32 %v1617_v43, 0.0  ;;  %v11143_v4 = vld [vmem:[#allocation2 + $0xf4] sm:$0xf0]  ;;  %v8854_v6 = vld [vmem:[#allocation2 + $0xf8] sm:$0xf0] }
 0x277   : > { %v8853_v43 = vor.u32 %v11143_v4, %v8852_v7  ;;  %v8857_v3 = vor.u32 %v11135_v29, %v8854_v6  ;;  %v2185_v29 = vpack.c.bf16 %v12969_v63, %v12322_v36  ;;  %v2186_v6 = vpack.c.bf16 %v12971_v14, %v12329_v60 }
 0x278   : > { %14096 = vst [vmem:[#allocation25_spill] sm:$0xff] %v13037_v56  ;;  %v1660_v34 = vpack.c.bf16 %v13039_v40, %v13037_v56 }
 0x279   : > { %14097 = vst [vmem:[#allocation26_spill] sm:$0xff] %v13039_v40  ;;  %2124 = vmatpush.bf16.msrb.mxu0 %v8781_v27  ;;  %2137 = vmatpush.bf16.msrb.mxu1 %v8785_v12  ;;  %v8790_v27 = vld [vmem:[#allocation2 + $0x78] sm:$0xf0]  ;;  %v8789_v12 = vor.u32 %v11127_v18, %v8788_v30 }
 0x27a   : > { %1636 = vst [vmem:[#allocation2 + $0x138] sm:$0xff] %v1628_v37 }
 0x27b   : > { %1668 = vst [vmem:[#allocation2 + $0x178] sm:$0xff] %v1660_v34  ;;  %v11119_v34 = vld [vmem:[#allocation2 + $0x3c] sm:$0xf] }
 0x27c   : > { %8934 = vmatmul.msk.bf16.vlgmr.msrb.gmra.mxu0 %vm892_vm0, %v12975_v21  ;;  %8935 = vmatmul.msk.bf16.vlgmr.msrb.gmra.mxu1 %vm892_vm0, %v12975_v21 }
 0x27d   : > { %v1606_v5 = vpop.f32.mrf.mxu2  ;;  %v1619_v39 = vpop.f32.mrf.mxu3 }
 0x27e   : > { %v8793_v5 = vor.u32 %v11119_v34, %v8790_v27 }
 0x281   : > { %v8916_v17 = vld [vmem:[#allocation2 + $0x138] sm:$0xf]  ;;  %v11151_v11 = vld [vmem:[#allocation2 + $0x13c] sm:$0xf] }
 0x282   : > { %v11159_v13 = vld [vmem:[#allocation2 + $0x174] sm:$0xf0]  ;;  %v8918_v37 = vld [vmem:[#allocation2 + $0x178] sm:$0xf0] }
 0x283   : > { %v8917_v10 = vor.u32 %v11159_v13, %v8916_v17  ;;  %v8921_v2 = vor.u32 %v11151_v11, %v8918_v37 }
 0x285   : > { %2148 = vmatpush.bf16.msrb.mxu2 %v8917_v10  ;;  %2161 = vmatpush.bf16.msrb.mxu3 %v8921_v2 }
 0x289   : > { %2149 = vmatpush.bf16.msrb.mxu2 %v8853_v43  ;;  %2162 = vmatpush.bf16.msrb.mxu3 %v8857_v3  ;;  %v8940_v43 = vld [vmem:[#allocation8 + $0x10] sm:$0xf]  ;;  %v11160_v3 = vld [vmem:[#allocation8 + $0x38] sm:$0xf0] }
 0x28a   : > { %v13065_v30 = vor.u32 %v11160_v3, %v8940_v43  ;;  %v2188_v43 = vpack.c.bf16 %v12979_v45, %v12388_v55 }
 0x28d   : > { %2150 = vmatpush.bf16.msrb.mxu2 %v8789_v12  ;;  %2163 = vmatpush.bf16.msrb.mxu3 %v8793_v5 }
 0x290   : > { %8936 = vmatmul.msk.bf16.vlgmr.msrb.gmra.mxu2 %vm892_vm0, %v12975_v21  ;;  %8937 = vmatmul.msk.bf16.vlgmr.msrb.gmra.mxu3 %vm892_vm0, %v12975_v21 }
 0x291   : > { %v1970_v39 = vpop.f32.mrf.mxu0  ;;  %v1983_v17 = vpop.f32.mrf.mxu1 }
 0x292   : > { %v13051_v11 = vmax.f32 %v1970_v39, 0.0  ;;  %v13053_v13 = vmax.f32 %v1983_v17, 0.0 }
 0x294   : > { %v2201_v37 = vpack.c.bf16 %v13051_v11, %v13051_v11  ;;  %v2202_v10 = vpack.c.bf16 %v13053_v13, %v13053_v13 }
 0x296   : > { %v2240_v2 = vsel %vm2238_vm2, %v2201_v37, 0  ;;  %v2243_v7 = vsel %vm2238_vm2, %v2202_v10, 0 }
 0x297   : > { %2292 = vmatpush.bf16.msra.mxu0 %v2240_v2  ;;  %2311 = vmatpush.bf16.msra.mxu1 %v2243_v7 }
 0x299   : > { %v1972_v21 = vpop.f32.mrf.mxu0  ;;  %v1985_v4 = vpop.f32.mrf.mxu1 }
 0x29b   : > { %2293 = vmatpush.bf16.msra.mxu0 %v2185_v29  ;;  %2312 = vmatpush.bf16.msra.mxu1 %v2186_v6  ;;  %v2187_v6 = vpack.c.bf16 %v12977_v62, %v12346_v23 }
 0x29f   : > { %2294 = vmatpush.bf16.msra.mxu0 %v12361_v31  ;;  %2313 = vmatpush.bf16.msra.mxu1 %v12400_v41 }
 0x2a2   : > { %8946 = vmatmul.msk.bf16.vlgmr.msra.gmra.mxu0 %vm2231_vm3, %v13065_v30  ;;  %8948 = vmatmul.msk.bf16.vlgmr.msra.gmra.mxu1 %vm2231_vm3, %v13065_v30 }
 0x2a4   : > { %v1996_v36 = vpop.f32.mrf.mxu2  ;;  %v2009_v18 = vpop.f32.mrf.mxu3 }
 0x2a5   : > { %v13073_v60 = vmax.f32 %v1996_v36, 0.0  ;;  %v13075_v34 = vmax.f32 %v2009_v18, 0.0  ;;  %v2189_v18 = vpack.c.bf16 %v12987_v9, %v12419_v22 }
 0x2a7   : > { %v2203_v27 = vpack.c.bf16 %v13073_v60, %v13073_v60  ;;  %v2204_v31 = vpack.c.bf16 %v13075_v34, %v13075_v34 }
 0x2a9   : > { %v2246_v17 = vsel %vm2238_vm2, %v2203_v27, 0  ;;  %v2249_v37 = vsel %vm2238_vm2, %v2204_v31, 0  ;;  %v2190_v27 = vpack.c.bf16 %v12989_v48, %v12479_v0  ;;  %v8944_v31 = vld [vmem:[#allocation8 + $0x68] sm:$0xf] }
 0x2aa   : > { %2330 = vmatpush.bf16.msra.mxu2 %v2246_v17  ;;  %2349 = vmatpush.bf16.msra.mxu3 %v2249_v37 }
 0x2ac   : > { %v1998_v7 = vpop.f32.mrf.mxu2  ;;  %v2011_v21 = vpop.f32.mrf.mxu3 }
 0x2ae   : > { %2331 = vmatpush.bf16.msra.mxu2 %v2187_v6  ;;  %2350 = vmatpush.bf16.msra.mxu3 %v2188_v43 }
 0x2af   : > { %v2022_v41 = vpop.f32.mrf.mxu0  ;;  %v2035_v12 = vpop.f32.mrf.mxu1 }
 0x2b0   : > { %v13081_v5 = vmax.f32 %v2022_v41, 0.0  ;;  %v13083_v39 = vmax.f32 %v2035_v12, 0.0  ;;  %v11161_v41 = vld [vmem:[#allocation8 + $0x90] sm:$0xf0] }
 0x2b1   : > { %v13101_v12 = vor.u32 %v11161_v41, %v8944_v31  ;;  %v2193_v31 = vpack.c.bf16 %v13007_v50, %v12643_v28  ;;  %v2194_v41 = vpack.c.bf16 %v13009_v35, %v12667_v59 }
 0x2b2   : > { %v2205_v10 = vpack.c.bf16 %v13081_v5, %v13081_v5  ;;  %v2206_v2 = vpack.c.bf16 %v13083_v39, %v13083_v39  ;;  %2332 = vmatpush.bf16.msra.mxu2 %v12406_v33  ;;  %2351 = vmatpush.bf16.msra.mxu3 %v12411_v58 }
 0x2b3   : > { %8947 = vmatmul.msk.bf16.gmra.mxu0 %vm2231_vm3, %v13101_v12  ;;  %8949 = vmatmul.msk.bf16.gmra.mxu1 %vm2231_vm3, %v13101_v12 }
 0x2b4   : > { %v2252_v4 = vsel %vm2238_vm2, %v2205_v10, 0  ;;  %v2255_v29 = vsel %vm2238_vm2, %v2206_v2, 0 }
 0x2b5   : > { %2368 = vmatpush.bf16.msrb.mxu0 %v2252_v4  ;;  %2387 = vmatpush.bf16.msrb.mxu1 %v2255_v29 }
 0x2b6   : > { %8950 = vmatmul.msk.bf16.vlgmr.msra.gmra.mxu2 %vm2231_vm3, %v13065_v30  ;;  %8952 = vmatmul.msk.bf16.vlgmr.msra.gmra.mxu3 %vm2231_vm3, %v13065_v30 }
 0x2b7   : > { %v2024_v3 = vpop.f32.mrf.mxu0  ;;  %v2037_v36 = vpop.f32.mrf.mxu1 }
 0x2b8   : > { %v2191_v3 = vpack.c.bf16 %v13001_v8, %v12504_v52  ;;  %v2192_v36 = vpack.c.bf16 %v13003_v20, %v12533_v44 }
 0x2b9   : > { %2369 = vmatpush.bf16.msrb.mxu0 %v2189_v18  ;;  %2388 = vmatpush.bf16.msrb.mxu1 %v2190_v27 }
 0x2bd   : > { %2370 = vmatpush.bf16.msrb.mxu0 %v12555_v46  ;;  %2389 = vmatpush.bf16.msrb.mxu1 %v12572_v32 }
 0x2c3   : > { %8954 = vmatmul.msk.bf16.vlgmr.msrb.gmra.mxu0 %vm2231_vm3, %v13065_v30  ;;  %8956 = vmatmul.msk.bf16.vlgmr.msrb.gmra.mxu1 %vm2231_vm3, %v13065_v30 }
 0x2c6   : > { %8951 = vmatmul.msk.bf16.gmra.mxu2 %vm2231_vm3, %v13101_v12  ;;  %8953 = vmatmul.msk.bf16.gmra.mxu3 %vm2231_vm3, %v13101_v12 }
 0x2c7   : > { %v2048_v23 = vpop.f32.mrf.mxu2 }
 0x2c8   : > { %v13123_v33 = vmax.f32 %v2048_v23, 0.0 }
 0x2c9   : > { %v2061_v55 = vpop.f32.mrf.mxu3 }
 0x2ca   : > { %14098 = vst [vmem:[#allocation27_spill] sm:$0xff] %v13123_v33  ;;  %v13125_v58 = vmax.f32 %v2061_v55, 0.0  ;;  %v2207_v22 = vpack.c.bf16 %v13123_v33, %v13123_v33 }
 0x2cc   : > { %14099 = vst [vmem:[#allocation28_spill] sm:$0xff] %v13125_v58  ;;  %v2208_v0 = vpack.c.bf16 %v13125_v58, %v13125_v58  ;;  %v2258_v10 = vsel %vm2238_vm2, %v2207_v22, 0  ;;  %v2195_v22 = vpack.c.bf16 %v13013_v38, %v12696_v26 }
 0x2cd   : > { %2406 = vmatpush.bf16.msrb.mxu2 %v2258_v10 }
 0x2ce   : > { %v2261_v2 = vsel %vm2238_vm2, %v2208_v0, 0  ;;  %v2196_v0 = vpack.c.bf16 %v13015_v25, %v12720_v1 }
 0x2cf   : > { %2425 = vmatpush.bf16.msrb.mxu3 %v2261_v2  ;;  %v2050_v4 = vpop.f32.mrf.mxu2 }
 0x2d1   : > { %v2063_v29 = vpop.f32.mrf.mxu3  ;;  %2407 = vmatpush.bf16.msrb.mxu2 %v2191_v3 }
 0x2d3   : > { %2426 = vmatpush.bf16.msrb.mxu3 %v2192_v36  ;;  %8955 = vmatmul.msk.bf16.gmra.mxu0 %vm2231_vm3, %v13101_v12 }
 0x2d4   : > { %8957 = vmatmul.msk.bf16.gmra.mxu1 %vm2231_vm3, %v13101_v12 }
 0x2d5   : > { %v2074_v46 = vpop.f32.mrf.mxu0  ;;  %v2087_v32 = vpop.f32.mrf.mxu1  ;;  %2408 = vmatpush.bf16.msrb.mxu2 %v12580_v53 }
 0x2d6   : > { %v13131_v17 = vmax.f32 %v2074_v46, 0.0  ;;  %v13133_v37 = vmax.f32 %v2087_v32, 0.0 }
 0x2d7   : > { %2427 = vmatpush.bf16.msrb.mxu3 %v12602_v47 }
 0x2d8   : > { %v2209_v7 = vpack.c.bf16 %v13131_v17, %v13131_v17  ;;  %v2210_v21 = vpack.c.bf16 %v13133_v37, %v13133_v37  ;;  %8958 = vmatmul.msk.bf16.vlgmr.msrb.gmra.mxu2 %vm2231_vm3, %v13065_v30 }
 0x2da   : > { %v2264_v6 = vsel %vm2238_vm2, %v2209_v7, 0  ;;  %v2267_v43 = vsel %vm2238_vm2, %v2210_v21, 0  ;;  %8960 = vmatmul.msk.bf16.vlgmr.msrb.gmra.mxu3 %vm2231_vm3, %v13065_v30 }
 0x2db   : > { %2444 = vmatpush.bf16.msra.mxu0 %v2264_v6  ;;  %2463 = vmatpush.bf16.msra.mxu1 %v2267_v43 }
 0x2dd   : > { %v2076_v18 = vpop.f32.mrf.mxu0  ;;  %v2089_v27 = vpop.f32.mrf.mxu1 }
 0x2de   : > { %v14106_v18 = vld [vmem:[#allocation15_spill] sm:$0xff] }
 0x2df   : > { %2445 = vmatpush.bf16.msra.mxu0 %v2193_v31  ;;  %2464 = vmatpush.bf16.msra.mxu1 %v2194_v41  ;;  %v2199_v27 = vpack.c.bf16 %v13037_v56, %v14106_v18  ;;  %v14107_v31 = vld [vmem:[#allocation16_spill] sm:$0xff] }
 0x2e0   : > { %v2200_v41 = vpack.c.bf16 %v13039_v40, %v14107_v31 }
 0x2e3   : > { %2446 = vmatpush.bf16.msra.mxu0 %v12741_v57  ;;  %2465 = vmatpush.bf16.msra.mxu1 %v12754_v24 }
 0x2e6   : > { %8962 = vmatmul.msk.bf16.vlgmr.msra.gmra.mxu0 %vm2231_vm3, %v13065_v30  ;;  %8964 = vmatmul.msk.bf16.vlgmr.msra.gmra.mxu1 %vm2231_vm3, %v13065_v30 }
 0x2e8   : > { %8959 = vmatmul.msk.bf16.gmra.mxu2 %vm2231_vm3, %v13101_v12 }
 0x2ea   : > { %8961 = vmatmul.msk.bf16.gmra.mxu3 %vm2231_vm3, %v13101_v12 }
 0x2ee   : > { %v2100_v52 = vpop.f32.mrf.mxu2  ;;  %v2113_v44 = vpop.f32.mrf.mxu3 }
 0x2ef   : > { %v13163_v28 = vmax.f32 %v2100_v52, 0.0  ;;  %v13165_v59 = vmax.f32 %v2113_v44, 0.0 }
 0x2f1   : > { %14100 = vst [vmem:[#allocation29_spill] sm:$0xff] %v13163_v28  ;;  %v2211_v53 = vpack.c.bf16 %v13163_v28, %v13163_v28  ;;  %v2212_v47 = vpack.c.bf16 %v13165_v59, %v13165_v59 }
 0x2f2   : > { %14101 = vst [vmem:[#allocation30_spill] sm:$0xff] %v13165_v59 }
 0x2f3   : > { %v2270_v57 = vsel %vm2238_vm2, %v2211_v53, 0  ;;  %v2273_v24 = vsel %vm2238_vm2, %v2212_v47, 0 }
 0x2f4   : > { %2482 = vmatpush.bf16.msra.mxu2 %v2270_v57  ;;  %2501 = vmatpush.bf16.msra.mxu3 %v2273_v24  ;;  %v14108_v57 = vld [vmem:[#allocation17_spill] sm:$0xff]  ;;  %v14109_v24 = vld [vmem:[#allocation18_spill] sm:$0xff] }
 0x2f6   : > { %v2102_v23 = vpop.f32.mrf.mxu2  ;;  %v2115_v55 = vpop.f32.mrf.mxu3  ;;  %8963 = vmatmul.msk.bf16.gmra.mxu0 %vm2231_vm3, %v13101_v12  ;;  %8965 = vmatmul.msk.bf16.gmra.mxu1 %vm2231_vm3, %v13101_v12 }
 0x2f8   : > { %2483 = vmatpush.bf16.msra.mxu2 %v2195_v22  ;;  %2502 = vmatpush.bf16.msra.mxu3 %v2196_v0 }
 0x2f9   : > { %v2126_v46 = vpop.f32.mrf.mxu0  ;;  %v2139_v32 = vpop.f32.mrf.mxu1 }
 0x2fa   : > { %v13185_v10 = vmax.f32 %v2126_v46, 0.0  ;;  %v13187_v2 = vmax.f32 %v2139_v32, 0.0 }
 0x2fc   : > { %14102 = vst [vmem:[#allocation31_spill] sm:$0xff] %v13185_v10  ;;  %2484 = vmatpush.bf16.msra.mxu2 %v12771_v51  ;;  %2503 = vmatpush.bf16.msra.mxu3 %v12793_v61  ;;  %v2213_v26 = vpack.c.bf16 %v13185_v10, %v13185_v10  ;;  %v2214_v1 = vpack.c.bf16 %v13187_v2, %v13187_v2 }
 0x2fd   : > { %14103 = vst [vmem:[#allocation32_spill] sm:$0xff] %v13187_v2  ;;  %v2197_v51 = vpack.c.bf16 %v13027_v54, %v12814_v42  ;;  %v2198_v61 = vpack.c.bf16 %v13029_v16, %v12849_v15 }
 0x2fe   : > { %v2276_v7 = vsel %vm2238_vm2, %v2213_v26, 0  ;;  %v2279_v21 = vsel %vm2238_vm2, %v2214_v1, 0 }
 0x2ff   : > { %2520 = vmatpush.bf16.msrb.mxu0 %v2276_v7  ;;  %2539 = vmatpush.bf16.msrb.mxu1 %v2279_v21 }
 0x300   : > { %8966 = vmatmul.msk.bf16.vlgmr.msra.gmra.mxu2 %vm2231_vm3, %v13065_v30  ;;  %8968 = vmatmul.msk.bf16.vlgmr.msra.gmra.mxu3 %vm2231_vm3, %v13065_v30 }
 0x301   : > { %v2128_v4 = vpop.f32.mrf.mxu0  ;;  %v2141_v29 = vpop.f32.mrf.mxu1 }
 0x303   : > { %2521 = vmatpush.bf16.msrb.mxu0 %v2197_v51  ;;  %2540 = vmatpush.bf16.msrb.mxu1 %v2198_v61 }
 0x307   : > { %2522 = vmatpush.bf16.msrb.mxu0 %v12909_v19  ;;  %2541 = vmatpush.bf16.msrb.mxu1 %v12915_v49 }
 0x30a   : > { %8970 = vmatmul.msk.bf16.vlgmr.msrb.gmra.mxu0 %vm2231_vm3, %v13065_v30  ;;  %8972 = vmatmul.msk.bf16.vlgmr.msrb.gmra.mxu1 %vm2231_vm3, %v13065_v30 }
 0x310   : > { %8967 = vmatmul.msk.bf16.gmra.mxu2 %vm2231_vm3, %v13101_v12  ;;  %8969 = vmatmul.msk.bf16.gmra.mxu3 %vm2231_vm3, %v13101_v12 }
 0x313   : > { %v2152_v42 = vpop.f32.mrf.mxu2  ;;  %v2165_v15 = vpop.f32.mrf.mxu3 }
 0x314   : > { %v13215_v6 = vmax.f32 %v2152_v42, 0.0  ;;  %v13217_v43 = vmax.f32 %v2165_v15, 0.0 }
 0x316   : > { %14104 = vst [vmem:[#allocation33_spill] sm:$0xff] %v13215_v6  ;;  %v2215_v19 = vpack.c.bf16 %v13215_v6, %v13215_v6  ;;  %v2216_v49 = vpack.c.bf16 %v13217_v43, %v13217_v43 }
 0x317   : > { %14105 = vst [vmem:[#allocation34_spill] sm:$0xff] %v13217_v43 }
 0x318   : > { %v2282_v3 = vsel %vm2238_vm2, %v2215_v19, 0  ;;  %v2285_v36 = vsel %vm2238_vm2, %v2216_v49, 0 }
 0x319   : > { %2558 = vmatpush.bf16.msrb.mxu2 %v2282_v3  ;;  %2577 = vmatpush.bf16.msrb.mxu3 %v2285_v36 }
 0x31a   : > { %8971 = vmatmul.msk.bf16.gmra.mxu0 %vm2231_vm3, %v13101_v12  ;;  %8973 = vmatmul.msk.bf16.gmra.mxu1 %vm2231_vm3, %v13101_v12 }
 0x31b   : > { %v2154_v52 = vpop.f32.mrf.mxu2  ;;  %v2167_v44 = vpop.f32.mrf.mxu3 }
 0x31d   : > { %2559 = vmatpush.bf16.msrb.mxu2 %v2199_v27  ;;  %2578 = vmatpush.bf16.msrb.mxu3 %v2200_v41 }
 0x31f   : > { %v2296_v53 = vpop.f32.mrf.mxu0  ;;  %v2315_v47 = vpop.f32.mrf.mxu1 }
 0x320   : > { %v2623_v23 = vmax.f32 %v2296_v53, 0.0  ;;  %v2591_v55 = vpack.c.bf16 %v2315_v47, %v2296_v53  ;;  %v2624_v22 = vmax.f32 %v2315_v47, 0.0 }
 0x321   : > { %2560 = vmatpush.bf16.msrb.mxu2 %v14108_v57  ;;  %2579 = vmatpush.bf16.msrb.mxu3 %v14109_v24 }
 0x322   : > { %2607 = vst [vmem:[#allocation2] sm:$0xff] %v2591_v55  ;;  %v2655_v0 = vpack.c.bf16 %v2624_v22, %v2623_v23 }
 0x324   : > { %2671 = vst [vmem:[#allocation2 + $0x80] sm:$0xff] %v2655_v0  ;;  %8974 = vmatmul.msk.bf16.vlgmr.msrb.gmra.mxu2 %vm2231_vm3, %v13065_v30  ;;  %8976 = vmatmul.msk.bf16.vlgmr.msrb.gmra.mxu3 %vm2231_vm3, %v13065_v30 }
 0x327   : > { %v2298_v46 = vpop.f32.mrf.mxu0  ;;  %v2317_v32 = vpop.f32.mrf.mxu1 }
 0x328   : > { %v2639_v26 = vmax.f32 %v2298_v46, 0.0  ;;  %v2599_v1 = vpack.c.bf16 %v2317_v32, %v2298_v46  ;;  %v2640_v7 = vmax.f32 %v2317_v32, 0.0 }
 0x32a   : > { %2615 = vst [vmem:[#allocation2 + $0x40] sm:$0xff] %v2599_v1  ;;  %v2663_v21 = vpack.c.bf16 %v2640_v7, %v2639_v26 }
 0x32c   : > { %2679 = vst [vmem:[#allocation2 + $0xc0] sm:$0xff] %v2663_v21 }
 0x330   : > { %v2301_v51 = vpop.f32.mrf.mxu0  ;;  %v2320_v61 = vpop.f32.mrf.mxu1 }
 0x331   : > { %v2719_v4 = vmax.f32 %v2301_v51, 0.0  ;;  %v2687_v29 = vpack.c.bf16 %v2320_v61, %v2301_v51  ;;  %v2720_v42 = vmax.f32 %v2320_v61, 0.0 }
 0x333   : > { %2703 = vst [vmem:[#allocation2 + $0x100] sm:$0xff] %v2687_v29  ;;  %v2751_v15 = vpack.c.bf16 %v2720_v42, %v2719_v4 }
 0x334   : > { %8975 = vmatmul.msk.bf16.gmra.mxu2 %vm2231_vm3, %v13101_v12  ;;  %8977 = vmatmul.msk.bf16.gmra.mxu3 %vm2231_vm3, %v13101_v12 }
 0x335   : > { %2767 = vst [vmem:[#allocation2 + $0x180] sm:$0xff] %v2751_v15 }
 0x338   : > { %v2303_v19 = vpop.f32.mrf.mxu0  ;;  %v2322_v49 = vpop.f32.mrf.mxu1 }
 0x339   : > { %v2735_v30 = vmax.f32 %v2303_v19, 0.0  ;;  %v2695_v3 = vpack.c.bf16 %v2322_v49, %v2303_v19  ;;  %v2736_v36 = vmax.f32 %v2322_v49, 0.0  ;;  %v2334_v18 = vpop.f32.mrf.mxu2  ;;  %v2353_v27 = vpop.f32.mrf.mxu3 }
 0x33a   : > { %v2625_v31 = vmax.f32 %v2334_v18, 0.0  ;;  %v2592_v41 = vpack.c.bf16 %v2353_v27, %v2334_v18  ;;  %v2626_v52 = vmax.f32 %v2353_v27, 0.0  ;;  %v9112_v7 = vld [vmem:[#allocation2 + $0x100] sm:$0xf]  ;;  %v11195_v21 = vld [vmem:[#allocation2 + $0x104] sm:$0xf] }
 0x33b   : > { %2711 = vst [vmem:[#allocation2 + $0x140] sm:$0xff] %v2695_v3  ;;  %v2759_v12 = vpack.c.bf16 %v2736_v36, %v2735_v30  ;;  %v9048_v36 = vld [vmem:[#allocation2 + $0x80] sm:$0xf] }
 0x33c   : > { %2608 = vst [vmem:[#allocation2 + $0x8] sm:$0xff] %v2592_v41  ;;  %v2656_v44 = vpack.c.bf16 %v2626_v52, %v2625_v31  ;;  %v9176_v26 = vld [vmem:[#allocation2 + $0x180] sm:$0xf]  ;;  %v11211_v1 = vld [vmem:[#allocation2 + $0x184] sm:$0xf] }
 0x33d   : > { %2775 = vst [vmem:[#allocation2 + $0x1c0] sm:$0xff] %v2759_v12  ;;  %v11187_v31 = vld [vmem:[#allocation2 + $0xbc] sm:$0xf0]  ;;  %v11179_v41 = vld [vmem:[#allocation2 + $0x84] sm:$0xf] }
 0x33e   : > { %2672 = vst [vmem:[#allocation2 + $0x88] sm:$0xff] %v2656_v44  ;;  %v9050_v52 = vld [vmem:[#allocation2 + $0xc0] sm:$0xf0] }
 0x340   : > { %v2372_v53 = vpop.f32.mrf.mxu0  ;;  %v2391_v47 = vpop.f32.mrf.mxu1 }
 0x341   : > { %v2336_v57 = vpop.f32.mrf.mxu2  ;;  %v2355_v24 = vpop.f32.mrf.mxu3  ;;  %v2627_v23 = vmax.f32 %v2372_v53, 0.0  ;;  %v2593_v55 = vpack.c.bf16 %v2391_v47, %v2372_v53  ;;  %v2628_v22 = vmax.f32 %v2391_v47, 0.0 }
 0x342   : > { %v2641_v0 = vmax.f32 %v2336_v57, 0.0  ;;  %v2600_v46 = vpack.c.bf16 %v2355_v24, %v2336_v57  ;;  %v2642_v32 = vmax.f32 %v2355_v24, 0.0  ;;  %v11203_v61 = vld [vmem:[#allocation2 + $0x13c] sm:$0xf0]  ;;  %v9114_v4 = vld [vmem:[#allocation2 + $0x140] sm:$0xf0] }
 0x343   : > { %2609 = vst [vmem:[#allocation2 + $0x10] sm:$0xff] %v2593_v55  ;;  %v2657_v51 = vpack.c.bf16 %v2628_v22, %v2627_v23  ;;  %v9113_v30 = vor.u32 %v11203_v61, %v9112_v7  ;;  %v9117_v3 = vor.u32 %v11195_v21, %v9114_v4  ;;  %v11163_v7 = vld [vmem:[#allocation2 + $0x4] sm:$0xf]  ;;  %v8980_v4 = vld [vmem:[#allocation8 + $0x14] sm:$0xf] }
 0x344   : > { %2616 = vst [vmem:[#allocation2 + $0x48] sm:$0xff] %v2600_v46  ;;  %v2664_v29 = vpack.c.bf16 %v2642_v32, %v2641_v0  ;;  %v11219_v42 = vld [vmem:[#allocation2 + $0x1bc] sm:$0xf0]  ;;  %v9178_v15 = vld [vmem:[#allocation2 + $0x1c0] sm:$0xf0]  ;;  %v9049_v0 = vor.u32 %v11187_v31, %v9048_v36  ;;  %v9053_v46 = vor.u32 %v11179_v41, %v9050_v52 }
 0x345   : > { %2673 = vst [vmem:[#allocation2 + $0x90] sm:$0xff] %v2657_v51  ;;  %v9177_v19 = vor.u32 %v11219_v42, %v9176_v26  ;;  %v9181_v49 = vor.u32 %v11211_v1, %v9178_v15  ;;  %v8984_v32 = vld [vmem:[#allocation2] sm:$0xf]  ;;  %v8986_v21 = vld [vmem:[#allocation2 + $0x40] sm:$0xf0] }
 0x346   : > { %2680 = vst [vmem:[#allocation2 + $0xc8] sm:$0xff] %v2664_v29  ;;  %v11171_v26 = vld [vmem:[#allocation2 + $0x3c] sm:$0xf0]  ;;  %v8989_v61 = vor.u32 %v11163_v7, %v8986_v21 }
 0x347   : > { %3182 = vmatpush.bf16.msra.mxu0 %v9177_v19  ;;  %3196 = vmatpush.bf16.msra.mxu1 %v9181_v49  ;;  %v8985_v51 = vor.u32 %v11171_v26, %v8984_v32  ;;  %v11162_v29 = vld [vmem:[#allocation8 + $0x3c] sm:$0xf0] }
 0x348   : > { %v2374_v18 = vpop.f32.mrf.mxu0  ;;  %v2393_v27 = vpop.f32.mrf.mxu1 }
 0x349   : > { %v2339_v12 = vpop.f32.mrf.mxu2  ;;  %v2358_v44 = vpop.f32.mrf.mxu3  ;;  %v2643_v53 = vmax.f32 %v2374_v18, 0.0  ;;  %v2601_v47 = vpack.c.bf16 %v2393_v27, %v2374_v18  ;;  %v2644_v57 = vmax.f32 %v2393_v27, 0.0  ;;  %v13247_v18 = vor.u32 %v11162_v29, %v8980_v4 }
 0x34a   : > { %v2721_v24 = vmax.f32 %v2339_v12, 0.0  ;;  %v2688_v23 = vpack.c.bf16 %v2358_v44, %v2339_v12  ;;  %v2722_v55 = vmax.f32 %v2358_v44, 0.0 }
 0x34b   : > { %2617 = vst [vmem:[#allocation2 + $0x50] sm:$0xff] %v2601_v47  ;;  %v2665_v22 = vpack.c.bf16 %v2644_v57, %v2643_v53  ;;  %3183 = vmatpush.bf16.msra.mxu0 %v9113_v30  ;;  %3197 = vmatpush.bf16.msra.mxu1 %v9117_v3 }
 0x34c   : > { %2704 = vst [vmem:[#allocation2 + $0x108] sm:$0xff] %v2688_v23  ;;  %v2752_v1 = vpack.c.bf16 %v2722_v55, %v2721_v24 }
 0x34d   : > { %2681 = vst [vmem:[#allocation2 + $0xd0] sm:$0xff] %v2665_v22 }
 0x34e   : > { %2768 = vst [vmem:[#allocation2 + $0x188] sm:$0xff] %v2752_v1 }
 0x34f   : > { %3184 = vmatpush.bf16.msra.mxu0 %v9049_v0  ;;  %3198 = vmatpush.bf16.msra.mxu1 %v9053_v46 }
 0x350   : > { %v2377_v3 = vpop.f32.mrf.mxu0 }
 0x351   : > { %v2341_v42 = vpop.f32.mrf.mxu2  ;;  %v2360_v15 = vpop.f32.mrf.mxu3  ;;  %v2723_v27 = vmax.f32 %v2377_v3, 0.0 }
 0x352   : > { %v2737_v19 = vmax.f32 %v2341_v42, 0.0  ;;  %v2696_v49 = vpack.c.bf16 %v2360_v15, %v2341_v42  ;;  %v2738_v30 = vmax.f32 %v2360_v15, 0.0  ;;  %v2396_v36 = vpop.f32.mrf.mxu1  ;;  %v11238_v38 = vld [vmem:[#allocation2 + $0x4c] sm:$0xf0] }
 0x353   : > { %v2689_v31 = vpack.c.bf16 %v2396_v36, %v2377_v3  ;;  %v2724_v41 = vmax.f32 %v2396_v36, 0.0  ;;  %3185 = vmatpush.bf16.msra.mxu0 %v8985_v51  ;;  %3199 = vmatpush.bf16.msra.mxu1 %v8989_v61  ;;  %v9120_v15 = vld [vmem:[#allocation2 + $0x108] sm:$0xf] }
 0x354   : > { %2712 = vst [vmem:[#allocation2 + $0x148] sm:$0xff] %v2696_v49  ;;  %v2760_v52 = vpack.c.bf16 %v2738_v30, %v2737_v19  ;;  %v11196_v19 = vld [vmem:[#allocation2 + $0x10c] sm:$0xf] }
 0x355   : > { %2705 = vst [vmem:[#allocation2 + $0x110] sm:$0xff] %v2689_v31  ;;  %v2753_v12 = vpack.c.bf16 %v2724_v41, %v2723_v27  ;;  %v9184_v23 = vld [vmem:[#allocation2 + $0x188] sm:$0xf]  ;;  %v11212_v55 = vld [vmem:[#allocation2 + $0x18c] sm:$0xf] }
 0x356   : > { %2776 = vst [vmem:[#allocation2 + $0x1c8] sm:$0xff] %v2760_v52  ;;  %9238 = vmatmul.msk.bf16.vlgmr.msra.gmra.mxu0 %vm3174_vm4, %v13247_v18  ;;  %9239 = vmatmul.msk.bf16.vlgmr.msra.gmra.mxu1 %vm3174_vm4, %v13247_v18  ;;  %v11188_v27 = vld [vmem:[#allocation2 + $0xc4] sm:$0xf0] }
 0x357   : > { %2769 = vst [vmem:[#allocation2 + $0x190] sm:$0xff] %v2753_v12  ;;  %v9056_v12 = vld [vmem:[#allocation2 + $0x88] sm:$0xf] }
 0x358   : > { %v2379_v44 = vpop.f32.mrf.mxu0 }
 0x359   : > { %v2739_v47 = vmax.f32 %v2379_v44, 0.0 }
 0x35a   : > { %v2398_v53 = vpop.f32.mrf.mxu1 }
 0x35b   : > { %v2697_v57 = vpack.c.bf16 %v2398_v53, %v2379_v44  ;;  %v2740_v24 = vmax.f32 %v2398_v53, 0.0  ;;  %v2410_v32 = vpop.f32.mrf.mxu2  ;;  %v11204_v21 = vld [vmem:[#allocation2 + $0x144] sm:$0xf0]  ;;  %v9122_v29 = vld [vmem:[#allocation2 + $0x148] sm:$0xf0] }
 0x35c   : > { %v2629_v51 = vmax.f32 %v2410_v32, 0.0  ;;  %v9121_v3 = vor.u32 %v11204_v21, %v9120_v15  ;;  %v9125_v36 = vor.u32 %v11196_v19, %v9122_v29  ;;  %v9058_v44 = vld [vmem:[#allocation2 + $0xc8] sm:$0xf0] }
 0x35d   : > { %2713 = vst [vmem:[#allocation2 + $0x150] sm:$0xff] %v2697_v57  ;;  %v2761_v22 = vpack.c.bf16 %v2740_v24, %v2739_v47  ;;  %v11220_v0 = vld [vmem:[#allocation2 + $0x1c4] sm:$0xf0]  ;;  %v9186_v46 = vld [vmem:[#allocation2 + $0x1c8] sm:$0xf0]  ;;  %v2429_v26 = vpop.f32.mrf.mxu3 }
 0x35e   : > { %v9185_v1 = vor.u32 %v11220_v0, %v9184_v23  ;;  %v9189_v7 = vor.u32 %v11212_v55, %v9186_v46  ;;  %v2594_v61 = vpack.c.bf16 %v2429_v26, %v2410_v32  ;;  %v2630_v4 = vmax.f32 %v2429_v26, 0.0  ;;  %v11180_v53 = vld [vmem:[#allocation2 + $0x8c] sm:$0xf]  ;;  %v9192_v47 = vld [vmem:[#allocation2 + $0x190] sm:$0xf] }
 0x35f   : > { %2777 = vst [vmem:[#allocation2 + $0x1d0] sm:$0xff] %v2761_v22  ;;  %v9128_v57 = vld [vmem:[#allocation2 + $0x110] sm:$0xf]  ;;  %v11213_v23 = vld [vmem:[#allocation2 + $0x194] sm:$0xf]  ;;  %v9057_v26 = vor.u32 %v11188_v27, %v9056_v12 }
 0x360   : > { %3210 = vmatpush.bf16.msra.mxu2 %v9185_v1  ;;  %3224 = vmatpush.bf16.msra.mxu3 %v9189_v7  ;;  %2610 = vst [vmem:[#allocation2 + $0x18] sm:$0xff] %v2594_v61  ;;  %v2658_v42 = vpack.c.bf16 %v2630_v4, %v2629_v51  ;;  %v11172_v55 = vld [vmem:[#allocation2 + $0x44] sm:$0xf0]  ;;  %v8994_v22 = vld [vmem:[#allocation2 + $0x48] sm:$0xf0]  ;;  %v9061_v1 = vor.u32 %v11180_v53, %v9058_v44 }
 0x361   : > { %v11197_v0 = vld [vmem:[#allocation2 + $0x114] sm:$0xf]  ;;  %v9064_v44 = vld [vmem:[#allocation2 + $0x90] sm:$0xf] }
 0x362   : > { %2674 = vst [vmem:[#allocation2 + $0x98] sm:$0xff] %v2658_v42  ;;  %v11189_v53 = vld [vmem:[#allocation2 + $0xcc] sm:$0xf0] }
 0x363   : > { %v2448_v49 = vpop.f32.mrf.mxu0  ;;  %v2467_v30 = vpop.f32.mrf.mxu1  ;;  %v9468_v56 = vld [vmem:[#allocation2 + $0x190] sm:$0xf] }
 0x364   : > { %v2631_v31 = vmax.f32 %v2448_v49, 0.0  ;;  %v2595_v41 = vpack.c.bf16 %v2467_v30, %v2448_v49  ;;  %v2632_v52 = vmax.f32 %v2467_v30, 0.0  ;;  %3211 = vmatpush.bf16.msra.mxu2 %v9121_v3  ;;  %3225 = vmatpush.bf16.msra.mxu3 %v9125_v36  ;;  %v2412_v46 = vpop.f32.mrf.mxu2  ;;  %v11205_v51 = vld [vmem:[#allocation2 + $0x14c] sm:$0xf0]  ;;  %v9130_v15 = vld [vmem:[#allocation2 + $0x150] sm:$0xf0] }
 0x365   : > { %v2431_v32 = vpop.f32.mrf.mxu3  ;;  %v2645_v61 = vmax.f32 %v2412_v46, 0.0  ;;  %v8992_v30 = vld [vmem:[#allocation2 + $0x8] sm:$0xf]  ;;  %v11164_v3 = vld [vmem:[#allocation2 + $0xc] sm:$0xf]  ;;  %v9129_v36 = vor.u32 %v11205_v51, %v9128_v57  ;;  %v9133_v12 = vor.u32 %v11197_v0, %v9130_v15  ;;  %v9065_v57 = vor.u32 %v11189_v53, %v9064_v44 }
 0x366   : > { %2611 = vst [vmem:[#allocation2 + $0x20] sm:$0xff] %v2595_v41  ;;  %v2659_v24 = vpack.c.bf16 %v2632_v52, %v2631_v31  ;;  %v11221_v7 = vld [vmem:[#allocation2 + $0x1cc] sm:$0xf0]  ;;  %v9194_v21 = vld [vmem:[#allocation2 + $0x1d0] sm:$0xf0]  ;;  %v2602_v4 = vpack.c.bf16 %v2431_v32, %v2412_v46  ;;  %v2646_v29 = vmax.f32 %v2431_v32, 0.0  ;;  %v8993_v41 = vor.u32 %v11172_v55, %v8992_v30 }
 0x367   : > { %v9193_v42 = vor.u32 %v11221_v7, %v9192_v47  ;;  %v9197_v19 = vor.u32 %v11213_v23, %v9194_v21  ;;  %v8997_v52 = vor.u32 %v11164_v3, %v8994_v22  ;;  %v9066_v23 = vld [vmem:[#allocation2 + $0xd0] sm:$0xf0]  ;;  %v9000_v7 = vld [vmem:[#allocation2 + $0x10] sm:$0xf] }
 0x368   : > { %2675 = vst [vmem:[#allocation2 + $0xa0] sm:$0xff] %v2659_v24  ;;  %3212 = vmatpush.bf16.msra.mxu2 %v9057_v26  ;;  %3226 = vmatpush.bf16.msra.mxu3 %v9061_v1  ;;  %v2666_v49 = vpack.c.bf16 %v2646_v29, %v2645_v61  ;;  %v11181_v24 = vld [vmem:[#allocation2 + $0x94] sm:$0xf]  ;;  %v11173_v55 = vld [vmem:[#allocation2 + $0x4c] sm:$0xf0] }
 0x369   : > { %2618 = vst [vmem:[#allocation2 + $0x58] sm:$0xff] %v2602_v4  ;;  %3238 = vmatpush.bf16.msrb.mxu0 %v9193_v42  ;;  %3252 = vmatpush.bf16.msrb.mxu1 %v9197_v19  ;;  %v9069_v1 = vor.u32 %v11181_v24, %v9066_v23  ;;  %v11165_v21 = vld [vmem:[#allocation2 + $0x14] sm:$0xf]  ;;  %v9001_v42 = vor.u32 %v11173_v55, %v9000_v7  ;;  %v11286_v28 = vld [vmem:[#allocation2 + $0x1cc] sm:$0xf0] }
 0x36a   : > { %2682 = vst [vmem:[#allocation2 + $0xd8] sm:$0xff] %v2666_v49  ;;  %v9002_v51 = vld [vmem:[#allocation2 + $0x50] sm:$0xf0] }
 0x36b   : > { %v2450_v27 = vpop.f32.mrf.mxu0  ;;  %v2469_v31 = vpop.f32.mrf.mxu1  ;;  %v9005_v30 = vor.u32 %v11165_v21, %v9002_v51 }
 0x36c   : > { %v2647_v47 = vmax.f32 %v2450_v27, 0.0  ;;  %v2603_v46 = vpack.c.bf16 %v2469_v31, %v2450_v27  ;;  %v2648_v32 = vmax.f32 %v2469_v31, 0.0  ;;  %3213 = vmatpush.bf16.msra.mxu2 %v8993_v41  ;;  %3227 = vmatpush.bf16.msra.mxu3 %v8997_v52  ;;  %v2415_v22 = vpop.f32.mrf.mxu2 }
 0x36d   : > { %3239 = vmatpush.bf16.msrb.mxu0 %v9129_v36  ;;  %3253 = vmatpush.bf16.msrb.mxu1 %v9133_v12  ;;  %v2434_v0 = vpop.f32.mrf.mxu3  ;;  %v2725_v61 = vmax.f32 %v2415_v22, 0.0 }
 0x36e   : > { %2619 = vst [vmem:[#allocation2 + $0x60] sm:$0xff] %v2603_v46  ;;  %v2667_v26 = vpack.c.bf16 %v2648_v32, %v2647_v47  ;;  %v2690_v4 = vpack.c.bf16 %v2434_v0, %v2415_v22  ;;  %v2726_v29 = vmax.f32 %v2434_v0, 0.0 }
 0x36f   : > { %9240 = vmatmul.msk.bf16.vlgmr.msra.gmra.mxu2 %vm3174_vm4, %v13247_v18  ;;  %9241 = vmatmul.msk.bf16.vlgmr.msra.gmra.mxu3 %vm3174_vm4, %v13247_v18 }
 0x370   : > { %2683 = vst [vmem:[#allocation2 + $0xe0] sm:$0xff] %v2667_v26  ;;  %v2754_v15 = vpack.c.bf16 %v2726_v29, %v2725_v61 }
 0x371   : > { %3240 = vmatpush.bf16.msrb.mxu0 %v9065_v57  ;;  %2706 = vst [vmem:[#allocation2 + $0x118] sm:$0xff] %v2690_v4  ;;  %3254 = vmatpush.bf16.msrb.mxu1 %v9069_v1 }
 0x372   : > { %2770 = vst [vmem:[#allocation2 + $0x198] sm:$0xff] %v2754_v15 }
 0x373   : > { %v2453_v19 = vpop.f32.mrf.mxu0  ;;  %v2472_v49 = vpop.f32.mrf.mxu1 }
 0x374   : > { %v2727_v3 = vmax.f32 %v2453_v19, 0.0  ;;  %v2691_v36 = vpack.c.bf16 %v2472_v49, %v2453_v19  ;;  %v2728_v27 = vmax.f32 %v2472_v49, 0.0  ;;  %v2417_v41 = vpop.f32.mrf.mxu2 }
 0x375   : > { %3241 = vmatpush.bf16.msrb.mxu0 %v9001_v42  ;;  %3255 = vmatpush.bf16.msrb.mxu1 %v9005_v30  ;;  %v2436_v52 = vpop.f32.mrf.mxu3  ;;  %v2741_v12 = vmax.f32 %v2417_v41, 0.0 }
 0x376   : > { %2707 = vst [vmem:[#allocation2 + $0x120] sm:$0xff] %v2691_v36  ;;  %v2755_v31 = vpack.c.bf16 %v2728_v27, %v2727_v3  ;;  %v2698_v44 = vpack.c.bf16 %v2436_v52, %v2417_v41  ;;  %v2742_v53 = vmax.f32 %v2436_v52, 0.0 }
 0x378   : > { %2771 = vst [vmem:[#allocation2 + $0x1a0] sm:$0xff] %v2755_v31  ;;  %9242 = vmatmul.msk.bf16.vlgmr.msrb.gmra.mxu0 %vm3174_vm4, %v13247_v18  ;;  %9243 = vmatmul.msk.bf16.vlgmr.msrb.gmra.mxu1 %vm3174_vm4, %v13247_v18  ;;  %v2762_v24 = vpack.c.bf16 %v2742_v53, %v2741_v12  ;;  %v9136_v61 = vld [vmem:[#allocation2 + $0x118] sm:$0xf]  ;;  %v11198_v15 = vld [vmem:[#allocation2 + $0x11c] sm:$0xf] }
 0x379   : > { %2714 = vst [vmem:[#allocation2 + $0x158] sm:$0xff] %v2698_v44  ;;  %v9200_v21 = vld [vmem:[#allocation2 + $0x198] sm:$0xf]  ;;  %v11214_v51 = vld [vmem:[#allocation2 + $0x19c] sm:$0xf] }
 0x37a   : > { %2778 = vst [vmem:[#allocation2 + $0x1d8] sm:$0xff] %v2762_v24  ;;  %v9476_v20 = vld [vmem:[#allocation2 + $0x198] sm:$0xf] }
 0x37b   : > { %v2455_v47 = vpop.f32.mrf.mxu0  ;;  %v2474_v46 = vpop.f32.mrf.mxu1 }
 0x37c   : > { %v2743_v32 = vmax.f32 %v2455_v47, 0.0  ;;  %v2699_v23 = vpack.c.bf16 %v2474_v46, %v2455_v47  ;;  %v2744_v26 = vmax.f32 %v2474_v46, 0.0  ;;  %v9072_v47 = vld [vmem:[#allocation2 + $0x98] sm:$0xf] }
 0x37d   : > { %v9144_v31 = vld [vmem:[#allocation2 + $0x120] sm:$0xf]  ;;  %v11199_v24 = vld [vmem:[#allocation2 + $0x124] sm:$0xf] }
 0x37e   : > { %2715 = vst [vmem:[#allocation2 + $0x160] sm:$0xff] %v2699_v23  ;;  %v2763_v57 = vpack.c.bf16 %v2744_v26, %v2743_v32 }
 0x37f   : > { %v9208_v44 = vld [vmem:[#allocation2 + $0x1a0] sm:$0xf]  ;;  %v11215_v53 = vld [vmem:[#allocation2 + $0x1a4] sm:$0xf] }
 0x380   : > { %2779 = vst [vmem:[#allocation2 + $0x1e0] sm:$0xff] %v2763_v57  ;;  %v11206_v42 = vld [vmem:[#allocation2 + $0x154] sm:$0xf0]  ;;  %v9138_v19 = vld [vmem:[#allocation2 + $0x158] sm:$0xf0] }
 0x381   : > { %v11222_v30 = vld [vmem:[#allocation2 + $0x1d4] sm:$0xf0]  ;;  %v9202_v3 = vld [vmem:[#allocation2 + $0x1d8] sm:$0xf0]  ;;  %v9137_v26 = vor.u32 %v11206_v42, %v9136_v61  ;;  %v9141_v57 = vor.u32 %v11198_v15, %v9138_v19  ;;  %v9484_v33 = vld [vmem:[#allocation2 + $0x1a0] sm:$0xf] }
 0x382   : > { %v9201_v41 = vor.u32 %v11222_v30, %v9200_v21  ;;  %v9205_v52 = vor.u32 %v11214_v51, %v9202_v3 }
 0x383   : > { %v2486_v1 = vpop.f32.mrf.mxu2  ;;  %v2505_v7 = vpop.f32.mrf.mxu3 }
 0x384   : > { %v2633_v55 = vmax.f32 %v2486_v1, 0.0  ;;  %v2596_v22 = vpack.c.bf16 %v2505_v7, %v2486_v1  ;;  %v2634_v0 = vmax.f32 %v2505_v7, 0.0  ;;  %3266 = vmatpush.bf16.msrb.mxu2 %v9201_v41  ;;  %3280 = vmatpush.bf16.msrb.mxu3 %v9205_v52  ;;  %v11191_v41 = vld [vmem:[#allocation2 + $0xdc] sm:$0xf0]  ;;  %v11183_v52 = vld [vmem:[#allocation2 + $0xa4] sm:$0xf] }
 0x385   : > { %v11207_v46 = vld [vmem:[#allocation2 + $0x15c] sm:$0xf0]  ;;  %v9146_v32 = vld [vmem:[#allocation2 + $0x160] sm:$0xf0] }
 0x386   : > { %2612 = vst [vmem:[#allocation2 + $0x28] sm:$0xff] %v2596_v22  ;;  %v2660_v49 = vpack.c.bf16 %v2634_v0, %v2633_v55  ;;  %v11190_v55 = vld [vmem:[#allocation2 + $0xd4] sm:$0xf0]  ;;  %v11182_v22 = vld [vmem:[#allocation2 + $0x9c] sm:$0xf] }
 0x387   : > { %v2524_v4 = vpop.f32.mrf.mxu0  ;;  %v2543_v29 = vpop.f32.mrf.mxu1  ;;  %v11223_v1 = vld [vmem:[#allocation2 + $0x1dc] sm:$0xf0]  ;;  %v9210_v7 = vld [vmem:[#allocation2 + $0x1e0] sm:$0xf0]  ;;  %v9074_v0 = vld [vmem:[#allocation2 + $0xd8] sm:$0xf0]  ;;  %v9073_v61 = vor.u32 %v11190_v55, %v9072_v47 }
 0x388   : > { %v2635_v36 = vmax.f32 %v2524_v4, 0.0  ;;  %v2597_v27 = vpack.c.bf16 %v2543_v29, %v2524_v4  ;;  %v2636_v12 = vmax.f32 %v2543_v29, 0.0  ;;  %2676 = vst [vmem:[#allocation2 + $0xa8] sm:$0xff] %v2660_v49  ;;  %v9209_v21 = vor.u32 %v11223_v1, %v9208_v44  ;;  %3267 = vmatpush.bf16.msrb.mxu2 %v9137_v26  ;;  %3281 = vmatpush.bf16.msrb.mxu3 %v9141_v57  ;;  %v11174_v1 = vld [vmem:[#allocation2 + $0x54] sm:$0xf0] }
 0x389   : > { %v9213_v51 = vor.u32 %v11215_v53, %v9210_v7  ;;  %v9145_v49 = vor.u32 %v11207_v46, %v9144_v31  ;;  %v9077_v42 = vor.u32 %v11182_v22, %v9074_v0  ;;  %v9016_v57 = vld [vmem:[#allocation2 + $0x20] sm:$0xf]  ;;  %v9018_v22 = vld [vmem:[#allocation2 + $0x60] sm:$0xf0] }
 0x38a   : > { %2613 = vst [vmem:[#allocation2 + $0x30] sm:$0xff] %v2597_v27  ;;  %v2661_v23 = vpack.c.bf16 %v2636_v12, %v2635_v36  ;;  %3294 = vmatpush.bf16.msra.mxu0 %v9209_v21  ;;  %v9149_v27 = vor.u32 %v11199_v24, %v9146_v32  ;;  %v9080_v36 = vld [vmem:[#allocation2 + $0xa0] sm:$0xf]  ;;  %v9082_v12 = vld [vmem:[#allocation2 + $0xe0] sm:$0xf0] }
 0x38b   : > { %v2488_v4 = vpop.f32.mrf.mxu2  ;;  %v2507_v29 = vpop.f32.mrf.mxu3  ;;  %3308 = vmatpush.bf16.msra.mxu1 %v9213_v51  ;;  %v11166_v24 = vld [vmem:[#allocation2 + $0x1c] sm:$0xf]  ;;  %v9081_v47 = vor.u32 %v11191_v41, %v9080_v36  ;;  %v9085_v26 = vor.u32 %v11183_v52, %v9082_v12  ;;  %v11175_v55 = vld [vmem:[#allocation2 + $0x5c] sm:$0xf0] }
 0x38c   : > { %2677 = vst [vmem:[#allocation2 + $0xb0] sm:$0xff] %v2661_v23  ;;  %v2649_v30 = vmax.f32 %v2488_v4, 0.0  ;;  %v2604_v3 = vpack.c.bf16 %v2507_v29, %v2488_v4  ;;  %v2650_v43 = vmax.f32 %v2507_v29, 0.0  ;;  %v9008_v23 = vld [vmem:[#allocation2 + $0x18] sm:$0xf]  ;;  %3268 = vmatpush.bf16.msrb.mxu2 %v9073_v61  ;;  %3282 = vmatpush.bf16.msrb.mxu3 %v9077_v42  ;;  %v9017_v36 = vor.u32 %v11175_v55, %v9016_v57 }
 0x38d   : > { %v9010_v32 = vld [vmem:[#allocation2 + $0x58] sm:$0xf0]  ;;  %v9009_v51 = vor.u32 %v11174_v1, %v9008_v23  ;;  %v11288_v8 = vld [vmem:[#allocation2 + $0x1dc] sm:$0xf0] }
 0x38e   : > { %2620 = vst [vmem:[#allocation2 + $0x68] sm:$0xff] %v2604_v3  ;;  %v2668_v44 = vpack.c.bf16 %v2650_v43, %v2649_v30  ;;  %3295 = vmatpush.bf16.msra.mxu0 %v9145_v49  ;;  %v11167_v43 = vld [vmem:[#allocation2 + $0x24] sm:$0xf]  ;;  %v9013_v4 = vor.u32 %v11166_v24, %v9010_v32 }
 0x38f   : > { %v2526_v15 = vpop.f32.mrf.mxu0  ;;  %v2545_v19 = vpop.f32.mrf.mxu1  ;;  %3309 = vmatpush.bf16.msra.mxu1 %v9149_v27  ;;  %v9021_v61 = vor.u32 %v11167_v43, %v9018_v22 }
 0x390   : > { %v2651_v53 = vmax.f32 %v2526_v15, 0.0  ;;  %v2605_v31 = vpack.c.bf16 %v2545_v19, %v2526_v15  ;;  %v2652_v46 = vmax.f32 %v2545_v19, 0.0  ;;  %2684 = vst [vmem:[#allocation2 + $0xe8] sm:$0xff] %v2668_v44  ;;  %3269 = vmatpush.bf16.msrb.mxu2 %v9009_v51  ;;  %3283 = vmatpush.bf16.msrb.mxu3 %v9013_v4 }
 0x392   : > { %v2669_v7 = vpack.c.bf16 %v2652_v46, %v2651_v53  ;;  %2621 = vst [vmem:[#allocation2 + $0x70] sm:$0xff] %v2605_v31  ;;  %3296 = vmatpush.bf16.msra.mxu0 %v9081_v47 }
 0x393   : > { %v2491_v0 = vpop.f32.mrf.mxu2  ;;  %v2510_v21 = vpop.f32.mrf.mxu3  ;;  %3310 = vmatpush.bf16.msra.mxu1 %v9085_v26  ;;  %9244 = vmatmul.msk.bf16.vlgmr.msrb.gmra.mxu2 %vm3174_vm4, %v13247_v18 }
 0x394   : > { %2685 = vst [vmem:[#allocation2 + $0xf0] sm:$0xff] %v2669_v7  ;;  %v2729_v29 = vmax.f32 %v2491_v0, 0.0  ;;  %v2692_v30 = vpack.c.bf16 %v2510_v21, %v2491_v0  ;;  %v2730_v3 = vmax.f32 %v2510_v21, 0.0  ;;  %9245 = vmatmul.msk.bf16.vlgmr.msrb.gmra.mxu3 %vm3174_vm4, %v13247_v18 }
 0x396   : > { %2708 = vst [vmem:[#allocation2 + $0x128] sm:$0xff] %v2692_v30  ;;  %v2756_v42 = vpack.c.bf16 %v2730_v3, %v2729_v29  ;;  %3297 = vmatpush.bf16.msra.mxu0 %v9017_v36 }
 0x397   : > { %v2529_v49 = vpop.f32.mrf.mxu0  ;;  %v2548_v27 = vpop.f32.mrf.mxu1  ;;  %3311 = vmatpush.bf16.msra.mxu1 %v9021_v61 }
 0x398   : > { %v2731_v15 = vmax.f32 %v2529_v49, 0.0  ;;  %v2693_v19 = vpack.c.bf16 %v2548_v27, %v2529_v49  ;;  %v2732_v41 = vmax.f32 %v2548_v27, 0.0  ;;  %2772 = vst [vmem:[#allocation2 + $0x1a8] sm:$0xff] %v2756_v42 }
 0x399   : > { %9246 = vmatmul.msk.bf16.vlgmr.msra.gmra.mxu0 %vm3174_vm4, %v13247_v18 }
 0x39a   : > { %v2757_v52 = vpack.c.bf16 %v2732_v41, %v2731_v15  ;;  %2709 = vst [vmem:[#allocation2 + $0x130] sm:$0xff] %v2693_v19  ;;  %9247 = vmatmul.msk.bf16.vlgmr.msra.gmra.mxu1 %vm3174_vm4, %v13247_v18 }
 0x39b   : > { %v2493_v12 = vpop.f32.mrf.mxu2  ;;  %v2512_v44 = vpop.f32.mrf.mxu3 }
 0x39c   : > { %2773 = vst [vmem:[#allocation2 + $0x1b0] sm:$0xff] %v2757_v52  ;;  %v2745_v53 = vmax.f32 %v2493_v12, 0.0  ;;  %v2700_v31 = vpack.c.bf16 %v2512_v44, %v2493_v12  ;;  %v2746_v46 = vmax.f32 %v2512_v44, 0.0 }
 0x39d   : > { %v9152_v21 = vld [vmem:[#allocation2 + $0x128] sm:$0xf]  ;;  %v11200_v29 = vld [vmem:[#allocation2 + $0x12c] sm:$0xf] }
 0x39e   : > { %2716 = vst [vmem:[#allocation2 + $0x168] sm:$0xff] %v2700_v31  ;;  %v2764_v7 = vpack.c.bf16 %v2746_v46, %v2745_v53 }
 0x39f   : > { %v2531_v23 = vpop.f32.mrf.mxu0  ;;  %v2550_v1 = vpop.f32.mrf.mxu1  ;;  %v9216_v51 = vld [vmem:[#allocation2 + $0x1a8] sm:$0xf]  ;;  %v11216_v4 = vld [vmem:[#allocation2 + $0x1ac] sm:$0xf] }
 0x3a0   : > { %v2747_v24 = vmax.f32 %v2531_v23, 0.0  ;;  %v2701_v32 = vpack.c.bf16 %v2550_v1, %v2531_v23  ;;  %v2748_v47 = vmax.f32 %v2550_v1, 0.0  ;;  %2780 = vst [vmem:[#allocation2 + $0x1e8] sm:$0xff] %v2764_v7  ;;  %v9088_v1 = vld [vmem:[#allocation2 + $0xa8] sm:$0xf] }
 0x3a1   : > { %v9160_v36 = vld [vmem:[#allocation2 + $0x130] sm:$0xf]  ;;  %v11201_v12 = vld [vmem:[#allocation2 + $0x134] sm:$0xf] }
 0x3a2   : > { %v2765_v26 = vpack.c.bf16 %v2748_v47, %v2747_v24  ;;  %2717 = vst [vmem:[#allocation2 + $0x170] sm:$0xff] %v2701_v32 }
 0x3a3   : > { %v9224_v30 = vld [vmem:[#allocation2 + $0x1b0] sm:$0xf]  ;;  %v11217_v27 = vld [vmem:[#allocation2 + $0x1b4] sm:$0xf] }
 0x3a4   : > { %2781 = vst [vmem:[#allocation2 + $0x1f0] sm:$0xff] %v2765_v26  ;;  %v11192_v26 = vld [vmem:[#allocation2 + $0xe4] sm:$0xf0] }
 0x3a5   : > { %v11208_v49 = vld [vmem:[#allocation2 + $0x164] sm:$0xf0]  ;;  %v9154_v15 = vld [vmem:[#allocation2 + $0x168] sm:$0xf0] }
 0x3a6   : > { %v9153_v44 = vor.u32 %v11208_v49, %v9152_v21  ;;  %v9157_v23 = vor.u32 %v11200_v29, %v9154_v15  ;;  %v11185_v49 = vld [vmem:[#allocation2 + $0xb4] sm:$0xf]  ;;  %v11176_v15 = vld [vmem:[#allocation2 + $0x64] sm:$0xf0] }
 0x3a7   : > { %v2562_v57 = vpop.f32.mrf.mxu2  ;;  %v2581_v55 = vpop.f32.mrf.mxu3  ;;  %v11224_v61 = vld [vmem:[#allocation2 + $0x1e4] sm:$0xf0]  ;;  %v9218_v42 = vld [vmem:[#allocation2 + $0x1e8] sm:$0xf0] }
 0x3a8   : > { %v2637_v43 = vmax.f32 %v2562_v57, 0.0  ;;  %v2598_v22 = vpack.c.bf16 %v2581_v55, %v2562_v57  ;;  %v2638_v0 = vmax.f32 %v2581_v55, 0.0  ;;  %v9217_v19 = vor.u32 %v11224_v61, %v9216_v51  ;;  %v11184_v57 = vld [vmem:[#allocation2 + $0xac] sm:$0xf]  ;;  %v9098_v61 = vld [vmem:[#allocation2 + $0xf0] sm:$0xf0] }
 0x3a9   : > { %v9221_v41 = vor.u32 %v11216_v4, %v9218_v42  ;;  %v11209_v52 = vld [vmem:[#allocation2 + $0x16c] sm:$0xf0]  ;;  %v9162_v46 = vld [vmem:[#allocation2 + $0x170] sm:$0xf0]  ;;  %v9090_v55 = vld [vmem:[#allocation2 + $0xe8] sm:$0xf0] }
 0x3aa   : > { %2614 = vst [vmem:[#allocation2 + $0x38] sm:$0xff] %v2598_v22  ;;  %v2662_v3 = vpack.c.bf16 %v2638_v0, %v2637_v43  ;;  %3322 = vmatpush.bf16.msra.mxu2 %v9217_v19  ;;  %v9161_v43 = vor.u32 %v11209_v52, %v9160_v36  ;;  %v9165_v21 = vor.u32 %v11201_v12, %v9162_v46  ;;  %v9096_v4 = vld [vmem:[#allocation2 + $0xb0] sm:$0xf]  ;;  %v9024_v42 = vld [vmem:[#allocation2 + $0x28] sm:$0xf] }
 0x3ab   : > { %v11225_v53 = vld [vmem:[#allocation2 + $0x1ec] sm:$0xf0]  ;;  %v9226_v31 = vld [vmem:[#allocation2 + $0x1f0] sm:$0xf0]  ;;  %3336 = vmatpush.bf16.msra.mxu3 %v9221_v41  ;;  %v11168_v19 = vld [vmem:[#allocation2 + $0x2c] sm:$0xf]  ;;  %v9101_v52 = vor.u32 %v11185_v49, %v9098_v61 }
 0x3ac   : > { %2678 = vst [vmem:[#allocation2 + $0xb8] sm:$0xff] %v2662_v3  ;;  %v9225_v7 = vor.u32 %v11225_v53, %v9224_v30  ;;  %v9229_v24 = vor.u32 %v11217_v27, %v9226_v31  ;;  %v11193_v3 = vld [vmem:[#allocation2 + $0xec] sm:$0xf0]  ;;  %v9089_v30 = vor.u32 %v11192_v26, %v9088_v1  ;;  %v9093_v27 = vor.u32 %v11184_v57, %v9090_v55  ;;  %v9026_v36 = vld [vmem:[#allocation2 + $0x68] sm:$0xf0] }
 0x3ad   : > { %v9097_v41 = vor.u32 %v11193_v3, %v9096_v4  ;;  %v9032_v12 = vld [vmem:[#allocation2 + $0x30] sm:$0xf]  ;;  %v11169_v31 = vld [vmem:[#allocation2 + $0x34] sm:$0xf] }
 0x3ae   : > { %3350 = vmatpush.bf16.msrb.mxu0 %v9225_v7  ;;  %3364 = vmatpush.bf16.msrb.mxu1 %v9229_v24  ;;  %v11177_v53 = vld [vmem:[#allocation2 + $0x6c] sm:$0xf0]  ;;  %v9034_v46 = vld [vmem:[#allocation2 + $0x70] sm:$0xf0]  ;;  %v9025_v7 = vor.u32 %v11176_v15, %v9024_v42 }
 0x3af   : > { %v2564_v32 = vpop.f32.mrf.mxu2  ;;  %v2583_v47 = vpop.f32.mrf.mxu3  ;;  %3323 = vmatpush.bf16.msra.mxu2 %v9153_v44  ;;  %3337 = vmatpush.bf16.msra.mxu3 %v9157_v23  ;;  %v9029_v44 = vor.u32 %v11168_v19, %v9026_v36  ;;  %v9033_v24 = vor.u32 %v11177_v53, %v9032_v12  ;;  %v9037_v57 = vor.u32 %v11169_v31, %v9034_v46 }
 0x3b0   : > { %v2653_v22 = vmax.f32 %v2564_v32, 0.0  ;;  %v2606_v0 = vpack.c.bf16 %v2583_v47, %v2564_v32  ;;  %v2654_v51 = vmax.f32 %v2583_v47, 0.0 }
 0x3b2   : > { %2622 = vst [vmem:[#allocation2 + $0x78] sm:$0xff] %v2606_v0  ;;  %v2670_v29 = vpack.c.bf16 %v2654_v51, %v2653_v22  ;;  %3351 = vmatpush.bf16.msrb.mxu0 %v9161_v43  ;;  %3365 = vmatpush.bf16.msrb.mxu1 %v9165_v21 }
 0x3b3   : > { %3324 = vmatpush.bf16.msra.mxu2 %v9089_v30  ;;  %3338 = vmatpush.bf16.msra.mxu3 %v9093_v27  ;;  %v9104_v12 = vld [vmem:[#allocation2 + $0xb8] sm:$0xf]  ;;  %v11186_v31 = vld [vmem:[#allocation2 + $0xbc] sm:$0xf] }
 0x3b4   : > { %2686 = vst [vmem:[#allocation2 + $0xf8] sm:$0xff] %v2670_v29 }
 0x3b6   : > { %3352 = vmatpush.bf16.msrb.mxu0 %v9097_v41  ;;  %3366 = vmatpush.bf16.msrb.mxu1 %v9101_v52 }
 0x3b7   : > { %v2567_v23 = vpop.f32.mrf.mxu2  ;;  %v2586_v1 = vpop.f32.mrf.mxu3  ;;  %3325 = vmatpush.bf16.msra.mxu2 %v9025_v7  ;;  %3339 = vmatpush.bf16.msra.mxu3 %v9029_v44 }
 0x3b8   : > { %v2733_v32 = vmax.f32 %v2567_v23, 0.0  ;;  %v2694_v47 = vpack.c.bf16 %v2586_v1, %v2567_v23  ;;  %v2734_v26 = vmax.f32 %v2586_v1, 0.0  ;;  %v9040_v23 = vld [vmem:[#allocation2 + $0x38] sm:$0xf] }
 0x3b9   : > { %v11178_v1 = vld [vmem:[#allocation2 + $0x74] sm:$0xf0] }
 0x3ba   : > { %2710 = vst [vmem:[#allocation2 + $0x138] sm:$0xff] %v2694_v47  ;;  %v2758_v55 = vpack.c.bf16 %v2734_v26, %v2733_v32  ;;  %3353 = vmatpush.bf16.msrb.mxu0 %v9033_v24  ;;  %3367 = vmatpush.bf16.msrb.mxu1 %v9037_v57  ;;  %v11170_v24 = vld [vmem:[#allocation2 + $0x3c] sm:$0xf]  ;;  %v9041_v47 = vor.u32 %v11178_v1, %v9040_v23  ;;  %v9454_v23 = vld [vmem:[#allocation2 + $0x1c0] sm:$0xf0] }
 0x3bb   : > { %9248 = vmatmul.msk.bf16.vlgmr.msra.gmra.mxu2 %vm3174_vm4, %v13247_v18  ;;  %9249 = vmatmul.msk.bf16.vlgmr.msra.gmra.mxu3 %vm3174_vm4, %v13247_v18  ;;  %v11194_v53 = vld [vmem:[#allocation2 + $0xf4] sm:$0xf0]  ;;  %v9106_v46 = vld [vmem:[#allocation2 + $0xf8] sm:$0xf0] }
 0x3bc   : > { %2774 = vst [vmem:[#allocation2 + $0x1b8] sm:$0xff] %v2758_v55  ;;  %v9105_v7 = vor.u32 %v11194_v53, %v9104_v12  ;;  %v9109_v44 = vor.u32 %v11186_v31, %v9106_v46  ;;  %v9042_v32 = vld [vmem:[#allocation2 + $0x78] sm:$0xf0]  ;;  %v9452_v46 = vld [vmem:[#allocation2 + $0x180] sm:$0xf] }
 0x3bd   : > { %9250 = vmatmul.msk.bf16.vlgmr.msrb.gmra.mxu0 %vm3174_vm4, %v13247_v18  ;;  %9251 = vmatmul.msk.bf16.vlgmr.msrb.gmra.mxu1 %vm3174_vm4, %v13247_v18  ;;  %v9045_v26 = vor.u32 %v11170_v24, %v9042_v32  ;;  %v9388_v32 = vld [vmem:[#allocation2 + $0x100] sm:$0xf] }
 0x3bf   : > { %v2569_v43 = vpop.f32.mrf.mxu2  ;;  %v2588_v22 = vpop.f32.mrf.mxu3 }
 0x3c0   : > { %v2749_v0 = vmax.f32 %v2569_v43, 0.0  ;;  %v2702_v51 = vpack.c.bf16 %v2588_v22, %v2569_v43  ;;  %v2750_v21 = vmax.f32 %v2588_v22, 0.0 }
 0x3c1   : > { %v9168_v61 = vld [vmem:[#allocation2 + $0x138] sm:$0xf]  ;;  %v11202_v30 = vld [vmem:[#allocation2 + $0x13c] sm:$0xf] }
 0x3c2   : > { %2718 = vst [vmem:[#allocation2 + $0x178] sm:$0xff] %v2702_v51  ;;  %v2766_v4 = vpack.c.bf16 %v2750_v21, %v2749_v0 }
 0x3c3   : > { %v9232_v3 = vld [vmem:[#allocation2 + $0x1b8] sm:$0xf]  ;;  %v11218_v49 = vld [vmem:[#allocation2 + $0x1bc] sm:$0xf] }
 0x3c4   : > { %2782 = vst [vmem:[#allocation2 + $0x1f8] sm:$0xff] %v2766_v4 }
 0x3c9   : > { %v11210_v29 = vld [vmem:[#allocation2 + $0x174] sm:$0xf0]  ;;  %v9170_v15 = vld [vmem:[#allocation2 + $0x178] sm:$0xf0] }
 0x3ca   : > { %v9169_v41 = vor.u32 %v11210_v29, %v9168_v61  ;;  %v9173_v52 = vor.u32 %v11202_v30, %v9170_v15 }
 0x3cb   : > { %v11226_v27 = vld [vmem:[#allocation2 + $0x1f4] sm:$0xf0]  ;;  %v9234_v42 = vld [vmem:[#allocation2 + $0x1f8] sm:$0xf0] }
 0x3cc   : > { %v9233_v19 = vor.u32 %v11226_v27, %v9232_v3  ;;  %v9237_v36 = vor.u32 %v11218_v49, %v9234_v42 }
 0x3ce   : > { %3378 = vmatpush.bf16.msrb.mxu2 %v9233_v19  ;;  %3392 = vmatpush.bf16.msrb.mxu3 %v9237_v36 }
 0x3d2   : > { %3379 = vmatpush.bf16.msrb.mxu2 %v9169_v41  ;;  %3393 = vmatpush.bf16.msrb.mxu3 %v9173_v52 }
 0x3d3   : > { %v13277_v57 = vpop.f32.mrf.mxu0  ;;  %v13279_v55 = vpop.f32.mrf.mxu1 }
 0x3d4   : > { %v14038_v43 = vmax.f32 %v13277_v57, 0.0  ;;  %v3402_v22 = vpack.c.bf16 %v13279_v55, %v13277_v57  ;;  %v14036_v0 = vmax.f32 %v13279_v55, 0.0 }
 0x3d6   : > { %3380 = vmatpush.bf16.msrb.mxu2 %v9105_v7  ;;  %3394 = vmatpush.bf16.msrb.mxu3 %v9109_v44  ;;  %3418 = vst [vmem:[#allocation2 + $0x200] sm:$0xff] %v3402_v22  ;;  %v3466_v51 = vpack.c.bf16 %v14036_v0, %v14038_v43  ;;  %v11284_v7 = vld [vmem:[#allocation2 + $0x1bc] sm:$0xf0]  ;;  %v11276_v44 = vld [vmem:[#allocation2 + $0x184] sm:$0xf] }
 0x3d7   : > { %v9453_v1 = vor.u32 %v11284_v7, %v9452_v46  ;;  %v9457_v24 = vor.u32 %v11276_v44, %v9454_v23  ;;  %v9390_v22 = vld [vmem:[#allocation2 + $0x140] sm:$0xf0] }
 0x3d8   : > { %3482 = vst [vmem:[#allocation2 + $0x280] sm:$0xff] %v3466_v51 }
 0x3da   : > { %3381 = vmatpush.bf16.msrb.mxu2 %v9041_v47  ;;  %3395 = vmatpush.bf16.msrb.mxu3 %v9045_v26  ;;  %v11268_v47 = vld [vmem:[#allocation2 + $0x13c] sm:$0xf0]  ;;  %v11260_v26 = vld [vmem:[#allocation2 + $0x104] sm:$0xf] }
 0x3db   : > { %v13293_v21 = vpop.f32.mrf.mxu0  ;;  %v13295_v4 = vpop.f32.mrf.mxu1 }
 0x3dc   : > { %v14037_v3 = vmax.f32 %v13293_v21, 0.0  ;;  %v3410_v49 = vpack.c.bf16 %v13295_v4, %v13293_v21  ;;  %v14035_v61 = vmax.f32 %v13295_v4, 0.0 }
 0x3dd   : > { %9252 = vmatmul.msk.bf16.vlgmr.msrb.gmra.mxu2 %vm3174_vm4, %v13247_v18  ;;  %9253 = vmatmul.msk.bf16.vlgmr.msrb.gmra.mxu3 %vm3174_vm4, %v13247_v18  ;;  %v9516_v27 = vld [vmem:[#allocation2 + $0x200] sm:$0xf]  ;;  %v11292_v15 = vld [vmem:[#allocation2 + $0x204] sm:$0xf] }
 0x3de   : > { %3426 = vst [vmem:[#allocation2 + $0x240] sm:$0xff] %v3410_v49  ;;  %v3474_v18 = vpack.c.bf16 %v14035_v61, %v14037_v3 }
 0x3df   : > { %v9580_v29 = vld [vmem:[#allocation2 + $0x280] sm:$0xf]  ;;  %v11308_v30 = vld [vmem:[#allocation2 + $0x284] sm:$0xf] }
 0x3e0   : > { %3490 = vst [vmem:[#allocation2 + $0x2c0] sm:$0xff] %v3474_v18 }
 0x3e5   : > { %v11300_v42 = vld [vmem:[#allocation2 + $0x23c] sm:$0xf0]  ;;  %v9518_v41 = vld [vmem:[#allocation2 + $0x240] sm:$0xf0] }
 0x3e6   : > { %v9517_v53 = vor.u32 %v11300_v42, %v9516_v27  ;;  %v9521_v31 = vor.u32 %v11292_v15, %v9518_v41  ;;  %v9389_v27 = vor.u32 %v11268_v47, %v9388_v32  ;;  %v9393_v42 = vor.u32 %v11260_v26, %v9390_v22  ;;  %v9324_v15 = vld [vmem:[#allocation2 + $0x80] sm:$0xf]  ;;  %v11228_v47 = vld [vmem:[#allocation2 + $0x4] sm:$0xf] }
 0x3e7   : > { %v11316_v19 = vld [vmem:[#allocation2 + $0x2bc] sm:$0xf0]  ;;  %v9582_v36 = vld [vmem:[#allocation2 + $0x2c0] sm:$0xf0] }
 0x3e8   : > { %v9581_v52 = vor.u32 %v11316_v19, %v9580_v29  ;;  %v9585_v12 = vor.u32 %v11308_v30, %v9582_v36  ;;  %v11252_v19 = vld [vmem:[#allocation2 + $0xbc] sm:$0xf0]  ;;  %v9262_v26 = vld [vmem:[#allocation2 + $0x40] sm:$0xf0] }
 0x3e9   : > { %v9325_v44 = vor.u32 %v11252_v19, %v9324_v15 }
 0x3ea   : > { %4087 = vmatpush.bf16.msra.mxu0 %v9581_v52  ;;  %4101 = vmatpush.bf16.msra.mxu1 %v9585_v12  ;;  %v11244_v52 = vld [vmem:[#allocation2 + $0x84] sm:$0xf] }
 0x3eb   : > { %v9326_v12 = vld [vmem:[#allocation2 + $0xc0] sm:$0xf0] }
 0x3ec   : > { %v9329_v23 = vor.u32 %v11244_v52, %v9326_v12  ;;  %v9265_v12 = vor.u32 %v11228_v47, %v9262_v26 }
 0x3ee   : > { %4088 = vmatpush.bf16.msra.mxu0 %v9517_v53  ;;  %4102 = vmatpush.bf16.msra.mxu1 %v9521_v31 }
 0x3f2   : > { %v13305_v51 = vpop.f32.mrf.mxu2  ;;  %v13307_v49 = vpop.f32.mrf.mxu3  ;;  %4089 = vmatpush.bf16.msra.mxu0 %v9453_v1  ;;  %4103 = vmatpush.bf16.msra.mxu1 %v9457_v24  ;;  %v9260_v1 = vld [vmem:[#allocation2] sm:$0xf] }
 0x3f3   : > { %v14030_v18 = vmax.f32 %v13305_v51, 0.0  ;;  %v3403_v29 = vpack.c.bf16 %v13307_v49, %v13305_v51  ;;  %v14027_v30 = vmax.f32 %v13307_v49, 0.0  ;;  %v11236_v24 = vld [vmem:[#allocation2 + $0x3c] sm:$0xf0] }
 0x3f4   : > { %v9261_v52 = vor.u32 %v11236_v24, %v9260_v1 }
 0x3f5   : > { %3419 = vst [vmem:[#allocation2 + $0x208] sm:$0xff] %v3403_v29  ;;  %v3467_v36 = vpack.c.bf16 %v14027_v30, %v14030_v18  ;;  %v13317_v41 = vpop.f32.mrf.mxu0  ;;  %v13320_v31 = vpop.f32.mrf.mxu1 }
 0x3f6   : > { %v14034_v53 = vmax.f32 %v13317_v41, 0.0  ;;  %4090 = vmatpush.bf16.msra.mxu0 %v9389_v27  ;;  %4104 = vmatpush.bf16.msra.mxu1 %v9393_v42  ;;  %v3404_v46 = vpack.c.bf16 %v13320_v31, %v13317_v41  ;;  %v14032_v7 = vmax.f32 %v13320_v31, 0.0  ;;  %v9256_v27 = vld [vmem:[#allocation8 + $0x18] sm:$0xf]  ;;  %v11227_v42 = vld [vmem:[#allocation8 + $0x40] sm:$0xf0] }
 0x3f7   : > { %3483 = vst [vmem:[#allocation2 + $0x288] sm:$0xff] %v3467_v36 }
 0x3f8   : > { %3420 = vst [vmem:[#allocation2 + $0x210] sm:$0xff] %v3404_v46  ;;  %v3468_v32 = vpack.c.bf16 %v14032_v7, %v14034_v53 }
 0x3fa   : > { %v13329_v22 = vpop.f32.mrf.mxu2  ;;  %v13331_v29 = vpop.f32.mrf.mxu3  ;;  %4091 = vmatpush.bf16.msra.mxu0 %v9325_v44  ;;  %4105 = vmatpush.bf16.msra.mxu1 %v9329_v23  ;;  %3484 = vst [vmem:[#allocation2 + $0x290] sm:$0xff] %v3468_v32  ;;  %v13343_v23 = vor.u32 %v11227_v42, %v9256_v27 }
 0x3fb   : > { %v14029_v15 = vmax.f32 %v13329_v22, 0.0  ;;  %v3411_v19 = vpack.c.bf16 %v13331_v29, %v13329_v22  ;;  %v14028_v36 = vmax.f32 %v13331_v29, 0.0 }
 0x3fc   : > { %v9524_v3 = vld [vmem:[#allocation2 + $0x208] sm:$0xf]  ;;  %v11293_v43 = vld [vmem:[#allocation2 + $0x20c] sm:$0xf] }
 0x3fd   : > { %3427 = vst [vmem:[#allocation2 + $0x248] sm:$0xff] %v3411_v19  ;;  %v3475_v46 = vpack.c.bf16 %v14028_v36, %v14029_v15  ;;  %v13341_v44 = vpop.f32.mrf.mxu0  ;;  %v13346_v30 = vpop.f32.mrf.mxu1 }
 0x3fe   : > { %v14033_v32 = vmax.f32 %v13341_v44, 0.0  ;;  %4092 = vmatpush.bf16.msra.mxu0 %v9261_v52  ;;  %4106 = vmatpush.bf16.msra.mxu1 %v9265_v12  ;;  %v3412_v1 = vpack.c.bf16 %v13346_v30, %v13341_v44  ;;  %v14031_v24 = vmax.f32 %v13346_v30, 0.0  ;;  %v9588_v26 = vld [vmem:[#allocation2 + $0x288] sm:$0xf]  ;;  %v11309_v42 = vld [vmem:[#allocation2 + $0x28c] sm:$0xf] }
 0x3ff   : > { %3491 = vst [vmem:[#allocation2 + $0x2c8] sm:$0xff] %v3475_v46  ;;  %v9532_v36 = vld [vmem:[#allocation2 + $0x210] sm:$0xf]  ;;  %v11294_v15 = vld [vmem:[#allocation2 + $0x214] sm:$0xf] }
 0x400   : > { %3428 = vst [vmem:[#allocation2 + $0x250] sm:$0xff] %v3412_v1  ;;  %v3476_v47 = vpack.c.bf16 %v14031_v24, %v14033_v32 }
 0x401   : > { %9642 = vmatmul.msk.bf16.vlgmr.msra.gmra.mxu0 %vm4081_vm5, %v13343_v23  ;;  %9643 = vmatmul.msk.bf16.vlgmr.msra.gmra.mxu1 %vm4081_vm5, %v13343_v23  ;;  %v9596_v46 = vld [vmem:[#allocation2 + $0x290] sm:$0xf]  ;;  %v11310_v1 = vld [vmem:[#allocation2 + $0x294] sm:$0xf] }
 0x402   : > { %3492 = vst [vmem:[#allocation2 + $0x2d0] sm:$0xff] %v3476_v47 }
 0x404   : > { %v11301_v18 = vld [vmem:[#allocation2 + $0x244] sm:$0xf0]  ;;  %v9526_v24 = vld [vmem:[#allocation2 + $0x248] sm:$0xf0] }
 0x405   : > { %v9525_v40 = vor.u32 %v11301_v18, %v9524_v3  ;;  %v9529_v6 = vor.u32 %v11293_v43, %v9526_v24  ;;  %v11269_v3 = vld [vmem:[#allocation2 + $0x144] sm:$0xf0]  ;;  %v9398_v43 = vld [vmem:[#allocation2 + $0x148] sm:$0xf0]  ;;  %v11262_v24 = vld [vmem:[#allocation2 + $0x114] sm:$0xf] }
 0x406   : > { %v11317_v27 = vld [vmem:[#allocation2 + $0x2c4] sm:$0xf0]  ;;  %v9590_v19 = vld [vmem:[#allocation2 + $0x2c8] sm:$0xf0] }
 0x407   : > { %v9589_v52 = vor.u32 %v11317_v27, %v9588_v26  ;;  %v9593_v12 = vor.u32 %v11309_v42, %v9590_v19  ;;  %v11302_v7 = vld [vmem:[#allocation2 + $0x24c] sm:$0xf0]  ;;  %v9534_v61 = vld [vmem:[#allocation2 + $0x250] sm:$0xf0]  ;;  %v11285_v42 = vld [vmem:[#allocation2 + $0x1c4] sm:$0xf0] }
 0x408   : > { %v9533_v26 = vor.u32 %v11302_v7, %v9532_v36  ;;  %v9537_v27 = vor.u32 %v11294_v15, %v9534_v61  ;;  %v9462_v19 = vld [vmem:[#allocation2 + $0x1c8] sm:$0xf0]  ;;  %v9469_v61 = vor.u32 %v11286_v28, %v9468_v56  ;;  %v9332_v56 = vld [vmem:[#allocation2 + $0x88] sm:$0xf] }
 0x409   : > { %4115 = vmatpush.bf16.msra.mxu2 %v9589_v52  ;;  %4129 = vmatpush.bf16.msra.mxu3 %v9593_v12  ;;  %v11318_v32 = vld [vmem:[#allocation2 + $0x2cc] sm:$0xf0]  ;;  %v9598_v53 = vld [vmem:[#allocation2 + $0x2d0] sm:$0xf0]  ;;  %v9460_v52 = vld [vmem:[#allocation2 + $0x188] sm:$0xf] }
 0x40a   : > { %v9597_v0 = vor.u32 %v11318_v32, %v9596_v46  ;;  %v9601_v47 = vor.u32 %v11310_v1, %v9598_v53  ;;  %v11277_v12 = vld [vmem:[#allocation2 + $0x18c] sm:$0xf]  ;;  %v9461_v59 = vor.u32 %v11285_v42, %v9460_v52  ;;  %v11278_v32 = vld [vmem:[#allocation2 + $0x194] sm:$0xf]  ;;  %v11253_v1 = vld [vmem:[#allocation2 + $0xc4] sm:$0xf0] }
 0x40b   : > { %v9465_v25 = vor.u32 %v11277_v12, %v9462_v19  ;;  %v9470_v53 = vld [vmem:[#allocation2 + $0x1d0] sm:$0xf0]  ;;  %v11261_v7 = vld [vmem:[#allocation2 + $0x10c] sm:$0xf]  ;;  %v9340_v12 = vld [vmem:[#allocation2 + $0x90] sm:$0xf] }
 0x40c   : > { %4143 = vmatpush.bf16.msrb.mxu0 %v9597_v0  ;;  %4157 = vmatpush.bf16.msrb.mxu1 %v9601_v47  ;;  %v9396_v0 = vld [vmem:[#allocation2 + $0x108] sm:$0xf]  ;;  %v9473_v18 = vor.u32 %v11278_v32, %v9470_v53  ;;  %v9401_v36 = vor.u32 %v11261_v7, %v9398_v43  ;;  %v9406_v46 = vld [vmem:[#allocation2 + $0x150] sm:$0xf0]  ;;  %v9334_v47 = vld [vmem:[#allocation2 + $0xc8] sm:$0xf0]  ;;  %v9333_v43 = vor.u32 %v11253_v1, %v9332_v56 }
 0x40d   : > { %4116 = vmatpush.bf16.msra.mxu2 %v9525_v40  ;;  %4130 = vmatpush.bf16.msra.mxu3 %v9529_v6  ;;  %v9404_v40 = vld [vmem:[#allocation2 + $0x110] sm:$0xf]  ;;  %v9397_v15 = vor.u32 %v11269_v3, %v9396_v0  ;;  %v11245_v28 = vld [vmem:[#allocation2 + $0x8c] sm:$0xf]  ;;  %v9409_v52 = vor.u32 %v11262_v24, %v9406_v46  ;;  %v11237_v32 = vld [vmem:[#allocation2 + $0x44] sm:$0xf0] }
 0x40e   : > { %v11270_v6 = vld [vmem:[#allocation2 + $0x14c] sm:$0xf0]  ;;  %v9337_v0 = vor.u32 %v11245_v28, %v9334_v47  ;;  %v9342_v7 = vld [vmem:[#allocation2 + $0xd0] sm:$0xf0]  ;;  %v9270_v24 = vld [vmem:[#allocation2 + $0x48] sm:$0xf0] }
 0x40f   : > { %v9268_v46 = vld [vmem:[#allocation2 + $0x8] sm:$0xf]  ;;  %v11229_v1 = vld [vmem:[#allocation2 + $0xc] sm:$0xf] }
 0x410   : > { %4144 = vmatpush.bf16.msrb.mxu0 %v9533_v26  ;;  %4158 = vmatpush.bf16.msrb.mxu1 %v9537_v27  ;;  %v9269_v2 = vor.u32 %v11237_v32, %v9268_v46 }
 0x411   : > { %4117 = vmatpush.bf16.msra.mxu2 %v9461_v59  ;;  %4131 = vmatpush.bf16.msra.mxu3 %v9465_v25  ;;  %v9405_v25 = vor.u32 %v11270_v6, %v9404_v40 }
 0x414   : > { %4145 = vmatpush.bf16.msrb.mxu0 %v9469_v61  ;;  %4159 = vmatpush.bf16.msrb.mxu1 %v9473_v18  ;;  %v11254_v61 = vld [vmem:[#allocation2 + $0xcc] sm:$0xf0]  ;;  %v11246_v18 = vld [vmem:[#allocation2 + $0x94] sm:$0xf] }
 0x415   : > { %4118 = vmatpush.bf16.msra.mxu2 %v9397_v15  ;;  %4132 = vmatpush.bf16.msra.mxu3 %v9401_v36  ;;  %v9341_v56 = vor.u32 %v11254_v61, %v9340_v12  ;;  %v9345_v28 = vor.u32 %v11246_v18, %v9342_v7 }
 0x416   : > { %v13359_v26 = vpop.f32.mrf.mxu0  ;;  %v13367_v53 = vpop.f32.mrf.mxu2 }
 0x417   : > { %v13361_v27 = vpop.f32.mrf.mxu1  ;;  %v14054_v59 = vmax.f32 %v13359_v26, 0.0  ;;  %v13369_v3 = vpop.f32.mrf.mxu3  ;;  %v14051_v40 = vmax.f32 %v13367_v53, 0.0 }
 0x418   : > { %v3406_v42 = vpack.c.bf16 %v13361_v27, %v13359_v26  ;;  %v14047_v19 = vmax.f32 %v13361_v27, 0.0  ;;  %14110 = vst [vmem:[#allocation15_spill] sm:$0xff] %v13369_v3  ;;  %v3405_v6 = vpack.c.bf16 %v13369_v3, %v13367_v53  ;;  %v14049_v15 = vmax.f32 %v13369_v3, 0.0  ;;  %4146 = vmatpush.bf16.msrb.mxu0 %v9405_v25  ;;  %4160 = vmatpush.bf16.msrb.mxu1 %v9409_v52  ;;  %v11230_v25 = vld [vmem:[#allocation2 + $0x14] sm:$0xf] }
 0x419   : > { %4119 = vmatpush.bf16.msra.mxu2 %v9333_v43  ;;  %4133 = vmatpush.bf16.msra.mxu3 %v9337_v0  ;;  %v9278_v52 = vld [vmem:[#allocation2 + $0x50] sm:$0xf0]  ;;  %v9486_v3 = vld [vmem:[#allocation2 + $0x1e0] sm:$0xf0] }
 0x41a   : > { %3422 = vst [vmem:[#allocation2 + $0x220] sm:$0xff] %v3406_v42  ;;  %v3470_v36 = vpack.c.bf16 %v14047_v19, %v14054_v59  ;;  %v3469_v47 = vpack.c.bf16 %v14049_v15, %v14051_v40  ;;  %v9276_v42 = vld [vmem:[#allocation2 + $0x10] sm:$0xf]  ;;  %v9273_v19 = vor.u32 %v11229_v1, %v9270_v24  ;;  %v9281_v18 = vor.u32 %v11230_v25, %v9278_v52 }
 0x41b   : > { %3421 = vst [vmem:[#allocation2 + $0x218] sm:$0xff] %v3405_v6  ;;  %v9277_v6 = vor.u32 %v11238_v38, %v9276_v42 }
 0x41c   : > { %3486 = vst [vmem:[#allocation2 + $0x2a0] sm:$0xff] %v3470_v36  ;;  %4147 = vmatpush.bf16.msrb.mxu0 %v9341_v56  ;;  %4161 = vmatpush.bf16.msrb.mxu1 %v9345_v28 }
 0x41d   : > { %3485 = vst [vmem:[#allocation2 + $0x298] sm:$0xff] %v3469_v47  ;;  %4120 = vmatpush.bf16.msra.mxu2 %v9269_v2  ;;  %4134 = vmatpush.bf16.msra.mxu3 %v9273_v19 }
 0x41e   : > { %v13383_v43 = vpop.f32.mrf.mxu0  ;;  %v13391_v7 = vpop.f32.mrf.mxu2 }
 0x41f   : > { %v13385_v0 = vpop.f32.mrf.mxu1  ;;  %v14053_v12 = vmax.f32 %v13383_v43, 0.0  ;;  %v13393_v36 = vpop.f32.mrf.mxu3  ;;  %v14050_v24 = vmax.f32 %v13391_v7, 0.0 }
 0x420   : > { %v3414_v61 = vpack.c.bf16 %v13385_v0, %v13383_v43  ;;  %v14052_v32 = vmax.f32 %v13385_v0, 0.0  ;;  %14111 = vst [vmem:[#allocation16_spill] sm:$0xff] %v13393_v36  ;;  %v3413_v46 = vpack.c.bf16 %v13393_v36, %v13391_v7  ;;  %v14048_v2 = vmax.f32 %v13393_v36, 0.0  ;;  %4148 = vmatpush.bf16.msrb.mxu0 %v9277_v6  ;;  %4162 = vmatpush.bf16.msrb.mxu1 %v9281_v18  ;;  %v11280_v36 = vld [vmem:[#allocation2 + $0x1a4] sm:$0xf] }
 0x421   : > { %9644 = vmatmul.msk.bf16.vlgmr.msra.gmra.mxu2 %vm4081_vm5, %v13343_v23  ;;  %9645 = vmatmul.msk.bf16.vlgmr.msra.gmra.mxu3 %vm4081_vm5, %v13343_v23  ;;  %v9548_v28 = vld [vmem:[#allocation2 + $0x220] sm:$0xf]  ;;  %v11296_v42 = vld [vmem:[#allocation2 + $0x224] sm:$0xf] }
 0x422   : > { %3430 = vst [vmem:[#allocation2 + $0x260] sm:$0xff] %v3414_v61  ;;  %v3478_v38 = vpack.c.bf16 %v14052_v32, %v14053_v12  ;;  %v3477_v19 = vpack.c.bf16 %v14048_v2, %v14050_v24  ;;  %v9540_v52 = vld [vmem:[#allocation2 + $0x218] sm:$0xf]  ;;  %v11295_v6 = vld [vmem:[#allocation2 + $0x21c] sm:$0xf] }
 0x423   : > { %3429 = vst [vmem:[#allocation2 + $0x258] sm:$0xff] %v3413_v46  ;;  %9646 = vmatmul.msk.bf16.vlgmr.msrb.gmra.mxu0 %vm4081_vm5, %v13343_v23  ;;  %9647 = vmatmul.msk.bf16.vlgmr.msrb.gmra.mxu1 %vm4081_vm5, %v13343_v23  ;;  %v9612_v47 = vld [vmem:[#allocation2 + $0x2a0] sm:$0xf]  ;;  %v11312_v56 = vld [vmem:[#allocation2 + $0x2a4] sm:$0xf] }
 0x424   : > { %3494 = vst [vmem:[#allocation2 + $0x2e0] sm:$0xff] %v3478_v38  ;;  %v9604_v1 = vld [vmem:[#allocation2 + $0x298] sm:$0xf]  ;;  %v11311_v25 = vld [vmem:[#allocation2 + $0x29c] sm:$0xf] }
 0x425   : > { %3493 = vst [vmem:[#allocation2 + $0x2d8] sm:$0xff] %v3477_v19 }
 0x429   : > { %v11304_v61 = vld [vmem:[#allocation2 + $0x25c] sm:$0xf0]  ;;  %v9550_v18 = vld [vmem:[#allocation2 + $0x260] sm:$0xf0] }
 0x42a   : > { %v11303_v38 = vld [vmem:[#allocation2 + $0x254] sm:$0xf0]  ;;  %v9542_v12 = vld [vmem:[#allocation2 + $0x258] sm:$0xf0]  ;;  %v9549_v16 = vor.u32 %v11304_v61, %v9548_v28  ;;  %v9553_v10 = vor.u32 %v11296_v42, %v9550_v18 }
 0x42b   : > { %v11320_v46 = vld [vmem:[#allocation2 + $0x2dc] sm:$0xf0]  ;;  %v9614_v2 = vld [vmem:[#allocation2 + $0x2e0] sm:$0xf0]  ;;  %v9541_v54 = vor.u32 %v11303_v38, %v9540_v52  ;;  %v9545_v58 = vor.u32 %v11295_v6, %v9542_v12  ;;  %v9348_v6 = vld [vmem:[#allocation2 + $0x98] sm:$0xf] }
 0x42c   : > { %v11319_v15 = vld [vmem:[#allocation2 + $0x2d4] sm:$0xf0]  ;;  %v9606_v24 = vld [vmem:[#allocation2 + $0x2d8] sm:$0xf0]  ;;  %v9613_v40 = vor.u32 %v11320_v46, %v9612_v47  ;;  %v9617_v32 = vor.u32 %v11312_v56, %v9614_v2  ;;  %v11264_v52 = vld [vmem:[#allocation2 + $0x124] sm:$0xf] }
 0x42d   : > { %v9605_v59 = vor.u32 %v11319_v15, %v9604_v1  ;;  %v9609_v19 = vor.u32 %v11311_v25, %v9606_v24  ;;  %v11287_v47 = vld [vmem:[#allocation2 + $0x1d4] sm:$0xf0]  ;;  %v11279_v2 = vld [vmem:[#allocation2 + $0x19c] sm:$0xf]  ;;  %v9489_v15 = vor.u32 %v11280_v36, %v9486_v3  ;;  %v11272_v25 = vld [vmem:[#allocation2 + $0x15c] sm:$0xf0] }
 0x42e   : > { %4199 = vmatpush.bf16.msra.mxu0 %v9613_v40  ;;  %4213 = vmatpush.bf16.msra.mxu1 %v9617_v32  ;;  %v9478_v56 = vld [vmem:[#allocation2 + $0x1d8] sm:$0xf0]  ;;  %v9485_v40 = vor.u32 %v11288_v8, %v9484_v33  ;;  %v9412_v32 = vld [vmem:[#allocation2 + $0x118] sm:$0xf]  ;;  %v9477_v1 = vor.u32 %v11287_v47, %v9476_v20  ;;  %v9356_v46 = vld [vmem:[#allocation2 + $0xa0] sm:$0xf] }
 0x42f   : > { %4171 = vmatpush.bf16.msrb.mxu2 %v9605_v59  ;;  %4185 = vmatpush.bf16.msrb.mxu3 %v9609_v19  ;;  %v11271_v24 = vld [vmem:[#allocation2 + $0x154] sm:$0xf0]  ;;  %v9420_v59 = vld [vmem:[#allocation2 + $0x120] sm:$0xf]  ;;  %v9481_v28 = vor.u32 %v11279_v2, %v9478_v56  ;;  %v11263_v33 = vld [vmem:[#allocation2 + $0x11c] sm:$0xf] }
 0x430   : > { %v9421_v3 = vor.u32 %v11272_v25, %v9420_v59  ;;  %v11255_v61 = vld [vmem:[#allocation2 + $0xd4] sm:$0xf0]  ;;  %v11247_v18 = vld [vmem:[#allocation2 + $0x9c] sm:$0xf]  ;;  %v9413_v47 = vor.u32 %v11271_v24, %v9412_v32  ;;  %v11256_v56 = vld [vmem:[#allocation2 + $0xdc] sm:$0xf0] }
 0x431   : > { %v9350_v25 = vld [vmem:[#allocation2 + $0xd8] sm:$0xf0]  ;;  %v9357_v24 = vor.u32 %v11256_v56, %v9356_v46 }
 0x432   : > { %4200 = vmatpush.bf16.msra.mxu0 %v9549_v16  ;;  %4214 = vmatpush.bf16.msra.mxu1 %v9553_v10  ;;  %v9422_v16 = vld [vmem:[#allocation2 + $0x160] sm:$0xf0] }
 0x433   : > { %4172 = vmatpush.bf16.msrb.mxu2 %v9541_v54  ;;  %4186 = vmatpush.bf16.msrb.mxu3 %v9545_v58  ;;  %v9414_v58 = vld [vmem:[#allocation2 + $0x158] sm:$0xf0]  ;;  %v9425_v36 = vor.u32 %v11264_v52, %v9422_v16  ;;  %v9284_v16 = vld [vmem:[#allocation2 + $0x18] sm:$0xf] }
 0x434   : > { %v9417_v2 = vor.u32 %v11263_v33, %v9414_v58  ;;  %v11231_v33 = vld [vmem:[#allocation2 + $0x1c] sm:$0xf]  ;;  %v9292_v58 = vld [vmem:[#allocation2 + $0x20] sm:$0xf] }
 0x436   : > { %4201 = vmatpush.bf16.msra.mxu0 %v9485_v40  ;;  %4215 = vmatpush.bf16.msra.mxu1 %v9489_v15  ;;  %v11248_v40 = vld [vmem:[#allocation2 + $0xa4] sm:$0xf] }
 0x437   : > { %4173 = vmatpush.bf16.msrb.mxu2 %v9477_v1  ;;  %4187 = vmatpush.bf16.msrb.mxu3 %v9481_v28  ;;  %v9358_v15 = vld [vmem:[#allocation2 + $0xe0] sm:$0xf0] }
 0x438   : > { %v9361_v52 = vor.u32 %v11248_v40, %v9358_v15  ;;  %v9286_v40 = vld [vmem:[#allocation2 + $0x58] sm:$0xf0] }
 0x43a   : > { %v13415_v12 = vpop.f32.mrf.mxu0  ;;  %v13417_v42 = vpop.f32.mrf.mxu1  ;;  %4202 = vmatpush.bf16.msra.mxu0 %v9421_v3  ;;  %4216 = vmatpush.bf16.msra.mxu1 %v9425_v36  ;;  %v11240_v36 = vld [vmem:[#allocation2 + $0x5c] sm:$0xf0] }
 0x43b   : > { %14112 = vst [vmem:[#allocation17_spill] sm:$0xff] %v13417_v42  ;;  %v14065_v10 = vmax.f32 %v13415_v12, 0.0  ;;  %v3408_v8 = vpack.c.bf16 %v13417_v42, %v13415_v12  ;;  %v14064_v54 = vmax.f32 %v13417_v42, 0.0  ;;  %4174 = vmatpush.bf16.msrb.mxu2 %v9413_v47  ;;  %4188 = vmatpush.bf16.msrb.mxu3 %v9417_v2  ;;  %v11232_v47 = vld [vmem:[#allocation2 + $0x24] sm:$0xf] }
 0x43c   : > { %v9294_v2 = vld [vmem:[#allocation2 + $0x60] sm:$0xf0] }
 0x43d   : > { %3424 = vst [vmem:[#allocation2 + $0x230] sm:$0xff] %v3408_v8  ;;  %v3472_v20 = vpack.c.bf16 %v14064_v54, %v14065_v10  ;;  %v11239_v8 = vld [vmem:[#allocation2 + $0x54] sm:$0xf0]  ;;  %v9349_v54 = vor.u32 %v11255_v61, %v9348_v6  ;;  %v9353_v10 = vor.u32 %v11247_v18, %v9350_v25  ;;  %v9293_v61 = vor.u32 %v11240_v36, %v9292_v58 }
 0x43e   : > { %v13427_v38 = vpop.f32.mrf.mxu2  ;;  %v13429_v19 = vpop.f32.mrf.mxu3  ;;  %4203 = vmatpush.bf16.msra.mxu0 %v9357_v24  ;;  %4217 = vmatpush.bf16.msra.mxu1 %v9361_v52  ;;  %v9297_v18 = vor.u32 %v11232_v47, %v9294_v2  ;;  %v9289_v24 = vor.u32 %v11231_v33, %v9286_v40 }
 0x43f   : > { %14113 = vst [vmem:[#allocation18_spill] sm:$0xff] %v13427_v38  ;;  %v14069_v1 = vmax.f32 %v13427_v38, 0.0  ;;  %v3407_v28 = vpack.c.bf16 %v13429_v19, %v13427_v38  ;;  %v14067_v59 = vmax.f32 %v13429_v19, 0.0  ;;  %4175 = vmatpush.bf16.msrb.mxu2 %v9349_v54  ;;  %4189 = vmatpush.bf16.msrb.mxu3 %v9353_v10  ;;  %v11281_v38 = vld [vmem:[#allocation2 + $0x1ac] sm:$0xf] }
 0x440   : > { %14114 = vst [vmem:[#allocation35_spill] sm:$0xff] %v13429_v19  ;;  %v9500_v19 = vld [vmem:[#allocation2 + $0x1b0] sm:$0xf] }
 0x441   : > { %3488 = vst [vmem:[#allocation2 + $0x2b0] sm:$0xff] %v3472_v20  ;;  %v3471_v32 = vpack.c.bf16 %v14067_v59, %v14069_v1 }
 0x442   : > { %3423 = vst [vmem:[#allocation2 + $0x228] sm:$0xff] %v3407_v28  ;;  %v13439_v20 = vpop.f32.mrf.mxu0  ;;  %v13441_v3 = vpop.f32.mrf.mxu1  ;;  %4204 = vmatpush.bf16.msra.mxu0 %v9293_v61  ;;  %4218 = vmatpush.bf16.msra.mxu1 %v9297_v18 }
 0x443   : > { %14115 = vst [vmem:[#allocation36_spill] sm:$0xff] %v13439_v20  ;;  %v14071_v28 = vmax.f32 %v13439_v20, 0.0  ;;  %v3416_v46 = vpack.c.bf16 %v13441_v3, %v13439_v20  ;;  %v14070_v56 = vmax.f32 %v13441_v3, 0.0  ;;  %4190 = vmatpush.bf16.msrb.mxu3 %v9289_v24 }
 0x444   : > { %14116 = vst [vmem:[#allocation37_spill] sm:$0xff] %v13441_v3  ;;  %v9564_v47 = vld [vmem:[#allocation2 + $0x230] sm:$0xf]  ;;  %v9494_v3 = vld [vmem:[#allocation2 + $0x1e8] sm:$0xf0] }
 0x445   : > { %3487 = vst [vmem:[#allocation2 + $0x2a8] sm:$0xff] %v3471_v32  ;;  %v3480_v6 = vpack.c.bf16 %v14070_v56, %v14071_v28  ;;  %v9285_v32 = vor.u32 %v11239_v8, %v9284_v16  ;;  %9650 = vmatmul.msk.bf16.vlgmr.msra.gmra.mxu0 %vm4081_vm5, %v13343_v23  ;;  %9651 = vmatmul.msk.bf16.vlgmr.msra.gmra.mxu1 %vm4081_vm5, %v13343_v23 }
 0x446   : > { %3432 = vst [vmem:[#allocation2 + $0x270] sm:$0xff] %v3416_v46  ;;  %v13451_v15 = vpop.f32.mrf.mxu2  ;;  %v13453_v25 = vpop.f32.mrf.mxu3  ;;  %9649 = vmatmul.msk.bf16.vlgmr.msrb.gmra.mxu3 %vm4081_vm5, %v13343_v23 }
 0x447   : > { %14117 = vst [vmem:[#allocation38_spill] sm:$0xff] %v13451_v15  ;;  %v14068_v52 = vmax.f32 %v13451_v15, 0.0  ;;  %v3415_v54 = vpack.c.bf16 %v13453_v25, %v13451_v15  ;;  %v14066_v10 = vmax.f32 %v13453_v25, 0.0  ;;  %4176 = vmatpush.bf16.msrb.mxu2 %v9285_v32  ;;  %v9502_v15 = vld [vmem:[#allocation2 + $0x1f0] sm:$0xf0] }
 0x448   : > { %14118 = vst [vmem:[#allocation39_spill] sm:$0xff] %v13453_v25  ;;  %v9628_v16 = vld [vmem:[#allocation2 + $0x2b0] sm:$0xf]  ;;  %v11314_v8 = vld [vmem:[#allocation2 + $0x2b4] sm:$0xf] }
 0x449   : > { %3496 = vst [vmem:[#allocation2 + $0x2f0] sm:$0xff] %v3480_v6  ;;  %v3479_v58 = vpack.c.bf16 %v14066_v10, %v14068_v52  ;;  %v11298_v6 = vld [vmem:[#allocation2 + $0x234] sm:$0xf]  ;;  %v9556_v24 = vld [vmem:[#allocation2 + $0x228] sm:$0xf] }
 0x44a   : > { %3431 = vst [vmem:[#allocation2 + $0x268] sm:$0xff] %v3415_v54  ;;  %9648 = vmatmul.msk.bf16.vlgmr.msrb.gmra.mxu2 %vm4081_vm5, %v13343_v23 }
 0x44b   : > { %3495 = vst [vmem:[#allocation2 + $0x2e8] sm:$0xff] %v3479_v58  ;;  %v11297_v58 = vld [vmem:[#allocation2 + $0x22c] sm:$0xf] }
 0x44c   : > { %v9620_v18 = vld [vmem:[#allocation2 + $0x2a8] sm:$0xf]  ;;  %v11313_v32 = vld [vmem:[#allocation2 + $0x2ac] sm:$0xf] }
 0x44d   : > { %v11306_v40 = vld [vmem:[#allocation2 + $0x26c] sm:$0xf0]  ;;  %v9566_v61 = vld [vmem:[#allocation2 + $0x270] sm:$0xf0] }
 0x44e   : > { %v9565_v1 = vor.u32 %v11306_v40, %v9564_v47  ;;  %v9569_v56 = vor.u32 %v11298_v6, %v9566_v61  ;;  %v9436_v47 = vld [vmem:[#allocation2 + $0x130] sm:$0xf]  ;;  %v9428_v40 = vld [vmem:[#allocation2 + $0x128] sm:$0xf] }
 0x44f   : > { %v11273_v6 = vld [vmem:[#allocation2 + $0x164] sm:$0xf0] }
 0x450   : > { %v11322_v33 = vld [vmem:[#allocation2 + $0x2ec] sm:$0xf0]  ;;  %v9630_v36 = vld [vmem:[#allocation2 + $0x2f0] sm:$0xf0] }
 0x451   : > { %v9629_v2 = vor.u32 %v11322_v33, %v9628_v16  ;;  %v9633_v46 = vor.u32 %v11314_v8, %v9630_v36  ;;  %v11305_v54 = vld [vmem:[#allocation2 + $0x264] sm:$0xf0]  ;;  %v9558_v52 = vld [vmem:[#allocation2 + $0x268] sm:$0xf0]  ;;  %v11290_v33 = vld [vmem:[#allocation2 + $0x1ec] sm:$0xf0] }
 0x452   : > { %v11321_v10 = vld [vmem:[#allocation2 + $0x2e4] sm:$0xf0]  ;;  %v9622_v59 = vld [vmem:[#allocation2 + $0x2e8] sm:$0xf0]  ;;  %v9557_v16 = vor.u32 %v11305_v54, %v9556_v24  ;;  %v9561_v8 = vor.u32 %v11297_v58, %v9558_v52  ;;  %v11282_v36 = vld [vmem:[#allocation2 + $0x1b4] sm:$0xf]  ;;  %v9501_v42 = vor.u32 %v11290_v33, %v9500_v19  ;;  %v9497_v52 = vor.u32 %v11281_v38, %v9494_v3 }
 0x453   : > { %4255 = vmatpush.bf16.msrb.mxu0 %v9629_v2  ;;  %4269 = vmatpush.bf16.msrb.mxu1 %v9633_v46  ;;  %v9621_v28 = vor.u32 %v11321_v10, %v9620_v18  ;;  %v9625_v25 = vor.u32 %v11313_v32, %v9622_v59  ;;  %v9492_v2 = vld [vmem:[#allocation2 + $0x1a8] sm:$0xf]  ;;  %v9505_v20 = vor.u32 %v11282_v36, %v9502_v15  ;;  %v11274_v59 = vld [vmem:[#allocation2 + $0x16c] sm:$0xf0]  ;;  %v11266_v10 = vld [vmem:[#allocation2 + $0x134] sm:$0xf] }
 0x454   : > { %v11289_v46 = vld [vmem:[#allocation2 + $0x1e4] sm:$0xf0]  ;;  %v9437_v61 = vor.u32 %v11274_v59, %v9436_v47  ;;  %v9372_v32 = vld [vmem:[#allocation2 + $0xb0] sm:$0xf]  ;;  %v11250_v15 = vld [vmem:[#allocation2 + $0xb4] sm:$0xf] }
 0x455   : > { %4227 = vmatpush.bf16.msra.mxu2 %v9621_v28  ;;  %4241 = vmatpush.bf16.msra.mxu3 %v9625_v25  ;;  %v9438_v28 = vld [vmem:[#allocation2 + $0x170] sm:$0xf0]  ;;  %v9493_v25 = vor.u32 %v11289_v46, %v9492_v2  ;;  %v11258_v19 = vld [vmem:[#allocation2 + $0xec] sm:$0xf0]  ;;  %v9364_v38 = vld [vmem:[#allocation2 + $0xa8] sm:$0xf] }
 0x456   : > { %v9441_v18 = vor.u32 %v11266_v10, %v9438_v28  ;;  %v9374_v24 = vld [vmem:[#allocation2 + $0xf0] sm:$0xf0]  ;;  %v11257_v33 = vld [vmem:[#allocation2 + $0xe4] sm:$0xf0]  ;;  %v11249_v36 = vld [vmem:[#allocation2 + $0xac] sm:$0xf]  ;;  %v9373_v46 = vor.u32 %v11258_v19, %v9372_v32 }
 0x457   : > { %4256 = vmatpush.bf16.msrb.mxu0 %v9565_v1  ;;  %4270 = vmatpush.bf16.msrb.mxu1 %v9569_v56  ;;  %v11265_v1 = vld [vmem:[#allocation2 + $0x12c] sm:$0xf]  ;;  %v9377_v47 = vor.u32 %v11250_v15, %v9374_v24  ;;  %v9308_v59 = vld [vmem:[#allocation2 + $0x30] sm:$0xf] }
 0x458   : > { %v9430_v56 = vld [vmem:[#allocation2 + $0x168] sm:$0xf0]  ;;  %v11242_v10 = vld [vmem:[#allocation2 + $0x6c] sm:$0xf0] }
 0x459   : > { %4228 = vmatpush.bf16.msra.mxu2 %v9557_v16  ;;  %4242 = vmatpush.bf16.msra.mxu3 %v9561_v8  ;;  %v9433_v8 = vor.u32 %v11265_v1, %v9430_v56  ;;  %v9366_v2 = vld [vmem:[#allocation2 + $0xe8] sm:$0xf0]  ;;  %v9300_v1 = vld [vmem:[#allocation2 + $0x28] sm:$0xf]  ;;  %v9309_v32 = vor.u32 %v11242_v10, %v9308_v59 }
 0x45a   : > { %v11241_v56 = vld [vmem:[#allocation2 + $0x64] sm:$0xf0] }
 0x45b   : > { %4257 = vmatpush.bf16.msrb.mxu0 %v9501_v42  ;;  %4271 = vmatpush.bf16.msrb.mxu1 %v9505_v20  ;;  %v9429_v42 = vor.u32 %v11273_v6, %v9428_v40  ;;  %v9365_v40 = vor.u32 %v11257_v33, %v9364_v38  ;;  %v9369_v6 = vor.u32 %v11249_v36, %v9366_v2 }
 0x45d   : > { %4229 = vmatpush.bf16.msra.mxu2 %v9493_v25  ;;  %4243 = vmatpush.bf16.msra.mxu3 %v9497_v52  ;;  %v11234_v25 = vld [vmem:[#allocation2 + $0x34] sm:$0xf] }
 0x45e   : > { %v9310_v52 = vld [vmem:[#allocation2 + $0x70] sm:$0xf0] }
 0x45f   : > { %4258 = vmatpush.bf16.msrb.mxu0 %v9437_v61  ;;  %4272 = vmatpush.bf16.msrb.mxu1 %v9441_v18  ;;  %v11233_v61 = vld [vmem:[#allocation2 + $0x2c] sm:$0xf]  ;;  %v9313_v19 = vor.u32 %v11234_v25, %v9310_v52 }
 0x460   : > { %v13471_v54 = vpop.f32.mrf.mxu2  ;;  %v13473_v58 = vpop.f32.mrf.mxu3  ;;  %v9302_v18 = vld [vmem:[#allocation2 + $0x68] sm:$0xf0] }
 0x461   : > { %v3448_v20 = vmax.f32 %v13471_v54, 0.0  ;;  %v3409_v3 = vpack.c.bf16 %v13473_v58, %v13471_v54  ;;  %v14080_v16 = vmax.f32 %v13473_v58, 0.0  ;;  %4230 = vmatpush.bf16.msra.mxu2 %v9429_v42  ;;  %4244 = vmatpush.bf16.msra.mxu3 %v9433_v8  ;;  %v9301_v42 = vor.u32 %v11241_v56, %v9300_v1 }
 0x462   : > { %v9305_v33 = vor.u32 %v11233_v61, %v9302_v18  ;;  %v9508_v61 = vld [vmem:[#allocation2 + $0x1b8] sm:$0xf] }
 0x463   : > { %3425 = vst [vmem:[#allocation2 + $0x238] sm:$0xff] %v3409_v3  ;;  %v3473_v28 = vpack.c.bf16 %v14080_v16, %v3448_v20  ;;  %4259 = vmatpush.bf16.msrb.mxu0 %v9373_v46  ;;  %4273 = vmatpush.bf16.msrb.mxu1 %v9377_v47  ;;  %v11291_v18 = vld [vmem:[#allocation2 + $0x1f4] sm:$0xf0]  ;;  %v9446_v16 = vld [vmem:[#allocation2 + $0x178] sm:$0xf0] }
 0x465   : > { %3489 = vst [vmem:[#allocation2 + $0x2b8] sm:$0xff] %v3473_v28  ;;  %4231 = vmatpush.bf16.msra.mxu2 %v9365_v40  ;;  %4245 = vmatpush.bf16.msra.mxu3 %v9369_v6 }
 0x467   : > { %4260 = vmatpush.bf16.msrb.mxu0 %v9309_v32  ;;  %4274 = vmatpush.bf16.msrb.mxu1 %v9313_v19  ;;  %v11283_v32 = vld [vmem:[#allocation2 + $0x1bc] sm:$0xf] }
 0x468   : > { %v13483_v15 = vpop.f32.mrf.mxu2  ;;  %v13485_v24 = vpop.f32.mrf.mxu3  ;;  %v9510_v19 = vld [vmem:[#allocation2 + $0x1f8] sm:$0xf0] }
 0x469   : > { %v3464_v3 = vmax.f32 %v13483_v15, 0.0  ;;  %v3417_v38 = vpack.c.bf16 %v13485_v24, %v13483_v15  ;;  %v14079_v8 = vmax.f32 %v13485_v24, 0.0  ;;  %4232 = vmatpush.bf16.msra.mxu2 %v9301_v42  ;;  %4246 = vmatpush.bf16.msra.mxu3 %v9305_v33  ;;  %v9509_v42 = vor.u32 %v11291_v18, %v9508_v61  ;;  %v9444_v33 = vld [vmem:[#allocation2 + $0x138] sm:$0xf]  ;;  %v11235_v61 = vld [vmem:[#allocation2 + $0x3c] sm:$0xf] }
 0x46a   : > { %9654 = vmatmul.msk.bf16.vlgmr.msrb.gmra.mxu0 %vm4081_vm5, %v13343_v23  ;;  %9655 = vmatmul.msk.bf16.vlgmr.msrb.gmra.mxu1 %vm4081_vm5, %v13343_v23  ;;  %v9572_v47 = vld [vmem:[#allocation2 + $0x238] sm:$0xf]  ;;  %v11299_v10 = vld [vmem:[#allocation2 + $0x23c] sm:$0xf]  ;;  %v14170_v15 = vld [vmem:[#allocation25_spill] sm:$0xff] }
 0x46b   : > { %3433 = vst [vmem:[#allocation2 + $0x278] sm:$0xff] %v3417_v38  ;;  %v3481_v36 = vpack.c.bf16 %v14079_v8, %v3464_v3  ;;  %v9513_v38 = vor.u32 %v11283_v32, %v9510_v19  ;;  %v11267_v8 = vld [vmem:[#allocation2 + $0x13c] sm:$0xf] }
 0x46c   : > { %9652 = vmatmul.msk.bf16.vlgmr.msra.gmra.mxu2 %vm4081_vm5, %v13343_v23  ;;  %9653 = vmatmul.msk.bf16.vlgmr.msra.gmra.mxu3 %vm4081_vm5, %v13343_v23  ;;  %v9636_v2 = vld [vmem:[#allocation2 + $0x2b8] sm:$0xf]  ;;  %v11315_v46 = vld [vmem:[#allocation2 + $0x2bc] sm:$0xf] }
 0x46d   : > { %3497 = vst [vmem:[#allocation2 + $0x2f8] sm:$0xff] %v3481_v36  ;;  %v11275_v36 = vld [vmem:[#allocation2 + $0x174] sm:$0xf0]  ;;  %v9318_v18 = vld [vmem:[#allocation2 + $0x78] sm:$0xf0] }
 0x46e   : > { %v9321_v19 = vor.u32 %v11235_v61, %v9318_v18 }
 0x472   : > { %v11307_v59 = vld [vmem:[#allocation2 + $0x274] sm:$0xf0]  ;;  %v9574_v52 = vld [vmem:[#allocation2 + $0x278] sm:$0xf0] }
 0x473   : > { %v9573_v1 = vor.u32 %v11307_v59, %v9572_v47  ;;  %v9577_v56 = vor.u32 %v11299_v10, %v9574_v52  ;;  %v11251_v47 = vld [vmem:[#allocation2 + $0xbc] sm:$0xf] }
 0x474   : > { %v11323_v28 = vld [vmem:[#allocation2 + $0x2f4] sm:$0xf0]  ;;  %v9638_v25 = vld [vmem:[#allocation2 + $0x2f8] sm:$0xf0] }
 0x475   : > { %v9637_v40 = vor.u32 %v11323_v28, %v9636_v2  ;;  %v9641_v6 = vor.u32 %v11315_v46, %v9638_v25  ;;  %v9445_v2 = vor.u32 %v11275_v36, %v9444_v33  ;;  %v9449_v46 = vor.u32 %v11267_v8, %v9446_v16  ;;  %v9380_v28 = vld [vmem:[#allocation2 + $0xb8] sm:$0xf]  ;;  %v9382_v59 = vld [vmem:[#allocation2 + $0xf8] sm:$0xf0] }
 0x476   : > { %v11259_v25 = vld [vmem:[#allocation2 + $0xf4] sm:$0xf0]  ;;  %v9385_v52 = vor.u32 %v11251_v47, %v9382_v59  ;;  %v14121_v59 = vmax.f32 %v13279_v55, 0.0  ;;  %v11325_v55 = vld [vmem:[#allocation8 + $0x9c] sm:$0xf0] }
 0x477   : > { %4283 = vmatpush.bf16.msrb.mxu2 %v9637_v40  ;;  %4297 = vmatpush.bf16.msrb.mxu3 %v9641_v6  ;;  %v9381_v10 = vor.u32 %v11259_v25, %v9380_v28  ;;  %v9316_v40 = vld [vmem:[#allocation2 + $0x38] sm:$0xf]  ;;  %v14119_v28 = vmax.f32 %v13277_v57, 0.0  ;;  %v14120_v25 = vmax.f32 %v13293_v21, 0.0  ;;  %v9664_v57 = vld [vmem:[#allocation8 + $0x74] sm:$0xf] }
 0x478   : > { %v13525_v61 = vor.u32 %v11325_v55, %v9664_v57  ;;  %v11326_v57 = vld [vmem:[#allocation8 + $0xf4] sm:$0xf0]  ;;  %v14127_v55 = vmax.f32 %v13305_v51, 0.0  ;;  %v4343_v51 = vpack.c.bf16 %v13073_v60, %v12977_v62 }
 0x479   : > { %v4357_v47 = vpack.c.bf16 %v14120_v25, %v14119_v28 }
 0x47b   : > { %4284 = vmatpush.bf16.msrb.mxu2 %v9573_v1  ;;  %4298 = vmatpush.bf16.msrb.mxu3 %v9577_v56  ;;  %v11243_v56 = vld [vmem:[#allocation2 + $0x74] sm:$0xf0] }
 0x47c   : > { %v9317_v32 = vor.u32 %v11243_v56, %v9316_v40  ;;  %v9660_v40 = vld [vmem:[#allocation8 + $0x1c] sm:$0xf] }
 0x47e   : > { %v4094_v6 = vpop.f32.mrf.mxu0  ;;  %v4108_v1 = vpop.f32.mrf.mxu1 }
 0x47f   : > { %4285 = vmatpush.bf16.msrb.mxu2 %v9509_v42  ;;  %4299 = vmatpush.bf16.msrb.mxu3 %v9513_v38  ;;  %v4309_v16 = vmax.f32 %v4094_v6, 0.0  ;;  %v4310_v8 = vmax.f32 %v4108_v1, 0.0  ;;  %v4341_v6 = vpack.c.bf16 %v13051_v11, %v12969_v63  ;;  %v4342_v1 = vpack.c.bf16 %v13053_v13, %v12971_v14 }
 0x483   : > { %4286 = vmatpush.bf16.msrb.mxu2 %v9445_v2  ;;  %4300 = vmatpush.bf16.msrb.mxu3 %v9449_v46 }
 0x486   : > { %v4096_v42 = vpop.f32.mrf.mxu0  ;;  %v4110_v38 = vpop.f32.mrf.mxu1 }
 0x487   : > { %4287 = vmatpush.bf16.msrb.mxu2 %v9381_v10  ;;  %4301 = vmatpush.bf16.msrb.mxu3 %v9385_v52  ;;  %v4325_v33 = vmax.f32 %v4096_v42, 0.0  ;;  %v4326_v36 = vmax.f32 %v4110_v38, 0.0  ;;  %v14122_v10 = vmax.f32 %v13295_v4, 0.0 }
 0x489   : > { %v4373_v2 = vpack.c.bf16 %v4325_v33, %v4309_v16  ;;  %v4374_v46 = vpack.c.bf16 %v4326_v36, %v4310_v8  ;;  %v4358_v52 = vpack.c.bf16 %v14122_v10, %v14121_v59  ;;  %v14123_v59 = vmax.f32 %v13317_v41, 0.0 }
 0x48a   : > { %v14124_v10 = vmax.f32 %v13341_v44, 0.0  ;;  %v14129_v41 = vmax.f32 %v13307_v49, 0.0  ;;  %v14130_v44 = vmax.f32 %v13331_v29, 0.0  ;;  %v4344_v49 = vpack.c.bf16 %v13075_v34, %v12979_v45 }
 0x48b   : > { %4288 = vmatpush.bf16.msrb.mxu2 %v9317_v32  ;;  %4302 = vmatpush.bf16.msrb.mxu3 %v9321_v19 }
 0x48c   : > { %4434 = vmatpush.bf16.msra.mxu0 %v4373_v2  ;;  %4463 = vmatpush.bf16.msra.mxu1 %v4374_v46 }
 0x48e   : > { %9656 = vmatmul.msk.bf16.vlgmr.msrb.gmra.mxu2 %vm4081_vm5, %v13343_v23  ;;  %9657 = vmatmul.msk.bf16.vlgmr.msrb.gmra.mxu3 %vm4081_vm5, %v13343_v23  ;;  %v11324_v23 = vld [vmem:[#allocation8 + $0x44] sm:$0xf0] }
 0x48f   : > { %v13519_v56 = vor.u32 %v11324_v23, %v9660_v40  ;;  %v14125_v40 = vmax.f32 %v13320_v31, 0.0  ;;  %v14126_v23 = vmax.f32 %v13346_v30, 0.0  ;;  %v4345_v30 = vpack.c.bf16 %v13081_v5, %v12987_v9  ;;  %v9672_v9 = vld [vmem:[#allocation8 + $0x124] sm:$0xf] }
 0x490   : > { %4435 = vmatpush.bf16.msra.mxu0 %v4357_v47  ;;  %4464 = vmatpush.bf16.msra.mxu1 %v4358_v52  ;;  %v4361_v52 = vpack.c.bf16 %v14124_v10, %v14123_v59 }
 0x494   : > { %4436 = vmatpush.bf16.msra.mxu0 %v4341_v6  ;;  %4465 = vmatpush.bf16.msra.mxu1 %v4342_v1  ;;  %v4362_v6 = vpack.c.bf16 %v14126_v23, %v14125_v40  ;;  %v9668_v1 = vld [vmem:[#allocation8 + $0xcc] sm:$0xf]  ;;  %v4349_v40 = vpack.c.bf16 %v13131_v17, %v13007_v50  ;;  %v14137_v23 = vld [vmem:[#allocation15_spill] sm:$0xff] }
 0x495   : > { %v13547_v31 = vor.u32 %v11326_v57, %v9668_v1  ;;  %v14139_v1 = vld [vmem:[#allocation16_spill] sm:$0xff]  ;;  %v14141_v50 = vld [vmem:[#allocation19_spill] sm:$0xff] }
 0x496   : > { %v14140_v57 = vmax.f32 %v14139_v1, 0.0  ;;  %v14164_v1 = vld [vmem:[#allocation21_spill] sm:$0xff] }
 0x497   : > { %9674 = vmatmul.msk.bf16.vlgmr.msra.gmra.mxu0 %vm892_vm0, %v13519_v56  ;;  %9678 = vmatmul.msk.bf16.vlgmr.msra.gmra.mxu1 %vm892_vm0, %v13519_v56 }
 0x4a0   : > { %v4150_v21 = vpop.f32.mrf.mxu0  ;;  %v4164_v4 = vpop.f32.mrf.mxu1 }
 0x4a1   : > { %v4313_v14 = vmax.f32 %v4150_v21, 0.0  ;;  %v4314_v13 = vmax.f32 %v4164_v4, 0.0  ;;  %v14128_v21 = vmax.f32 %v13329_v22, 0.0 }
 0x4a3   : > { %v4359_v4 = vpack.c.bf16 %v14128_v21, %v14127_v55 }
 0x4a4   : > { %v4122_v63 = vpop.f32.mrf.mxu2  ;;  %v4136_v11 = vpop.f32.mrf.mxu3 }
 0x4a5   : > { %v4311_v36 = vmax.f32 %v4122_v63, 0.0  ;;  %v4312_v2 = vmax.f32 %v4136_v11, 0.0  ;;  %v4360_v63 = vpack.c.bf16 %v14130_v44, %v14129_v41  ;;  %v4346_v11 = vpack.c.bf16 %v13083_v39, %v12989_v48  ;;  %v11327_v48 = vld [vmem:[#allocation8 + $0x14c] sm:$0xf0] }
 0x4a6   : > { %v13565_v5 = vor.u32 %v11327_v48, %v9672_v9 }
 0x4a7   : > { %9675 = vmatmul.msk.bf16.gmra.mxu0 %vm892_vm0, %v13525_v61  ;;  %9679 = vmatmul.msk.bf16.gmra.mxu1 %vm892_vm0, %v13525_v61 }
 0x4a8   : > { %v4152_v18 = vpop.f32.mrf.mxu0  ;;  %v4166_v32 = vpop.f32.mrf.mxu1 }
 0x4a9   : > { %v4329_v19 = vmax.f32 %v4152_v18, 0.0  ;;  %v4330_v16 = vmax.f32 %v4166_v32, 0.0 }
 0x4ab   : > { %v4377_v8 = vpack.c.bf16 %v4329_v19, %v4313_v14  ;;  %v4378_v42 = vpack.c.bf16 %v4330_v16, %v4314_v13 }
 0x4ac   : > { %v4124_v38 = vpop.f32.mrf.mxu2  ;;  %v4138_v33 = vpop.f32.mrf.mxu3 }
 0x4ad   : > { %v4327_v46 = vmax.f32 %v4124_v38, 0.0  ;;  %v4328_v28 = vmax.f32 %v4138_v33, 0.0  ;;  %4550 = vmatpush.bf16.msrb.mxu0 %v4377_v8  ;;  %4579 = vmatpush.bf16.msrb.mxu1 %v4378_v42  ;;  %v14131_v33 = vmax.f32 %v13359_v26, 0.0  ;;  %v4350_v26 = vpack.c.bf16 %v13133_v37, %v13009_v35  ;;  %v14142_v35 = vld [vmem:[#allocation27_spill] sm:$0xff]  ;;  %v14143_v37 = vld [vmem:[#allocation20_spill] sm:$0xff] }
 0x4ae   : > { %v4347_v17 = vpack.c.bf16 %v14142_v35, %v14141_v50  ;;  %v14166_v50 = vld [vmem:[#allocation22_spill] sm:$0xff] }
 0x4af   : > { %v4375_v25 = vpack.c.bf16 %v4327_v46, %v4311_v36  ;;  %v4376_v47 = vpack.c.bf16 %v4328_v28, %v4312_v2  ;;  %v14132_v36 = vmax.f32 %v13383_v43, 0.0  ;;  %v14133_v46 = vmax.f32 %v13361_v27, 0.0  ;;  %v14167_v35 = vld [vmem:[#allocation30_spill] sm:$0xff] }
 0x4b0   : > { %v14134_v28 = vmax.f32 %v13385_v0, 0.0  ;;  %v14135_v27 = vmax.f32 %v13367_v53, 0.0  ;;  %v14136_v43 = vmax.f32 %v13391_v7, 0.0  ;;  %v14144_v53 = vld [vmem:[#allocation28_spill] sm:$0xff] }
 0x4b1   : > { %4492 = vmatpush.bf16.msra.mxu2 %v4375_v25  ;;  %4521 = vmatpush.bf16.msra.mxu3 %v4376_v47  ;;  %v4365_v2 = vpack.c.bf16 %v14132_v36, %v14131_v33  ;;  %v4348_v7 = vpack.c.bf16 %v14144_v53, %v14143_v37 }
 0x4b2   : > { %4551 = vmatpush.bf16.msrb.mxu0 %v4361_v52  ;;  %4580 = vmatpush.bf16.msrb.mxu1 %v4362_v6  ;;  %v4366_v25 = vpack.c.bf16 %v14134_v28, %v14133_v46  ;;  %v4363_v0 = vpack.c.bf16 %v14136_v43, %v14135_v27  ;;  %v14138_v6 = vmax.f32 %v14137_v23, 0.0  ;;  %v14153_v46 = vld [vmem:[#allocation31_spill] sm:$0xff] }
 0x4b3   : > { %v14160_v27 = vld [vmem:[#allocation35_spill] sm:$0xff] }
 0x4b4   : > { %v4364_v55 = vpack.c.bf16 %v14140_v57, %v14138_v6  ;;  %v14161_v43 = vmax.f32 %v14160_v27, 0.0  ;;  %v14165_v57 = vld [vmem:[#allocation29_spill] sm:$0xff] }
 0x4b5   : > { %4493 = vmatpush.bf16.msra.mxu2 %v4359_v4  ;;  %4522 = vmatpush.bf16.msra.mxu3 %v4360_v63 }
 0x4b6   : > { %4552 = vmatpush.bf16.msrb.mxu0 %v4345_v30  ;;  %4581 = vmatpush.bf16.msrb.mxu1 %v4346_v11 }
 0x4b7   : > { %9676 = vmatmul.msk.bf16.gmra.mxu0 %vm892_vm0, %v13547_v31  ;;  %9680 = vmatmul.msk.bf16.gmra.mxu1 %vm892_vm0, %v13547_v31 }
 0x4b9   : > { %4494 = vmatpush.bf16.msra.mxu2 %v4343_v51  ;;  %4523 = vmatpush.bf16.msra.mxu3 %v4344_v49 }
 0x4bc   : > { %9682 = vmatmul.msk.bf16.vlgmr.msra.gmra.mxu2 %vm892_vm0, %v13519_v56  ;;  %9686 = vmatmul.msk.bf16.vlgmr.msra.gmra.mxu3 %vm892_vm0, %v13519_v56 }
 0x4c2   : > { %v4206_v62 = vpop.f32.mrf.mxu0  ;;  %v4220_v60 = vpop.f32.mrf.mxu1 }
 0x4c3   : > { %v4317_v45 = vmax.f32 %v4206_v62, 0.0  ;;  %v4318_v34 = vmax.f32 %v4220_v60, 0.0 }
 0x4c7   : > { %9677 = vmatmul.msk.bf16.gmra.mxu0 %vm892_vm0, %v13565_v5  ;;  %9681 = vmatmul.msk.bf16.gmra.mxu1 %vm892_vm0, %v13565_v5 }
 0x4c9   : > { %v4192_v22 = vpop.f32.mrf.mxu3 }
 0x4ca   : > { %v4208_v29 = vpop.f32.mrf.mxu0  ;;  %v4222_v14 = vpop.f32.mrf.mxu1  ;;  %v4316_v8 = vmax.f32 %v4192_v22, 0.0  ;;  %v14145_v22 = vmax.f32 %v13415_v12, 0.0 }
 0x4cb   : > { %v4333_v13 = vmax.f32 %v4208_v29, 0.0  ;;  %v4334_v18 = vmax.f32 %v4222_v14, 0.0  ;;  %v14146_v29 = vld [vmem:[#allocation36_spill] sm:$0xff] }
 0x4cc   : > { %9683 = vmatmul.msk.bf16.gmra.mxu2 %vm892_vm0, %v13525_v61  ;;  %9687 = vmatmul.msk.bf16.gmra.mxu3 %vm892_vm0, %v13525_v61  ;;  %v14147_v14 = vmax.f32 %v14146_v29, 0.0 }
 0x4cd   : > { %v4178_v39 = vpop.f32.mrf.mxu2  ;;  %v4381_v32 = vpack.c.bf16 %v4333_v13, %v4317_v45  ;;  %v4382_v19 = vpack.c.bf16 %v4334_v18, %v4318_v34  ;;  %v14148_v18 = vld [vmem:[#allocation17_spill] sm:$0xff] }
 0x4ce   : > { %v4315_v16 = vmax.f32 %v4178_v39, 0.0  ;;  %v4369_v13 = vpack.c.bf16 %v14147_v14, %v14145_v22 }
 0x4cf   : > { %4666 = vmatpush.bf16.msra.mxu0 %v4381_v32  ;;  %4695 = vmatpush.bf16.msra.mxu1 %v4382_v19  ;;  %v14149_v32 = vmax.f32 %v14148_v18, 0.0  ;;  %v14150_v19 = vld [vmem:[#allocation37_spill] sm:$0xff] }
 0x4d1   : > { %v4194_v38 = vpop.f32.mrf.mxu3 }
 0x4d2   : > { %v4332_v59 = vmax.f32 %v4194_v38, 0.0 }
 0x4d3   : > { %4667 = vmatpush.bf16.msra.mxu0 %v4365_v2  ;;  %4696 = vmatpush.bf16.msra.mxu1 %v4366_v25  ;;  %v14152_v2 = vld [vmem:[#allocation23_spill] sm:$0xff]  ;;  %v14154_v25 = vld [vmem:[#allocation24_spill] sm:$0xff] }
 0x4d4   : > { %v4380_v52 = vpack.c.bf16 %v4332_v59, %v4316_v8  ;;  %v4353_v28 = vpack.c.bf16 %v14153_v46, %v14152_v2  ;;  %v14156_v59 = vld [vmem:[#allocation18_spill] sm:$0xff] }
 0x4d5   : > { %v4180_v42 = vpop.f32.mrf.mxu2 }
 0x4d6   : > { %v4331_v47 = vmax.f32 %v4180_v42, 0.0  ;;  %4637 = vmatpush.bf16.msrb.mxu3 %v4380_v52  ;;  %v14158_v52 = vld [vmem:[#allocation38_spill] sm:$0xff] }
 0x4d7   : > { %4668 = vmatpush.bf16.msra.mxu0 %v4349_v40  ;;  %4697 = vmatpush.bf16.msra.mxu1 %v4350_v26  ;;  %v14159_v40 = vmax.f32 %v14158_v52, 0.0 }
 0x4d8   : > { %v4379_v10 = vpack.c.bf16 %v4331_v47, %v4315_v16  ;;  %9690 = vmatmul.msk.bf16.vlgmr.msrb.gmra.mxu0 %vm892_vm0, %v13519_v56  ;;  %9694 = vmatmul.msk.bf16.vlgmr.msrb.gmra.mxu1 %vm892_vm0, %v13519_v56  ;;  %v14151_v16 = vmax.f32 %v14150_v19, 0.0  ;;  %v14155_v47 = vld [vmem:[#allocation32_spill] sm:$0xff] }
 0x4d9   : > { %v4354_v12 = vpack.c.bf16 %v14155_v47, %v14154_v25 }
 0x4da   : > { %4608 = vmatpush.bf16.msrb.mxu2 %v4379_v10  ;;  %4638 = vmatpush.bf16.msrb.mxu3 %v4364_v55  ;;  %v4370_v8 = vpack.c.bf16 %v14151_v16, %v14149_v32  ;;  %v14157_v10 = vmax.f32 %v14156_v59, 0.0  ;;  %v4351_v55 = vpack.c.bf16 %v14165_v57, %v14164_v1  ;;  %v14173_v32 = vld [vmem:[#allocation34_spill] sm:$0xff] }
 0x4dc   : > { %9684 = vmatmul.msk.bf16.gmra.mxu2 %vm892_vm0, %v13547_v31  ;;  %9688 = vmatmul.msk.bf16.gmra.mxu3 %vm892_vm0, %v13547_v31  ;;  %v4367_v26 = vpack.c.bf16 %v14159_v40, %v14157_v10 }
 0x4de   : > { %4609 = vmatpush.bf16.msrb.mxu2 %v4363_v0  ;;  %4639 = vmatpush.bf16.msrb.mxu3 %v4348_v7  ;;  %v14162_v0 = vld [vmem:[#allocation39_spill] sm:$0xff] }
 0x4df   : > { %v14163_v23 = vmax.f32 %v14162_v0, 0.0 }
 0x4e1   : > { %v4368_v6 = vpack.c.bf16 %v14163_v23, %v14161_v43 }
 0x4e2   : > { %4610 = vmatpush.bf16.msrb.mxu2 %v4347_v17  ;;  %v4352_v17 = vpack.c.bf16 %v14167_v35, %v14166_v50 }
 0x4e7   : > { %v4262_v21 = vpop.f32.mrf.mxu0  ;;  %v4276_v4 = vpop.f32.mrf.mxu1 }
 0x4e8   : > { %9691 = vmatmul.msk.bf16.gmra.mxu0 %vm892_vm0, %v13525_v61  ;;  %9695 = vmatmul.msk.bf16.gmra.mxu1 %vm892_vm0, %v13525_v61  ;;  %v4321_v41 = vmax.f32 %v4262_v21, 0.0  ;;  %v4322_v44 = vmax.f32 %v4276_v4, 0.0 }
 0x4ec   : > { %9685 = vmatmul.msk.bf16.gmra.mxu2 %vm892_vm0, %v13565_v5  ;;  %9689 = vmatmul.msk.bf16.gmra.mxu3 %vm892_vm0, %v13565_v5 }
 0x4ef   : > { %v4234_v63 = vpop.f32.mrf.mxu2  ;;  %v4248_v30 = vpop.f32.mrf.mxu3 }
 0x4f0   : > { %v4264_v11 = vpop.f32.mrf.mxu0  ;;  %v4278_v51 = vpop.f32.mrf.mxu1  ;;  %v4319_v60 = vmax.f32 %v4234_v63, 0.0  ;;  %v4320_v45 = vmax.f32 %v4248_v30, 0.0 }
 0x4f1   : > { %v4337_v49 = vmax.f32 %v4264_v11, 0.0  ;;  %v4338_v9 = vmax.f32 %v4278_v51, 0.0 }
 0x4f3   : > { %v4385_v48 = vpack.c.bf16 %v4337_v49, %v4321_v41  ;;  %v4386_v62 = vpack.c.bf16 %v4338_v9, %v4322_v44 }
 0x4f5   : > { %4782 = vmatpush.bf16.msrb.mxu0 %v4385_v48  ;;  %4811 = vmatpush.bf16.msrb.mxu1 %v4386_v62 }
 0x4f7   : > { %v4236_v34 = vpop.f32.mrf.mxu2  ;;  %v4250_v39 = vpop.f32.mrf.mxu3 }
 0x4f8   : > { %v4335_v42 = vmax.f32 %v4236_v34, 0.0  ;;  %v4336_v38 = vmax.f32 %v4250_v39, 0.0  ;;  %9692 = vmatmul.msk.bf16.gmra.mxu0 %vm892_vm0, %v13547_v31  ;;  %9696 = vmatmul.msk.bf16.gmra.mxu1 %vm892_vm0, %v13547_v31  ;;  %v14168_v34 = vmax.f32 %v13473_v58, 0.0  ;;  %v14169_v39 = vmax.f32 %v13485_v24, 0.0  ;;  %v14172_v58 = vld [vmem:[#allocation26_spill] sm:$0xff] }
 0x4f9   : > { %4783 = vmatpush.bf16.msrb.mxu0 %v4369_v13  ;;  %4812 = vmatpush.bf16.msrb.mxu1 %v4370_v8  ;;  %v4356_v24 = vpack.c.bf16 %v14173_v32, %v14172_v58 }
 0x4fa   : > { %v4383_v33 = vpack.c.bf16 %v4335_v42, %v4319_v60  ;;  %v4384_v36 = vpack.c.bf16 %v4336_v38, %v4320_v45  ;;  %v4371_v45 = vpack.c.bf16 %v3464_v3, %v3448_v20  ;;  %v4372_v22 = vpack.c.bf16 %v14169_v39, %v14168_v34  ;;  %v14171_v20 = vld [vmem:[#allocation33_spill] sm:$0xff] }
 0x4fb   : > { %v4355_v3 = vpack.c.bf16 %v14171_v20, %v14170_v15 }
 0x4fc   : > { %4724 = vmatpush.bf16.msra.mxu2 %v4383_v33  ;;  %4753 = vmatpush.bf16.msra.mxu3 %v4384_v36 }
 0x4fd   : > { %4784 = vmatpush.bf16.msrb.mxu0 %v4353_v28  ;;  %4813 = vmatpush.bf16.msrb.mxu1 %v4354_v12 }
 0x4fe   : > { %9698 = vmatmul.msk.bf16.vlgmr.msrb.gmra.mxu2 %vm892_vm0, %v13519_v56  ;;  %9702 = vmatmul.msk.bf16.vlgmr.msrb.gmra.mxu3 %vm892_vm0, %v13519_v56 }
 0x500   : > { %4725 = vmatpush.bf16.msra.mxu2 %v4367_v26  ;;  %4754 = vmatpush.bf16.msra.mxu3 %v4368_v6 }
 0x504   : > { %4726 = vmatpush.bf16.msra.mxu2 %v4351_v55  ;;  %4755 = vmatpush.bf16.msra.mxu3 %v4352_v17 }
 0x508   : > { %9693 = vmatmul.msk.bf16.gmra.mxu0 %vm892_vm0, %v13565_v5  ;;  %9697 = vmatmul.msk.bf16.gmra.mxu1 %vm892_vm0, %v13565_v5 }
 0x50e   : > { %9699 = vmatmul.msk.bf16.gmra.mxu2 %vm892_vm0, %v13525_v61  ;;  %9703 = vmatmul.msk.bf16.gmra.mxu3 %vm892_vm0, %v13525_v61 }
 0x511   : > { %v4290_v37 = vpop.f32.mrf.mxu2  ;;  %v4304_v53 = vpop.f32.mrf.mxu3 }
 0x512   : > { %v4323_v7 = vmax.f32 %v4290_v37, 0.0  ;;  %v4324_v21 = vmax.f32 %v4304_v53, 0.0 }
 0x514   : > { %v4438_v30 = vpop.f32.mrf.mxu0  ;;  %v4467_v11 = vpop.f32.mrf.mxu1 }
 0x515   : > { %v4957_v51 = vmax.f32 %v4438_v30, 0.0  ;;  %v4893_v49 = vpack.c.bf16 %v4467_v11, %v4438_v30  ;;  %v4958_v9 = vmax.f32 %v4467_v11, 0.0 }
 0x517   : > { %4925 = vst [vmem:[#allocation2] sm:$0xff] %v4893_v49  ;;  %v5021_v60 = vpack.c.bf16 %v4958_v9, %v4957_v51 }
 0x518   : > { %9706 = vmatmul.msk.bf16.vlgmr.msra.gmra.mxu0 %vm892_vm0, %v13519_v56  ;;  %9710 = vmatmul.msk.bf16.vlgmr.msra.gmra.mxu1 %vm892_vm0, %v13519_v56 }
 0x519   : > { %v4292_v4 = vpop.f32.mrf.mxu2  ;;  %v4306_v41 = vpop.f32.mrf.mxu3  ;;  %5053 = vst [vmem:[#allocation2 + $0x100] sm:$0xff] %v5021_v60 }
 0x51a   : > { %v4339_v44 = vmax.f32 %v4292_v4, 0.0  ;;  %v4340_v63 = vmax.f32 %v4306_v41, 0.0 }
 0x51c   : > { %v4387_v48 = vpack.c.bf16 %v4339_v44, %v4323_v7  ;;  %v4388_v62 = vpack.c.bf16 %v4340_v63, %v4324_v21  ;;  %v4440_v29 = vpop.f32.mrf.mxu0  ;;  %v4469_v14 = vpop.f32.mrf.mxu1 }
 0x51d   : > { %v4973_v13 = vmax.f32 %v4440_v29, 0.0  ;;  %v4901_v54 = vpack.c.bf16 %v4469_v14, %v4440_v29  ;;  %v4974_v18 = vmax.f32 %v4469_v14, 0.0 }
 0x51e   : > { %4840 = vmatpush.bf16.msrb.mxu2 %v4387_v48  ;;  %4869 = vmatpush.bf16.msrb.mxu3 %v4388_v62 }
 0x51f   : > { %9700 = vmatmul.msk.bf16.gmra.mxu2 %vm892_vm0, %v13547_v31  ;;  %9704 = vmatmul.msk.bf16.gmra.mxu3 %vm892_vm0, %v13547_v31  ;;  %4933 = vst [vmem:[#allocation2 + $0x40] sm:$0xff] %v4901_v54  ;;  %v5029_v19 = vpack.c.bf16 %v4974_v18, %v4973_v13 }
 0x521   : > { %5061 = vst [vmem:[#allocation2 + $0x140] sm:$0xff] %v5029_v19 }
 0x522   : > { %4841 = vmatpush.bf16.msrb.mxu2 %v4371_v45  ;;  %4870 = vmatpush.bf16.msrb.mxu3 %v4372_v22 }
 0x524   : > { %v4443_v16 = vpop.f32.mrf.mxu0  ;;  %v4472_v8 = vpop.f32.mrf.mxu1 }
 0x525   : > { %v4989_v42 = vmax.f32 %v4443_v16, 0.0  ;;  %v4909_v38 = vpack.c.bf16 %v4472_v8, %v4443_v16  ;;  %v4990_v33 = vmax.f32 %v4472_v8, 0.0 }
 0x526   : > { %4842 = vmatpush.bf16.msrb.mxu2 %v4355_v3  ;;  %4871 = vmatpush.bf16.msrb.mxu3 %v4356_v24 }
 0x527   : > { %4941 = vst [vmem:[#allocation2 + $0x80] sm:$0xff] %v4909_v38  ;;  %v5037_v36 = vpack.c.bf16 %v4990_v33, %v4989_v42 }
 0x528   : > { %9707 = vmatmul.msk.bf16.gmra.mxu0 %vm892_vm0, %v13525_v61  ;;  %9711 = vmatmul.msk.bf16.gmra.mxu1 %vm892_vm0, %v13525_v61 }
 0x529   : > { %5069 = vst [vmem:[#allocation2 + $0x180] sm:$0xff] %v5037_v36 }
 0x52c   : > { %v4445_v2 = vpop.f32.mrf.mxu0  ;;  %v4474_v46 = vpop.f32.mrf.mxu1 }
 0x52d   : > { %v5005_v28 = vmax.f32 %v4445_v2, 0.0  ;;  %v4917_v25 = vpack.c.bf16 %v4474_v46, %v4445_v2  ;;  %v5006_v47 = vmax.f32 %v4474_v46, 0.0 }
 0x52f   : > { %9701 = vmatmul.msk.bf16.gmra.mxu2 %vm892_vm0, %v13565_v5  ;;  %9705 = vmatmul.msk.bf16.gmra.mxu3 %vm892_vm0, %v13565_v5  ;;  %4949 = vst [vmem:[#allocation2 + $0xc0] sm:$0xff] %v4917_v25  ;;  %v5045_v12 = vpack.c.bf16 %v5006_v47, %v5005_v28 }
 0x531   : > { %5077 = vst [vmem:[#allocation2 + $0x1c0] sm:$0xff] %v5045_v12 }
 0x534   : > { %v4448_v59 = vpop.f32.mrf.mxu0  ;;  %v4477_v10 = vpop.f32.mrf.mxu1 }
 0x535   : > { %v5149_v52 = vmax.f32 %v4448_v59, 0.0  ;;  %v5085_v40 = vpack.c.bf16 %v4477_v10, %v4448_v59  ;;  %v5150_v26 = vmax.f32 %v4477_v10, 0.0 }
 0x537   : > { %5117 = vst [vmem:[#allocation2 + $0x200] sm:$0xff] %v5085_v40  ;;  %v5213_v27 = vpack.c.bf16 %v5150_v26, %v5149_v52 }
 0x538   : > { %9708 = vmatmul.msk.bf16.gmra.mxu0 %vm892_vm0, %v13547_v31  ;;  %9712 = vmatmul.msk.bf16.gmra.mxu1 %vm892_vm0, %v13547_v31 }
 0x539   : > { %5245 = vst [vmem:[#allocation2 + $0x300] sm:$0xff] %v5213_v27 }
 0x53c   : > { %v4450_v43 = vpop.f32.mrf.mxu0  ;;  %v4479_v0 = vpop.f32.mrf.mxu1 }
 0x53d   : > { %v5165_v23 = vmax.f32 %v4450_v43, 0.0  ;;  %v5093_v6 = vpack.c.bf16 %v4479_v0, %v4450_v43  ;;  %v5166_v1 = vmax.f32 %v4479_v0, 0.0 }
 0x53f   : > { %9714 = vmatmul.msk.bf16.vlgmr.msra.gmra.mxu2 %vm892_vm0, %v13519_v56  ;;  %9718 = vmatmul.msk.bf16.vlgmr.msra.gmra.mxu3 %vm892_vm0, %v13519_v56  ;;  %5125 = vst [vmem:[#allocation2 + $0x240] sm:$0xff] %v5093_v6  ;;  %v5221_v57 = vpack.c.bf16 %v5166_v1, %v5165_v23  ;;  %v4496_v55 = vpop.f32.mrf.mxu2  ;;  %v4525_v50 = vpop.f32.mrf.mxu3 }
 0x540   : > { %v4959_v35 = vmax.f32 %v4496_v55, 0.0  ;;  %v4894_v17 = vpack.c.bf16 %v4525_v50, %v4496_v55  ;;  %v4960_v37 = vmax.f32 %v4525_v50, 0.0  ;;  %v10132_v8 = vld [vmem:[#allocation2 + $0x300] sm:$0xf]  ;;  %v11426_v42 = vld [vmem:[#allocation2 + $0x304] sm:$0xf] }
 0x541   : > { %5253 = vst [vmem:[#allocation2 + $0x340] sm:$0xff] %v5221_v57 }
 0x542   : > { %4926 = vst [vmem:[#allocation2 + $0x8] sm:$0xff] %v4894_v17  ;;  %v5022_v53 = vpack.c.bf16 %v4960_v37, %v4959_v35 }
 0x544   : > { %5054 = vst [vmem:[#allocation2 + $0x108] sm:$0xff] %v5022_v53  ;;  %v4453_v7 = vpop.f32.mrf.mxu0  ;;  %v4482_v21 = vpop.f32.mrf.mxu1 }
 0x545   : > { %v5181_v4 = vmax.f32 %v4453_v7, 0.0  ;;  %v5101_v41 = vpack.c.bf16 %v4482_v21, %v4453_v7  ;;  %v5182_v44 = vmax.f32 %v4482_v21, 0.0 }
 0x547   : > { %5133 = vst [vmem:[#allocation2 + $0x280] sm:$0xff] %v5101_v41  ;;  %v5229_v63 = vpack.c.bf16 %v5182_v44, %v5181_v4  ;;  %v4498_v30 = vpop.f32.mrf.mxu2  ;;  %v4527_v11 = vpop.f32.mrf.mxu3  ;;  %v10004_v4 = vld [vmem:[#allocation2 + $0x200] sm:$0xf] }
 0x548   : > { %v4975_v51 = vmax.f32 %v4498_v30, 0.0  ;;  %v4902_v49 = vpack.c.bf16 %v4527_v11, %v4498_v30  ;;  %v4976_v9 = vmax.f32 %v4527_v11, 0.0  ;;  %9709 = vmatmul.msk.bf16.gmra.mxu0 %vm892_vm0, %v13565_v5  ;;  %9713 = vmatmul.msk.bf16.gmra.mxu1 %vm892_vm0, %v13565_v5  ;;  %v11434_v2 = vld [vmem:[#allocation2 + $0x33c] sm:$0xf0]  ;;  %v10134_v46 = vld [vmem:[#allocation2 + $0x340] sm:$0xf0] }
 0x549   : > { %5261 = vst [vmem:[#allocation2 + $0x380] sm:$0xff] %v5229_v63  ;;  %v10133_v26 = vor.u32 %v11434_v2, %v10132_v8  ;;  %v10137_v27 = vor.u32 %v11426_v42, %v10134_v46  ;;  %v11402_v41 = vld [vmem:[#allocation2 + $0x23c] sm:$0xf0]  ;;  %v11394_v11 = vld [vmem:[#allocation2 + $0x204] sm:$0xf] }
 0x54a   : > { %4934 = vst [vmem:[#allocation2 + $0x48] sm:$0xff] %v4902_v49  ;;  %v5030_v48 = vpack.c.bf16 %v4976_v9, %v4975_v51  ;;  %v10006_v51 = vld [vmem:[#allocation2 + $0x240] sm:$0xf0]  ;;  %v10005_v9 = vor.u32 %v11402_v41, %v10004_v4 }
 0x54b   : > { %v11362_v42 = vld [vmem:[#allocation2 + $0x104] sm:$0xf] }
 0x54c   : > { %5062 = vst [vmem:[#allocation2 + $0x148] sm:$0xff] %v5030_v48  ;;  %v4455_v62 = vpop.f32.mrf.mxu0  ;;  %v4484_v60 = vpop.f32.mrf.mxu1  ;;  %v10009_v48 = vor.u32 %v11394_v11, %v10006_v51 }
 0x54d   : > { %v5197_v45 = vmax.f32 %v4455_v62, 0.0  ;;  %v5109_v34 = vpack.c.bf16 %v4484_v60, %v4455_v62  ;;  %v5198_v39 = vmax.f32 %v4484_v60, 0.0 }
 0x54e   : > { %v10068_v43 = vld [vmem:[#allocation2 + $0x280] sm:$0xf]  ;;  %v11410_v0 = vld [vmem:[#allocation2 + $0x284] sm:$0xf] }
 0x54f   : > { %9715 = vmatmul.msk.bf16.gmra.mxu2 %vm892_vm0, %v13525_v61  ;;  %9719 = vmatmul.msk.bf16.gmra.mxu3 %vm892_vm0, %v13525_v61  ;;  %5141 = vst [vmem:[#allocation2 + $0x2c0] sm:$0xff] %v5109_v34  ;;  %v5237_v22 = vpack.c.bf16 %v5198_v39, %v5197_v45  ;;  %v4501_v29 = vpop.f32.mrf.mxu2  ;;  %v4530_v14 = vpop.f32.mrf.mxu3 }
 0x550   : > { %v4991_v13 = vmax.f32 %v4501_v29, 0.0  ;;  %v4910_v54 = vpack.c.bf16 %v4530_v14, %v4501_v29  ;;  %v4992_v18 = vmax.f32 %v4530_v14, 0.0  ;;  %v10196_v19 = vld [vmem:[#allocation2 + $0x380] sm:$0xf]  ;;  %v11442_v16 = vld [vmem:[#allocation2 + $0x384] sm:$0xf] }
 0x551   : > { %5269 = vst [vmem:[#allocation2 + $0x3c0] sm:$0xff] %v5237_v22  ;;  %v9940_v22 = vld [vmem:[#allocation2 + $0x180] sm:$0xf]  ;;  %v11378_v14 = vld [vmem:[#allocation2 + $0x184] sm:$0xf] }
 0x552   : > { %4942 = vst [vmem:[#allocation2 + $0x88] sm:$0xff] %v4910_v54  ;;  %v5038_v15 = vpack.c.bf16 %v4992_v18, %v4991_v13  ;;  %v11386_v29 = vld [vmem:[#allocation2 + $0x1bc] sm:$0xf0]  ;;  %v9942_v13 = vld [vmem:[#allocation2 + $0x1c0] sm:$0xf0] }
 0x554   : > { %5070 = vst [vmem:[#allocation2 + $0x188] sm:$0xff] %v5038_v15 }
 0x555   : > { %v4554_v20 = vpop.f32.mrf.mxu0  ;;  %v4583_v3 = vpop.f32.mrf.mxu1 }
 0x556   : > { %v4961_v58 = vmax.f32 %v4554_v20, 0.0  ;;  %v4895_v32 = vpack.c.bf16 %v4583_v3, %v4554_v20  ;;  %v4962_v24 = vmax.f32 %v4583_v3, 0.0  ;;  %v11418_v1 = vld [vmem:[#allocation2 + $0x2bc] sm:$0xf0]  ;;  %v10070_v57 = vld [vmem:[#allocation2 + $0x2c0] sm:$0xf0] }
 0x557   : > { %v4503_v33 = vpop.f32.mrf.mxu2  ;;  %v4532_v36 = vpop.f32.mrf.mxu3  ;;  %v10069_v7 = vor.u32 %v11418_v1, %v10068_v43  ;;  %v10073_v21 = vor.u32 %v11410_v0, %v10070_v57  ;;  %v9748_v57 = vld [vmem:[#allocation2] sm:$0xf] }
 0x558   : > { %4927 = vst [vmem:[#allocation2 + $0x10] sm:$0xff] %v4895_v32  ;;  %v5023_v38 = vpack.c.bf16 %v4962_v24, %v4961_v58  ;;  %v5007_v28 = vmax.f32 %v4503_v33, 0.0  ;;  %v4918_v25 = vpack.c.bf16 %v4532_v36, %v4503_v33  ;;  %v5008_v47 = vmax.f32 %v4532_v36, 0.0  ;;  %9722 = vmatmul.msk.bf16.vlgmr.msrb.gmra.mxu0 %vm892_vm0, %v13519_v56  ;;  %9726 = vmatmul.msk.bf16.vlgmr.msrb.gmra.mxu1 %vm892_vm0, %v13519_v56  ;;  %v11450_v12 = vld [vmem:[#allocation2 + $0x3bc] sm:$0xf0] }
 0x559   : > { %v10198_v59 = vld [vmem:[#allocation2 + $0x3c0] sm:$0xf0]  ;;  %v10197_v10 = vor.u32 %v11450_v12, %v10196_v19  ;;  %v9941_v32 = vor.u32 %v11386_v29, %v9940_v22  ;;  %v9945_v24 = vor.u32 %v11378_v14, %v9942_v13  ;;  %v9876_v19 = vld [vmem:[#allocation2 + $0x100] sm:$0xf] }
 0x55a   : > { %5055 = vst [vmem:[#allocation2 + $0x110] sm:$0xff] %v5023_v38  ;;  %v10201_v52 = vor.u32 %v11442_v16, %v10198_v59  ;;  %v5046_v40 = vpack.c.bf16 %v5008_v47, %v5007_v28  ;;  %v11370_v16 = vld [vmem:[#allocation2 + $0x13c] sm:$0xf0]  ;;  %v9878_v38 = vld [vmem:[#allocation2 + $0x140] sm:$0xf0] }
 0x55b   : > { %4950 = vst [vmem:[#allocation2 + $0xc8] sm:$0xff] %v4918_v25  ;;  %6061 = vmatpush.bf16.msra.mxu0 %v10197_v10  ;;  %v9877_v2 = vor.u32 %v11370_v16, %v9876_v19  ;;  %v9881_v47 = vor.u32 %v11362_v42, %v9878_v38  ;;  %v9812_v12 = vld [vmem:[#allocation2 + $0x80] sm:$0xf]  ;;  %v11346_v10 = vld [vmem:[#allocation2 + $0x84] sm:$0xf] }
 0x55c   : > { %6080 = vmatpush.bf16.msra.mxu1 %v10201_v52  ;;  %5078 = vst [vmem:[#allocation2 + $0x1c8] sm:$0xff] %v5046_v40  ;;  %v11354_v59 = vld [vmem:[#allocation2 + $0xbc] sm:$0xf0]  ;;  %v9814_v52 = vld [vmem:[#allocation2 + $0xc0] sm:$0xf0] }
 0x55d   : > { %v4556_v23 = vpop.f32.mrf.mxu0  ;;  %v4585_v6 = vpop.f32.mrf.mxu1  ;;  %v9817_v1 = vor.u32 %v11346_v10, %v9814_v52 }
 0x55e   : > { %v4977_v55 = vmax.f32 %v4556_v23, 0.0  ;;  %v4903_v50 = vpack.c.bf16 %v4585_v6, %v4556_v23  ;;  %v4978_v35 = vmax.f32 %v4585_v6, 0.0  ;;  %v9813_v6 = vor.u32 %v11354_v59, %v9812_v12 }
 0x55f   : > { %9716 = vmatmul.msk.bf16.gmra.mxu2 %vm892_vm0, %v13547_v31  ;;  %9720 = vmatmul.msk.bf16.gmra.mxu3 %vm892_vm0, %v13547_v31  ;;  %v4506_v37 = vpop.f32.mrf.mxu2  ;;  %v4535_v53 = vpop.f32.mrf.mxu3 }
 0x560   : > { %4935 = vst [vmem:[#allocation2 + $0x50] sm:$0xff] %v4903_v50  ;;  %v5031_v17 = vpack.c.bf16 %v4978_v35, %v4977_v55  ;;  %6062 = vmatpush.bf16.msra.mxu0 %v10133_v26  ;;  %6081 = vmatpush.bf16.msra.mxu1 %v10137_v27  ;;  %v5151_v44 = vmax.f32 %v4506_v37, 0.0  ;;  %v5086_v63 = vpack.c.bf16 %v4535_v53, %v4506_v37  ;;  %v5152_v30 = vmax.f32 %v4535_v53, 0.0  ;;  %v11338_v55 = vld [vmem:[#allocation2 + $0x3c] sm:$0xf0] }
 0x561   : > { %v11330_v35 = vld [vmem:[#allocation2 + $0x4] sm:$0xf] }
 0x562   : > { %5063 = vst [vmem:[#allocation2 + $0x150] sm:$0xff] %v5031_v17  ;;  %v5214_v49 = vpack.c.bf16 %v5152_v30, %v5151_v44  ;;  %v9750_v17 = vld [vmem:[#allocation2 + $0x40] sm:$0xf0] }
 0x563   : > { %5118 = vst [vmem:[#allocation2 + $0x208] sm:$0xff] %v5086_v63 }
 0x564   : > { %6063 = vmatpush.bf16.msra.mxu0 %v10069_v7  ;;  %6082 = vmatpush.bf16.msra.mxu1 %v10073_v21  ;;  %5246 = vst [vmem:[#allocation2 + $0x308] sm:$0xff] %v5214_v49  ;;  %v9749_v7 = vor.u32 %v11338_v55, %v9748_v57  ;;  %v9753_v21 = vor.u32 %v11330_v35, %v9750_v17 }
 0x565   : > { %v4559_v62 = vpop.f32.mrf.mxu0  ;;  %v4588_v60 = vpop.f32.mrf.mxu1 }
 0x566   : > { %v4993_v45 = vmax.f32 %v4559_v62, 0.0  ;;  %v4911_v34 = vpack.c.bf16 %v4588_v60, %v4559_v62  ;;  %v4994_v39 = vmax.f32 %v4588_v60, 0.0 }
 0x567   : > { %v4508_v18 = vpop.f32.mrf.mxu2  ;;  %v4537_v15 = vpop.f32.mrf.mxu3 }
 0x568   : > { %4943 = vst [vmem:[#allocation2 + $0x90] sm:$0xff] %v4911_v34  ;;  %v5039_v54 = vpack.c.bf16 %v4994_v39, %v4993_v45  ;;  %6064 = vmatpush.bf16.msra.mxu0 %v10005_v9  ;;  %6083 = vmatpush.bf16.msra.mxu1 %v10009_v48  ;;  %v5167_v20 = vmax.f32 %v4508_v18, 0.0  ;;  %v5094_v3 = vpack.c.bf16 %v4537_v15, %v4508_v18  ;;  %v5168_v58 = vmax.f32 %v4537_v15, 0.0 }
 0x569   : > { %9723 = vmatmul.msk.bf16.gmra.mxu0 %vm892_vm0, %v13525_v61  ;;  %9727 = vmatmul.msk.bf16.gmra.mxu1 %vm892_vm0, %v13525_v61 }
 0x56a   : > { %5071 = vst [vmem:[#allocation2 + $0x190] sm:$0xff] %v5039_v54  ;;  %v5222_v8 = vpack.c.bf16 %v5168_v58, %v5167_v20 }
 0x56b   : > { %5126 = vst [vmem:[#allocation2 + $0x248] sm:$0xff] %v5094_v3 }
 0x56c   : > { %6065 = vmatpush.bf16.msra.mxu0 %v9941_v32  ;;  %6084 = vmatpush.bf16.msra.mxu1 %v9945_v24  ;;  %5254 = vst [vmem:[#allocation2 + $0x348] sm:$0xff] %v5222_v8 }
 0x56d   : > { %v4561_v33 = vpop.f32.mrf.mxu0  ;;  %v4590_v36 = vpop.f32.mrf.mxu1 }
 0x56e   : > { %v5009_v46 = vmax.f32 %v4561_v33, 0.0  ;;  %v4919_v28 = vpack.c.bf16 %v4590_v36, %v4561_v33  ;;  %v5010_v25 = vmax.f32 %v4590_v36, 0.0 }
 0x56f   : > { %9717 = vmatmul.msk.bf16.gmra.mxu2 %vm892_vm0, %v13565_v5  ;;  %9721 = vmatmul.msk.bf16.gmra.mxu3 %vm892_vm0, %v13565_v5  ;;  %v4511_v26 = vpop.f32.mrf.mxu2  ;;  %v4540_v27 = vpop.f32.mrf.mxu3 }
 0x570   : > { %4951 = vst [vmem:[#allocation2 + $0xd0] sm:$0xff] %v4919_v28  ;;  %v5047_v40 = vpack.c.bf16 %v5010_v25, %v5009_v46  ;;  %6066 = vmatpush.bf16.msra.mxu0 %v9877_v2  ;;  %6085 = vmatpush.bf16.msra.mxu1 %v9881_v47  ;;  %v5183_v43 = vmax.f32 %v4511_v26, 0.0  ;;  %v5102_v0 = vpack.c.bf16 %v4540_v27, %v4511_v26  ;;  %v5184_v23 = vmax.f32 %v4540_v27, 0.0  ;;  %v10140_v2 = vld [vmem:[#allocation2 + $0x308] sm:$0xf] }
 0x571   : > { %v11427_v46 = vld [vmem:[#allocation2 + $0x30c] sm:$0xf] }
 0x572   : > { %5079 = vst [vmem:[#allocation2 + $0x1d0] sm:$0xff] %v5047_v40  ;;  %v5230_v50 = vpack.c.bf16 %v5184_v23, %v5183_v43  ;;  %v11403_v57 = vld [vmem:[#allocation2 + $0x244] sm:$0xf0]  ;;  %v10014_v55 = vld [vmem:[#allocation2 + $0x248] sm:$0xf0] }
 0x573   : > { %5134 = vst [vmem:[#allocation2 + $0x288] sm:$0xff] %v5102_v0  ;;  %v11435_v19 = vld [vmem:[#allocation2 + $0x344] sm:$0xf0]  ;;  %v10142_v16 = vld [vmem:[#allocation2 + $0x348] sm:$0xf0] }
 0x574   : > { %6067 = vmatpush.bf16.msra.mxu0 %v9813_v6  ;;  %6086 = vmatpush.bf16.msra.mxu1 %v9817_v1  ;;  %5262 = vst [vmem:[#allocation2 + $0x388] sm:$0xff] %v5230_v50  ;;  %v10141_v47 = vor.u32 %v11435_v19, %v10140_v2  ;;  %v10145_v12 = vor.u32 %v11427_v46, %v10142_v16 }
 0x575   : > { %v4564_v37 = vpop.f32.mrf.mxu0  ;;  %v4593_v53 = vpop.f32.mrf.mxu1 }
 0x576   : > { %v5153_v4 = vmax.f32 %v4564_v37, 0.0  ;;  %v5087_v41 = vpack.c.bf16 %v4593_v53, %v4564_v37  ;;  %v5154_v44 = vmax.f32 %v4593_v53, 0.0 }
 0x577   : > { %v4513_v63 = vpop.f32.mrf.mxu2  ;;  %v4542_v30 = vpop.f32.mrf.mxu3 }
 0x578   : > { %6068 = vmatpush.bf16.msra.mxu0 %v9749_v7  ;;  %6087 = vmatpush.bf16.msra.mxu1 %v9753_v21  ;;  %5119 = vst [vmem:[#allocation2 + $0x210] sm:$0xff] %v5087_v41  ;;  %v5215_v11 = vpack.c.bf16 %v5154_v44, %v5153_v4  ;;  %v5199_v51 = vmax.f32 %v4513_v63, 0.0  ;;  %v5110_v49 = vpack.c.bf16 %v4542_v30, %v4513_v63  ;;  %v5200_v9 = vmax.f32 %v4542_v30, 0.0  ;;  %v10012_v7 = vld [vmem:[#allocation2 + $0x208] sm:$0xf] }
 0x579   : > { %9724 = vmatmul.msk.bf16.gmra.mxu0 %vm892_vm0, %v13547_v31  ;;  %9728 = vmatmul.msk.bf16.gmra.mxu1 %vm892_vm0, %v13547_v31  ;;  %v11395_v21 = vld [vmem:[#allocation2 + $0x20c] sm:$0xf]  ;;  %v10013_v44 = vor.u32 %v11403_v57, %v10012_v7  ;;  %v11339_v57 = vld [vmem:[#allocation2 + $0x44] sm:$0xf0] }
 0x57a   : > { %5247 = vst [vmem:[#allocation2 + $0x310] sm:$0xff] %v5215_v11  ;;  %v5238_v48 = vpack.c.bf16 %v5200_v9, %v5199_v51  ;;  %v10076_v0 = vld [vmem:[#allocation2 + $0x288] sm:$0xf]  ;;  %v11411_v23 = vld [vmem:[#allocation2 + $0x28c] sm:$0xf]  ;;  %v10017_v63 = vor.u32 %v11395_v21, %v10014_v55 }
 0x57b   : > { %5142 = vst [vmem:[#allocation2 + $0x2c8] sm:$0xff] %v5110_v49  ;;  %v10204_v20 = vld [vmem:[#allocation2 + $0x388] sm:$0xf]  ;;  %v11443_v3 = vld [vmem:[#allocation2 + $0x38c] sm:$0xf] }
 0x57c   : > { %5270 = vst [vmem:[#allocation2 + $0x3c8] sm:$0xff] %v5238_v48  ;;  %v11387_v49 = vld [vmem:[#allocation2 + $0x1c4] sm:$0xf0]  ;;  %v9950_v9 = vld [vmem:[#allocation2 + $0x1c8] sm:$0xf0] }
 0x57d   : > { %v4566_v62 = vpop.f32.mrf.mxu0  ;;  %v4595_v60 = vpop.f32.mrf.mxu1  ;;  %v9758_v55 = vld [vmem:[#allocation2 + $0x48] sm:$0xf0] }
 0x57e   : > { %v5169_v45 = vmax.f32 %v4566_v62, 0.0  ;;  %v5095_v34 = vpack.c.bf16 %v4595_v60, %v4566_v62  ;;  %v5170_v39 = vmax.f32 %v4595_v60, 0.0  ;;  %v9948_v62 = vld [vmem:[#allocation2 + $0x188] sm:$0xf]  ;;  %v11379_v60 = vld [vmem:[#allocation2 + $0x18c] sm:$0xf] }
 0x57f   : > { %9730 = vmatmul.msk.bf16.vlgmr.msrb.gmra.mxu2 %vm892_vm0, %v13519_v56  ;;  %9734 = vmatmul.msk.bf16.vlgmr.msrb.gmra.mxu3 %vm892_vm0, %v13519_v56 }
 0x580   : > { %5127 = vst [vmem:[#allocation2 + $0x250] sm:$0xff] %v5095_v34  ;;  %v5223_v14 = vpack.c.bf16 %v5170_v39, %v5169_v45  ;;  %v11371_v45 = vld [vmem:[#allocation2 + $0x144] sm:$0xf0]  ;;  %v9886_v34 = vld [vmem:[#allocation2 + $0x148] sm:$0xf0]  ;;  %v9949_v39 = vor.u32 %v11387_v49, %v9948_v62 }
 0x581   : > { %v4612_v22 = vpop.f32.mrf.mxu2  ;;  %v4641_v29 = vpop.f32.mrf.mxu3 }
 0x582   : > { %v4963_v13 = vmax.f32 %v4612_v22, 0.0  ;;  %v4896_v54 = vpack.c.bf16 %v4641_v29, %v4612_v22  ;;  %v4964_v18 = vmax.f32 %v4641_v29, 0.0  ;;  %5255 = vst [vmem:[#allocation2 + $0x350] sm:$0xff] %v5223_v14  ;;  %v11419_v26 = vld [vmem:[#allocation2 + $0x2c4] sm:$0xf0]  ;;  %v9953_v22 = vor.u32 %v11379_v60, %v9950_v9 }
 0x583   : > { %v11451_v58 = vld [vmem:[#allocation2 + $0x3c4] sm:$0xf0]  ;;  %v10206_v32 = vld [vmem:[#allocation2 + $0x3c8] sm:$0xf0]  ;;  %v10077_v6 = vor.u32 %v11419_v26, %v10076_v0  ;;  %v9740_v29 = vld [vmem:[#allocation8 + $0x20] sm:$0xf] }
 0x584   : > { %v5024_v15 = vpack.c.bf16 %v4964_v18, %v4963_v13  ;;  %4928 = vst [vmem:[#allocation2 + $0x18] sm:$0xff] %v4896_v54  ;;  %v10205_v56 = vor.u32 %v11451_v58, %v10204_v20  ;;  %v10209_v24 = vor.u32 %v11443_v3, %v10206_v32  ;;  %v10078_v27 = vld [vmem:[#allocation2 + $0x2c8] sm:$0xf0]  ;;  %v9884_v58 = vld [vmem:[#allocation2 + $0x108] sm:$0xf] }
 0x585   : > { %v4569_v8 = vpop.f32.mrf.mxu0  ;;  %v4598_v42 = vpop.f32.mrf.mxu1  ;;  %v10081_v1 = vor.u32 %v11411_v23, %v10078_v27  ;;  %v11328_v14 = vld [vmem:[#allocation8 + $0x48] sm:$0xf0]  ;;  %v9885_v19 = vor.u32 %v11371_v45, %v9884_v58 }
 0x586   : > { %5056 = vst [vmem:[#allocation2 + $0x118] sm:$0xff] %v5024_v15  ;;  %v5185_v38 = vmax.f32 %v4569_v8, 0.0  ;;  %v5103_v33 = vpack.c.bf16 %v4598_v42, %v4569_v8  ;;  %v5186_v36 = vmax.f32 %v4598_v42, 0.0  ;;  %6099 = vmatpush.bf16.msra.mxu2 %v10205_v56  ;;  %6118 = vmatpush.bf16.msra.mxu3 %v10209_v24  ;;  %v13731_v18 = vor.u32 %v11328_v14, %v9740_v29  ;;  %v11363_v32 = vld [vmem:[#allocation2 + $0x10c] sm:$0xf] }
 0x587   : > { %v9889_v16 = vor.u32 %v11363_v32, %v9886_v34  ;;  %v11347_v0 = vld [vmem:[#allocation2 + $0x8c] sm:$0xf]  ;;  %v10020_v34 = vld [vmem:[#allocation2 + $0x210] sm:$0xf]  ;;  %v11396_v29 = vld [vmem:[#allocation2 + $0x214] sm:$0xf] }
 0x588   : > { %5135 = vst [vmem:[#allocation2 + $0x290] sm:$0xff] %v5103_v33  ;;  %v5231_v59 = vpack.c.bf16 %v5186_v36, %v5185_v38  ;;  %v11355_v38 = vld [vmem:[#allocation2 + $0xc4] sm:$0xf0]  ;;  %v9822_v33 = vld [vmem:[#allocation2 + $0xc8] sm:$0xf0] }
 0x589   : > { %v4614_v28 = vpop.f32.mrf.mxu2  ;;  %v4643_v25 = vpop.f32.mrf.mxu3  ;;  %9725 = vmatmul.msk.bf16.gmra.mxu0 %vm892_vm0, %v13565_v5  ;;  %9729 = vmatmul.msk.bf16.gmra.mxu1 %vm892_vm0, %v13565_v5  ;;  %v11436_v26 = vld [vmem:[#allocation2 + $0x34c] sm:$0xf0]  ;;  %v10150_v27 = vld [vmem:[#allocation2 + $0x350] sm:$0xf0] }
 0x58a   : > { %v4979_v10 = vmax.f32 %v4614_v28, 0.0  ;;  %v4904_v52 = vpack.c.bf16 %v4643_v25, %v4614_v28  ;;  %v4980_v40 = vmax.f32 %v4643_v25, 0.0  ;;  %5263 = vst [vmem:[#allocation2 + $0x390] sm:$0xff] %v5231_v59  ;;  %6100 = vmatpush.bf16.msra.mxu2 %v10141_v47  ;;  %6119 = vmatpush.bf16.msra.mxu3 %v10145_v12  ;;  %v10148_v25 = vld [vmem:[#allocation2 + $0x310] sm:$0xf] }
 0x58b   : > { %v11428_v59 = vld [vmem:[#allocation2 + $0x314] sm:$0xf] }
 0x58c   : > { %v5032_v43 = vpack.c.bf16 %v4980_v40, %v4979_v10  ;;  %4936 = vst [vmem:[#allocation2 + $0x58] sm:$0xff] %v4904_v52  ;;  %v10022_v14 = vld [vmem:[#allocation2 + $0x250] sm:$0xf0] }
 0x58d   : > { %v4571_v50 = vpop.f32.mrf.mxu0  ;;  %v4600_v35 = vpop.f32.mrf.mxu1  ;;  %v10025_v58 = vor.u32 %v11396_v29, %v10022_v14 }
 0x58e   : > { %5064 = vst [vmem:[#allocation2 + $0x158] sm:$0xff] %v5032_v43  ;;  %v5201_v17 = vmax.f32 %v4571_v50, 0.0  ;;  %v5111_v37 = vpack.c.bf16 %v4600_v35, %v4571_v50  ;;  %v5202_v53 = vmax.f32 %v4600_v35, 0.0  ;;  %6101 = vmatpush.bf16.msra.mxu2 %v10077_v6  ;;  %6120 = vmatpush.bf16.msra.mxu3 %v10081_v1  ;;  %v9820_v43 = vld [vmem:[#allocation2 + $0x88] sm:$0xf]  ;;  %v9825_v6 = vor.u32 %v11347_v0, %v9822_v33 }
 0x58f   : > { %9731 = vmatmul.msk.bf16.gmra.mxu2 %vm892_vm0, %v13525_v61  ;;  %9735 = vmatmul.msk.bf16.gmra.mxu3 %vm892_vm0, %v13525_v61  ;;  %v9821_v23 = vor.u32 %v11355_v38, %v9820_v43  ;;  %v9756_v1 = vld [vmem:[#allocation2 + $0x8] sm:$0xf]  ;;  %v10084_v7 = vld [vmem:[#allocation2 + $0x290] sm:$0xf]  ;;  %v11412_v21 = vld [vmem:[#allocation2 + $0x294] sm:$0xf] }
 0x590   : > { %5143 = vst [vmem:[#allocation2 + $0x2d0] sm:$0xff] %v5111_v37  ;;  %v5239_v30 = vpack.c.bf16 %v5202_v53, %v5201_v17  ;;  %v10149_v17 = vor.u32 %v11436_v26, %v10148_v25  ;;  %v10153_v37 = vor.u32 %v11428_v59, %v10150_v27  ;;  %v11331_v53 = vld [vmem:[#allocation2 + $0xc] sm:$0xf]  ;;  %v11388_v38 = vld [vmem:[#allocation2 + $0x1cc] sm:$0xf0] }
 0x591   : > { %v4617_v4 = vpop.f32.mrf.mxu2  ;;  %v4646_v41 = vpop.f32.mrf.mxu3  ;;  %v10212_v8 = vld [vmem:[#allocation2 + $0x390] sm:$0xf]  ;;  %v11444_v42 = vld [vmem:[#allocation2 + $0x394] sm:$0xf] }
 0x592   : > { %v4995_v61 = vmax.f32 %v4617_v4, 0.0  ;;  %v4912_v11 = vpack.c.bf16 %v4646_v41, %v4617_v4  ;;  %v4996_v51 = vmax.f32 %v4646_v41, 0.0  ;;  %5271 = vst [vmem:[#allocation2 + $0x3d0] sm:$0xff] %v5239_v30  ;;  %6102 = vmatpush.bf16.msra.mxu2 %v10013_v44  ;;  %6121 = vmatpush.bf16.msra.mxu3 %v10017_v63  ;;  %v11380_v33 = vld [vmem:[#allocation2 + $0x194] sm:$0xf] }
 0x593   : > { %v9958_v25 = vld [vmem:[#allocation2 + $0x1d0] sm:$0xf0] }
 0x594   : > { %v5040_v48 = vpack.c.bf16 %v4996_v51, %v4995_v61  ;;  %4944 = vst [vmem:[#allocation2 + $0x98] sm:$0xff] %v4912_v11  ;;  %v9757_v11 = vor.u32 %v11339_v57, %v9756_v1  ;;  %v9761_v51 = vor.u32 %v11331_v53, %v9758_v55  ;;  %v9961_v59 = vor.u32 %v11380_v33, %v9958_v25  ;;  %v9894_v26 = vld [vmem:[#allocation2 + $0x150] sm:$0xf0] }
 0x595   : > { %v4670_v13 = vpop.f32.mrf.mxu0  ;;  %v4699_v54 = vpop.f32.mrf.mxu1 }
 0x596   : > { %5072 = vst [vmem:[#allocation2 + $0x198] sm:$0xff] %v5040_v48  ;;  %v4965_v15 = vmax.f32 %v4670_v13, 0.0  ;;  %v4897_v20 = vpack.c.bf16 %v4699_v54, %v4670_v13  ;;  %v4966_v3 = vmax.f32 %v4699_v54, 0.0  ;;  %6103 = vmatpush.bf16.msra.mxu2 %v9949_v39  ;;  %6122 = vmatpush.bf16.msra.mxu3 %v9953_v22  ;;  %v11404_v39 = vld [vmem:[#allocation2 + $0x24c] sm:$0xf0] }
 0x597   : > { %v10086_v63 = vld [vmem:[#allocation2 + $0x2d0] sm:$0xf0]  ;;  %v9744_v13 = vld [vmem:[#allocation8 + $0x78] sm:$0xf]  ;;  %v11329_v54 = vld [vmem:[#allocation8 + $0xa0] sm:$0xf0] }
 0x598   : > { %4929 = vst [vmem:[#allocation2 + $0x20] sm:$0xff] %v4897_v20  ;;  %v5025_v36 = vpack.c.bf16 %v4966_v3, %v4965_v15  ;;  %v10089_v45 = vor.u32 %v11412_v21, %v10086_v63  ;;  %v10021_v3 = vor.u32 %v11404_v39, %v10020_v34  ;;  %v13739_v32 = vor.u32 %v11329_v54, %v9744_v13  ;;  %v9764_v63 = vld [vmem:[#allocation2 + $0x10] sm:$0xf] }
 0x599   : > { %v4619_v56 = vpop.f32.mrf.mxu2  ;;  %v4648_v24 = vpop.f32.mrf.mxu3  ;;  %6069 = vmatmul.bf16.vlgmr.msra.gmra.mxu0 %v13731_v18  ;;  %6088 = vmatmul.bf16.vlgmr.msra.gmra.mxu1 %v13731_v18  ;;  %v11452_v47 = vld [vmem:[#allocation2 + $0x3cc] sm:$0xf0]  ;;  %v10214_v12 = vld [vmem:[#allocation2 + $0x3d0] sm:$0xf0] }
 0x59a   : > { %v5011_v2 = vmax.f32 %v4619_v56, 0.0  ;;  %v4920_v46 = vpack.c.bf16 %v4648_v24, %v4619_v56  ;;  %v5012_v28 = vmax.f32 %v4648_v24, 0.0  ;;  %5057 = vst [vmem:[#allocation2 + $0x120] sm:$0xff] %v5025_v36  ;;  %6104 = vmatpush.bf16.msra.mxu2 %v9885_v19  ;;  %6123 = vmatpush.bf16.msra.mxu3 %v9889_v16  ;;  %v10213_v52 = vor.u32 %v11452_v47, %v10212_v8 }
 0x59b   : > { %v10217_v40 = vor.u32 %v11444_v42, %v10214_v12  ;;  %v9956_v42 = vld [vmem:[#allocation2 + $0x190] sm:$0xf] }
 0x59c   : > { %v5048_v10 = vpack.c.bf16 %v5012_v28, %v5011_v2  ;;  %4952 = vst [vmem:[#allocation2 + $0xd8] sm:$0xff] %v4920_v46  ;;  %6137 = vmatpush.bf16.msrb.mxu0 %v10213_v52  ;;  %v9957_v12 = vor.u32 %v11388_v38, %v9956_v42  ;;  %v11372_v52 = vld [vmem:[#allocation2 + $0x14c] sm:$0xf0] }
 0x59d   : > { %6156 = vmatpush.bf16.msrb.mxu1 %v10217_v40  ;;  %v4672_v50 = vpop.f32.mrf.mxu0  ;;  %v4701_v35 = vpop.f32.mrf.mxu1  ;;  %v11364_v40 = vld [vmem:[#allocation2 + $0x114] sm:$0xf] }
 0x59e   : > { %5080 = vst [vmem:[#allocation2 + $0x1d8] sm:$0xff] %v5048_v10  ;;  %v4981_v4 = vmax.f32 %v4672_v50, 0.0  ;;  %v4905_v41 = vpack.c.bf16 %v4701_v35, %v4672_v50  ;;  %v4982_v44 = vmax.f32 %v4701_v35, 0.0  ;;  %6105 = vmatpush.bf16.msra.mxu2 %v9821_v23  ;;  %6124 = vmatpush.bf16.msra.mxu3 %v9825_v6  ;;  %v9892_v10 = vld [vmem:[#allocation2 + $0x110] sm:$0xf]  ;;  %v9897_v50 = vor.u32 %v11364_v40, %v9894_v26 }
 0x59f   : > { %9732 = vmatmul.msk.bf16.gmra.mxu2 %vm892_vm0, %v13547_v31  ;;  %9736 = vmatmul.msk.bf16.gmra.mxu3 %vm892_vm0, %v13547_v31  ;;  %v11420_v31 = vld [vmem:[#allocation2 + $0x2cc] sm:$0xf0]  ;;  %v9893_v55 = vor.u32 %v11372_v52, %v9892_v10 }
 0x5a0   : > { %4937 = vst [vmem:[#allocation2 + $0x60] sm:$0xff] %v4905_v41  ;;  %v5033_v49 = vpack.c.bf16 %v4982_v44, %v4981_v4  ;;  %6138 = vmatpush.bf16.msrb.mxu0 %v10149_v17  ;;  %v10085_v60 = vor.u32 %v11420_v31, %v10084_v7  ;;  %v9828_v35 = vld [vmem:[#allocation2 + $0x90] sm:$0xf]  ;;  %v9830_v4 = vld [vmem:[#allocation2 + $0xd0] sm:$0xf0] }
 0x5a1   : > { %6157 = vmatpush.bf16.msrb.mxu1 %v10153_v37  ;;  %v11356_v17 = vld [vmem:[#allocation2 + $0xcc] sm:$0xf0]  ;;  %v11348_v37 = vld [vmem:[#allocation2 + $0x94] sm:$0xf] }
 0x5a2   : > { %v4622_v30 = vpop.f32.mrf.mxu2  ;;  %v4651_v61 = vpop.f32.mrf.mxu3  ;;  %5065 = vst [vmem:[#allocation2 + $0x160] sm:$0xff] %v5033_v49  ;;  %6106 = vmatpush.bf16.msra.mxu2 %v9757_v11  ;;  %6125 = vmatpush.bf16.msra.mxu3 %v9761_v51  ;;  %v9829_v44 = vor.u32 %v11356_v17, %v9828_v35  ;;  %v9833_v31 = vor.u32 %v11348_v37, %v9830_v4  ;;  %v9766_v11 = vld [vmem:[#allocation2 + $0x50] sm:$0xf0] }
 0x5a3   : > { %v5155_v9 = vmax.f32 %v4622_v30, 0.0  ;;  %v5088_v48 = vpack.c.bf16 %v4651_v61, %v4622_v30  ;;  %v5156_v62 = vmax.f32 %v4651_v61, 0.0  ;;  %v11340_v30 = vld [vmem:[#allocation2 + $0x4c] sm:$0xf0]  ;;  %v11332_v61 = vld [vmem:[#allocation2 + $0x14] sm:$0xf] }
 0x5a4   : > { %6139 = vmatpush.bf16.msrb.mxu0 %v10085_v60  ;;  %v9765_v34 = vor.u32 %v11340_v30, %v9764_v63  ;;  %v9769_v39 = vor.u32 %v11332_v61, %v9766_v11 }
 0x5a5   : > { %v5216_v22 = vpack.c.bf16 %v5156_v62, %v5155_v9  ;;  %5120 = vst [vmem:[#allocation2 + $0x218] sm:$0xff] %v5088_v48  ;;  %6158 = vmatpush.bf16.msrb.mxu1 %v10089_v45  ;;  %v4675_v15 = vpop.f32.mrf.mxu0  ;;  %v4704_v20 = vpop.f32.mrf.mxu1 }
 0x5a6   : > { %v4997_v56 = vmax.f32 %v4675_v15, 0.0  ;;  %v4913_v24 = vpack.c.bf16 %v4704_v20, %v4675_v15  ;;  %v4998_v19 = vmax.f32 %v4704_v20, 0.0 }
 0x5a7   : > { %5248 = vst [vmem:[#allocation2 + $0x318] sm:$0xff] %v5216_v22 }
 0x5a8   : > { %4945 = vst [vmem:[#allocation2 + $0xa0] sm:$0xff] %v4913_v24  ;;  %v5041_v36 = vpack.c.bf16 %v4998_v19, %v4997_v56  ;;  %6140 = vmatpush.bf16.msrb.mxu0 %v10021_v3 }
 0x5a9   : > { %6074 = vmatmul.bf16.gmra.mxu0 %v13739_v32  ;;  %6093 = vmatmul.bf16.gmra.mxu1 %v13739_v32 }
 0x5aa   : > { %v4624_v16 = vpop.f32.mrf.mxu2  ;;  %v4653_v8 = vpop.f32.mrf.mxu3  ;;  %6159 = vmatpush.bf16.msrb.mxu1 %v10025_v58  ;;  %5073 = vst [vmem:[#allocation2 + $0x1a0] sm:$0xff] %v5041_v36 }
 0x5ab   : > { %v5171_v2 = vmax.f32 %v4624_v16, 0.0  ;;  %v5096_v46 = vpack.c.bf16 %v4653_v8, %v4624_v16  ;;  %v5172_v28 = vmax.f32 %v4653_v8, 0.0 }
 0x5ac   : > { %6141 = vmatpush.bf16.msrb.mxu0 %v9957_v12 }
 0x5ad   : > { %v5224_v47 = vpack.c.bf16 %v5172_v28, %v5171_v2  ;;  %5128 = vst [vmem:[#allocation2 + $0x258] sm:$0xff] %v5096_v46  ;;  %v4677_v27 = vpop.f32.mrf.mxu0  ;;  %v4706_v43 = vpop.f32.mrf.mxu1 }
 0x5ae   : > { %6160 = vmatpush.bf16.msrb.mxu1 %v9961_v59  ;;  %v5013_v0 = vmax.f32 %v4677_v27, 0.0  ;;  %v4921_v23 = vpack.c.bf16 %v4706_v43, %v4677_v27  ;;  %v5014_v6 = vmax.f32 %v4706_v43, 0.0  ;;  %v10156_v43 = vld [vmem:[#allocation2 + $0x318] sm:$0xf] }
 0x5af   : > { %5256 = vst [vmem:[#allocation2 + $0x358] sm:$0xff] %v5224_v47  ;;  %9733 = vmatmul.msk.bf16.gmra.mxu2 %vm892_vm0, %v13565_v5  ;;  %9737 = vmatmul.msk.bf16.gmra.mxu3 %vm892_vm0, %v13565_v5 }
 0x5b0   : > { %4953 = vst [vmem:[#allocation2 + $0xe0] sm:$0xff] %v4921_v23  ;;  %v5049_v53 = vpack.c.bf16 %v5014_v6, %v5013_v0  ;;  %6142 = vmatpush.bf16.msrb.mxu0 %v9893_v55  ;;  %v11429_v0 = vld [vmem:[#allocation2 + $0x31c] sm:$0xf] }
 0x5b2   : > { %v4627_v1 = vpop.f32.mrf.mxu2  ;;  %v4656_v57 = vpop.f32.mrf.mxu3  ;;  %6161 = vmatpush.bf16.msrb.mxu1 %v9897_v50  ;;  %5081 = vst [vmem:[#allocation2 + $0x1e0] sm:$0xff] %v5049_v53 }
 0x5b3   : > { %v5187_v7 = vmax.f32 %v4627_v1, 0.0  ;;  %v5104_v5 = vpack.c.bf16 %v4656_v57, %v4627_v1  ;;  %v5188_v21 = vmax.f32 %v4656_v57, 0.0 }
 0x5b4   : > { %6143 = vmatpush.bf16.msrb.mxu0 %v9829_v44  ;;  %v11405_v44 = vld [vmem:[#allocation2 + $0x254] sm:$0xf0] }
 0x5b5   : > { %v5232_v41 = vpack.c.bf16 %v5188_v21, %v5187_v7  ;;  %5136 = vst [vmem:[#allocation2 + $0x298] sm:$0xff] %v5104_v5  ;;  %v4680_v51 = vpop.f32.mrf.mxu0  ;;  %v4709_v49 = vpop.f32.mrf.mxu1 }
 0x5b6   : > { %6162 = vmatpush.bf16.msrb.mxu1 %v9833_v31  ;;  %v5157_v9 = vmax.f32 %v4680_v51, 0.0  ;;  %v5089_v48 = vpack.c.bf16 %v4709_v49, %v4680_v51  ;;  %v5158_v62 = vmax.f32 %v4709_v49, 0.0  ;;  %v11437_v12 = vld [vmem:[#allocation2 + $0x354] sm:$0xf0]  ;;  %v10158_v59 = vld [vmem:[#allocation2 + $0x358] sm:$0xf0] }
 0x5b7   : > { %5264 = vst [vmem:[#allocation2 + $0x398] sm:$0xff] %v5232_v41  ;;  %v10157_v1 = vor.u32 %v11437_v12, %v10156_v43  ;;  %v10161_v57 = vor.u32 %v11429_v0, %v10158_v59  ;;  %v10030_v31 = vld [vmem:[#allocation2 + $0x258] sm:$0xf0]  ;;  %v10028_v49 = vld [vmem:[#allocation2 + $0x218] sm:$0xf] }
 0x5b8   : > { %5121 = vst [vmem:[#allocation2 + $0x220] sm:$0xff] %v5089_v48  ;;  %v5217_v22 = vpack.c.bf16 %v5158_v62, %v5157_v9  ;;  %6144 = vmatpush.bf16.msrb.mxu0 %v9765_v34  ;;  %v11397_v9 = vld [vmem:[#allocation2 + $0x21c] sm:$0xf] }
 0x5ba   : > { %v4629_v60 = vpop.f32.mrf.mxu2  ;;  %v4658_v45 = vpop.f32.mrf.mxu3  ;;  %6163 = vmatpush.bf16.msrb.mxu1 %v9769_v39  ;;  %5249 = vst [vmem:[#allocation2 + $0x320] sm:$0xff] %v5217_v22 }
 0x5bb   : > { %v5203_v29 = vmax.f32 %v4629_v60, 0.0  ;;  %v5112_v14 = vpack.c.bf16 %v4658_v45, %v4629_v60  ;;  %v5204_v13 = vmax.f32 %v4658_v45, 0.0  ;;  %6145 = vmatmul.bf16.vlgmr.msrb.gmra.mxu0 %v13731_v18  ;;  %v10029_v60 = vor.u32 %v11405_v44, %v10028_v49 }
 0x5bc   : > { %v10092_v5 = vld [vmem:[#allocation2 + $0x298] sm:$0xf]  ;;  %v11413_v21 = vld [vmem:[#allocation2 + $0x29c] sm:$0xf]  ;;  %v10033_v45 = vor.u32 %v11397_v9, %v10030_v31 }
 0x5bd   : > { %v5240_v54 = vpack.c.bf16 %v5204_v13, %v5203_v29  ;;  %5144 = vst [vmem:[#allocation2 + $0x2d8] sm:$0xff] %v5112_v14  ;;  %v4682_v15 = vpop.f32.mrf.mxu0  ;;  %v4711_v20 = vpop.f32.mrf.mxu1  ;;  %6164 = vmatmul.bf16.vlgmr.msrb.gmra.mxu1 %v13731_v18  ;;  %v11389_v14 = vld [vmem:[#allocation2 + $0x1d4] sm:$0xf0]  ;;  %v9966_v13 = vld [vmem:[#allocation2 + $0x1d8] sm:$0xf0] }
 0x5be   : > { %v5173_v3 = vmax.f32 %v4682_v15, 0.0  ;;  %v5097_v58 = vpack.c.bf16 %v4711_v20, %v4682_v15  ;;  %v5174_v56 = vmax.f32 %v4711_v20, 0.0  ;;  %v10220_v36 = vld [vmem:[#allocation2 + $0x398] sm:$0xf]  ;;  %v11445_v2 = vld [vmem:[#allocation2 + $0x39c] sm:$0xf] }
 0x5bf   : > { %5272 = vst [vmem:[#allocation2 + $0x3d8] sm:$0xff] %v5240_v54  ;;  %6107 = vmatmul.bf16.vlgmr.msra.gmra.mxu2 %v13731_v18  ;;  %6126 = vmatmul.bf16.vlgmr.msra.gmra.mxu3 %v13731_v18  ;;  %v9964_v15 = vld [vmem:[#allocation2 + $0x198] sm:$0xf]  ;;  %v11381_v20 = vld [vmem:[#allocation2 + $0x19c] sm:$0xf] }
 0x5c0   : > { %5129 = vst [vmem:[#allocation2 + $0x260] sm:$0xff] %v5097_v58  ;;  %v5225_v16 = vpack.c.bf16 %v5174_v56, %v5173_v3  ;;  %v9965_v3 = vor.u32 %v11389_v14, %v9964_v15  ;;  %v9969_v58 = vor.u32 %v11381_v20, %v9966_v13  ;;  %v11373_v56 = vld [vmem:[#allocation2 + $0x154] sm:$0xf0]  ;;  %v10036_v20 = vld [vmem:[#allocation2 + $0x220] sm:$0xf] }
 0x5c2   : > { %v4728_v24 = vpop.f32.mrf.mxu2  ;;  %v4757_v19 = vpop.f32.mrf.mxu3  ;;  %5257 = vst [vmem:[#allocation2 + $0x360] sm:$0xff] %v5225_v16 }
 0x5c3   : > { %v4967_v8 = vmax.f32 %v4728_v24, 0.0  ;;  %v4898_v42 = vpack.c.bf16 %v4757_v19, %v4728_v24  ;;  %v4968_v38 = vmax.f32 %v4757_v19, 0.0  ;;  %v9902_v24 = vld [vmem:[#allocation2 + $0x158] sm:$0xf0] }
 0x5c4   : > { %v11421_v37 = vld [vmem:[#allocation2 + $0x2d4] sm:$0xf0]  ;;  %v10094_v53 = vld [vmem:[#allocation2 + $0x2d8] sm:$0xf0] }
 0x5c5   : > { %v5026_v33 = vpack.c.bf16 %v4968_v38, %v4967_v8  ;;  %4930 = vst [vmem:[#allocation2 + $0x28] sm:$0xff] %v4898_v42  ;;  %v4685_v10 = vpop.f32.mrf.mxu0  ;;  %v4714_v52 = vpop.f32.mrf.mxu1  ;;  %v10093_v4 = vor.u32 %v11421_v37, %v10092_v5  ;;  %v10097_v41 = vor.u32 %v11413_v21, %v10094_v53  ;;  %v9900_v8 = vld [vmem:[#allocation2 + $0x118] sm:$0xf] }
 0x5c6   : > { %v11453_v46 = vld [vmem:[#allocation2 + $0x3d4] sm:$0xf0]  ;;  %v10222_v28 = vld [vmem:[#allocation2 + $0x3d8] sm:$0xf0]  ;;  %v5189_v40 = vmax.f32 %v4685_v10, 0.0  ;;  %v5105_v26 = vpack.c.bf16 %v4714_v52, %v4685_v10  ;;  %v5190_v27 = vmax.f32 %v4714_v52, 0.0 }
 0x5c7   : > { %5058 = vst [vmem:[#allocation2 + $0x128] sm:$0xff] %v5026_v33  ;;  %v10221_v25 = vor.u32 %v11453_v46, %v10220_v36  ;;  %v10225_v47 = vor.u32 %v11445_v2, %v10222_v28  ;;  %v11365_v36 = vld [vmem:[#allocation2 + $0x11c] sm:$0xf]  ;;  %v11357_v2 = vld [vmem:[#allocation2 + $0xd4] sm:$0xf0] }
 0x5c8   : > { %5137 = vst [vmem:[#allocation2 + $0x2a0] sm:$0xff] %v5105_v26  ;;  %v5233_v55 = vpack.c.bf16 %v5190_v27, %v5189_v40  ;;  %v9838_v10 = vld [vmem:[#allocation2 + $0xd8] sm:$0xf0]  ;;  %v10164_v52 = vld [vmem:[#allocation2 + $0x320] sm:$0xf] }
 0x5c9   : > { %6175 = vmatpush.bf16.msrb.mxu2 %v10221_v25  ;;  %6194 = vmatpush.bf16.msrb.mxu3 %v10225_v47  ;;  %v9901_v25 = vor.u32 %v11373_v56, %v9900_v8  ;;  %v9905_v47 = vor.u32 %v11365_v36, %v9902_v24  ;;  %v11430_v40 = vld [vmem:[#allocation2 + $0x324] sm:$0xf]  ;;  %v11341_v53 = vld [vmem:[#allocation2 + $0x54] sm:$0xf0] }
 0x5ca   : > { %v4730_v23 = vpop.f32.mrf.mxu2  ;;  %v4759_v6 = vpop.f32.mrf.mxu3  ;;  %5265 = vst [vmem:[#allocation2 + $0x3a0] sm:$0xff] %v5233_v55  ;;  %v11349_v55 = vld [vmem:[#allocation2 + $0x9c] sm:$0xf]  ;;  %v10038_v56 = vld [vmem:[#allocation2 + $0x260] sm:$0xf0] }
 0x5cb   : > { %v4983_v50 = vmax.f32 %v4730_v23, 0.0  ;;  %v4906_v35 = vpack.c.bf16 %v4759_v6, %v4730_v23  ;;  %v4984_v17 = vmax.f32 %v4759_v6, 0.0  ;;  %6150 = vmatmul.bf16.gmra.mxu0 %v13739_v32  ;;  %v9836_v23 = vld [vmem:[#allocation2 + $0x98] sm:$0xf]  ;;  %v11438_v6 = vld [vmem:[#allocation2 + $0x35c] sm:$0xf0] }
 0x5cc   : > { %v9837_v5 = vor.u32 %v11357_v2, %v9836_v23  ;;  %v10165_v44 = vor.u32 %v11438_v6, %v10164_v52  ;;  %v9972_v2 = vld [vmem:[#allocation2 + $0x1a0] sm:$0xf]  ;;  %v11366_v6 = vld [vmem:[#allocation2 + $0x124] sm:$0xf] }
 0x5cd   : > { %v5034_v7 = vpack.c.bf16 %v4984_v17, %v4983_v50  ;;  %6176 = vmatpush.bf16.msrb.mxu2 %v10157_v1  ;;  %6195 = vmatpush.bf16.msrb.mxu3 %v10161_v57  ;;  %4938 = vst [vmem:[#allocation2 + $0x68] sm:$0xff] %v4906_v35  ;;  %v4687_v63 = vpop.f32.mrf.mxu0  ;;  %v4716_v30 = vpop.f32.mrf.mxu1  ;;  %v10166_v50 = vld [vmem:[#allocation2 + $0x360] sm:$0xf0]  ;;  %v11374_v23 = vld [vmem:[#allocation2 + $0x15c] sm:$0xf0] }
 0x5ce   : > { %6169 = vmatmul.bf16.gmra.mxu1 %v13739_v32  ;;  %v5205_v61 = vmax.f32 %v4687_v63, 0.0  ;;  %v5113_v11 = vpack.c.bf16 %v4716_v30, %v4687_v63  ;;  %v5206_v51 = vmax.f32 %v4716_v30, 0.0  ;;  %v10169_v31 = vor.u32 %v11430_v40, %v10166_v50 }
 0x5cf   : > { %5066 = vst [vmem:[#allocation2 + $0x168] sm:$0xff] %v5034_v7  ;;  %6112 = vmatmul.bf16.gmra.mxu2 %v13739_v32  ;;  %6131 = vmatmul.bf16.gmra.mxu3 %v13739_v32  ;;  %v9774_v7 = vld [vmem:[#allocation2 + $0x58] sm:$0xf0]  ;;  %v10100_v21 = vld [vmem:[#allocation2 + $0x2a0] sm:$0xf] }
 0x5d0   : > { %5145 = vst [vmem:[#allocation2 + $0x2e0] sm:$0xff] %v5113_v11  ;;  %v5241_v34 = vpack.c.bf16 %v5206_v51, %v5205_v61 }
 0x5d1   : > { %6177 = vmatpush.bf16.msrb.mxu2 %v10093_v4  ;;  %6196 = vmatpush.bf16.msrb.mxu3 %v10097_v41  ;;  %v10228_v12 = vld [vmem:[#allocation2 + $0x3a0] sm:$0xf]  ;;  %v11446_v59 = vld [vmem:[#allocation2 + $0x3a4] sm:$0xf]  ;;  %v9841_v41 = vor.u32 %v11349_v55, %v9838_v10 }
 0x5d2   : > { %v4733_v48 = vpop.f32.mrf.mxu2  ;;  %v4762_v62 = vpop.f32.mrf.mxu3  ;;  %5273 = vst [vmem:[#allocation2 + $0x3e0] sm:$0xff] %v5241_v34  ;;  %v11414_v4 = vld [vmem:[#allocation2 + $0x2a4] sm:$0xf] }
 0x5d3   : > { %v4999_v39 = vmax.f32 %v4733_v48, 0.0  ;;  %v4914_v22 = vpack.c.bf16 %v4762_v62, %v4733_v48  ;;  %v5000_v29 = vmax.f32 %v4762_v62, 0.0  ;;  %v9772_v48 = vld [vmem:[#allocation2 + $0x18] sm:$0xf]  ;;  %v11333_v62 = vld [vmem:[#allocation2 + $0x1c] sm:$0xf] }
 0x5d4   : > { %v9773_v34 = vor.u32 %v11341_v53, %v9772_v48  ;;  %v11342_v48 = vld [vmem:[#allocation2 + $0x5c] sm:$0xf0] }
 0x5d5   : > { %v5042_v54 = vpack.c.bf16 %v5000_v29, %v4999_v39  ;;  %6178 = vmatpush.bf16.msrb.mxu2 %v10029_v60  ;;  %6197 = vmatpush.bf16.msrb.mxu3 %v10033_v45  ;;  %4946 = vst [vmem:[#allocation2 + $0xa8] sm:$0xff] %v4914_v22  ;;  %v4786_v19 = vpop.f32.mrf.mxu0  ;;  %v4815_v16 = vpop.f32.mrf.mxu1  ;;  %v9777_v39 = vor.u32 %v11333_v62, %v9774_v7  ;;  %v9844_v7 = vld [vmem:[#allocation2 + $0xa0] sm:$0xf]  ;;  %v11334_v62 = vld [vmem:[#allocation2 + $0x24] sm:$0xf] }
 0x5d6   : > { %v4969_v42 = vmax.f32 %v4786_v19, 0.0  ;;  %v4899_v38 = vpack.c.bf16 %v4815_v16, %v4786_v19  ;;  %v4970_v33 = vmax.f32 %v4815_v16, 0.0 }
 0x5d7   : > { %5074 = vst [vmem:[#allocation2 + $0x1a8] sm:$0xff] %v5042_v54  ;;  %v11422_v63 = vld [vmem:[#allocation2 + $0x2dc] sm:$0xf0]  ;;  %v10102_v30 = vld [vmem:[#allocation2 + $0x2e0] sm:$0xf0] }
 0x5d8   : > { %4931 = vst [vmem:[#allocation2 + $0x30] sm:$0xff] %v4899_v38  ;;  %v5027_v26 = vpack.c.bf16 %v4970_v33, %v4969_v42  ;;  %v10101_v22 = vor.u32 %v11422_v63, %v10100_v21  ;;  %v10105_v29 = vor.u32 %v11414_v4, %v10102_v30  ;;  %v11358_v4 = vld [vmem:[#allocation2 + $0xdc] sm:$0xf0] }
 0x5d9   : > { %6179 = vmatpush.bf16.msrb.mxu2 %v9965_v3  ;;  %6198 = vmatpush.bf16.msrb.mxu3 %v9969_v58  ;;  %v11454_v1 = vld [vmem:[#allocation2 + $0x3dc] sm:$0xf0]  ;;  %v10230_v57 = vld [vmem:[#allocation2 + $0x3e0] sm:$0xf0] }
 0x5da   : > { %v4735_v46 = vpop.f32.mrf.mxu2  ;;  %v4764_v28 = vpop.f32.mrf.mxu3  ;;  %5059 = vst [vmem:[#allocation2 + $0x130] sm:$0xff] %v5027_v26  ;;  %v10229_v17 = vor.u32 %v11454_v1, %v10228_v12  ;;  %v10233_v37 = vor.u32 %v11446_v59, %v10230_v57  ;;  %v11406_v3 = vld [vmem:[#allocation2 + $0x25c] sm:$0xf0]  ;;  %v11398_v58 = vld [vmem:[#allocation2 + $0x224] sm:$0xf] }
 0x5db   : > { %v5015_v27 = vmax.f32 %v4735_v46, 0.0  ;;  %v4922_v43 = vpack.c.bf16 %v4764_v28, %v4735_v46  ;;  %v5016_v0 = vmax.f32 %v4764_v28, 0.0  ;;  %v10037_v19 = vor.u32 %v11406_v3, %v10036_v20  ;;  %v9974_v12 = vld [vmem:[#allocation2 + $0x1e0] sm:$0xf0] }
 0x5dc   : > { %6213 = vmatpush.bf16.msra.mxu0 %v10229_v17  ;;  %6232 = vmatpush.bf16.msra.mxu1 %v10233_v37  ;;  %v10041_v16 = vor.u32 %v11398_v58, %v10038_v56  ;;  %v9910_v1 = vld [vmem:[#allocation2 + $0x160] sm:$0xf0] }
 0x5dd   : > { %v5050_v35 = vpack.c.bf16 %v5016_v0, %v5015_v27  ;;  %6180 = vmatpush.bf16.msrb.mxu2 %v9901_v25  ;;  %6199 = vmatpush.bf16.msrb.mxu3 %v9905_v47  ;;  %4954 = vst [vmem:[#allocation2 + $0xe8] sm:$0xff] %v4922_v43  ;;  %v4788_v61 = vpop.f32.mrf.mxu0  ;;  %v4817_v11 = vpop.f32.mrf.mxu1  ;;  %v11390_v25 = vld [vmem:[#allocation2 + $0x1dc] sm:$0xf0]  ;;  %v11382_v47 = vld [vmem:[#allocation2 + $0x1a4] sm:$0xf]  ;;  %v9913_v53 = vor.u32 %v11366_v6, %v9910_v1 }
 0x5de   : > { %v4985_v51 = vmax.f32 %v4788_v61, 0.0  ;;  %v4907_v49 = vpack.c.bf16 %v4817_v11, %v4788_v61  ;;  %v4986_v9 = vmax.f32 %v4817_v11, 0.0  ;;  %v9973_v27 = vor.u32 %v11390_v25, %v9972_v2  ;;  %v9908_v0 = vld [vmem:[#allocation2 + $0x120] sm:$0xf] }
 0x5df   : > { %5082 = vst [vmem:[#allocation2 + $0x1e8] sm:$0xff] %v5050_v35  ;;  %v9977_v43 = vor.u32 %v11382_v47, %v9974_v12  ;;  %v9909_v50 = vor.u32 %v11374_v23, %v9908_v0 }
 0x5e0   : > { %4939 = vst [vmem:[#allocation2 + $0x70] sm:$0xff] %v4907_v49  ;;  %v5035_v14 = vpack.c.bf16 %v4986_v9, %v4985_v51  ;;  %6214 = vmatpush.bf16.msra.mxu0 %v10165_v44  ;;  %6233 = vmatpush.bf16.msra.mxu1 %v10169_v31  ;;  %v9846_v44 = vld [vmem:[#allocation2 + $0xe0] sm:$0xf0]  ;;  %v9845_v51 = vor.u32 %v11358_v4, %v9844_v7  ;;  %v9780_v9 = vld [vmem:[#allocation2 + $0x20] sm:$0xf] }
 0x5e1   : > { %6181 = vmatpush.bf16.msrb.mxu2 %v9837_v5  ;;  %6200 = vmatpush.bf16.msrb.mxu3 %v9841_v41  ;;  %v11350_v41 = vld [vmem:[#allocation2 + $0xa4] sm:$0xf] }
 0x5e2   : > { %v4738_v60 = vpop.f32.mrf.mxu2  ;;  %v4767_v45 = vpop.f32.mrf.mxu3  ;;  %5067 = vst [vmem:[#allocation2 + $0x170] sm:$0xff] %v5035_v14  ;;  %v9849_v49 = vor.u32 %v11350_v41, %v9846_v44 }
 0x5e3   : > { %v5159_v13 = vmax.f32 %v4738_v60, 0.0  ;;  %v5090_v54 = vpack.c.bf16 %v4767_v45, %v4738_v60  ;;  %v5160_v15 = vmax.f32 %v4767_v45, 0.0  ;;  %v9782_v60 = vld [vmem:[#allocation2 + $0x60] sm:$0xf0] }
 0x5e4   : > { %6215 = vmatpush.bf16.msra.mxu0 %v10101_v22  ;;  %6234 = vmatpush.bf16.msra.mxu1 %v10105_v29 }
 0x5e5   : > { %v5218_v24 = vpack.c.bf16 %v5160_v15, %v5159_v13  ;;  %6182 = vmatpush.bf16.msrb.mxu2 %v9773_v34  ;;  %6201 = vmatpush.bf16.msrb.mxu3 %v9777_v39  ;;  %5122 = vst [vmem:[#allocation2 + $0x228] sm:$0xff] %v5090_v54  ;;  %v9781_v39 = vor.u32 %v11342_v48, %v9780_v9 }
 0x5e6   : > { %v4791_v8 = vpop.f32.mrf.mxu0  ;;  %v4820_v42 = vpop.f32.mrf.mxu1  ;;  %v9785_v13 = vor.u32 %v11334_v62, %v9782_v60 }
 0x5e7   : > { %5250 = vst [vmem:[#allocation2 + $0x328] sm:$0xff] %v5218_v24  ;;  %v5001_v38 = vmax.f32 %v4791_v8, 0.0  ;;  %v4915_v33 = vpack.c.bf16 %v4820_v42, %v4791_v8  ;;  %v5002_v36 = vmax.f32 %v4820_v42, 0.0 }
 0x5e8   : > { %6183 = vmatmul.bf16.vlgmr.msrb.gmra.mxu2 %v13731_v18  ;;  %6202 = vmatmul.bf16.vlgmr.msrb.gmra.mxu3 %v13731_v18 }
 0x5e9   : > { %4947 = vst [vmem:[#allocation2 + $0xb0] sm:$0xff] %v4915_v33  ;;  %v5043_v59 = vpack.c.bf16 %v5002_v36, %v5001_v38  ;;  %6216 = vmatpush.bf16.msra.mxu0 %v10037_v19  ;;  %6235 = vmatpush.bf16.msra.mxu1 %v10041_v16 }
 0x5ea   : > { %v4740_v46 = vpop.f32.mrf.mxu2  ;;  %v4769_v28 = vpop.f32.mrf.mxu3 }
 0x5eb   : > { %v5175_v10 = vmax.f32 %v4740_v46, 0.0  ;;  %v5098_v52 = vpack.c.bf16 %v4769_v28, %v4740_v46  ;;  %v5176_v40 = vmax.f32 %v4769_v28, 0.0  ;;  %5075 = vst [vmem:[#allocation2 + $0x1b0] sm:$0xff] %v5043_v59 }
 0x5ed   : > { %v5226_v26 = vpack.c.bf16 %v5176_v40, %v5175_v10  ;;  %5130 = vst [vmem:[#allocation2 + $0x268] sm:$0xff] %v5098_v52  ;;  %6217 = vmatpush.bf16.msra.mxu0 %v9973_v27  ;;  %6236 = vmatpush.bf16.msra.mxu1 %v9977_v43 }
 0x5ee   : > { %v4793_v57 = vpop.f32.mrf.mxu0  ;;  %v4822_v55 = vpop.f32.mrf.mxu1 }
 0x5ef   : > { %5258 = vst [vmem:[#allocation2 + $0x368] sm:$0xff] %v5226_v26  ;;  %v5017_v35 = vmax.f32 %v4793_v57, 0.0  ;;  %v4923_v17 = vpack.c.bf16 %v4822_v55, %v4793_v57  ;;  %v5018_v37 = vmax.f32 %v4822_v55, 0.0  ;;  %v10172_v55 = vld [vmem:[#allocation2 + $0x328] sm:$0xf] }
 0x5f1   : > { %4955 = vst [vmem:[#allocation2 + $0xf0] sm:$0xff] %v4923_v17  ;;  %v5051_v31 = vpack.c.bf16 %v5018_v37, %v5017_v35  ;;  %6218 = vmatpush.bf16.msra.mxu0 %v9909_v50  ;;  %6237 = vmatpush.bf16.msra.mxu1 %v9913_v53  ;;  %v11431_v50 = vld [vmem:[#allocation2 + $0x32c] sm:$0xf] }
 0x5f2   : > { %v4743_v5 = vpop.f32.mrf.mxu2  ;;  %v4772_v21 = vpop.f32.mrf.mxu3 }
 0x5f3   : > { %v5191_v63 = vmax.f32 %v4743_v5, 0.0  ;;  %v5106_v30 = vpack.c.bf16 %v4772_v21, %v4743_v5  ;;  %v5192_v61 = vmax.f32 %v4772_v21, 0.0  ;;  %5083 = vst [vmem:[#allocation2 + $0x1f0] sm:$0xff] %v5051_v31 }
 0x5f5   : > { %v5234_v11 = vpack.c.bf16 %v5192_v61, %v5191_v63  ;;  %5138 = vst [vmem:[#allocation2 + $0x2a8] sm:$0xff] %v5106_v30  ;;  %6219 = vmatpush.bf16.msra.mxu0 %v9845_v51  ;;  %6238 = vmatpush.bf16.msra.mxu1 %v9849_v49  ;;  %v11407_v51 = vld [vmem:[#allocation2 + $0x264] sm:$0xf0]  ;;  %v10046_v49 = vld [vmem:[#allocation2 + $0x268] sm:$0xf0] }
 0x5f6   : > { %v4796_v45 = vpop.f32.mrf.mxu0  ;;  %v4825_v34 = vpop.f32.mrf.mxu1  ;;  %v11439_v27 = vld [vmem:[#allocation2 + $0x364] sm:$0xf0]  ;;  %v10174_v43 = vld [vmem:[#allocation2 + $0x368] sm:$0xf0] }
 0x5f7   : > { %5266 = vst [vmem:[#allocation2 + $0x3a8] sm:$0xff] %v5234_v11  ;;  %v5161_v22 = vmax.f32 %v4796_v45, 0.0  ;;  %v5091_v29 = vpack.c.bf16 %v4825_v34, %v4796_v45  ;;  %v5162_v14 = vmax.f32 %v4825_v34, 0.0  ;;  %v10173_v37 = vor.u32 %v11439_v27, %v10172_v55  ;;  %v10044_v34 = vld [vmem:[#allocation2 + $0x228] sm:$0xf] }
 0x5f8   : > { %6188 = vmatmul.bf16.gmra.mxu2 %v13739_v32  ;;  %6207 = vmatmul.bf16.gmra.mxu3 %v13739_v32  ;;  %v10177_v53 = vor.u32 %v11431_v50, %v10174_v43  ;;  %v9854_v43 = vld [vmem:[#allocation2 + $0xe8] sm:$0xf0]  ;;  %v9852_v50 = vld [vmem:[#allocation2 + $0xa8] sm:$0xf] }
 0x5f9   : > { %5123 = vst [vmem:[#allocation2 + $0x230] sm:$0xff] %v5091_v29  ;;  %v5219_v20 = vpack.c.bf16 %v5162_v14, %v5161_v22  ;;  %6220 = vmatpush.bf16.msra.mxu0 %v9781_v39  ;;  %6239 = vmatpush.bf16.msra.mxu1 %v9785_v13  ;;  %v11399_v39 = vld [vmem:[#allocation2 + $0x22c] sm:$0xf]  ;;  %v10045_v14 = vor.u32 %v11407_v51, %v10044_v34 }
 0x5fa   : > { %v4745_v54 = vpop.f32.mrf.mxu2  ;;  %v4774_v15 = vpop.f32.mrf.mxu3  ;;  %v10049_v13 = vor.u32 %v11399_v39, %v10046_v49  ;;  %v11335_v34 = vld [vmem:[#allocation2 + $0x2c] sm:$0xf] }
 0x5fb   : > { %v5207_v3 = vmax.f32 %v4745_v54, 0.0  ;;  %v5114_v58 = vpack.c.bf16 %v4774_v15, %v4745_v54  ;;  %v5208_v56 = vmax.f32 %v4774_v15, 0.0  ;;  %5251 = vst [vmem:[#allocation2 + $0x330] sm:$0xff] %v5219_v20 }
 0x5fc   : > { %6221 = vmatmul.bf16.vlgmr.msra.gmra.mxu0 %v13731_v18  ;;  %6240 = vmatmul.bf16.vlgmr.msra.gmra.mxu1 %v13731_v18  ;;  %v10108_v63 = vld [vmem:[#allocation2 + $0x2a8] sm:$0xf]  ;;  %v11415_v30 = vld [vmem:[#allocation2 + $0x2ac] sm:$0xf] }
 0x5fd   : > { %v5242_v24 = vpack.c.bf16 %v5208_v56, %v5207_v3  ;;  %5146 = vst [vmem:[#allocation2 + $0x2e8] sm:$0xff] %v5114_v58  ;;  %v11391_v58 = vld [vmem:[#allocation2 + $0x1e4] sm:$0xf0]  ;;  %v9982_v56 = vld [vmem:[#allocation2 + $0x1e8] sm:$0xf0] }
 0x5fe   : > { %v4798_v19 = vpop.f32.mrf.mxu0  ;;  %v4827_v16 = vpop.f32.mrf.mxu1  ;;  %v10236_v12 = vld [vmem:[#allocation2 + $0x3a8] sm:$0xf]  ;;  %v11447_v59 = vld [vmem:[#allocation2 + $0x3ac] sm:$0xf] }
 0x5ff   : > { %5274 = vst [vmem:[#allocation2 + $0x3e8] sm:$0xff] %v5242_v24  ;;  %v5177_v8 = vmax.f32 %v4798_v19, 0.0  ;;  %v5099_v42 = vpack.c.bf16 %v4827_v16, %v4798_v19  ;;  %v5178_v38 = vmax.f32 %v4827_v16, 0.0  ;;  %v9980_v19 = vld [vmem:[#allocation2 + $0x1a8] sm:$0xf] }
 0x600   : > { %v11383_v16 = vld [vmem:[#allocation2 + $0x1ac] sm:$0xf] }
 0x601   : > { %5131 = vst [vmem:[#allocation2 + $0x270] sm:$0xff] %v5099_v42  ;;  %v5227_v2 = vpack.c.bf16 %v5178_v38, %v5177_v8  ;;  %v9981_v8 = vor.u32 %v11391_v58, %v9980_v19  ;;  %v9985_v42 = vor.u32 %v11383_v16, %v9982_v56  ;;  %v11375_v38 = vld [vmem:[#allocation2 + $0x164] sm:$0xf0]  ;;  %v10052_v58 = vld [vmem:[#allocation2 + $0x230] sm:$0xf] }
 0x602   : > { %v4844_v33 = vpop.f32.mrf.mxu2  ;;  %v4873_v36 = vpop.f32.mrf.mxu3 }
 0x603   : > { %v4971_v46 = vmax.f32 %v4844_v33, 0.0  ;;  %v4900_v28 = vpack.c.bf16 %v4873_v36, %v4844_v33  ;;  %v4972_v25 = vmax.f32 %v4873_v36, 0.0  ;;  %5259 = vst [vmem:[#allocation2 + $0x370] sm:$0xff] %v5227_v2  ;;  %v9916_v33 = vld [vmem:[#allocation2 + $0x128] sm:$0xf] }
 0x604   : > { %v11423_v41 = vld [vmem:[#allocation2 + $0x2e4] sm:$0xf0]  ;;  %v10110_v44 = vld [vmem:[#allocation2 + $0x2e8] sm:$0xf0] }
 0x605   : > { %v5028_v47 = vpack.c.bf16 %v4972_v25, %v4971_v46  ;;  %4932 = vst [vmem:[#allocation2 + $0x38] sm:$0xff] %v4900_v28  ;;  %v10109_v61 = vor.u32 %v11423_v41, %v10108_v63  ;;  %v10113_v11 = vor.u32 %v11415_v30, %v10110_v44  ;;  %v9918_v36 = vld [vmem:[#allocation2 + $0x168] sm:$0xf0]  ;;  %v11359_v25 = vld [vmem:[#allocation2 + $0xe4] sm:$0xf0] }
 0x606   : > { %v11455_v10 = vld [vmem:[#allocation2 + $0x3e4] sm:$0xf0]  ;;  %v10238_v52 = vld [vmem:[#allocation2 + $0x3e8] sm:$0xf0]  ;;  %v4801_v0 = vpop.f32.mrf.mxu0  ;;  %v4830_v23 = vpop.f32.mrf.mxu1  ;;  %v9853_v63 = vor.u32 %v11359_v25, %v9852_v50  ;;  %v9988_v25 = vld [vmem:[#allocation2 + $0x1b0] sm:$0xf] }
 0x607   : > { %5060 = vst [vmem:[#allocation2 + $0x138] sm:$0xff] %v5028_v47  ;;  %v10237_v40 = vor.u32 %v11455_v10, %v10236_v12  ;;  %v10241_v26 = vor.u32 %v11447_v59, %v10238_v52  ;;  %v5193_v6 = vmax.f32 %v4801_v0, 0.0  ;;  %v5107_v1 = vpack.c.bf16 %v4830_v23, %v4801_v0  ;;  %v11367_v28 = vld [vmem:[#allocation2 + $0x12c] sm:$0xf]  ;;  %v10180_v0 = vld [vmem:[#allocation2 + $0x330] sm:$0xf] }
 0x608   : > { %v5194_v57 = vmax.f32 %v4830_v23, 0.0  ;;  %v11432_v23 = vld [vmem:[#allocation2 + $0x334] sm:$0xf]  ;;  %v9921_v55 = vor.u32 %v11367_v28, %v9918_v36  ;;  %v11343_v44 = vld [vmem:[#allocation2 + $0x64] sm:$0xf0] }
 0x609   : > { %6251 = vmatpush.bf16.msra.mxu2 %v10237_v40  ;;  %6270 = vmatpush.bf16.msra.mxu3 %v10241_v26  ;;  %5139 = vst [vmem:[#allocation2 + $0x2b0] sm:$0xff] %v5107_v1  ;;  %v9917_v40 = vor.u32 %v11375_v38, %v9916_v33  ;;  %v11408_v16 = vld [vmem:[#allocation2 + $0x26c] sm:$0xf0]  ;;  %v10054_v38 = vld [vmem:[#allocation2 + $0x270] sm:$0xf0] }
 0x60a   : > { %v4846_v35 = vpop.f32.mrf.mxu2  ;;  %v4875_v17 = vpop.f32.mrf.mxu3  ;;  %v5235_v7 = vpack.c.bf16 %v5194_v57, %v5193_v6  ;;  %v10053_v36 = vor.u32 %v11408_v16, %v10052_v58  ;;  %v9924_v50 = vld [vmem:[#allocation2 + $0x130] sm:$0xf] }
 0x60b   : > { %v4987_v5 = vmax.f32 %v4846_v35, 0.0  ;;  %v4908_v21 = vpack.c.bf16 %v4875_v17, %v4846_v35  ;;  %v4988_v4 = vmax.f32 %v4875_v17, 0.0  ;;  %v11440_v35 = vld [vmem:[#allocation2 + $0x36c] sm:$0xf0] }
 0x60c   : > { %5267 = vst [vmem:[#allocation2 + $0x3b0] sm:$0xff] %v5235_v7  ;;  %6226 = vmatmul.bf16.gmra.mxu0 %v13739_v32  ;;  %6245 = vmatmul.bf16.gmra.mxu1 %v13739_v32  ;;  %v10182_v7 = vld [vmem:[#allocation2 + $0x370] sm:$0xf0]  ;;  %v10181_v51 = vor.u32 %v11440_v35, %v10180_v0  ;;  %v11376_v35 = vld [vmem:[#allocation2 + $0x16c] sm:$0xf0] }
 0x60d   : > { %v5036_v31 = vpack.c.bf16 %v4988_v4, %v4987_v5  ;;  %6252 = vmatpush.bf16.msra.mxu2 %v10173_v37  ;;  %6271 = vmatpush.bf16.msra.mxu3 %v10177_v53  ;;  %4940 = vst [vmem:[#allocation2 + $0x78] sm:$0xff] %v4908_v21  ;;  %v11351_v53 = vld [vmem:[#allocation2 + $0xac] sm:$0xf]  ;;  %v10185_v49 = vor.u32 %v11432_v23, %v10182_v7 }
 0x60e   : > { %v4803_v9 = vpop.f32.mrf.mxu0  ;;  %v4832_v48 = vpop.f32.mrf.mxu1 }
 0x60f   : > { %5068 = vst [vmem:[#allocation2 + $0x178] sm:$0xff] %v5036_v31  ;;  %v5209_v62 = vmax.f32 %v4803_v9, 0.0  ;;  %v5115_v60 = vpack.c.bf16 %v4832_v48, %v4803_v9  ;;  %v5210_v45 = vmax.f32 %v4832_v48, 0.0  ;;  %v9790_v31 = vld [vmem:[#allocation2 + $0x68] sm:$0xf0] }
 0x610   : > { %v10116_v30 = vld [vmem:[#allocation2 + $0x2b0] sm:$0xf] }
 0x611   : > { %6253 = vmatpush.bf16.msra.mxu2 %v10109_v61  ;;  %6272 = vmatpush.bf16.msra.mxu3 %v10113_v11  ;;  %5147 = vst [vmem:[#allocation2 + $0x2f0] sm:$0xff] %v5115_v60  ;;  %v5243_v54 = vpack.c.bf16 %v5210_v45, %v5209_v62  ;;  %v11416_v61 = vld [vmem:[#allocation2 + $0x2b4] sm:$0xf]  ;;  %v9857_v11 = vor.u32 %v11351_v53, %v9854_v43  ;;  %v9788_v45 = vld [vmem:[#allocation2 + $0x28] sm:$0xf] }
 0x612   : > { %v4849_v22 = vpop.f32.mrf.mxu2  ;;  %v4878_v29 = vpop.f32.mrf.mxu3  ;;  %v9925_v53 = vor.u32 %v11376_v35, %v9924_v50  ;;  %v10468_v35 = vld [vmem:[#allocation2 + $0x180] sm:$0xf] }
 0x613   : > { %v5003_v15 = vmax.f32 %v4849_v22, 0.0  ;;  %v4916_v20 = vpack.c.bf16 %v4878_v29, %v4849_v22  ;;  %v5004_v3 = vmax.f32 %v4878_v29, 0.0  ;;  %5275 = vst [vmem:[#allocation2 + $0x3f0] sm:$0xff] %v5243_v54  ;;  %v10244_v26 = vld [vmem:[#allocation2 + $0x3b0] sm:$0xf]  ;;  %v9789_v54 = vor.u32 %v11343_v44, %v9788_v45 }
 0x614   : > { %v11448_v27 = vld [vmem:[#allocation2 + $0x3b4] sm:$0xf] }
 0x615   : > { %v5044_v24 = vpack.c.bf16 %v5004_v3, %v5003_v15  ;;  %6254 = vmatpush.bf16.msra.mxu2 %v10045_v14  ;;  %6273 = vmatpush.bf16.msra.mxu3 %v10049_v13  ;;  %4948 = vst [vmem:[#allocation2 + $0xb8] sm:$0xff] %v4916_v20  ;;  %v9793_v15 = vor.u32 %v11335_v34, %v9790_v31 }
 0x616   : > { %v6070_v2 = vpop.f32.mrf.mxu0  ;;  %v6089_v46 = vpop.f32.mrf.mxu1 }
 0x617   : > { %5076 = vst [vmem:[#allocation2 + $0x1b8] sm:$0xff] %v5044_v24  ;;  %v6429_v47 = vmax.f32 %v6070_v2, 0.0  ;;  %v6365_v12 = vpack.c.bf16 %v6089_v46, %v6070_v2  ;;  %v6430_v59 = vmax.f32 %v6089_v46, 0.0 }
 0x618   : > { %v11424_v9 = vld [vmem:[#allocation2 + $0x2ec] sm:$0xf0]  ;;  %v10118_v48 = vld [vmem:[#allocation2 + $0x2f0] sm:$0xf0] }
 0x619   : > { %6255 = vmatpush.bf16.msra.mxu2 %v9981_v8  ;;  %6274 = vmatpush.bf16.msra.mxu3 %v9985_v42  ;;  %6397 = vst [vmem:[#allocation2 + $0x400] sm:$0xff] %v6365_v12  ;;  %v6493_v5 = vpack.c.bf16 %v6430_v59, %v6429_v47  ;;  %v10117_v20 = vor.u32 %v11424_v9, %v10116_v30  ;;  %v11400_v42 = vld [vmem:[#allocation2 + $0x234] sm:$0xf] }
 0x61a   : > { %v4851_v10 = vpop.f32.mrf.mxu2  ;;  %v4880_v52 = vpop.f32.mrf.mxu3  ;;  %v11456_v17 = vld [vmem:[#allocation2 + $0x3ec] sm:$0xf0]  ;;  %v10246_v37 = vld [vmem:[#allocation2 + $0x3f0] sm:$0xf0]  ;;  %8377 = vst [vmem:[%s13766_s26] sm:$0xff] %v6365_v12  ;;  %v10121_v3 = vor.u32 %v11416_v61, %v10118_v48  ;;  %v10057_v2 = vor.u32 %v11400_v42, %v10054_v38  ;;  %v11566_v42 = vld [vmem:[#allocation2 + $0x33c] sm:$0xf0] }
 0x61b   : > { %v5019_v6 = vmax.f32 %v4851_v10, 0.0  ;;  %v4924_v1 = vpack.c.bf16 %v4880_v52, %v4851_v10  ;;  %v5020_v57 = vmax.f32 %v4880_v52, 0.0  ;;  %v10245_v4 = vor.u32 %v11456_v17, %v10244_v26  ;;  %6525 = vst [vmem:[#allocation2 + $0x500] sm:$0xff] %v6493_v5  ;;  %v11384_v26 = vld [vmem:[#allocation2 + $0x1b4] sm:$0xf] }
 0x61c   : > { %v10249_v41 = vor.u32 %v11448_v27, %v10246_v37  ;;  %v9990_v27 = vld [vmem:[#allocation2 + $0x1f0] sm:$0xf0]  ;;  %v11360_v61 = vld [vmem:[#allocation2 + $0xec] sm:$0xf0] }
 0x61d   : > { %4956 = vst [vmem:[#allocation2 + $0xf8] sm:$0xff] %v4924_v1  ;;  %v5052_v21 = vpack.c.bf16 %v5020_v57, %v5019_v6  ;;  %6256 = vmatpush.bf16.msra.mxu2 %v9917_v40  ;;  %6275 = vmatpush.bf16.msra.mxu3 %v9921_v55  ;;  %v11392_v40 = vld [vmem:[#allocation2 + $0x1ec] sm:$0xf0]  ;;  %v9993_v55 = vor.u32 %v11384_v26, %v9990_v27  ;;  %v11368_v17 = vld [vmem:[#allocation2 + $0x134] sm:$0xf] }
 0x61e   : > { %6289 = vmatpush.bf16.msrb.mxu0 %v10245_v4  ;;  %6308 = vmatpush.bf16.msrb.mxu1 %v10249_v41  ;;  %v6072_v62 = vpop.f32.mrf.mxu0  ;;  %v6091_v60 = vpop.f32.mrf.mxu1  ;;  %v9989_v57 = vor.u32 %v11392_v40, %v9988_v25  ;;  %v9926_v37 = vld [vmem:[#allocation2 + $0x170] sm:$0xf0]  ;;  %v9860_v4 = vld [vmem:[#allocation2 + $0xb0] sm:$0xf] }
 0x61f   : > { %5084 = vst [vmem:[#allocation2 + $0x1f8] sm:$0xff] %v5052_v21  ;;  %v6445_v39 = vmax.f32 %v6072_v62, 0.0  ;;  %v6373_v22 = vpack.c.bf16 %v6091_v60, %v6072_v62  ;;  %v6446_v29 = vmax.f32 %v6091_v60, 0.0  ;;  %v9929_v21 = vor.u32 %v11368_v17, %v9926_v37 }
 0x620   : > { %v9861_v45 = vor.u32 %v11360_v61, %v9860_v4  ;;  %v10788_v37 = vld [vmem:[#allocation2 + $0x400] sm:$0xf] }
 0x621   : > { %6257 = vmatpush.bf16.msra.mxu2 %v9853_v63  ;;  %6276 = vmatpush.bf16.msra.mxu3 %v9857_v11  ;;  %6405 = vst [vmem:[#allocation2 + $0x440] sm:$0xff] %v6373_v22  ;;  %v6501_v8 = vpack.c.bf16 %v6446_v29, %v6445_v39  ;;  %v11352_v11 = vld [vmem:[#allocation2 + $0xb4] sm:$0xf]  ;;  %v9796_v39 = vld [vmem:[#allocation2 + $0x30] sm:$0xf] }
 0x622   : > { %v4854_v14 = vpop.f32.mrf.mxu2  ;;  %v4883_v13 = vpop.f32.mrf.mxu3  ;;  %6290 = vmatpush.bf16.msrb.mxu0 %v10181_v51  ;;  %6309 = vmatpush.bf16.msrb.mxu1 %v10185_v49  ;;  %8385 = vst [vmem:[%s13766_s26 + $0x40] sm:$0xff] %v6373_v22  ;;  %v9862_v51 = vld [vmem:[#allocation2 + $0xf0] sm:$0xf0]  ;;  %v11344_v22 = vld [vmem:[#allocation2 + $0x6c] sm:$0xf0] }
 0x623   : > { %v5163_v56 = vmax.f32 %v4854_v14, 0.0  ;;  %v5092_v24 = vpack.c.bf16 %v4883_v13, %v4854_v14  ;;  %v5164_v19 = vmax.f32 %v4883_v13, 0.0  ;;  %6533 = vst [vmem:[#allocation2 + $0x540] sm:$0xff] %v6501_v8  ;;  %v9865_v34 = vor.u32 %v11352_v11, %v9862_v51  ;;  %v11336_v29 = vld [vmem:[#allocation2 + $0x34] sm:$0xf] }
 0x624   : > { %v9798_v14 = vld [vmem:[#allocation2 + $0x70] sm:$0xf0]  ;;  %v10724_v13 = vld [vmem:[#allocation2 + $0x380] sm:$0xf] }
 0x625   : > { %5124 = vst [vmem:[#allocation2 + $0x238] sm:$0xff] %v5092_v24  ;;  %v5220_v33 = vpack.c.bf16 %v5164_v19, %v5163_v56  ;;  %6258 = vmatpush.bf16.msra.mxu2 %v9789_v54  ;;  %6277 = vmatpush.bf16.msra.mxu3 %v9793_v15  ;;  %v11582_v54 = vld [vmem:[#allocation2 + $0x3bc] sm:$0xf0]  ;;  %v9797_v15 = vor.u32 %v11344_v22, %v9796_v39 }
 0x626   : > { %6291 = vmatpush.bf16.msrb.mxu0 %v10117_v20  ;;  %6310 = vmatpush.bf16.msrb.mxu1 %v10121_v3  ;;  %v6075_v46 = vpop.f32.mrf.mxu0  ;;  %v6094_v28 = vpop.f32.mrf.mxu1  ;;  %v9801_v20 = vor.u32 %v11336_v29, %v9798_v14  ;;  %v10725_v56 = vor.u32 %v11582_v54, %v10724_v13  ;;  %v10660_v24 = vld [vmem:[#allocation2 + $0x300] sm:$0xf] }
 0x627   : > { %5252 = vst [vmem:[#allocation2 + $0x338] sm:$0xff] %v5220_v33  ;;  %v6461_v47 = vmax.f32 %v6075_v46, 0.0  ;;  %v6381_v12 = vpack.c.bf16 %v6094_v28, %v6075_v46  ;;  %v6462_v59 = vmax.f32 %v6094_v28, 0.0  ;;  %v10916_v33 = vld [vmem:[#allocation2 + $0x500] sm:$0xf]  ;;  %v10661_v28 = vor.u32 %v11566_v42, %v10660_v24 }
 0x628   : > { %6259 = vmatmul.bf16.vlgmr.msra.gmra.mxu2 %v13731_v18  ;;  %6278 = vmatmul.bf16.vlgmr.msra.gmra.mxu3 %v13731_v18  ;;  %v10340_v13 = vld [vmem:[#allocation2 + $0x80] sm:$0xf] }
 0x629   : > { %6413 = vst [vmem:[#allocation2 + $0x480] sm:$0xff] %v6381_v12  ;;  %v6509_v6 = vpack.c.bf16 %v6462_v59, %v6461_v47  ;;  %v10596_v47 = vld [vmem:[#allocation2 + $0x280] sm:$0xf] }
 0x62a   : > { %v4856_v10 = vpop.f32.mrf.mxu2  ;;  %v4885_v52 = vpop.f32.mrf.mxu3  ;;  %6292 = vmatpush.bf16.msrb.mxu0 %v10053_v36  ;;  %6311 = vmatpush.bf16.msrb.mxu1 %v10057_v2  ;;  %8393 = vst [vmem:[%s13766_s26 + $0x80] sm:$0xff] %v6381_v12  ;;  %v11630_v46 = vld [vmem:[#allocation2 + $0x53c] sm:$0xf0] }
 0x62b   : > { %v5179_v43 = vmax.f32 %v4856_v10, 0.0  ;;  %v5100_v0 = vpack.c.bf16 %v4885_v52, %v4856_v10  ;;  %v5180_v23 = vmax.f32 %v4885_v52, 0.0  ;;  %6541 = vst [vmem:[#allocation2 + $0x580] sm:$0xff] %v6509_v6  ;;  %v11550_v12 = vld [vmem:[#allocation2 + $0x2bc] sm:$0xf0]  ;;  %v10917_v59 = vor.u32 %v11630_v46, %v10916_v33 }
 0x62c   : > { %v10597_v40 = vor.u32 %v11550_v12, %v10596_v47  ;;  %v11486_v24 = vld [vmem:[#allocation2 + $0xbc] sm:$0xf0]  ;;  %v11401_v47 = vld [vmem:[#allocation2 + $0x23c] sm:$0xf] }
 0x62d   : > { %5132 = vst [vmem:[#allocation2 + $0x278] sm:$0xff] %v5100_v0  ;;  %v5228_v1 = vpack.c.bf16 %v5180_v23, %v5179_v43  ;;  %v10532_v43 = vld [vmem:[#allocation2 + $0x200] sm:$0xf] }
 0x62e   : > { %6293 = vmatpush.bf16.msrb.mxu0 %v9989_v57  ;;  %6312 = vmatpush.bf16.msrb.mxu1 %v9993_v55  ;;  %v6077_v7 = vpop.f32.mrf.mxu0  ;;  %v6096_v5 = vpop.f32.mrf.mxu1  ;;  %v11534_v0 = vld [vmem:[#allocation2 + $0x23c] sm:$0xf0]  ;;  %v10188_v61 = vld [vmem:[#allocation2 + $0x338] sm:$0xf] }
 0x62f   : > { %5260 = vst [vmem:[#allocation2 + $0x378] sm:$0xff] %v5228_v1  ;;  %v6477_v41 = vmax.f32 %v6077_v7, 0.0  ;;  %v6389_v44 = vpack.c.bf16 %v6096_v5, %v6077_v7  ;;  %v6478_v31 = vmax.f32 %v6096_v5, 0.0  ;;  %v10533_v7 = vor.u32 %v11534_v0, %v10532_v43  ;;  %v10276_v46 = vld [vmem:[#allocation2] sm:$0xf] }
 0x630   : > { %v10852_v10 = vld [vmem:[#allocation2 + $0x480] sm:$0xf] }
 0x631   : > { %6421 = vst [vmem:[#allocation2 + $0x4c0] sm:$0xff] %v6389_v44  ;;  %v6517_v62 = vpack.c.bf16 %v6478_v31, %v6477_v41  ;;  %v11470_v12 = vld [vmem:[#allocation2 + $0x3c] sm:$0xf0] }
 0x632   : > { %v4859_v63 = vpop.f32.mrf.mxu2  ;;  %v4888_v30 = vpop.f32.mrf.mxu3  ;;  %6294 = vmatpush.bf16.msrb.mxu0 %v9925_v53  ;;  %6313 = vmatpush.bf16.msrb.mxu1 %v9929_v21  ;;  %8401 = vst [vmem:[%s13766_s26 + $0xc0] sm:$0xff] %v6389_v44  ;;  %v10980_v38 = vld [vmem:[#allocation2 + $0x580] sm:$0xf] }
 0x633   : > { %v5195_v49 = vmax.f32 %v4859_v63, 0.0  ;;  %v5108_v9 = vpack.c.bf16 %v4888_v30, %v4859_v63  ;;  %v5196_v48 = vmax.f32 %v4888_v30, 0.0  ;;  %6549 = vst [vmem:[#allocation2 + $0x5c0] sm:$0xff] %v6517_v62  ;;  %v11598_v53 = vld [vmem:[#allocation2 + $0x43c] sm:$0xf0] }
 0x634   : > { %v11518_v44 = vld [vmem:[#allocation2 + $0x1bc] sm:$0xf0]  ;;  %v10789_v30 = vor.u32 %v11598_v53, %v10788_v37  ;;  %v10062_v42 = vld [vmem:[#allocation2 + $0x278] sm:$0xf0]  ;;  %v11377_v37 = vld [vmem:[#allocation2 + $0x174] sm:$0xf0] }
 0x635   : > { %5140 = vst [vmem:[#allocation2 + $0x2b8] sm:$0xff] %v5108_v9  ;;  %v5236_v60 = vpack.c.bf16 %v5196_v48, %v5195_v49  ;;  %v10469_v11 = vor.u32 %v11518_v44, %v10468_v35  ;;  %v11433_v49 = vld [vmem:[#allocation2 + $0x33c] sm:$0xf]  ;;  %v10277_v35 = vor.u32 %v11470_v12, %v10276_v46 }
 0x636   : > { %6295 = vmatpush.bf16.msrb.mxu0 %v9861_v45  ;;  %6314 = vmatpush.bf16.msrb.mxu1 %v9865_v34  ;;  %v11441_v31 = vld [vmem:[#allocation2 + $0x374] sm:$0xf0]  ;;  %v10190_v63 = vld [vmem:[#allocation2 + $0x378] sm:$0xf0]  ;;  %v11502_v45 = vld [vmem:[#allocation2 + $0x13c] sm:$0xf0] }
 0x637   : > { %5268 = vst [vmem:[#allocation2 + $0x3b8] sm:$0xff] %v5236_v60  ;;  %v10189_v51 = vor.u32 %v11441_v31, %v10188_v61  ;;  %v10193_v62 = vor.u32 %v11433_v49, %v10190_v63  ;;  %v10404_v60 = vld [vmem:[#allocation2 + $0x100] sm:$0xf]  ;;  %v9934_v53 = vld [vmem:[#allocation2 + $0x178] sm:$0xf0] }
 0x638   : > { %6264 = vmatmul.bf16.gmra.mxu2 %v13739_v32  ;;  %6283 = vmatmul.bf16.gmra.mxu3 %v13739_v32  ;;  %v11614_v52 = vld [vmem:[#allocation2 + $0x4bc] sm:$0xf0]  ;;  %v10260_v63 = vld [vmem:[#allocation8 + $0x24] sm:$0xf] }
 0x639   : > { %v10853_v50 = vor.u32 %v11614_v52, %v10852_v10 }
 0x63a   : > { %v4861_v3 = vpop.f32.mrf.mxu2  ;;  %v4890_v58 = vpop.f32.mrf.mxu3  ;;  %6296 = vmatpush.bf16.msrb.mxu0 %v9797_v15  ;;  %6315 = vmatpush.bf16.msrb.mxu1 %v9801_v20  ;;  %v11646_v2 = vld [vmem:[#allocation2 + $0x5bc] sm:$0xf0]  ;;  %v10405_v15 = vor.u32 %v11502_v45, %v10404_v60 }
 0x63b   : > { %v5211_v19 = vmax.f32 %v4861_v3, 0.0  ;;  %v5116_v16 = vpack.c.bf16 %v4890_v58, %v4861_v3  ;;  %v5212_v8 = vmax.f32 %v4890_v58, 0.0  ;;  %v10981_v25 = vor.u32 %v11646_v2, %v10980_v38  ;;  %v10060_v2 = vld [vmem:[#allocation2 + $0x238] sm:$0xf] }
 0x63c   : > { %v10124_v20 = vld [vmem:[#allocation2 + $0x2b8] sm:$0xf]  ;;  %v11417_v3 = vld [vmem:[#allocation2 + $0x2bc] sm:$0xf] }
 0x63d   : > { %5148 = vst [vmem:[#allocation2 + $0x2f8] sm:$0xff] %v5116_v16  ;;  %v5244_v36 = vpack.c.bf16 %v5212_v8, %v5211_v19  ;;  %6297 = vmatmul.bf16.vlgmr.msrb.gmra.mxu0 %v13731_v18  ;;  %6316 = vmatmul.bf16.vlgmr.msrb.gmra.mxu1 %v13731_v18  ;;  %v11409_v19 = vld [vmem:[#allocation2 + $0x274] sm:$0xf0]  ;;  %v6146_v16 = vpop.f32.mrf.mxu0  ;;  %v6165_v8 = vpop.f32.mrf.mxu1 }
 0x63e   : > { %7737 = vmatpush.bf16.msra.mxu0 %v10725_v56  ;;  %7760 = vmatpush.bf16.msra.mxu1 %v10981_v25  ;;  %v10252_v57 = vld [vmem:[#allocation2 + $0x3b8] sm:$0xf]  ;;  %v11449_v55 = vld [vmem:[#allocation2 + $0x3bc] sm:$0xf]  ;;  %v6433_v38 = vmax.f32 %v6146_v16, 0.0  ;;  %v6367_v33 = vpack.c.bf16 %v6165_v8, %v6146_v16  ;;  %v10061_v25 = vor.u32 %v11409_v19, %v10060_v2 }
 0x63f   : > { %5276 = vst [vmem:[#allocation2 + $0x3f8] sm:$0xff] %v5244_v36  ;;  %v6434_v36 = vmax.f32 %v6165_v8, 0.0  ;;  %v9868_v19 = vld [vmem:[#allocation2 + $0xb8] sm:$0xf]  ;;  %v11353_v16 = vld [vmem:[#allocation2 + $0xbc] sm:$0xf] }
 0x640   : > { %6399 = vst [vmem:[#allocation2 + $0x410] sm:$0xff] %v6367_v33 }
 0x641   : > { %v6495_v52 = vpack.c.bf16 %v6434_v36, %v6433_v38  ;;  %8379 = vst [vmem:[%s13766_s26 + $0x10] sm:$0xff] %v6367_v33  ;;  %v11345_v38 = vld [vmem:[#allocation2 + $0x74] sm:$0xf0]  ;;  %v9806_v33 = vld [vmem:[#allocation2 + $0x78] sm:$0xf0] }
 0x642   : > { %7738 = vmatpush.bf16.msra.mxu0 %v10661_v28  ;;  %v6108_v26 = vpop.f32.mrf.mxu2  ;;  %v6127_v27 = vpop.f32.mrf.mxu3  ;;  %7761 = vmatpush.bf16.msra.mxu1 %v10917_v59  ;;  %v10341_v28 = vor.u32 %v11486_v24, %v10340_v13 }
 0x643   : > { %v6431_v23 = vmax.f32 %v6108_v26, 0.0  ;;  %v6366_v6 = vpack.c.bf16 %v6127_v27, %v6108_v26  ;;  %v6432_v1 = vmax.f32 %v6127_v27, 0.0  ;;  %v11583_v26 = vld [vmem:[#allocation2 + $0x3c4] sm:$0xf0]  ;;  %6527 = vst [vmem:[#allocation2 + $0x510] sm:$0xff] %v6495_v52 }
 0x644   : > { %v11425_v29 = vld [vmem:[#allocation2 + $0x2f4] sm:$0xf0]  ;;  %v10126_v14 = vld [vmem:[#allocation2 + $0x2f8] sm:$0xf0]  ;;  %v11574_v52 = vld [vmem:[#allocation2 + $0x384] sm:$0xf] }
 0x645   : > { %6398 = vst [vmem:[#allocation2 + $0x408] sm:$0xff] %v6366_v6  ;;  %v6494_v17 = vpack.c.bf16 %v6432_v1, %v6431_v23  ;;  %v10125_v58 = vor.u32 %v11425_v29, %v10124_v20  ;;  %v10129_v56 = vor.u32 %v11417_v3, %v10126_v14  ;;  %v11393_v23 = vld [vmem:[#allocation2 + $0x1f4] sm:$0xf0]  ;;  %v6167_v44 = vpop.f32.mrf.mxu1  ;;  %v9870_v3 = vld [vmem:[#allocation2 + $0xf8] sm:$0xf0] }
 0x646   : > { %7739 = vmatpush.bf16.msra.mxu0 %v10597_v40  ;;  %v11457_v5 = vld [vmem:[#allocation2 + $0x3f4] sm:$0xf0]  ;;  %v10254_v21 = vld [vmem:[#allocation2 + $0x3f8] sm:$0xf0]  ;;  %8378 = vst [vmem:[%s13766_s26 + $0x8] sm:$0xff] %v6366_v6  ;;  %7762 = vmatpush.bf16.msra.mxu1 %v10853_v50  ;;  %v10065_v40 = vor.u32 %v11401_v47, %v10062_v42  ;;  %v9873_v42 = vor.u32 %v11353_v16, %v9870_v3 }
 0x647   : > { %v10253_v4 = vor.u32 %v11457_v5, %v10252_v57  ;;  %v10257_v41 = vor.u32 %v11449_v55, %v10254_v21  ;;  %6526 = vst [vmem:[#allocation2 + $0x508] sm:$0xff] %v6494_v17  ;;  %v9998_v6 = vld [vmem:[#allocation2 + $0x1f8] sm:$0xf0]  ;;  %v9996_v1 = vld [vmem:[#allocation2 + $0x1b8] sm:$0xf] }
 0x648   : > { %v11385_v57 = vld [vmem:[#allocation2 + $0x1bc] sm:$0xf]  ;;  %v10732_v55 = vld [vmem:[#allocation2 + $0x388] sm:$0xf]  ;;  %v9932_v17 = vld [vmem:[#allocation2 + $0x138] sm:$0xf] }
 0x649   : > { %6327 = vmatpush.bf16.msrb.mxu2 %v10253_v4  ;;  %6346 = vmatpush.bf16.msrb.mxu3 %v10257_v41  ;;  %v10001_v5 = vor.u32 %v11385_v57, %v9998_v6  ;;  %v11458_v21 = vld [vmem:[#allocation8 + $0x28] sm:$0xf]  ;;  %v10262_v4 = vld [vmem:[#allocation8 + $0x50] sm:$0xf0]  ;;  %v6148_v41 = vpop.f32.mrf.mxu0  ;;  %v10733_v31 = vor.u32 %v11583_v26, %v10732_v55  ;;  %v9933_v49 = vor.u32 %v11377_v37, %v9932_v17  ;;  %v11361_v20 = vld [vmem:[#allocation2 + $0xf4] sm:$0xf0] }
 0x64a   : > { %7740 = vmatpush.bf16.msra.mxu0 %v10533_v7  ;;  %v6110_v9 = vpop.f32.mrf.mxu2  ;;  %v6129_v48 = vpop.f32.mrf.mxu3  ;;  %7763 = vmatpush.bf16.msra.mxu1 %v10789_v30  ;;  %v9997_v7 = vor.u32 %v11393_v23, %v9996_v1  ;;  %v11459_v30 = vld [vmem:[#allocation8 + $0x4c] sm:$0xf0]  ;;  %v6449_v61 = vmax.f32 %v6148_v41, 0.0  ;;  %v9869_v8 = vor.u32 %v11361_v20, %v9868_v19  ;;  %v9804_v26 = vld [vmem:[#allocation2 + $0x38] sm:$0xf] }
 0x64b   : > { %v6447_v34 = vmax.f32 %v6110_v9, 0.0  ;;  %v6374_v39 = vpack.c.bf16 %v6129_v48, %v6110_v9  ;;  %v6448_v22 = vmax.f32 %v6129_v48, 0.0  ;;  %v11369_v9 = vld [vmem:[#allocation2 + $0x13c] sm:$0xf]  ;;  %v11567_v48 = vld [vmem:[#allocation2 + $0x344] sm:$0xf0]  ;;  %v13786_v29 = vor.u32 %v11459_v30, %v10260_v63 }
 0x64c   : > { %v10540_v6 = vld [vmem:[#allocation2 + $0x208] sm:$0xf]  ;;  %v11558_v17 = vld [vmem:[#allocation2 + $0x304] sm:$0xf] }
 0x64d   : > { %6328 = vmatpush.bf16.msrb.mxu2 %v10189_v51  ;;  %6347 = vmatpush.bf16.msrb.mxu3 %v10193_v62  ;;  %6406 = vst [vmem:[#allocation2 + $0x448] sm:$0xff] %v6374_v39  ;;  %v6502_v54 = vpack.c.bf16 %v6448_v22, %v6447_v34  ;;  %v6450_v51 = vmax.f32 %v6167_v44, 0.0  ;;  %v9937_v62 = vor.u32 %v11369_v9, %v9934_v53  ;;  %v10668_v22 = vld [vmem:[#allocation2 + $0x308] sm:$0xf]  ;;  %v6170_v2 = vpop.f32.mrf.mxu1  ;;  %v10662_v53 = vld [vmem:[#allocation2 + $0x340] sm:$0xf0] }
 0x64e   : > { %7741 = vmatpush.bf16.msra.mxu0 %v10469_v11  ;;  %8386 = vst [vmem:[%s13766_s26 + $0x48] sm:$0xff] %v6374_v39  ;;  %6321 = vmatmul.bf16.gmra.mxu1 %v13739_v32  ;;  %v6375_v11 = vpack.c.bf16 %v6167_v44, %v6148_v41  ;;  %v13784_v34 = vor.u32 %v11458_v21, %v10262_v4  ;;  %v11519_v57 = vld [vmem:[#allocation2 + $0x1c4] sm:$0xf0]  ;;  %v11542_v63 = vld [vmem:[#allocation2 + $0x284] sm:$0xf] }
 0x64f   : > { %6302 = vmatmul.bf16.gmra.mxu0 %v13739_v32  ;;  %6534 = vst [vmem:[#allocation2 + $0x548] sm:$0xff] %v6502_v54  ;;  %v6503_v39 = vpack.c.bf16 %v6450_v51, %v6449_v61  ;;  %v10924_v4 = vld [vmem:[#allocation2 + $0x508] sm:$0xf]  ;;  %v11606_v30 = vld [vmem:[#allocation2 + $0x484] sm:$0xf]  ;;  %v10665_v9 = vor.u32 %v11558_v17, %v10662_v53 }
 0x650   : > { %6407 = vst [vmem:[#allocation2 + $0x450] sm:$0xff] %v6375_v11  ;;  %v10854_v61 = vld [vmem:[#allocation2 + $0x4c0] sm:$0xf0] }
 0x651   : > { %6329 = vmatpush.bf16.msrb.mxu2 %v10125_v58  ;;  %6348 = vmatpush.bf16.msrb.mxu3 %v10129_v56  ;;  %8387 = vst [vmem:[%s13766_s26 + $0x50] sm:$0xff] %v6375_v11  ;;  %v10604_v58 = vld [vmem:[#allocation2 + $0x288] sm:$0xf]  ;;  %v6151_v36 = vpop.f32.mrf.mxu0 }
 0x652   : > { %7742 = vmatpush.bf16.msra.mxu0 %v10405_v15  ;;  %v6113_v59 = vpop.f32.mrf.mxu2  ;;  %v6132_v10 = vpop.f32.mrf.mxu3  ;;  %v10669_v15 = vor.u32 %v11567_v48, %v10668_v22  ;;  %6535 = vst [vmem:[#allocation2 + $0x550] sm:$0xff] %v6503_v39  ;;  %v11551_v56 = vld [vmem:[#allocation2 + $0x2c4] sm:$0xf0]  ;;  %v6465_v47 = vmax.f32 %v6151_v36, 0.0  ;;  %v6383_v12 = vpack.c.bf16 %v6170_v2, %v6151_v36  ;;  %v10268_v48 = vld [vmem:[#allocation8 + $0x7c] sm:$0xf] }
 0x653   : > { %v6463_v27 = vmax.f32 %v6113_v59, 0.0  ;;  %v6382_v43 = vpack.c.bf16 %v6132_v10, %v6113_v59  ;;  %v6464_v0 = vmax.f32 %v6132_v10, 0.0  ;;  %v10605_v46 = vor.u32 %v11551_v56, %v10604_v58  ;;  %v11535_v10 = vld [vmem:[#allocation2 + $0x244] sm:$0xf0] }
 0x654   : > { %v6466_v59 = vmax.f32 %v6170_v2, 0.0  ;;  %6415 = vst [vmem:[#allocation2 + $0x490] sm:$0xff] %v6383_v12  ;;  %v10541_v55 = vor.u32 %v11535_v10, %v10540_v6  ;;  %v10857_v56 = vor.u32 %v11606_v30, %v10854_v61  ;;  %v11590_v2 = vld [vmem:[#allocation2 + $0x404] sm:$0xf]  ;;  %v11568_v30 = vld [vmem:[#allocation2 + $0x34c] sm:$0xf0] }
 0x655   : > { %6330 = vmatpush.bf16.msrb.mxu2 %v10061_v25  ;;  %6349 = vmatpush.bf16.msrb.mxu3 %v10065_v40  ;;  %6414 = vst [vmem:[#allocation2 + $0x488] sm:$0xff] %v6382_v43  ;;  %v6510_v50 = vpack.c.bf16 %v6464_v0, %v6463_v27  ;;  %v10982_v25 = vld [vmem:[#allocation2 + $0x5c0] sm:$0xf0]  ;;  %v11337_v27 = vld [vmem:[#allocation2 + $0x3c] sm:$0xf]  ;;  %v9805_v0 = vor.u32 %v11345_v38, %v9804_v26 }
 0x656   : > { %7743 = vmatpush.bf16.msra.mxu0 %v10341_v28  ;;  %8394 = vst [vmem:[%s13766_s26 + $0x88] sm:$0xff] %v6382_v43  ;;  %v11638_v28 = vld [vmem:[#allocation2 + $0x584] sm:$0xf]  ;;  %v6511_v43 = vpack.c.bf16 %v6466_v59, %v6465_v47  ;;  %v9809_v23 = vor.u32 %v11337_v27, %v9806_v33  ;;  %v11631_v41 = vld [vmem:[#allocation2 + $0x544] sm:$0xf0] }
 0x657   : > { %6542 = vst [vmem:[#allocation2 + $0x588] sm:$0xff] %v6510_v50  ;;  %v10726_v40 = vld [vmem:[#allocation2 + $0x3c0] sm:$0xf0]  ;;  %v10985_v1 = vor.u32 %v11638_v28, %v10982_v25  ;;  %v11599_v59 = vld [vmem:[#allocation2 + $0x444] sm:$0xf0] }
 0x658   : > { %8395 = vst [vmem:[%s13766_s26 + $0x90] sm:$0xff] %v6383_v12  ;;  %v10729_v50 = vor.u32 %v11574_v52, %v10726_v40  ;;  %v11526_v38 = vld [vmem:[#allocation2 + $0x204] sm:$0xf]  ;;  %v10796_v12 = vld [vmem:[#allocation2 + $0x408] sm:$0xf] }
 0x659   : > { %6331 = vmatpush.bf16.msrb.mxu2 %v9997_v7  ;;  %6350 = vmatpush.bf16.msrb.mxu3 %v10001_v5  ;;  %6543 = vst [vmem:[#allocation2 + $0x590] sm:$0xff] %v6511_v43  ;;  %v11622_v7 = vld [vmem:[#allocation2 + $0x504] sm:$0xf]  ;;  %v6153_v51 = vpop.f32.mrf.mxu0  ;;  %v11471_v27 = vld [vmem:[#allocation2 + $0x44] sm:$0xf0]  ;;  %v10797_v17 = vor.u32 %v11599_v59, %v10796_v12 }
 0x65a   : > { %7744 = vmatpush.bf16.msra.mxu0 %v10277_v35  ;;  %v6115_v60 = vpop.f32.mrf.mxu2  ;;  %v6134_v45 = vpop.f32.mrf.mxu3  ;;  %v10476_v35 = vld [vmem:[#allocation2 + $0x188] sm:$0xf]  ;;  %v10918_v5 = vld [vmem:[#allocation2 + $0x540] sm:$0xf0]  ;;  %v10926_v53 = vld [vmem:[#allocation2 + $0x548] sm:$0xf0] }
 0x65b   : > { %v6479_v14 = vmax.f32 %v6115_v60, 0.0  ;;  %v6390_v13 = vpack.c.bf16 %v6134_v45, %v6115_v60  ;;  %v6480_v54 = vmax.f32 %v6134_v45, 0.0  ;;  %v10477_v44 = vor.u32 %v11519_v57, %v10476_v35  ;;  %v10534_v33 = vld [vmem:[#allocation2 + $0x240] sm:$0xf0]  ;;  %v11584_v35 = vld [vmem:[#allocation2 + $0x3cc] sm:$0xf0] }
 0x65c   : > { %v6481_v60 = vmax.f32 %v6153_v51, 0.0  ;;  %v10921_v22 = vor.u32 %v11622_v7, %v10918_v5  ;;  %v10860_v20 = vld [vmem:[#allocation2 + $0x488] sm:$0xf]  ;;  %v10790_v47 = vld [vmem:[#allocation2 + $0x440] sm:$0xf0]  ;;  %v10537_v52 = vor.u32 %v11526_v38, %v10534_v33 }
 0x65d   : > { %6332 = vmatpush.bf16.msrb.mxu2 %v9933_v49  ;;  %6351 = vmatpush.bf16.msrb.mxu3 %v9937_v62  ;;  %6422 = vst [vmem:[#allocation2 + $0x4c8] sm:$0xff] %v6390_v13  ;;  %v6518_v24 = vpack.c.bf16 %v6480_v54, %v6479_v14  ;;  %v6172_v49 = vpop.f32.mrf.mxu1  ;;  %v11461_v62 = vld [vmem:[#allocation8 + $0xa4] sm:$0xf0]  ;;  %v10598_v14 = vld [vmem:[#allocation2 + $0x2c0] sm:$0xf0]  ;;  %v10793_v57 = vor.u32 %v11590_v2, %v10790_v47 }
 0x65e   : > { %7813 = vmatpush.bf16.msrb.mxu0 %v10733_v31  ;;  %8402 = vst [vmem:[%s13766_s26 + $0xc8] sm:$0xff] %v6390_v13  ;;  %11042 = vmatmul.msk.bf16.vlgmr.msra.gmra.mxu1 %vm3174_vm4, %v13784_v34  ;;  %v10988_v37 = vld [vmem:[#allocation2 + $0x588] sm:$0xf]  ;;  %v6391_v45 = vpack.c.bf16 %v6172_v49, %v6153_v51  ;;  %v6482_v39 = vmax.f32 %v6172_v49, 0.0  ;;  %v10925_v13 = vor.u32 %v11631_v41, %v10924_v4  ;;  %v11460_v54 = vld [vmem:[#allocation8 + $0x80] sm:$0xf] }
 0x65f   : > { %7745 = vmatmul.bf16.vlgmr.msra.gmra.mxu0 %v13786_v29  ;;  %6550 = vst [vmem:[#allocation2 + $0x5c8] sm:$0xff] %v6518_v24  ;;  %v11503_v31 = vld [vmem:[#allocation2 + $0x144] sm:$0xf0]  ;;  %v13796_v19 = vor.u32 %v11461_v62, %v10268_v48  ;;  %v11510_v43 = vld [vmem:[#allocation2 + $0x184] sm:$0xf] }
 0x660   : > { %6423 = vst [vmem:[#allocation2 + $0x4d0] sm:$0xff] %v6391_v45  ;;  %v6519_v58 = vpack.c.bf16 %v6482_v39, %v6481_v60  ;;  %v11487_v24 = vld [vmem:[#allocation2 + $0xc4] sm:$0xf0]  ;;  %v11494_v41 = vld [vmem:[#allocation2 + $0x104] sm:$0xf] }
 0x661   : > { %6333 = vmatpush.bf16.msrb.mxu2 %v9869_v8  ;;  %6352 = vmatpush.bf16.msrb.mxu3 %v9873_v42  ;;  %8403 = vst [vmem:[%s13766_s26 + $0xd0] sm:$0xff] %v6391_v45  ;;  %v10601_v8 = vor.u32 %v11542_v63, %v10598_v14  ;;  %v10348_v42 = vld [vmem:[#allocation2 + $0x88] sm:$0xf]  ;;  %v10676_v63 = vld [vmem:[#allocation2 + $0x310] sm:$0xf] }
 0x662   : > { %7814 = vmatpush.bf16.msrb.mxu0 %v10669_v15  ;;  %v10270_v15 = vld [vmem:[#allocation8 + $0xa8] sm:$0xf0]  ;;  %6551 = vst [vmem:[#allocation2 + $0x5d0] sm:$0xff] %v6519_v58  ;;  %v10349_v10 = vor.u32 %v11487_v24, %v10348_v42  ;;  %v10284_v5 = vld [vmem:[#allocation2 + $0x8] sm:$0xf]  ;;  %v10677_v62 = vor.u32 %v11568_v30, %v10676_v63 }
 0x663   : > { %v13799_v36 = vor.u32 %v11460_v54, %v10270_v15  ;;  %v10996_v49 = vld [vmem:[#allocation2 + $0x590] sm:$0xf]  ;;  %v11478_v60 = vld [vmem:[#allocation2 + $0x84] sm:$0xf]  ;;  %v11575_v12 = vld [vmem:[#allocation2 + $0x38c] sm:$0xf] }
 0x664   : > { %v11615_v3 = vld [vmem:[#allocation2 + $0x4c4] sm:$0xf0]  ;;  %v10862_v51 = vld [vmem:[#allocation2 + $0x4c8] sm:$0xf0]  ;;  %v10342_v14 = vld [vmem:[#allocation2 + $0xc0] sm:$0xf0] }
 0x665   : > { %6334 = vmatpush.bf16.msrb.mxu2 %v9805_v0  ;;  %6353 = vmatpush.bf16.msrb.mxu3 %v9809_v23  ;;  %v10861_v25 = vor.u32 %v11615_v3, %v10860_v20  ;;  %v11552_v58 = vld [vmem:[#allocation2 + $0x2cc] sm:$0xf0]  ;;  %v11462_v42 = vld [vmem:[#allocation2 + $0x4] sm:$0xf]  ;;  %v10606_v63 = vld [vmem:[#allocation2 + $0x2c8] sm:$0xf0] }
 0x666   : > { %7815 = vmatpush.bf16.msrb.mxu0 %v10605_v46  ;;  %v11647_v21 = vld [vmem:[#allocation2 + $0x5c4] sm:$0xf0]  ;;  %v11639_v46 = vld [vmem:[#allocation2 + $0x58c] sm:$0xf]  ;;  %v10932_v24 = vld [vmem:[#allocation2 + $0x510] sm:$0xf] }
 0x667   : > { %v10989_v11 = vor.u32 %v11647_v21, %v10988_v37  ;;  %v10990_v28 = vld [vmem:[#allocation2 + $0x5c8] sm:$0xf0]  ;;  %v10285_v21 = vor.u32 %v11471_v27, %v10284_v5  ;;  %v10278_v2 = vld [vmem:[#allocation2 + $0x40] sm:$0xf0]  ;;  %v11536_v47 = vld [vmem:[#allocation2 + $0x24c] sm:$0xf0] }
 0x668   : > { %6335 = vmatmul.bf16.vlgmr.msrb.gmra.mxu2 %v13731_v18  ;;  %6354 = vmatmul.bf16.vlgmr.msrb.gmra.mxu3 %v13731_v18  ;;  %v10412_v18 = vld [vmem:[#allocation2 + $0x108] sm:$0xf]  ;;  %v10993_v0 = vor.u32 %v11639_v46, %v10990_v28  ;;  %v11623_v37 = vld [vmem:[#allocation2 + $0x50c] sm:$0xf]  ;;  %v10868_v59 = vld [vmem:[#allocation2 + $0x490] sm:$0xf] }
 0x669   : > { %7775 = vmatpush.bf16.msra.mxu2 %v10729_v50  ;;  %7798 = vmatpush.bf16.msra.mxu3 %v10985_v1  ;;  %v10413_v16 = vor.u32 %v11503_v31, %v10412_v18  ;;  %v10740_v50 = vld [vmem:[#allocation2 + $0x390] sm:$0xf]  ;;  %v10406_v31 = vld [vmem:[#allocation2 + $0x140] sm:$0xf0]  ;;  %v10929_v61 = vor.u32 %v11623_v37, %v10926_v53  ;;  %v11591_v18 = vld [vmem:[#allocation2 + $0x40c] sm:$0xf] }
 0x66a   : > { %7816 = vmatpush.bf16.msrb.mxu0 %v10541_v55  ;;  %7836 = vmatpush.bf16.msrb.mxu1 %v10989_v11  ;;  %v10470_v55 = vld [vmem:[#allocation2 + $0x1c0] sm:$0xf0]  ;;  %v11607_v11 = vld [vmem:[#allocation2 + $0x48c] sm:$0xf]  ;;  %v10409_v48 = vor.u32 %v11494_v41, %v10406_v31  ;;  %v11640_v37 = vld [vmem:[#allocation2 + $0x594] sm:$0xf] }
 0x66b   : > { %v6184_v40 = vpop.f32.mrf.mxu2  ;;  %v6203_v26 = vpop.f32.mrf.mxu3  ;;  %v10473_v4 = vor.u32 %v11510_v43, %v10470_v55  ;;  %v10865_v54 = vor.u32 %v11607_v11, %v10862_v51  ;;  %v10734_v46 = vld [vmem:[#allocation2 + $0x3c8] sm:$0xf0]  ;;  %v10998_v53 = vld [vmem:[#allocation2 + $0x5d0] sm:$0xf0]  ;;  %v11504_v31 = vld [vmem:[#allocation2 + $0x14c] sm:$0xf0] }
 0x66c   : > { %v6435_v23 = vmax.f32 %v6184_v40, 0.0  ;;  %v6368_v6 = vpack.c.bf16 %v6203_v26, %v6184_v40  ;;  %v6436_v1 = vmax.f32 %v6203_v26, 0.0  ;;  %v10737_v40 = vor.u32 %v11575_v12, %v10734_v46  ;;  %v10934_v11 = vld [vmem:[#allocation2 + $0x550] sm:$0xf0]  ;;  %v11543_v51 = vld [vmem:[#allocation2 + $0x28c] sm:$0xf] }
 0x66d   : > { %7776 = vmatpush.bf16.msra.mxu2 %v10665_v9  ;;  %7799 = vmatpush.bf16.msra.mxu3 %v10921_v22  ;;  %v11648_v9 = vld [vmem:[#allocation2 + $0x5cc] sm:$0xf0]  ;;  %v11001_v30 = vor.u32 %v11640_v37, %v10998_v53  ;;  %v11511_v12 = vld [vmem:[#allocation2 + $0x18c] sm:$0xf] }
 0x66e   : > { %7817 = vmatpush.bf16.msrb.mxu0 %v10477_v44  ;;  %7837 = vmatpush.bf16.msrb.mxu1 %v10925_v13  ;;  %6400 = vst [vmem:[#allocation2 + $0x418] sm:$0xff] %v6368_v6  ;;  %v6496_v7 = vpack.c.bf16 %v6436_v1, %v6435_v23  ;;  %v10741_v44 = vor.u32 %v11584_v35, %v10740_v50  ;;  %v10612_v13 = vld [vmem:[#allocation2 + $0x290] sm:$0xf]  ;;  %v10350_v37 = vld [vmem:[#allocation2 + $0xc8] sm:$0xf0] }
 0x66f   : > { %7750 = vmatmul.bf16.gmra.mxu0 %v13796_v19  ;;  %11043 = vmatmul.msk.bf16.gmra.mxu1 %vm3174_vm4, %v13799_v36  ;;  %8380 = vst [vmem:[%s13766_s26 + $0x18] sm:$0xff] %v6368_v6  ;;  %v10997_v45 = vor.u32 %v11648_v9, %v10996_v49  ;;  %v10613_v33 = vor.u32 %v11552_v58, %v10612_v13  ;;  %v11600_v23 = vld [vmem:[#allocation2 + $0x44c] sm:$0xf0]  ;;  %v11527_v58 = vld [vmem:[#allocation2 + $0x20c] sm:$0xf] }
 0x670   : > { %6528 = vst [vmem:[#allocation2 + $0x518] sm:$0xff] %v6496_v7  ;;  %v10484_v1 = vld [vmem:[#allocation2 + $0x190] sm:$0xf]  ;;  %v10609_v9 = vor.u32 %v11543_v51, %v10606_v63  ;;  %v10286_v51 = vld [vmem:[#allocation2 + $0x48] sm:$0xf0] }
 0x671   : > { %7777 = vmatpush.bf16.msra.mxu2 %v10601_v8  ;;  %7800 = vmatpush.bf16.msra.mxu3 %v10857_v56  ;;  %v10798_v56 = vld [vmem:[#allocation2 + $0x448] sm:$0xf0]  ;;  %v10345_v8 = vor.u32 %v11478_v60, %v10342_v14  ;;  %v10356_v60 = vld [vmem:[#allocation2 + $0x90] sm:$0xf] }
 0x672   : > { %7818 = vmatpush.bf16.msrb.mxu0 %v10413_v16  ;;  %7838 = vmatpush.bf16.msrb.mxu1 %v10861_v25  ;;  %v11632_v16 = vld [vmem:[#allocation2 + $0x54c] sm:$0xf0]  ;;  %v10801_v28 = vor.u32 %v11591_v18, %v10798_v56  ;;  %v10478_v18 = vld [vmem:[#allocation2 + $0x1c8] sm:$0xf0] }
 0x673   : > { %v6186_v39 = vpop.f32.mrf.mxu2  ;;  %v6205_v22 = vpop.f32.mrf.mxu3  ;;  %v10933_v38 = vor.u32 %v11632_v16, %v10932_v24  ;;  %v10548_v25 = vld [vmem:[#allocation2 + $0x210] sm:$0xf] }
 0x674   : > { %v6451_v15 = vmax.f32 %v6186_v39, 0.0  ;;  %v6376_v20 = vpack.c.bf16 %v6205_v22, %v6186_v39  ;;  %v6452_v3 = vmax.f32 %v6205_v22, 0.0  ;;  %v10549_v6 = vor.u32 %v11536_v47, %v10548_v25  ;;  %v10292_v24 = vld [vmem:[#allocation2 + $0x10] sm:$0xf]  ;;  %v11585_v47 = vld [vmem:[#allocation2 + $0x3d4] sm:$0xf0] }
 0x675   : > { %7778 = vmatpush.bf16.msra.mxu2 %v10537_v52  ;;  %7801 = vmatpush.bf16.msra.mxu3 %v10793_v57  ;;  %v10281_v52 = vor.u32 %v11462_v42, %v10278_v2  ;;  %v10670_v57 = vld [vmem:[#allocation2 + $0x348] sm:$0xf0]  ;;  %v11472_v16 = vld [vmem:[#allocation2 + $0x4c] sm:$0xf0]  ;;  %v10806_v2 = vld [vmem:[#allocation2 + $0x450] sm:$0xf0] }
 0x676   : > { %7819 = vmatpush.bf16.msrb.mxu0 %v10349_v10  ;;  %7839 = vmatpush.bf16.msrb.mxu1 %v10797_v17  ;;  %6408 = vst [vmem:[#allocation2 + $0x458] sm:$0xff] %v6376_v20  ;;  %v11616_v10 = vld [vmem:[#allocation2 + $0x4cc] sm:$0xf0] }
 0x677   : > { %8388 = vst [vmem:[%s13766_s26 + $0x58] sm:$0xff] %v6376_v20  ;;  %v10869_v26 = vor.u32 %v11616_v10, %v10868_v59  ;;  %v11520_v17 = vld [vmem:[#allocation2 + $0x1cc] sm:$0xf0]  ;;  %v10870_v20 = vld [vmem:[#allocation2 + $0x4d0] sm:$0xf0]  ;;  %v10293_v10 = vor.u32 %v11472_v16, %v10292_v24 }
 0x678   : > { %6340 = vmatmul.bf16.gmra.mxu2 %v13739_v32  ;;  %6359 = vmatmul.bf16.gmra.mxu3 %v13739_v32  ;;  %v6504_v32 = vpack.c.bf16 %v6452_v3, %v6451_v15  ;;  %v10485_v41 = vor.u32 %v11520_v17, %v10484_v1  ;;  %v11608_v15 = vld [vmem:[#allocation2 + $0x494] sm:$0xf] }
 0x679   : > { %7874 = vmatpush.bf16.msrb.mxu3 %v10993_v0  ;;  %7779 = vmatpush.bf16.msra.mxu2 %v10473_v4  ;;  %v10804_v0 = vld [vmem:[#allocation2 + $0x410] sm:$0xf]  ;;  %v6222_v42 = vpop.f32.mrf.mxu0  ;;  %v10678_v24 = vld [vmem:[#allocation2 + $0x350] sm:$0xf0] }
 0x67a   : > { %7820 = vmatpush.bf16.msrb.mxu0 %v10285_v21  ;;  %7912 = vmatpush.bf16.msra.mxu1 %v10997_v45  ;;  %6536 = vst [vmem:[#allocation2 + $0x558] sm:$0xff] %v6504_v32  ;;  %v10805_v7 = vor.u32 %v11600_v23, %v10804_v0  ;;  %v11559_v21 = vld [vmem:[#allocation2 + $0x30c] sm:$0xf]  ;;  %v10420_v4 = vld [vmem:[#allocation2 + $0x110] sm:$0xf]  ;;  %v6437_v46 = vmax.f32 %v6222_v42, 0.0 }
 0x67b   : > { %v6189_v27 = vpop.f32.mrf.mxu2  ;;  %v6208_v43 = vpop.f32.mrf.mxu3  ;;  %v10421_v49 = vor.u32 %v11504_v31, %v10420_v4  ;;  %v10542_v45 = vld [vmem:[#allocation2 + $0x248] sm:$0xf0]  ;;  %v11569_v0 = vld [vmem:[#allocation2 + $0x354] sm:$0xf0] }
 0x67c   : > { %v6467_v55 = vmax.f32 %v6189_v27, 0.0  ;;  %v6384_v50 = vpack.c.bf16 %v6208_v43, %v6189_v27  ;;  %v6468_v35 = vmax.f32 %v6208_v43, 0.0  ;;  %v10545_v32 = vor.u32 %v11527_v58, %v10542_v45  ;;  %v10414_v43 = vld [vmem:[#allocation2 + $0x148] sm:$0xf0]  ;;  %v11553_v4 = vld [vmem:[#allocation2 + $0x2d4] sm:$0xf0] }
 0x67d   : > { %7875 = vmatpush.bf16.msrb.mxu3 %v10929_v61  ;;  %7780 = vmatpush.bf16.msra.mxu2 %v10409_v48  ;;  %v11624_v61 = vld [vmem:[#allocation2 + $0x514] sm:$0xf]  ;;  %v11495_v23 = vld [vmem:[#allocation2 + $0x10c] sm:$0xf]  ;;  %v10556_v45 = vld [vmem:[#allocation2 + $0x218] sm:$0xf] }
 0x67e   : > { %7889 = vmatpush.bf16.msra.mxu0 %v10741_v44  ;;  %7913 = vmatpush.bf16.msra.mxu1 %v10933_v38  ;;  %6416 = vst [vmem:[#allocation2 + $0x498] sm:$0xff] %v6384_v50  ;;  %v6512_v5 = vpack.c.bf16 %v6468_v35, %v6467_v55  ;;  %v10673_v44 = vor.u32 %v11559_v21, %v10670_v57  ;;  %v6241_v38 = vpop.f32.mrf.mxu1 }
 0x67f   : > { %7821 = vmatmul.bf16.vlgmr.msrb.gmra.mxu0 %v13786_v29  ;;  %11046 = vmatmul.msk.bf16.vlgmr.msrb.gmra.mxu1 %vm3174_vm4, %v13784_v34  ;;  %8396 = vst [vmem:[%s13766_s26 + $0x98] sm:$0xff] %v6384_v50  ;;  %v10937_v39 = vor.u32 %v11624_v61, %v10934_v11  ;;  %v6438_v25 = vmax.f32 %v6241_v38, 0.0  ;;  %v10417_v1 = vor.u32 %v11495_v23, %v10414_v43 }
 0x680   : > { %6544 = vst [vmem:[#allocation2 + $0x598] sm:$0xff] %v6512_v5 }
 0x681   : > { %7876 = vmatpush.bf16.msrb.mxu3 %v10865_v54  ;;  %7781 = vmatpush.bf16.msra.mxu2 %v10345_v8  ;;  %v11488_v54 = vld [vmem:[#allocation2 + $0xcc] sm:$0xf0]  ;;  %v10873_v8 = vor.u32 %v11608_v15, %v10870_v20  ;;  %v6497_v59 = vpack.c.bf16 %v6438_v25, %v6437_v46  ;;  %v6224_v55 = vpop.f32.mrf.mxu0  ;;  %v11633_v61 = vld [vmem:[#allocation2 + $0x554] sm:$0xf0]  ;;  %v10942_v23 = vld [vmem:[#allocation2 + $0x558] sm:$0xf0] }
 0x682   : > { %7890 = vmatpush.bf16.msra.mxu0 %v10677_v62  ;;  %7914 = vmatpush.bf16.msra.mxu1 %v10869_v26  ;;  %v10357_v56 = vor.u32 %v11488_v54, %v10356_v60  ;;  %v6453_v53 = vmax.f32 %v6224_v55, 0.0  ;;  %v11463_v60 = vld [vmem:[#allocation2 + $0xc] sm:$0xf]  ;;  %v11601_v25 = vld [vmem:[#allocation2 + $0x454] sm:$0xf0] }
 0x683   : > { %v6191_v48 = vpop.f32.mrf.mxu2  ;;  %v6210_v62 = vpop.f32.mrf.mxu3  ;;  %6529 = vst [vmem:[#allocation2 + $0x520] sm:$0xff] %v6497_v59  ;;  %v11544_v59 = vld [vmem:[#allocation2 + $0x294] sm:$0xf] }
 0x684   : > { %v6483_v22 = vmax.f32 %v6191_v48, 0.0  ;;  %v6392_v14 = vpack.c.bf16 %v6210_v62, %v6191_v48  ;;  %v6484_v13 = vmax.f32 %v6210_v62, 0.0  ;;  %v11576_v48 = vld [vmem:[#allocation2 + $0x394] sm:$0xf] }
 0x685   : > { %7877 = vmatpush.bf16.msrb.mxu3 %v10801_v28  ;;  %7782 = vmatpush.bf16.msra.mxu2 %v10281_v52  ;;  %v6369_v28 = vpack.c.bf16 %v6241_v38, %v6222_v42  ;;  %v10481_v52 = vor.u32 %v11511_v12, %v10478_v18  ;;  %v10742_v62 = vld [vmem:[#allocation2 + $0x3d0] sm:$0xf0]  ;;  %v10876_v58 = vld [vmem:[#allocation2 + $0x498] sm:$0xf] }
 0x686   : > { %7891 = vmatpush.bf16.msra.mxu0 %v10613_v33  ;;  %7915 = vmatpush.bf16.msra.mxu1 %v10805_v7  ;;  %6424 = vst [vmem:[#allocation2 + $0x4d8] sm:$0xff] %v6392_v14  ;;  %v6520_v3 = vpack.c.bf16 %v6484_v13, %v6483_v22  ;;  %v11592_v33 = vld [vmem:[#allocation2 + $0x414] sm:$0xf]  ;;  %v6243_v50 = vpop.f32.mrf.mxu1  ;;  %v10745_v54 = vor.u32 %v11576_v48, %v10742_v62  ;;  %v10300_v62 = vld [vmem:[#allocation2 + $0x18] sm:$0xf] }
 0x687   : > { %8404 = vst [vmem:[%s13766_s26 + $0xd8] sm:$0xff] %v6392_v14  ;;  %v10809_v26 = vor.u32 %v11592_v33, %v10806_v2  ;;  %v11004_v35 = vld [vmem:[#allocation2 + $0x598] sm:$0xf]  ;;  %v6377_v7 = vpack.c.bf16 %v6243_v50, %v6224_v55  ;;  %v6454_v5 = vmax.f32 %v6243_v50, 0.0  ;;  %v11641_v38 = vld [vmem:[#allocation2 + $0x59c] sm:$0xf] }
 0x688   : > { %11044 = vmatmul.msk.bf16.vlgmr.msra.gmra.mxu3 %vm3174_vm4, %v13784_v34  ;;  %7783 = vmatmul.bf16.vlgmr.msra.gmra.mxu2 %v13786_v29  ;;  %6552 = vst [vmem:[#allocation2 + $0x5d8] sm:$0xff] %v6520_v3  ;;  %v11489_v50 = vld [vmem:[#allocation2 + $0xd4] sm:$0xf0] }
 0x689   : > { %7851 = vmatpush.bf16.msrb.mxu2 %v10737_v40  ;;  %7950 = vmatpush.bf16.msra.mxu3 %v11001_v30  ;;  %6401 = vst [vmem:[#allocation2 + $0x420] sm:$0xff] %v6369_v28  ;;  %v10748_v40 = vld [vmem:[#allocation2 + $0x398] sm:$0xf]  ;;  %v6505_v31 = vpack.c.bf16 %v6454_v5, %v6453_v53  ;;  %v6227_v14 = vpop.f32.mrf.mxu0 }
 0x68a   : > { %7892 = vmatpush.bf16.msra.mxu0 %v10549_v6  ;;  %8381 = vst [vmem:[%s13766_s26 + $0x20] sm:$0xff] %v6369_v28  ;;  %v10749_v27 = vor.u32 %v11585_v47, %v10748_v40  ;;  %v10684_v6 = vld [vmem:[#allocation2 + $0x318] sm:$0xf]  ;;  %v6469_v15 = vmax.f32 %v6227_v14, 0.0 }
 0x68b   : > { %v10685_v57 = vor.u32 %v11569_v0, %v10684_v6  ;;  %6409 = vst [vmem:[#allocation2 + $0x460] sm:$0xff] %v6377_v7  ;;  %v10940_v30 = vld [vmem:[#allocation2 + $0x518] sm:$0xf]  ;;  %v11625_v0 = vld [vmem:[#allocation2 + $0x51c] sm:$0xf] }
 0x68c   : > { %8389 = vst [vmem:[%s13766_s26 + $0x60] sm:$0xff] %v6377_v7  ;;  %v10812_v28 = vld [vmem:[#allocation2 + $0x418] sm:$0xf]  ;;  %v10945_v7 = vor.u32 %v11625_v0, %v10942_v23  ;;  %v10948_v0 = vld [vmem:[#allocation2 + $0x520] sm:$0xf] }
 0x68d   : > { %7852 = vmatpush.bf16.msrb.mxu2 %v10673_v44  ;;  %7951 = vmatpush.bf16.msra.mxu3 %v10937_v39  ;;  %v10620_v44 = vld [vmem:[#allocation2 + $0x298] sm:$0xf]  ;;  %6537 = vst [vmem:[#allocation2 + $0x560] sm:$0xff] %v6505_v31  ;;  %v10289_v39 = vor.u32 %v11463_v60, %v10286_v51  ;;  %v10813_v12 = vor.u32 %v11601_v25, %v10812_v28  ;;  %v11586_v51 = vld [vmem:[#allocation2 + $0x3dc] sm:$0xf0] }
 0x68e   : > { %7893 = vmatpush.bf16.msra.mxu0 %v10485_v41  ;;  %v11479_v41 = vld [vmem:[#allocation2 + $0x8c] sm:$0xf]  ;;  %v10621_v11 = vor.u32 %v11553_v4, %v10620_v44  ;;  %v6246_v13 = vpop.f32.mrf.mxu1  ;;  %v11617_v18 = vld [vmem:[#allocation2 + $0x4d4] sm:$0xf0]  ;;  %v11512_v4 = vld [vmem:[#allocation2 + $0x194] sm:$0xf] }
 0x68f   : > { %7826 = vmatmul.bf16.gmra.mxu0 %v13796_v19  ;;  %11047 = vmatmul.msk.bf16.gmra.mxu1 %vm3174_vm4, %v13799_v36  ;;  %v11649_v17 = vld [vmem:[#allocation2 + $0x5d4] sm:$0xf0]  ;;  %v10353_v63 = vor.u32 %v11479_v41, %v10350_v37  ;;  %v6385_v20 = vpack.c.bf16 %v6246_v13, %v6227_v14  ;;  %v6470_v3 = vmax.f32 %v6246_v13, 0.0  ;;  %v10877_v16 = vor.u32 %v11617_v18, %v10876_v58  ;;  %v11006_v33 = vld [vmem:[#allocation2 + $0x5d8] sm:$0xf0] }
 0x690   : > { %v11005_v21 = vor.u32 %v11649_v17, %v11004_v35  ;;  %v11505_v47 = vld [vmem:[#allocation2 + $0x154] sm:$0xf0]  ;;  %v11009_v40 = vor.u32 %v11641_v38, %v11006_v33  ;;  %v11528_v35 = vld [vmem:[#allocation2 + $0x214] sm:$0xf]  ;;  %v11570_v58 = vld [vmem:[#allocation2 + $0x35c] sm:$0xf0] }
 0x691   : > { %7853 = vmatpush.bf16.msrb.mxu2 %v10609_v9  ;;  %7952 = vmatpush.bf16.msra.mxu3 %v10873_v8  ;;  %v10941_v9 = vor.u32 %v11633_v61, %v10940_v30  ;;  %v10492_v8 = vld [vmem:[#allocation2 + $0x198] sm:$0xf]  ;;  %6417 = vst [vmem:[#allocation2 + $0x4a0] sm:$0xff] %v6385_v20  ;;  %v6513_v42 = vpack.c.bf16 %v6470_v3, %v6469_v15  ;;  %v10550_v17 = vld [vmem:[#allocation2 + $0x250] sm:$0xf0] }
 0x692   : > { %7894 = vmatpush.bf16.msra.mxu0 %v10421_v49  ;;  %7988 = vmatpush.bf16.msrb.mxu1 %v11005_v21  ;;  %v11537_v49 = vld [vmem:[#allocation2 + $0x254] sm:$0xf0]  ;;  %8397 = vst [vmem:[%s13766_s26 + $0xa0] sm:$0xff] %v6385_v20  ;;  %v10553_v41 = vor.u32 %v11528_v35, %v10550_v17  ;;  %v10486_v44 = vld [vmem:[#allocation2 + $0x1d0] sm:$0xf0] }
 0x693   : > { %v10557_v22 = vor.u32 %v11537_v49, %v10556_v45  ;;  %6545 = vst [vmem:[#allocation2 + $0x5a0] sm:$0xff] %v6513_v42  ;;  %v10364_v53 = vld [vmem:[#allocation2 + $0x98] sm:$0xf]  ;;  %v11609_v30 = vld [vmem:[#allocation2 + $0x49c] sm:$0xf]  ;;  %v10489_v13 = vor.u32 %v11512_v4, %v10486_v44 }
 0x694   : > { %v10365_v5 = vor.u32 %v11489_v50, %v10364_v53  ;;  %v11473_v21 = vld [vmem:[#allocation2 + $0x54] sm:$0xf0]  ;;  %v10878_v61 = vld [vmem:[#allocation2 + $0x4d8] sm:$0xf0]  ;;  %v11496_v45 = vld [vmem:[#allocation2 + $0x114] sm:$0xf] }
 0x695   : > { %7854 = vmatpush.bf16.msrb.mxu2 %v10545_v32  ;;  %7953 = vmatpush.bf16.msra.mxu3 %v10809_v26  ;;  %v11560_v32 = vld [vmem:[#allocation2 + $0x314] sm:$0xf]  ;;  %v6229_v26 = vpop.f32.mrf.mxu0  ;;  %v10301_v60 = vor.u32 %v11473_v21, %v10300_v62  ;;  %v10881_v14 = vor.u32 %v11609_v30, %v10878_v61  ;;  %v11593_v15 = vld [vmem:[#allocation2 + $0x41c] sm:$0xf]  ;;  %v10692_v3 = vld [vmem:[#allocation2 + $0x320] sm:$0xf] }
 0x696   : > { %7895 = vmatpush.bf16.msra.mxu0 %v10357_v56  ;;  %7989 = vmatpush.bf16.msrb.mxu1 %v10941_v9  ;;  %v11521_v56 = vld [vmem:[#allocation2 + $0x1d4] sm:$0xf0]  ;;  %v10681_v46 = vor.u32 %v11560_v32, %v10678_v24  ;;  %v6485_v6 = vmax.f32 %v6229_v26, 0.0  ;;  %v10814_v20 = vld [vmem:[#allocation2 + $0x458] sm:$0xf0] }
 0x697   : > { %v10493_v2 = vor.u32 %v11521_v56, %v10492_v8  ;;  %v10817_v18 = vor.u32 %v11593_v15, %v10814_v20  ;;  %v11480_v8 = vld [vmem:[#allocation2 + $0x94] sm:$0xf]  ;;  %v11554_v28 = vld [vmem:[#allocation2 + $0x2dc] sm:$0xf0]  ;;  %v11577_v50 = vld [vmem:[#allocation2 + $0x39c] sm:$0xf] }
 0x698   : > { %11045 = vmatmul.msk.bf16.gmra.mxu3 %vm3174_vm4, %v13799_v36  ;;  %7788 = vmatmul.bf16.gmra.mxu2 %v13796_v19  ;;  %v10358_v42 = vld [vmem:[#allocation2 + $0xd0] sm:$0xf0]  ;;  %v11634_v23 = vld [vmem:[#allocation2 + $0x55c] sm:$0xf0]  ;;  %v10686_v30 = vld [vmem:[#allocation2 + $0x358] sm:$0xf0] }
 0x699   : > { %7855 = vmatpush.bf16.msrb.mxu2 %v10481_v52  ;;  %v10428_v52 = vld [vmem:[#allocation2 + $0x118] sm:$0xf]  ;;  %v10500_v35 = vld [vmem:[#allocation2 + $0x1a0] sm:$0xf] }
 0x69a   : > { %7896 = vmatpush.bf16.msra.mxu0 %v10293_v10  ;;  %7990 = vmatpush.bf16.msrb.mxu1 %v10877_v16  ;;  %v10614_v10 = vld [vmem:[#allocation2 + $0x2d0] sm:$0xf0]  ;;  %v10429_v43 = vor.u32 %v11505_v47, %v10428_v52  ;;  %v11012_v56 = vld [vmem:[#allocation2 + $0x5a0] sm:$0xf]  ;;  %v10693_v16 = vor.u32 %v11570_v58, %v10692_v3  ;;  %v11642_v20 = vld [vmem:[#allocation2 + $0x5a4] sm:$0xf] }
 0x69b   : > { %v10617_v55 = vor.u32 %v11544_v59, %v10614_v10  ;;  %v11464_v59 = vld [vmem:[#allocation2 + $0x14] sm:$0xf]  ;;  %v10884_v53 = vld [vmem:[#allocation2 + $0x4a0] sm:$0xf] }
 0x69c   : > { %v10294_v10 = vld [vmem:[#allocation2 + $0x50] sm:$0xf0] }
 0x69d   : > { %7856 = vmatpush.bf16.msrb.mxu2 %v10417_v1 }
 0x69e   : > { %7965 = vmatpush.bf16.msrb.mxu0 %v10749_v27  ;;  %v6248_v27 = vpop.f32.mrf.mxu1  ;;  %7991 = vmatpush.bf16.msrb.mxu1 %v10813_v12 }
 0x69f   : > { %7897 = vmatmul.bf16.vlgmr.msra.gmra.mxu0 %v13786_v29  ;;  %11050 = vmatmul.msk.bf16.vlgmr.msra.gmra.mxu1 %vm3174_vm4, %v13784_v34  ;;  %v6393_v1 = vpack.c.bf16 %v6248_v27, %v6229_v26 }
 0x6a1   : > { %7857 = vmatpush.bf16.msrb.mxu2 %v10353_v63  ;;  %6425 = vst [vmem:[#allocation2 + $0x4e0] sm:$0xff] %v6393_v1 }
 0x6a2   : > { %7966 = vmatpush.bf16.msrb.mxu0 %v10685_v57  ;;  %v6486_v57 = vmax.f32 %v6248_v27, 0.0  ;;  %8405 = vst [vmem:[%s13766_s26 + $0xe0] sm:$0xff] %v6393_v1  ;;  %v10564_v27 = vld [vmem:[#allocation2 + $0x220] sm:$0xf]  ;;  %v10949_v1 = vor.u32 %v11634_v23, %v10948_v0 }
 0x6a3   : > { %v10308_v23 = vld [vmem:[#allocation2 + $0x20] sm:$0xf] }
 0x6a4   : > { %v6521_v37 = vpack.c.bf16 %v6486_v57, %v6485_v6  ;;  %v10750_v6 = vld [vmem:[#allocation2 + $0x3d8] sm:$0xf0]  ;;  %v10297_v57 = vor.u32 %v11464_v59, %v10294_v10 }
 0x6a5   : > { %7858 = vmatpush.bf16.msrb.mxu2 %v10289_v39  ;;  %v10422_v39 = vld [vmem:[#allocation2 + $0x150] sm:$0xf0] }
 0x6a6   : > { %7967 = vmatpush.bf16.msrb.mxu0 %v10621_v11  ;;  %6553 = vst [vmem:[#allocation2 + $0x5e0] sm:$0xff] %v6521_v37  ;;  %v10756_v11 = vld [vmem:[#allocation2 + $0x3a0] sm:$0xf]  ;;  %v10425_v24 = vor.u32 %v11496_v45, %v10422_v39 }
 0x6a7   : > { %v11506_v45 = vld [vmem:[#allocation2 + $0x15c] sm:$0xf0] }
 0x6a8   : > { %11048 = vmatmul.msk.bf16.vlgmr.msrb.gmra.mxu3 %vm3174_vm4, %v13784_v34  ;;  %7859 = vmatmul.bf16.vlgmr.msrb.gmra.mxu2 %v13786_v29 }
 0x6a9   : > { %7927 = vmatpush.bf16.msra.mxu2 %v10745_v54  ;;  %8026 = vmatpush.bf16.msrb.mxu3 %v11009_v40  ;;  %v10757_v54 = vor.u32 %v11586_v51, %v10756_v11  ;;  %v10361_v40 = vor.u32 %v11480_v8, %v10358_v42  ;;  %v11490_v8 = vld [vmem:[#allocation2 + $0xdc] sm:$0xf0] }
 0x6aa   : > { %7968 = vmatpush.bf16.msrb.mxu0 %v10557_v22 }
 0x6ab   : > { %v6260_v31 = vpop.f32.mrf.mxu2  ;;  %v6279_v63 = vpop.f32.mrf.mxu3 }
 0x6ac   : > { %v6439_v49 = vmax.f32 %v6260_v31, 0.0  ;;  %v6370_v9 = vpack.c.bf16 %v6279_v63, %v6260_v31  ;;  %v6440_v48 = vmax.f32 %v6279_v63, 0.0  ;;  %v11618_v63 = vld [vmem:[#allocation2 + $0x4dc] sm:$0xf0] }
 0x6ad   : > { %7928 = vmatpush.bf16.msra.mxu2 %v10681_v46  ;;  %8027 = vmatpush.bf16.msrb.mxu3 %v10945_v7  ;;  %v11650_v32 = vld [vmem:[#allocation2 + $0x5dc] sm:$0xf0]  ;;  %v10753_v7 = vor.u32 %v11577_v50, %v10750_v6  ;;  %v11014_v3 = vld [vmem:[#allocation2 + $0x5e0] sm:$0xf0] }
 0x6ae   : > { %7969 = vmatpush.bf16.msrb.mxu0 %v10493_v2  ;;  %6402 = vst [vmem:[#allocation2 + $0x428] sm:$0xff] %v6370_v9  ;;  %v6498_v22 = vpack.c.bf16 %v6440_v48, %v6439_v49  ;;  %v11013_v2 = vor.u32 %v11650_v32, %v11012_v56  ;;  %v10628_v46 = vld [vmem:[#allocation2 + $0x2a0] sm:$0xf]  ;;  %v10885_v49 = vor.u32 %v11618_v63, %v10884_v53  ;;  %v11610_v50 = vld [vmem:[#allocation2 + $0x4a4] sm:$0xf] }
 0x6af   : > { %8382 = vst [vmem:[%s13766_s26 + $0x28] sm:$0xff] %v6370_v9  ;;  %7902 = vmatmul.bf16.gmra.mxu0 %v13796_v19  ;;  %11051 = vmatmul.msk.bf16.gmra.mxu1 %vm3174_vm4, %v13799_v36  ;;  %v10629_v26 = vor.u32 %v11554_v28, %v10628_v46  ;;  %v11561_v9 = vld [vmem:[#allocation2 + $0x31c] sm:$0xf]  ;;  %v11474_v6 = vld [vmem:[#allocation2 + $0x5c] sm:$0xf0] }
 0x6b0   : > { %6530 = vst [vmem:[#allocation2 + $0x528] sm:$0xff] %v6498_v22  ;;  %8064 = vmatpush.bf16.msra.mxu1 %v11013_v2  ;;  %v10689_v22 = vor.u32 %v11561_v9, %v10686_v30  ;;  %v10558_v28 = vld [vmem:[#allocation2 + $0x258] sm:$0xf0]  ;;  %v10764_v53 = vld [vmem:[#allocation2 + $0x3a8] sm:$0xf] }
 0x6b1   : > { %7929 = vmatpush.bf16.msra.mxu2 %v10617_v55  ;;  %8028 = vmatpush.bf16.msrb.mxu3 %v10881_v14  ;;  %v10820_v14 = vld [vmem:[#allocation2 + $0x420] sm:$0xf]  ;;  %v10822_v9 = vld [vmem:[#allocation2 + $0x460] sm:$0xf0] }
 0x6b2   : > { %7970 = vmatpush.bf16.msrb.mxu0 %v10429_v43  ;;  %v11538_v43 = vld [vmem:[#allocation2 + $0x25c] sm:$0xf0] }
 0x6b3   : > { %v6262_v38 = vpop.f32.mrf.mxu2  ;;  %v6281_v33 = vpop.f32.mrf.mxu3  ;;  %v10565_v55 = vor.u32 %v11538_v43, %v10564_v27  ;;  %v11529_v27 = vld [vmem:[#allocation2 + $0x21c] sm:$0xf] }
 0x6b4   : > { %v6455_v25 = vmax.f32 %v6262_v38, 0.0  ;;  %v6378_v47 = vpack.c.bf16 %v6281_v33, %v6262_v38  ;;  %v6456_v12 = vmax.f32 %v6281_v33, 0.0  ;;  %8065 = vmatpush.bf16.msra.mxu1 %v10949_v1  ;;  %v10561_v0 = vor.u32 %v11529_v27, %v10558_v28  ;;  %v10494_v1 = vld [vmem:[#allocation2 + $0x1d8] sm:$0xf0] }
 0x6b5   : > { %7930 = vmatpush.bf16.msra.mxu2 %v10553_v41  ;;  %8029 = vmatpush.bf16.msrb.mxu3 %v10817_v18  ;;  %v11545_v18 = vld [vmem:[#allocation2 + $0x29c] sm:$0xf] }
 0x6b6   : > { %7971 = vmatpush.bf16.msrb.mxu0 %v10365_v5  ;;  %6410 = vst [vmem:[#allocation2 + $0x468] sm:$0xff] %v6378_v47  ;;  %v6506_v52 = vpack.c.bf16 %v6456_v12, %v6455_v25  ;;  %v11522_v5 = vld [vmem:[#allocation2 + $0x1dc] sm:$0xf0]  ;;  %v11017_v25 = vor.u32 %v11642_v20, %v11014_v3  ;;  %v11481_v3 = vld [vmem:[#allocation2 + $0x9c] sm:$0xf] }
 0x6b7   : > { %8390 = vst [vmem:[%s13766_s26 + $0x68] sm:$0xff] %v6378_v47  ;;  %v10501_v62 = vor.u32 %v11522_v5, %v10500_v35  ;;  %v10886_v35 = vld [vmem:[#allocation2 + $0x4e0] sm:$0xf0] }
 0x6b8   : > { %11049 = vmatmul.msk.bf16.gmra.mxu3 %vm3174_vm4, %v13799_v36  ;;  %6538 = vst [vmem:[#allocation2 + $0x568] sm:$0xff] %v6506_v52  ;;  %7864 = vmatmul.bf16.gmra.mxu2 %v13796_v19  ;;  %v11626_v52 = vld [vmem:[#allocation2 + $0x524] sm:$0xf] }
 0x6b9   : > { %7931 = vmatpush.bf16.msra.mxu2 %v10489_v13  ;;  %8066 = vmatpush.bf16.msra.mxu1 %v10885_v49  ;;  %v11602_v13 = vld [vmem:[#allocation2 + $0x45c] sm:$0xf0]  ;;  %v11594_v49 = vld [vmem:[#allocation2 + $0x424] sm:$0xf] }
 0x6ba   : > { %7972 = vmatpush.bf16.msrb.mxu0 %v10301_v60  ;;  %v6298_v44 = vpop.f32.mrf.mxu0  ;;  %v6317_v31 = vpop.f32.mrf.mxu1  ;;  %v10436_v60 = vld [vmem:[#allocation2 + $0x120] sm:$0xf]  ;;  %v10821_v15 = vor.u32 %v11602_v13, %v10820_v14  ;;  %v10956_v14 = vld [vmem:[#allocation2 + $0x528] sm:$0xf]  ;;  %v10825_v20 = vor.u32 %v11594_v49, %v10822_v9 }
 0x6bb   : > { %v6265_v17 = vpop.f32.mrf.mxu2  ;;  %v6284_v37 = vpop.f32.mrf.mxu3  ;;  %v6441_v61 = vmax.f32 %v6298_v44, 0.0  ;;  %v6371_v11 = vpack.c.bf16 %v6317_v31, %v6298_v44  ;;  %v6442_v51 = vmax.f32 %v6317_v31, 0.0  ;;  %v10437_v58 = vor.u32 %v11506_v45, %v10436_v60  ;;  %v11571_v44 = vld [vmem:[#allocation2 + $0x364] sm:$0xf0] }
 0x6bc   : > { %v6471_v21 = vmax.f32 %v6265_v17, 0.0  ;;  %v6386_v4 = vpack.c.bf16 %v6284_v37, %v6265_v17  ;;  %v6472_v41 = vmax.f32 %v6284_v37, 0.0  ;;  %v10309_v17 = vor.u32 %v11474_v6, %v10308_v23  ;;  %v11513_v37 = vld [vmem:[#allocation2 + $0x19c] sm:$0xf]  ;;  %v10694_v23 = vld [vmem:[#allocation2 + $0x360] sm:$0xf0] }
 0x6bd   : > { %7932 = vmatpush.bf16.msra.mxu2 %v10425_v24  ;;  %v6499_v39 = vpack.c.bf16 %v6442_v51, %v6441_v61  ;;  %6403 = vst [vmem:[#allocation2 + $0x430] sm:$0xff] %v6371_v11  ;;  %8067 = vmatpush.bf16.msra.mxu1 %v10821_v15  ;;  %v10889_v31 = vor.u32 %v11610_v50, %v10886_v35  ;;  %v11497_v51 = vld [vmem:[#allocation2 + $0x11c] sm:$0xf]  ;;  %v11555_v15 = vld [vmem:[#allocation2 + $0x2e4] sm:$0xf0] }
 0x6be   : > { %8041 = vmatpush.bf16.msra.mxu0 %v10757_v54  ;;  %6418 = vst [vmem:[#allocation2 + $0x4a8] sm:$0xff] %v6386_v4  ;;  %v6514_v48 = vpack.c.bf16 %v6472_v41, %v6471_v21  ;;  %v10622_v54 = vld [vmem:[#allocation2 + $0x2d8] sm:$0xf0]  ;;  %v10828_v6 = vld [vmem:[#allocation2 + $0x428] sm:$0xf] }
 0x6bf   : > { %8398 = vst [vmem:[%s13766_s26 + $0xa8] sm:$0xff] %v6386_v4  ;;  %7973 = vmatmul.bf16.vlgmr.msrb.gmra.mxu0 %v13786_v29  ;;  %11054 = vmatmul.msk.bf16.vlgmr.msrb.gmra.mxu1 %vm3174_vm4, %v13784_v34  ;;  %v10625_v24 = vor.u32 %v11545_v18, %v10622_v54  ;;  %v10430_v21 = vld [vmem:[#allocation2 + $0x158] sm:$0xf0]  ;;  %v11635_v13 = vld [vmem:[#allocation2 + $0x564] sm:$0xf0] }
 0x6c0   : > { %6546 = vst [vmem:[#allocation2 + $0x5a8] sm:$0xff] %v6514_v48  ;;  %v10700_v48 = vld [vmem:[#allocation2 + $0x328] sm:$0xf]  ;;  %v10433_v45 = vor.u32 %v11497_v51, %v10430_v21  ;;  %v10366_v54 = vld [vmem:[#allocation2 + $0xd8] sm:$0xf0]  ;;  %v10957_v18 = vor.u32 %v11635_v13, %v10956_v14 }
 0x6c1   : > { %7933 = vmatpush.bf16.msra.mxu2 %v10361_v40  ;;  %6531 = vst [vmem:[#allocation2 + $0x530] sm:$0xff] %v6499_v39  ;;  %v10950_v40 = vld [vmem:[#allocation2 + $0x560] sm:$0xf0]  ;;  %v10701_v39 = vor.u32 %v11571_v44, %v10700_v48  ;;  %v11507_v35 = vld [vmem:[#allocation2 + $0x164] sm:$0xf0] }
 0x6c2   : > { %8042 = vmatpush.bf16.msra.mxu0 %v10693_v16  ;;  %8383 = vst [vmem:[%s13766_s26 + $0x30] sm:$0xff] %v6371_v11  ;;  %v10372_v16 = vld [vmem:[#allocation2 + $0xa0] sm:$0xf]  ;;  %v6300_v2 = vpop.f32.mrf.mxu0  ;;  %v6319_v46 = vpop.f32.mrf.mxu1  ;;  %v11491_v44 = vld [vmem:[#allocation2 + $0xe4] sm:$0xf0] }
 0x6c3   : > { %v6267_v56 = vpop.f32.mrf.mxu2  ;;  %v6286_v32 = vpop.f32.mrf.mxu3  ;;  %v6457_v47 = vmax.f32 %v6300_v2, 0.0  ;;  %v6379_v12 = vpack.c.bf16 %v6319_v46, %v6300_v2  ;;  %v6458_v59 = vmax.f32 %v6319_v46, 0.0  ;;  %v10380_v51 = vld [vmem:[#allocation2 + $0xa8] sm:$0xf]  ;;  %v11627_v13 = vld [vmem:[#allocation2 + $0x52c] sm:$0xf] }
 0x6c4   : > { %v6487_v42 = vmax.f32 %v6267_v56, 0.0  ;;  %v6394_v38 = vpack.c.bf16 %v6286_v32, %v6267_v56  ;;  %v6488_v33 = vmax.f32 %v6286_v32, 0.0  ;;  %v10369_v56 = vor.u32 %v11481_v3, %v10366_v54  ;;  %v10316_v14 = vld [vmem:[#allocation2 + $0x28] sm:$0xf] }
 0x6c5   : > { %7934 = vmatpush.bf16.msra.mxu2 %v10297_v57  ;;  %v6507_v43 = vpack.c.bf16 %v6458_v59, %v6457_v47  ;;  %v11587_v57 = vld [vmem:[#allocation2 + $0x3e4] sm:$0xf0]  ;;  %6411 = vst [vmem:[#allocation2 + $0x470] sm:$0xff] %v6379_v12  ;;  %v10758_v47 = vld [vmem:[#allocation2 + $0x3e0] sm:$0xf0]  ;;  %v10381_v49 = vor.u32 %v11491_v44, %v10380_v51 }
 0x6c6   : > { %8043 = vmatpush.bf16.msra.mxu0 %v10629_v26  ;;  %6426 = vst [vmem:[#allocation2 + $0x4e8] sm:$0xff] %v6394_v38  ;;  %v6522_v10 = vpack.c.bf16 %v6488_v33, %v6487_v42  ;;  %v10373_v26 = vor.u32 %v11490_v8, %v10372_v16  ;;  %v10765_v5 = vor.u32 %v11587_v57, %v10764_v53  ;;  %v11539_v33 = vld [vmem:[#allocation2 + $0x264] sm:$0xf0]  ;;  %v10630_v53 = vld [vmem:[#allocation2 + $0x2e0] sm:$0xf0] }
 0x6c7   : > { %8406 = vst [vmem:[%s13766_s26 + $0xe8] sm:$0xff] %v6394_v38  ;;  %v11020_v63 = vld [vmem:[#allocation2 + $0x5a8] sm:$0xf]  ;;  %v10302_v38 = vld [vmem:[#allocation2 + $0x58] sm:$0xf0] }
 0x6c8   : > { %11052 = vmatmul.msk.bf16.vlgmr.msra.gmra.mxu3 %vm3174_vm4, %v13784_v34  ;;  %6554 = vst [vmem:[#allocation2 + $0x5e8] sm:$0xff] %v6522_v10  ;;  %7935 = vmatmul.bf16.vlgmr.msra.gmra.mxu2 %v13786_v29  ;;  %v10572_v59 = vld [vmem:[#allocation2 + $0x228] sm:$0xf] }
 0x6c9   : > { %8003 = vmatpush.bf16.msrb.mxu2 %v10753_v7  ;;  %8102 = vmatpush.bf16.msra.mxu3 %v11017_v25  ;;  %6539 = vst [vmem:[#allocation2 + $0x570] sm:$0xff] %v6507_v43  ;;  %v10497_v7 = vor.u32 %v11513_v37, %v10494_v1  ;;  %v11578_v25 = vld [vmem:[#allocation2 + $0x3a4] sm:$0xf]  ;;  %v11523_v43 = vld [vmem:[#allocation2 + $0x1e4] sm:$0xf0] }
 0x6ca   : > { %8044 = vmatpush.bf16.msra.mxu0 %v10565_v55  ;;  %v10953_v55 = vor.u32 %v11626_v52, %v10950_v40  ;;  %8391 = vst [vmem:[%s13766_s26 + $0x70] sm:$0xff] %v6379_v12  ;;  %v11465_v12 = vld [vmem:[#allocation2 + $0x1c] sm:$0xf]  ;;  %v10761_v27 = vor.u32 %v11578_v25, %v10758_v47  ;;  %v11603_v1 = vld [vmem:[#allocation2 + $0x464] sm:$0xf0] }
 0x6cb   : > { %v6322_v41 = vpop.f32.mrf.mxu1  ;;  %v10305_v40 = vor.u32 %v11465_v12, %v10302_v38  ;;  %v10508_v57 = vld [vmem:[#allocation2 + $0x1a8] sm:$0xf]  ;;  %v11546_v37 = vld [vmem:[#allocation2 + $0x2a4] sm:$0xf]  ;;  %v11611_v12 = vld [vmem:[#allocation2 + $0x4ac] sm:$0xf] }
 0x6cc   : > { %v6303_v4 = vpop.f32.mrf.mxu0  ;;  %v6474_v11 = vmax.f32 %v6322_v41, 0.0 }
 0x6cd   : > { %8004 = vmatpush.bf16.msrb.mxu2 %v10689_v22  ;;  %8103 = vmatpush.bf16.msra.mxu3 %v10953_v55  ;;  %v6473_v30 = vmax.f32 %v6303_v4, 0.0  ;;  %v6387_v61 = vpack.c.bf16 %v6322_v41, %v6303_v4  ;;  %v11619_v16 = vld [vmem:[#allocation2 + $0x4e4] sm:$0xf0]  ;;  %v10509_v55 = vor.u32 %v11523_v43, %v10508_v57  ;;  %v10633_v41 = vor.u32 %v11546_v37, %v10630_v53  ;;  %v10644_v43 = vld [vmem:[#allocation2 + $0x2b0] sm:$0xf] }
 0x6ce   : > { %8045 = vmatpush.bf16.msra.mxu0 %v10501_v62  ;;  %v11466_v37 = vld [vmem:[#allocation2 + $0x24] sm:$0xf] }
 0x6cf   : > { %v11651_v62 = vld [vmem:[#allocation2 + $0x5e4] sm:$0xf0]  ;;  %6419 = vst [vmem:[#allocation2 + $0x4b0] sm:$0xff] %v6387_v61  ;;  %v6515_v60 = vpack.c.bf16 %v6474_v11, %v6473_v30  ;;  %7978 = vmatmul.bf16.gmra.mxu0 %v13796_v19  ;;  %11055 = vmatmul.msk.bf16.gmra.mxu1 %vm3174_vm4, %v13799_v36  ;;  %v10566_v30 = vld [vmem:[#allocation2 + $0x260] sm:$0xf0] }
 0x6d0   : > { %v11021_v22 = vor.u32 %v11651_v62, %v11020_v63  ;;  %8399 = vst [vmem:[%s13766_s26 + $0xb0] sm:$0xff] %v6387_v61  ;;  %v11643_v61 = vld [vmem:[#allocation2 + $0x5ac] sm:$0xf]  ;;  %v11475_v62 = vld [vmem:[#allocation2 + $0x64] sm:$0xf0] }
 0x6d1   : > { %8005 = vmatpush.bf16.msrb.mxu2 %v10625_v24  ;;  %8104 = vmatpush.bf16.msra.mxu3 %v10889_v31  ;;  %6547 = vst [vmem:[#allocation2 + $0x5b0] sm:$0xff] %v6515_v60  ;;  %v10892_v24 = vld [vmem:[#allocation2 + $0x4a8] sm:$0xf]  ;;  %v11530_v31 = vld [vmem:[#allocation2 + $0x224] sm:$0xf]  ;;  %v10317_v54 = vor.u32 %v11475_v62, %v10316_v14 }
 0x6d2   : > { %8046 = vmatpush.bf16.msra.mxu0 %v10437_v58  ;;  %v10636_v58 = vld [vmem:[#allocation2 + $0x2a8] sm:$0xf]  ;;  %8140 = vmatpush.bf16.msrb.mxu1 %v11021_v22  ;;  %v10893_v10 = vor.u32 %v11619_v16, %v10892_v24  ;;  %v11022_v11 = vld [vmem:[#allocation2 + $0x5e8] sm:$0xf0]  ;;  %v10569_v9 = vor.u32 %v11530_v31, %v10566_v30  ;;  %v11514_v60 = vld [vmem:[#allocation2 + $0x1a4] sm:$0xf] }
 0x6d3   : > { %v10637_v32 = vor.u32 %v11555_v15, %v10636_v58  ;;  %v6324_v42 = vpop.f32.mrf.mxu1  ;;  %v11025_v48 = vor.u32 %v11643_v61, %v11022_v11  ;;  %v11588_v22 = vld [vmem:[#allocation2 + $0x3ec] sm:$0xf0]  ;;  %v10958_v15 = vld [vmem:[#allocation2 + $0x568] sm:$0xf0] }
 0x6d4   : > { %v6305_v8 = vpop.f32.mrf.mxu0  ;;  %v6490_v28 = vmax.f32 %v6324_v42, 0.0  ;;  %v11636_v3 = vld [vmem:[#allocation2 + $0x56c] sm:$0xf0]  ;;  %v10766_v31 = vld [vmem:[#allocation2 + $0x3e8] sm:$0xf0] }
 0x6d5   : > { %8006 = vmatpush.bf16.msrb.mxu2 %v10561_v0  ;;  %8105 = vmatpush.bf16.msra.mxu3 %v10825_v20  ;;  %v6489_v2 = vmax.f32 %v6305_v8, 0.0  ;;  %v6395_v46 = vpack.c.bf16 %v6324_v42, %v6305_v8  ;;  %v11562_v0 = vld [vmem:[#allocation2 + $0x324] sm:$0xf]  ;;  %v10964_v20 = vld [vmem:[#allocation2 + $0x530] sm:$0xf] }
 0x6d6   : > { %8047 = vmatpush.bf16.msra.mxu0 %v10373_v26  ;;  %8141 = vmatpush.bf16.msrb.mxu1 %v10957_v18  ;;  %v10573_v26 = vor.u32 %v11539_v33, %v10572_v59  ;;  %v10697_v50 = vor.u32 %v11562_v0, %v10694_v23  ;;  %v10708_v24 = vld [vmem:[#allocation2 + $0x330] sm:$0xf]  ;;  %v10965_v16 = vor.u32 %v11636_v3, %v10964_v20  ;;  %v10894_v59 = vld [vmem:[#allocation2 + $0x4e8] sm:$0xf0] }
 0x6d7   : > { %6427 = vst [vmem:[#allocation2 + $0x4f0] sm:$0xff] %v6395_v46  ;;  %v6523_v52 = vpack.c.bf16 %v6490_v28, %v6489_v2  ;;  %v11572_v8 = vld [vmem:[#allocation2 + $0x36c] sm:$0xf0]  ;;  %v10897_v57 = vor.u32 %v11611_v12, %v10894_v59  ;;  %v11531_v12 = vld [vmem:[#allocation2 + $0x22c] sm:$0xf] }
 0x6d8   : > { %11053 = vmatmul.msk.bf16.gmra.mxu3 %vm3174_vm4, %v13799_v36  ;;  %8407 = vst [vmem:[%s13766_s26 + $0xf0] sm:$0xff] %v6395_v46  ;;  %7940 = vmatmul.bf16.gmra.mxu2 %v13796_v19  ;;  %v11028_v21 = vld [vmem:[#allocation2 + $0x5b0] sm:$0xf]  ;;  %v10961_v46 = vor.u32 %v11627_v13, %v10958_v15  ;;  %v11563_v13 = vld [vmem:[#allocation2 + $0x32c] sm:$0xf] }
 0x6d9   : > { %8007 = vmatpush.bf16.msrb.mxu2 %v10497_v7  ;;  %6555 = vst [vmem:[#allocation2 + $0x5f0] sm:$0xff] %v6523_v52  ;;  %v10444_v7 = vld [vmem:[#allocation2 + $0x128] sm:$0xf]  ;;  %v10900_v42 = vld [vmem:[#allocation2 + $0x4b0] sm:$0xf] }
 0x6da   : > { %8048 = vmatpush.bf16.msra.mxu0 %v10309_v17  ;;  %8142 = vmatpush.bf16.msrb.mxu1 %v10893_v10  ;;  %v10829_v17 = vor.u32 %v11603_v1, %v10828_v6  ;;  %v11482_v10 = vld [vmem:[#allocation2 + $0xa4] sm:$0xf]  ;;  %v11556_v0 = vld [vmem:[#allocation2 + $0x2ec] sm:$0xf0] }
 0x6db   : > { %v10836_v6 = vld [vmem:[#allocation2 + $0x430] sm:$0xf] }
 0x6dc   : > { %v11604_v1 = vld [vmem:[#allocation2 + $0x46c] sm:$0xf0] }
 0x6dd   : > { %8008 = vmatpush.bf16.msrb.mxu2 %v10433_v45  ;;  %v10502_v45 = vld [vmem:[#allocation2 + $0x1e0] sm:$0xf0]  ;;  %v10837_v53 = vor.u32 %v11604_v1, %v10836_v6  ;;  %v10516_v62 = vld [vmem:[#allocation2 + $0x1b0] sm:$0xf] }
 0x6de   : > { %8117 = vmatpush.bf16.msrb.mxu0 %v10765_v5  ;;  %8143 = vmatpush.bf16.msrb.mxu1 %v10829_v17  ;;  %v10445_v5 = vor.u32 %v11507_v35, %v10444_v7  ;;  %v10505_v58 = vor.u32 %v11514_v60, %v10502_v45  ;;  %v11620_v38 = vld [vmem:[#allocation2 + $0x4ec] sm:$0xf0]  ;;  %v10645_v17 = vor.u32 %v11556_v0, %v10644_v43  ;;  %v10310_v7 = vld [vmem:[#allocation2 + $0x60] sm:$0xf0]  ;;  %v10702_v45 = vld [vmem:[#allocation2 + $0x368] sm:$0xf0] }
 0x6df   : > { %8049 = vmatmul.bf16.vlgmr.msra.gmra.mxu0 %v13786_v29  ;;  %11058 = vmatmul.msk.bf16.vlgmr.msra.gmra.mxu1 %vm3174_vm4, %v13784_v34  ;;  %v10901_v52 = vor.u32 %v11620_v38, %v10900_v42  ;;  %v10313_v11 = vor.u32 %v11466_v37, %v10310_v7  ;;  %v11524_v60 = vld [vmem:[#allocation2 + $0x1ec] sm:$0xf0]  ;;  %v11589_v43 = vld [vmem:[#allocation2 + $0x3f4] sm:$0xf0]  ;;  %v11644_v0 = vld [vmem:[#allocation2 + $0x5b4] sm:$0xf] }
 0x6e0   : > { %v11652_v4 = vld [vmem:[#allocation2 + $0x5ec] sm:$0xf0]  ;;  %v10517_v14 = vor.u32 %v11524_v60, %v10516_v62 }
 0x6e1   : > { %8009 = vmatpush.bf16.msrb.mxu2 %v10369_v56  ;;  %v11029_v63 = vor.u32 %v11652_v4, %v11028_v21  ;;  %v11498_v56 = vld [vmem:[#allocation2 + $0x124] sm:$0xf]  ;;  %v11540_v21 = vld [vmem:[#allocation2 + $0x26c] sm:$0xf0] }
 0x6e2   : > { %8118 = vmatpush.bf16.msrb.mxu0 %v10701_v39  ;;  %v10772_v39 = vld [vmem:[#allocation2 + $0x3b0] sm:$0xf] }
 0x6e3   : > { %8216 = vmatpush.bf16.msra.mxu1 %v11029_v63  ;;  %v10773_v18 = vor.u32 %v11588_v22, %v10772_v39  ;;  %v13871_v39 = vpop.f32.mrf.mxu0  ;;  %v13873_v22 = vpop.f32.mrf.mxu1  ;;  %v10452_v15 = vld [vmem:[#allocation2 + $0x130] sm:$0xf] }
 0x6e4   : > { %v11508_v20 = vld [vmem:[#allocation2 + $0x16c] sm:$0xf0] }
 0x6e5   : > { %8010 = vmatpush.bf16.msrb.mxu2 %v10305_v40 }
 0x6e6   : > { %8119 = vmatpush.bf16.msrb.mxu0 %v10637_v32  ;;  %v10438_v32 = vld [vmem:[#allocation2 + $0x160] sm:$0xf0] }
 0x6e7   : > { %8217 = vmatpush.bf16.msra.mxu1 %v10965_v16  ;;  %v10441_v40 = vor.u32 %v11498_v56, %v10438_v32  ;;  %v10453_v16 = vor.u32 %v11508_v20, %v10452_v15  ;;  %v10902_v15 = vld [vmem:[#allocation2 + $0x4f0] sm:$0xf0] }
 0x6e8   : > { %11056 = vmatmul.msk.bf16.vlgmr.msrb.gmra.mxu3 %vm3174_vm4, %v13784_v34  ;;  %8011 = vmatmul.bf16.vlgmr.msrb.gmra.mxu2 %v13786_v29 }
 0x6e9   : > { %8079 = vmatpush.bf16.msra.mxu2 %v10761_v27  ;;  %8178 = vmatpush.bf16.msrb.mxu3 %v11025_v48  ;;  %v10374_v27 = vld [vmem:[#allocation2 + $0xe0] sm:$0xf0] }
 0x6ea   : > { %8120 = vmatpush.bf16.msrb.mxu0 %v10573_v26  ;;  %v10709_v26 = vor.u32 %v11572_v8, %v10708_v24  ;;  %v10377_v35 = vor.u32 %v11482_v10, %v10374_v27  ;;  %v11547_v8 = vld [vmem:[#allocation2 + $0x2ac] sm:$0xf]  ;;  %v10324_v10 = vld [vmem:[#allocation2 + $0x30] sm:$0xf] }
 0x6eb   : > { %v6336_v33 = vpop.f32.mrf.mxu2  ;;  %v6355_v2 = vpop.f32.mrf.mxu3  ;;  %8218 = vmatpush.bf16.msra.mxu1 %v10901_v52  ;;  %v11476_v52 = vld [vmem:[#allocation2 + $0x6c] sm:$0xf0] }
 0x6ec   : > { %v6443_v28 = vmax.f32 %v6336_v33, 0.0  ;;  %v6372_v25 = vpack.c.bf16 %v6355_v2, %v6336_v33  ;;  %v6444_v47 = vmax.f32 %v6355_v2, 0.0  ;;  %v10388_v33 = vld [vmem:[#allocation2 + $0xb0] sm:$0xf] }
 0x6ed   : > { %8080 = vmatpush.bf16.msra.mxu2 %v10697_v50  ;;  %8179 = vmatpush.bf16.msrb.mxu3 %v10961_v46  ;;  %v10830_v50 = vld [vmem:[#allocation2 + $0x468] sm:$0xf0]  ;;  %v11492_v2 = vld [vmem:[#allocation2 + $0xec] sm:$0xf0] }
 0x6ee   : > { %8121 = vmatpush.bf16.msrb.mxu0 %v10509_v55  ;;  %6404 = vst [vmem:[#allocation2 + $0x438] sm:$0xff] %v6372_v25  ;;  %v6500_v23 = vpack.c.bf16 %v6444_v47, %v6443_v28  ;;  %v11595_v55 = vld [vmem:[#allocation2 + $0x42c] sm:$0xf]  ;;  %v13877_v28 = vpop.f32.mrf.mxu0  ;;  %v10389_v47 = vor.u32 %v11492_v2, %v10388_v33 }
 0x6ef   : > { %8384 = vst [vmem:[%s13766_s26 + $0x38] sm:$0xff] %v6372_v25  ;;  %v10833_v44 = vor.u32 %v11595_v55, %v10830_v50  ;;  %8054 = vmatmul.bf16.gmra.mxu0 %v13796_v19  ;;  %11059 = vmatmul.msk.bf16.gmra.mxu1 %vm3174_vm4, %v13799_v36  ;;  %v10574_v46 = vld [vmem:[#allocation2 + $0x268] sm:$0xf0]  ;;  %v13879_v25 = vpop.f32.mrf.mxu1  ;;  %v10325_v55 = vor.u32 %v11476_v52, %v10324_v10 }
 0x6f0   : > { %6532 = vst [vmem:[#allocation2 + $0x538] sm:$0xff] %v6500_v23  ;;  %8219 = vmatpush.bf16.msra.mxu1 %v10837_v53  ;;  %v10577_v59 = vor.u32 %v11531_v12, %v10574_v46  ;;  %v11030_v23 = vld [vmem:[#allocation2 + $0x5f0] sm:$0xf0]  ;;  %v11515_v50 = vld [vmem:[#allocation2 + $0x1ac] sm:$0xf] }
 0x6f1   : > { %8081 = vmatpush.bf16.msra.mxu2 %v10633_v41  ;;  %8180 = vmatpush.bf16.msrb.mxu3 %v10897_v57  ;;  %v11033_v7 = vor.u32 %v11644_v0, %v11030_v23  ;;  %v11467_v46 = vld [vmem:[#allocation2 + $0x2c] sm:$0xf] }
 0x6f2   : > { %8122 = vmatpush.bf16.msrb.mxu0 %v10445_v5  ;;  %v10580_v5 = vld [vmem:[#allocation2 + $0x230] sm:$0xf] }
 0x6f3   : > { %v6338_v4 = vpop.f32.mrf.mxu2  ;;  %v6357_v41 = vpop.f32.mrf.mxu3  ;;  %v10581_v51 = vor.u32 %v11540_v21, %v10580_v5  ;;  %v10446_v5 = vld [vmem:[#allocation2 + $0x168] sm:$0xf0]  ;;  %v11573_v21 = vld [vmem:[#allocation2 + $0x374] sm:$0xf0] }
 0x6f4   : > { %v6459_v63 = vmax.f32 %v6338_v4, 0.0  ;;  %v6380_v30 = vpack.c.bf16 %v6357_v41, %v6338_v4  ;;  %v6460_v61 = vmax.f32 %v6357_v41, 0.0  ;;  %v11499_v4 = vld [vmem:[#allocation2 + $0x12c] sm:$0xf] }
 0x6f5   : > { %8082 = vmatpush.bf16.msra.mxu2 %v10569_v9  ;;  %8181 = vmatpush.bf16.msrb.mxu3 %v10833_v44 }
 0x6f6   : > { %8123 = vmatpush.bf16.msrb.mxu0 %v10381_v49  ;;  %v11579_v49 = vld [vmem:[#allocation2 + $0x3ac] sm:$0xf]  ;;  %6412 = vst [vmem:[#allocation2 + $0x478] sm:$0xff] %v6380_v30  ;;  %v6508_v9 = vpack.c.bf16 %v6460_v61, %v6459_v63  ;;  %v13885_v41 = vpop.f32.mrf.mxu0  ;;  %v11628_v63 = vld [vmem:[#allocation2 + $0x534] sm:$0xf]  ;;  %v10449_v61 = vor.u32 %v11499_v4, %v10446_v5 }
 0x6f7   : > { %v10769_v48 = vor.u32 %v11579_v49, %v10766_v31  ;;  %8392 = vst [vmem:[%s13766_s26 + $0x78] sm:$0xff] %v6380_v30  ;;  %v13887_v44 = vpop.f32.mrf.mxu1  ;;  %v10716_v31 = vld [vmem:[#allocation2 + $0x338] sm:$0xf]  ;;  %v10966_v30 = vld [vmem:[#allocation2 + $0x570] sm:$0xf0] }
 0x6f8   : > { %6540 = vst [vmem:[#allocation2 + $0x578] sm:$0xff] %v6508_v9  ;;  %11057 = vmatmul.msk.bf16.gmra.mxu3 %vm3174_vm4, %v13799_v36  ;;  %8016 = vmatmul.bf16.gmra.mxu2 %v13796_v19  ;;  %v10382_v49 = vld [vmem:[#allocation2 + $0xe8] sm:$0xf0]  ;;  %v11557_v9 = vld [vmem:[#allocation2 + $0x2f4] sm:$0xf0]  ;;  %v10969_v60 = vor.u32 %v11628_v63, %v10966_v30 }
 0x6f9   : > { %8083 = vmatpush.bf16.msra.mxu2 %v10505_v58  ;;  %v11509_v5 = vld [vmem:[#allocation2 + $0x174] sm:$0xf0] }
 0x6fa   : > { %8124 = vmatpush.bf16.msrb.mxu0 %v10317_v54  ;;  %v10705_v54 = vor.u32 %v11563_v13, %v10702_v45  ;;  %v11483_v45 = vld [vmem:[#allocation2 + $0xac] sm:$0xf]  ;;  %v10652_v13 = vld [vmem:[#allocation2 + $0x2b8] sm:$0xf] }
 0x6fb   : > { %v6341_v3 = vpop.f32.mrf.mxu2  ;;  %v6360_v58 = vpop.f32.mrf.mxu3  ;;  %v10385_v20 = vor.u32 %v11483_v45, %v10382_v49  ;;  %v10460_v63 = vld [vmem:[#allocation2 + $0x138] sm:$0xf]  ;;  %v10582_v45 = vld [vmem:[#allocation2 + $0x270] sm:$0xf0] }
 0x6fc   : > { %v6475_v56 = vmax.f32 %v6341_v3, 0.0  ;;  %v6388_v32 = vpack.c.bf16 %v6360_v58, %v6341_v3  ;;  %v6476_v24 = vmax.f32 %v6360_v58, 0.0  ;;  %v10653_v3 = vor.u32 %v11557_v9, %v10652_v13  ;;  %v10318_v58 = vld [vmem:[#allocation2 + $0x68] sm:$0xf0]  ;;  %v11493_v49 = vld [vmem:[#allocation2 + $0xf4] sm:$0xf0] }
 0x6fd   : > { %8084 = vmatpush.bf16.msra.mxu2 %v10441_v40  ;;  %v10510_v40 = vld [vmem:[#allocation2 + $0x1e8] sm:$0xf0]  ;;  %v11605_v30 = vld [vmem:[#allocation2 + $0x474] sm:$0xf0]  ;;  %v7771_v9 = vadd.f32 %v13887_v44, %v13885_v41  ;;  %v10518_v41 = vld [vmem:[#allocation2 + $0x1f0] sm:$0xf0] }
 0x6fe   : > { %8193 = vmatpush.bf16.msra.mxu0 %v10773_v18  ;;  %v10638_v18 = vld [vmem:[#allocation2 + $0x2e8] sm:$0xf0]  ;;  %6420 = vst [vmem:[#allocation2 + $0x4b8] sm:$0xff] %v6388_v32  ;;  %v6516_v42 = vpack.c.bf16 %v6476_v24, %v6475_v56  ;;  %v10513_v37 = vor.u32 %v11515_v50, %v10510_v40  ;;  %v10774_v24 = vld [vmem:[#allocation2 + $0x3f0] sm:$0xf0]  ;;  %v13895_v33 = vpop.f32.mrf.mxu0 }
 0x6ff   : > { %v10641_v38 = vor.u32 %v11547_v8, %v10638_v18  ;;  %8400 = vst [vmem:[%s13766_s26 + $0xb8] sm:$0xff] %v6388_v32  ;;  %8125 = vmatmul.bf16.vlgmr.msrb.gmra.mxu0 %v13786_v29  ;;  %11062 = vmatmul.msk.bf16.vlgmr.msrb.gmra.mxu1 %vm3174_vm4, %v13784_v34  ;;  %v13897_v2 = vpop.f32.mrf.mxu1  ;;  %v11637_v12 = vld [vmem:[#allocation2 + $0x574] sm:$0xf0] }
 0x700   : > { %6548 = vst [vmem:[#allocation2 + $0x5b8] sm:$0xff] %v6516_v42  ;;  %v11596_v42 = vld [vmem:[#allocation2 + $0x434] sm:$0xf]  ;;  %v10524_v50 = vld [vmem:[#allocation2 + $0x1b8] sm:$0xf] }
 0x701   : > { %8085 = vmatpush.bf16.msra.mxu2 %v10377_v35  ;;  %v10780_v35 = vld [vmem:[#allocation2 + $0x3b8] sm:$0xf] }
 0x702   : > { %8194 = vmatpush.bf16.msra.mxu0 %v10709_v26  ;;  %v10781_v53 = vor.u32 %v11589_v43, %v10780_v35  ;;  %v10396_v13 = vld [vmem:[#allocation2 + $0xb8] sm:$0xf] }
 0x703   : > { %v6343_v26 = vpop.f32.mrf.mxu2  ;;  %v6362_v27 = vpop.f32.mrf.mxu3 }
 0x704   : > { %v6491_v6 = vmax.f32 %v6343_v26, 0.0  ;;  %v6396_v1 = vpack.c.bf16 %v6362_v27, %v6343_v26  ;;  %v6492_v57 = vmax.f32 %v6362_v27, 0.0  ;;  %v10972_v26 = vld [vmem:[#allocation2 + $0x538] sm:$0xf] }
 0x705   : > { %8086 = vmatpush.bf16.msra.mxu2 %v10313_v11  ;;  %v10717_v11 = vor.u32 %v11573_v21, %v10716_v31  ;;  %v11525_v27 = vld [vmem:[#allocation2 + $0x1f4] sm:$0xf0]  ;;  %v10973_v23 = vor.u32 %v11637_v12, %v10972_v26  ;;  %v10390_v26 = vld [vmem:[#allocation2 + $0xf0] sm:$0xf0] }
 0x706   : > { %8195 = vmatpush.bf16.msra.mxu0 %v10645_v17  ;;  %6428 = vst [vmem:[#allocation2 + $0x4f8] sm:$0xff] %v6396_v1  ;;  %v6524_v17 = vpack.c.bf16 %v6492_v57, %v6491_v6  ;;  %v11564_v6 = vld [vmem:[#allocation2 + $0x334] sm:$0xf]  ;;  %v7768_v57 = vadd.f32 %v13879_v25, %v13877_v28  ;;  %v13905_v4 = vpop.f32.mrf.mxu0 }
 0x707   : > { %8408 = vst [vmem:[%s13766_s26 + $0xf8] sm:$0xff] %v6396_v1  ;;  %v11036_v56 = vld [vmem:[#allocation2 + $0x5b8] sm:$0xf]  ;;  %v10710_v1 = vld [vmem:[#allocation2 + $0x370] sm:$0xf0]  ;;  %v13907_v31 = vpop.f32.mrf.mxu1 }
 0x708   : > { %6556 = vst [vmem:[#allocation2 + $0x5f8] sm:$0xff] %v6524_v17  ;;  %11060 = vmatmul.msk.bf16.vlgmr.msra.gmra.mxu3 %vm3174_vm4, %v13784_v34  ;;  %8087 = vmatmul.bf16.vlgmr.msra.gmra.mxu2 %v13786_v29  ;;  %v10525_v17 = vor.u32 %v11525_v27, %v10524_v50  ;;  %v11548_v28 = vld [vmem:[#allocation2 + $0x2b4] sm:$0xf] }
 0x709   : > { %8155 = vmatpush.bf16.msrb.mxu2 %v10769_v48  ;;  %8254 = vmatpush.bf16.msra.mxu3 %v11033_v7  ;;  %v10908_v7 = vld [vmem:[#allocation2 + $0x4b8] sm:$0xf]  ;;  %v10646_v25 = vld [vmem:[#allocation2 + $0x2f0] sm:$0xf0] }
 0x70a   : > { %8196 = vmatpush.bf16.msra.mxu0 %v10581_v51  ;;  %v7766_v51 = vadd.f32 %v13873_v22, %v13871_v39  ;;  %v11541_v39 = vld [vmem:[#allocation2 + $0x274] sm:$0xf0]  ;;  %v11580_v22 = vld [vmem:[#allocation2 + $0x3b4] sm:$0xf] }
 0x70b   : > { %v7784_v48 = vpop.f32.mrf.mxu2  ;;  %v7803_v62 = vpop.f32.mrf.mxu3  ;;  %v10777_v52 = vor.u32 %v11580_v22, %v10774_v24 }
 0x70d   : > { %8156 = vmatpush.bf16.msrb.mxu2 %v10705_v54  ;;  %v11612_v54 = vld [vmem:[#allocation2 + $0x4b4] sm:$0xf]  ;;  %8255 = vmatpush.bf16.msra.mxu3 %v10969_v60  ;;  %v11621_v35 = vld [vmem:[#allocation2 + $0x4f4] sm:$0xf0]  ;;  %v10910_v50 = vld [vmem:[#allocation2 + $0x4f8] sm:$0xf0] }
 0x70e   : > { %8197 = vmatpush.bf16.msra.mxu0 %v10517_v14  ;;  %v7804_v14 = vadd.f32 %v7803_v62, %v7784_v48  ;;  %v10909_v21 = vor.u32 %v11621_v35, %v10908_v7  ;;  %v11532_v60 = vld [vmem:[#allocation2 + $0x234] sm:$0xf]  ;;  %v13914_v44 = vpop.f32.mrf.mxu0  ;;  %v10782_v35 = vld [vmem:[#allocation2 + $0x3f8] sm:$0xf0] }
 0x70f   : > { %v11653_v32 = vld [vmem:[#allocation2 + $0x5f4] sm:$0xf0]  ;;  %8130 = vmatmul.bf16.gmra.mxu0 %v13796_v19  ;;  %11063 = vmatmul.msk.bf16.gmra.mxu1 %vm3174_vm4, %v13799_v36  ;;  %v13916_v22 = vpop.f32.mrf.mxu1  ;;  %v11613_v7 = vld [vmem:[#allocation2 + $0x4bc] sm:$0xf] }
 0x710   : > { %v8345_v18 = vpack.c.bf16 %v7804_v14, %v7766_v51  ;;  %v11037_v8 = vor.u32 %v11653_v32, %v11036_v56  ;;  %v10844_v51 = vld [vmem:[#allocation2 + $0x438] sm:$0xf] }
 0x711   : > { %8157 = vmatpush.bf16.msrb.mxu2 %v10641_v38  ;;  %v10838_v38 = vld [vmem:[#allocation2 + $0x470] sm:$0xf0]  ;;  %v10845_v62 = vor.u32 %v11605_v30, %v10844_v51 }
 0x712   : > { %8198 = vmatpush.bf16.msra.mxu0 %v10453_v16  ;;  %v10905_v16 = vor.u32 %v11612_v54, %v10902_v15  ;;  %8409 = vst [vmem:[%s13766_s26 + $0x100] sm:$0xff] %v8345_v18  ;;  %8292 = vmatpush.bf16.msrb.mxu1 %v11037_v8  ;;  %v10841_v40 = vor.u32 %v11596_v42, %v10838_v38  ;;  %v10332_v18 = vld [vmem:[#allocation2 + $0x38] sm:$0xf]  ;;  %v10454_v8 = vld [vmem:[#allocation2 + $0x170] sm:$0xf0] }
 0x713   : > { %v7786_v43 = vpop.f32.mrf.mxu2  ;;  %v7805_v0 = vpop.f32.mrf.mxu3  ;;  %v10397_v15 = vor.u32 %v11493_v49, %v10396_v13  ;;  %v11038_v38 = vld [vmem:[#allocation2 + $0x5f8] sm:$0xf0] }
 0x714   : > { %8256 = vmatpush.bf16.msra.mxu3 %v10905_v16  ;;  %v11500_v16 = vld [vmem:[#allocation2 + $0x134] sm:$0xf] }
 0x715   : > { %8158 = vmatpush.bf16.msrb.mxu2 %v10577_v59  ;;  %v10321_v59 = vor.u32 %v11467_v46, %v10318_v58  ;;  %v7773_v46 = vadd.f32 %v13897_v2, %v13895_v33  ;;  %v10457_v12 = vor.u32 %v11500_v16, %v10454_v8  ;;  %v11629_v2 = vld [vmem:[#allocation2 + $0x53c] sm:$0xf] }
 0x716   : > { %8199 = vmatpush.bf16.msra.mxu0 %v10389_v47  ;;  %v10588_v47 = vld [vmem:[#allocation2 + $0x238] sm:$0xf]  ;;  %8293 = vmatpush.bf16.msrb.mxu1 %v10973_v23  ;;  %v7827_v27 = vpop.f32.mrf.mxu0 }
 0x717   : > { %v10589_v10 = vor.u32 %v11541_v39, %v10588_v47  ;;  %v11516_v39 = vld [vmem:[#allocation2 + $0x1b4] sm:$0xf] }
 0x718   : > { %8257 = vmatpush.bf16.msra.mxu3 %v10841_v40  ;;  %8092 = vmatmul.bf16.gmra.mxu2 %v13796_v19  ;;  %v10521_v32 = vor.u32 %v11516_v39, %v10518_v41  ;;  %v11484_v40 = vld [vmem:[#allocation2 + $0xb4] sm:$0xf] }
 0x719   : > { %8159 = vmatpush.bf16.msrb.mxu2 %v10513_v37  ;;  %11061 = vmatmul.msk.bf16.gmra.mxu3 %vm3174_vm4, %v13799_v36  ;;  %v10393_v33 = vor.u32 %v11484_v40, %v10390_v26  ;;  %v11485_v26 = vld [vmem:[#allocation2 + $0xbc] sm:$0xf] }
 0x71a   : > { %8200 = vmatpush.bf16.msra.mxu0 %v10325_v55  ;;  %v7806_v55 = vadd.f32 %v7805_v0, %v7786_v43  ;;  %8294 = vmatpush.bf16.msrb.mxu1 %v10909_v21  ;;  %v7846_v43 = vpop.f32.mrf.mxu1  ;;  %v10974_v0 = vld [vmem:[#allocation2 + $0x578] sm:$0xf0]  ;;  %v10913_v21 = vor.u32 %v11613_v7, %v10910_v50 }
 0x71b   : > { %v7808_v48 = vpop.f32.mrf.mxu3  ;;  %v7789_v14 = vpop.f32.mrf.mxu2 }
 0x71c   : > { %v8353_v37 = vpack.c.bf16 %v7806_v55, %v7768_v57  ;;  %v7809_v54 = vadd.f32 %v7808_v48, %v7789_v14  ;;  %v10326_v57 = vld [vmem:[#allocation2 + $0x70] sm:$0xf0]  ;;  %v7842_v55 = vadd.f32 %v13907_v31, %v13905_v4  ;;  %v10718_v4 = vld [vmem:[#allocation2 + $0x378] sm:$0xf0] }
 0x71d   : > { %8160 = vmatpush.bf16.msrb.mxu2 %v10449_v61  ;;  %v10461_v61 = vor.u32 %v11509_v5, %v10460_v63  ;;  %v11581_v5 = vld [vmem:[#allocation2 + $0x3bc] sm:$0xf] }
 0x71e   : > { %8269 = vmatpush.bf16.msrb.mxu0 %v10781_v53  ;;  %v10713_v53 = vor.u32 %v11564_v6, %v10710_v1  ;;  %8417 = vst [vmem:[%s13766_s26 + $0x140] sm:$0xff] %v8353_v37  ;;  %8295 = vmatpush.bf16.msrb.mxu1 %v10845_v62  ;;  %v8361_v58 = vpack.c.bf16 %v7809_v54, %v7771_v9  ;;  %v11468_v1 = vld [vmem:[#allocation2 + $0x34] sm:$0xf]  ;;  %v7829_v63 = vpop.f32.mrf.mxu0  ;;  %v11597_v31 = vld [vmem:[#allocation2 + $0x43c] sm:$0xf] }
 0x71f   : > { %8201 = vmatmul.bf16.vlgmr.msra.gmra.mxu0 %v13786_v29  ;;  %11066 = vmatmul.msk.bf16.vlgmr.msra.gmra.mxu1 %vm3174_vm4, %v13784_v34  ;;  %v10977_v6 = vor.u32 %v11629_v2, %v10974_v0  ;;  %v10654_v48 = vld [vmem:[#allocation2 + $0x2f8] sm:$0xf0] }
 0x720   : > { %8425 = vst [vmem:[%s13766_s26 + $0x180] sm:$0xff] %v8361_v58  ;;  %v11549_v14 = vld [vmem:[#allocation2 + $0x2bc] sm:$0xf] }
 0x721   : > { %8161 = vmatpush.bf16.msrb.mxu2 %v10385_v20  ;;  %v10585_v20 = vor.u32 %v11532_v60, %v10582_v45  ;;  %v7844_v60 = vadd.f32 %v13916_v22, %v13914_v44  ;;  %v10657_v13 = vor.u32 %v11549_v14, %v10654_v48  ;;  %v11533_v58 = vld [vmem:[#allocation2 + $0x23c] sm:$0xf]  ;;  %v7847_v44 = vadd.f32 %v7846_v43, %v7827_v27 }
 0x722   : > { %8270 = vmatpush.bf16.msrb.mxu0 %v10717_v11  ;;  %v10649_v11 = vor.u32 %v11548_v28, %v10646_v25  ;;  %v10785_v28 = vor.u32 %v11581_v5, %v10782_v35  ;;  %v7848_v30 = vpop.f32.mrf.mxu1  ;;  %v10526_v22 = vld [vmem:[#allocation2 + $0x1f8] sm:$0xf0] }
 0x723   : > { %v7810_v24 = vpop.f32.mrf.mxu3  ;;  %v7791_v42 = vpop.f32.mrf.mxu2  ;;  %v10334_v2 = vld [vmem:[#allocation2 + $0x78] sm:$0xf0] }
 0x724   : > { %v7811_v47 = vadd.f32 %v7810_v24, %v7791_v42 }
 0x725   : > { %8162 = vmatpush.bf16.msrb.mxu2 %v10321_v59  ;;  %v11645_v59 = vld [vmem:[#allocation2 + $0x5bc] sm:$0xf] }
 0x726   : > { %8271 = vmatpush.bf16.msrb.mxu0 %v10653_v3  ;;  %v11477_v3 = vld [vmem:[#allocation2 + $0x74] sm:$0xf0] }
 0x727   : > { %v10333_v56 = vor.u32 %v11477_v3, %v10332_v18  ;;  %v10590_v3 = vld [vmem:[#allocation2 + $0x278] sm:$0xf0] }
 0x728   : > { %8163 = vmatmul.bf16.vlgmr.msrb.gmra.mxu2 %v13786_v29  ;;  %v10593_v41 = vor.u32 %v11533_v58, %v10590_v3 }
 0x729   : > { %8231 = vmatpush.bf16.msra.mxu2 %v10777_v52  ;;  %v11041_v52 = vor.u32 %v11645_v59, %v11038_v38  ;;  %11064 = vmatmul.msk.bf16.vlgmr.msrb.gmra.mxu3 %vm3174_vm4, %v13784_v34  ;;  %v10462_v38 = vld [vmem:[#allocation2 + $0x178] sm:$0xf0] }
 0x72a   : > { %8272 = vmatpush.bf16.msrb.mxu0 %v10589_v10  ;;  %v8369_v10 = vpack.c.bf16 %v7811_v47, %v7773_v46  ;;  %v11501_v46 = vld [vmem:[#allocation2 + $0x13c] sm:$0xf] }
 0x72b   : > { %8330 = vmatpush.bf16.msrb.mxu3 %v11041_v52  ;;  %v7879_v23 = vpop.f32.mrf.mxu3  ;;  %v10398_v59 = vld [vmem:[#allocation2 + $0xf8] sm:$0xf0]  ;;  %v7849_v52 = vadd.f32 %v7848_v30, %v7829_v63 }
 0x72c   : > { %8433 = vst [vmem:[%s13766_s26 + $0x1c0] sm:$0xff] %v8369_v10  ;;  %v10401_v27 = vor.u32 %v11485_v26, %v10398_v59 }
 0x72d   : > { %8232 = vmatpush.bf16.msra.mxu2 %v10713_v53  ;;  %v10329_v53 = vor.u32 %v11468_v1, %v10326_v57 }
 0x72e   : > { %8273 = vmatpush.bf16.msrb.mxu0 %v10525_v17  ;;  %v7860_v17 = vpop.f32.mrf.mxu2 }
 0x72f   : > { %8331 = vmatpush.bf16.msrb.mxu3 %v10977_v6  ;;  %v7880_v37 = vadd.f32 %v7879_v23, %v7860_v17  ;;  %8206 = vmatmul.bf16.gmra.mxu0 %v13796_v19  ;;  %v11469_v23 = vld [vmem:[#allocation2 + $0x3c] sm:$0xf] }
 0x730   : > { %11067 = vmatmul.msk.bf16.gmra.mxu1 %vm3174_vm4, %v13799_v36  ;;  %v10337_v1 = vor.u32 %v11469_v23, %v10334_v2 }
 0x731   : > { %8233 = vmatpush.bf16.msra.mxu2 %v10649_v11  ;;  %v8346_v25 = vpack.c.bf16 %v7880_v37, %v7842_v55  ;;  %v11565_v11 = vld [vmem:[#allocation2 + $0x33c] sm:$0xf] }
 0x732   : > { %8274 = vmatpush.bf16.msrb.mxu0 %v10461_v61  ;;  %v10846_v61 = vld [vmem:[#allocation2 + $0x478] sm:$0xf0]  ;;  %v10721_v9 = vor.u32 %v11565_v11, %v10718_v4 }
 0x733   : > { %8332 = vmatpush.bf16.msrb.mxu3 %v10913_v21  ;;  %8410 = vst [vmem:[%s13766_s26 + $0x108] sm:$0xff] %v8346_v25  ;;  %v7881_v51 = vpop.f32.mrf.mxu3  ;;  %v10849_v49 = vor.u32 %v11597_v31, %v10846_v61 }
 0x735   : > { %8234 = vmatpush.bf16.msra.mxu2 %v10585_v20  ;;  %v7917_v20 = vpop.f32.mrf.mxu1 }
 0x736   : > { %8275 = vmatpush.bf16.msrb.mxu0 %v10397_v15  ;;  %v7862_v62 = vpop.f32.mrf.mxu2  ;;  %v7898_v15 = vpop.f32.mrf.mxu0 }
 0x737   : > { %8333 = vmatpush.bf16.msrb.mxu3 %v10849_v49  ;;  %v7882_v45 = vadd.f32 %v7881_v51, %v7862_v62  ;;  %v7918_v57 = vadd.f32 %v7917_v20, %v7898_v15 }
 0x738   : > { %8168 = vmatmul.bf16.gmra.mxu2 %v13796_v19 }
 0x739   : > { %8235 = vmatpush.bf16.msra.mxu2 %v10521_v32  ;;  %v8354_v54 = vpack.c.bf16 %v7882_v45, %v7844_v60  ;;  %11065 = vmatmul.msk.bf16.gmra.mxu3 %vm3174_vm4, %v13799_v36  ;;  %v11517_v32 = vld [vmem:[#allocation2 + $0x1bc] sm:$0xf] }
 0x73a   : > { %8276 = vmatpush.bf16.msrb.mxu0 %v10333_v56  ;;  %v10529_v24 = vor.u32 %v11517_v32, %v10526_v22 }
 0x73b   : > { %8418 = vst [vmem:[%s13766_s26 + $0x148] sm:$0xff] %v8354_v54  ;;  %v7884_v39 = vpop.f32.mrf.mxu3 }
 0x73d   : > { %8236 = vmatpush.bf16.msra.mxu2 %v10457_v12  ;;  %v7919_v42 = vpop.f32.mrf.mxu1  ;;  %v10465_v12 = vor.u32 %v11501_v46, %v10462_v38 }
 0x73e   : > { %v7865_v18 = vpop.f32.mrf.mxu2  ;;  %v7900_v8 = vpop.f32.mrf.mxu0 }
 0x73f   : > { %v7885_v56 = vadd.f32 %v7884_v39, %v7865_v18  ;;  %8277 = vmatmul.bf16.vlgmr.msrb.gmra.mxu0 %v13786_v29  ;;  %v7920_v5 = vadd.f32 %v7919_v42, %v7900_v8 }
 0x740   : > { %11070 = vmatmul.msk.bf16.vlgmr.msrb.gmra.mxu1 %vm3174_vm4, %v13784_v34 }
 0x741   : > { %8237 = vmatpush.bf16.msra.mxu2 %v10393_v33  ;;  %v8362_v16 = vpack.c.bf16 %v7885_v56, %v7847_v44 }
 0x743   : > { %8426 = vst [vmem:[%s13766_s26 + $0x188] sm:$0xff] %v8362_v16  ;;  %v7886_v47 = vpop.f32.mrf.mxu3 }
 0x745   : > { %8238 = vmatpush.bf16.msra.mxu2 %v10329_v53  ;;  %v7922_v33 = vpop.f32.mrf.mxu1 }
 0x746   : > { %v7867_v10 = vpop.f32.mrf.mxu2  ;;  %v7903_v0 = vpop.f32.mrf.mxu0 }
 0x747   : > { %v7887_v40 = vadd.f32 %v7886_v47, %v7867_v10  ;;  %v7923_v61 = vadd.f32 %v7922_v33, %v7903_v0 }
 0x748   : > { %8239 = vmatmul.bf16.vlgmr.msra.gmra.mxu2 %v13786_v29 }
 0x749   : > { %8307 = vmatpush.bf16.msrb.mxu2 %v10785_v28  ;;  %v8370_v43 = vpack.c.bf16 %v7887_v40, %v7849_v52  ;;  %11068 = vmatmul.msk.bf16.vlgmr.msra.gmra.mxu3 %vm3174_vm4, %v13784_v34 }
 0x74b   : > { %8434 = vst [vmem:[%s13766_s26 + $0x1c8] sm:$0xff] %v8370_v43  ;;  %v7955_v6 = vpop.f32.mrf.mxu3 }
 0x74d   : > { %8308 = vmatpush.bf16.msrb.mxu2 %v10721_v9  ;;  %v7924_v17 = vpop.f32.mrf.mxu1 }
 0x74e   : > { %v7936_v55 = vpop.f32.mrf.mxu2  ;;  %v7905_v35 = vpop.f32.mrf.mxu0 }
 0x74f   : > { %v7956_v50 = vadd.f32 %v7955_v6, %v7936_v55  ;;  %8282 = vmatmul.bf16.gmra.mxu0 %v13796_v19  ;;  %v7925_v62 = vadd.f32 %v7924_v17, %v7905_v35 }
 0x750   : > { %11071 = vmatmul.msk.bf16.gmra.mxu1 %vm3174_vm4, %v13799_v36 }
 0x751   : > { %8309 = vmatpush.bf16.msrb.mxu2 %v10657_v13  ;;  %v8347_v37 = vpack.c.bf16 %v7956_v50, %v7918_v57 }
 0x753   : > { %8411 = vst [vmem:[%s13766_s26 + $0x110] sm:$0xff] %v8347_v37  ;;  %v7957_v53 = vpop.f32.mrf.mxu3 }
 0x755   : > { %8310 = vmatpush.bf16.msrb.mxu2 %v10593_v41  ;;  %v7993_v25 = vpop.f32.mrf.mxu1 }
 0x756   : > { %v7938_v7 = vpop.f32.mrf.mxu2  ;;  %v7974_v28 = vpop.f32.mrf.mxu0 }
 0x757   : > { %v7958_v21 = vadd.f32 %v7957_v53, %v7938_v7  ;;  %v7994_v15 = vadd.f32 %v7993_v25, %v7974_v28 }
 0x758   : > { %8244 = vmatmul.bf16.gmra.mxu2 %v13796_v19 }
 0x759   : > { %8311 = vmatpush.bf16.msrb.mxu2 %v10529_v24  ;;  %v8355_v63 = vpack.c.bf16 %v7958_v21, %v7920_v5  ;;  %11069 = vmatmul.msk.bf16.gmra.mxu3 %vm3174_vm4, %v13799_v36 }
 0x75b   : > { %8419 = vst [vmem:[%s13766_s26 + $0x150] sm:$0xff] %v8355_v63  ;;  %v7960_v30 = vpop.f32.mrf.mxu3 }
 0x75d   : > { %8312 = vmatpush.bf16.msrb.mxu2 %v10465_v12  ;;  %v7995_v51 = vpop.f32.mrf.mxu1 }
 0x75e   : > { %v7941_v4 = vpop.f32.mrf.mxu2  ;;  %v7976_v11 = vpop.f32.mrf.mxu0 }
 0x75f   : > { %v7961_v31 = vadd.f32 %v7960_v30, %v7941_v4  ;;  %v7996_v18 = vadd.f32 %v7995_v51, %v7976_v11 }
 0x761   : > { %8313 = vmatpush.bf16.msrb.mxu2 %v10401_v27  ;;  %v8363_v49 = vpack.c.bf16 %v7961_v31, %v7923_v61 }
 0x763   : > { %v7962_v9 = vpop.f32.mrf.mxu3  ;;  %8427 = vst [vmem:[%s13766_s26 + $0x190] sm:$0xff] %v8363_v49 }
 0x765   : > { %8314 = vmatpush.bf16.msrb.mxu2 %v10337_v1  ;;  %v7998_v14 = vpop.f32.mrf.mxu1 }
 0x766   : > { %v7943_v48 = vpop.f32.mrf.mxu2  ;;  %v7979_v45 = vpop.f32.mrf.mxu0 }
 0x767   : > { %v7963_v60 = vadd.f32 %v7962_v9, %v7943_v48 }
 0x768   : > { %8315 = vmatmul.bf16.vlgmr.msrb.gmra.mxu2 %v13786_v29  ;;  %v7999_v29 = vadd.f32 %v7998_v14, %v7979_v45 }
 0x769   : > { %11072 = vmatmul.msk.bf16.vlgmr.msrb.gmra.mxu3 %vm3174_vm4, %v13784_v34  ;;  %v8371_v13 = vpack.c.bf16 %v7963_v60, %v7925_v62 }
 0x76b   : > { %v8031_v54 = vpop.f32.mrf.mxu3  ;;  %8435 = vst [vmem:[%s13766_s26 + $0x1d0] sm:$0xff] %v8371_v13 }
 0x76d   : > { %v8000_v39 = vpop.f32.mrf.mxu1 }
 0x76e   : > { %v8012_v20 = vpop.f32.mrf.mxu2  ;;  %v7981_v58 = vpop.f32.mrf.mxu0 }
 0x76f   : > { %v8032_v3 = vadd.f32 %v8031_v54, %v8012_v20  ;;  %v8001_v52 = vadd.f32 %v8000_v39, %v7981_v58 }
 0x771   : > { %v8348_v41 = vpack.c.bf16 %v8032_v3, %v7994_v15 }
 0x773   : > { %v8033_v44 = vpop.f32.mrf.mxu3  ;;  %8412 = vst [vmem:[%s13766_s26 + $0x118] sm:$0xff] %v8348_v41 }
 0x775   : > { %v8069_v34 = vpop.f32.mrf.mxu1 }
 0x776   : > { %v8014_v22 = vpop.f32.mrf.mxu2  ;;  %v8050_v32 = vpop.f32.mrf.mxu0 }
 0x777   : > { %v8034_v56 = vadd.f32 %v8033_v44, %v8014_v22 }
 0x778   : > { %8320 = vmatmul.bf16.gmra.mxu2 %v13796_v19  ;;  %v8070_v19 = vadd.f32 %v8069_v34, %v8050_v32 }
 0x779   : > { %11073 = vmatmul.msk.bf16.gmra.mxu3 %vm3174_vm4, %v13799_v36  ;;  %v8356_v24 = vpack.c.bf16 %v8034_v56, %v7996_v18 }
 0x77b   : > { %v8036_v16 = vpop.f32.mrf.mxu3  ;;  %8420 = vst [vmem:[%s13766_s26 + $0x158] sm:$0xff] %v8356_v24 }
 0x77d   : > { %v8071_v46 = vpop.f32.mrf.mxu1 }
 0x77e   : > { %v8017_v8 = vpop.f32.mrf.mxu2  ;;  %v8052_v42 = vpop.f32.mrf.mxu0 }
 0x77f   : > { %v8037_v38 = vadd.f32 %v8036_v16, %v8017_v8  ;;  %v8072_v57 = vadd.f32 %v8071_v46, %v8052_v42 }
 0x781   : > { %v8364_v47 = vpack.c.bf16 %v8037_v38, %v7999_v29 }
 0x783   : > { %v8038_v12 = vpop.f32.mrf.mxu3  ;;  %8428 = vst [vmem:[%s13766_s26 + $0x198] sm:$0xff] %v8364_v47 }
 0x785   : > { %v8074_v36 = vpop.f32.mrf.mxu1 }
 0x786   : > { %v8019_v59 = vpop.f32.mrf.mxu2  ;;  %v8055_v10 = vpop.f32.mrf.mxu0 }
 0x787   : > { %v8039_v40 = vadd.f32 %v8038_v12, %v8019_v59  ;;  %v8075_v53 = vadd.f32 %v8074_v36, %v8055_v10 }
 0x789   : > { %v8372_v26 = vpack.c.bf16 %v8039_v40, %v8001_v52 }
 0x78b   : > { %v8107_v27 = vpop.f32.mrf.mxu3  ;;  %8436 = vst [vmem:[%s13766_s26 + $0x1d8] sm:$0xff] %v8372_v26 }
 0x78d   : > { %v8076_v2 = vpop.f32.mrf.mxu1 }
 0x78e   : > { %v8088_v43 = vpop.f32.mrf.mxu2  ;;  %v8057_v0 = vpop.f32.mrf.mxu0 }
 0x78f   : > { %v8108_v33 = vadd.f32 %v8107_v27, %v8088_v43  ;;  %v8077_v61 = vadd.f32 %v8076_v2, %v8057_v0 }
 0x791   : > { %v8349_v23 = vpack.c.bf16 %v8108_v33, %v8070_v19 }
 0x793   : > { %v8109_v6 = vpop.f32.mrf.mxu3  ;;  %8413 = vst [vmem:[%s13766_s26 + $0x120] sm:$0xff] %v8349_v23 }
 0x795   : > { %v8145_v35 = vpop.f32.mrf.mxu1 }
 0x796   : > { %v8090_v1 = vpop.f32.mrf.mxu2  ;;  %v8126_v50 = vpop.f32.mrf.mxu0 }
 0x797   : > { %v8110_v55 = vadd.f32 %v8109_v6, %v8090_v1  ;;  %v8146_v9 = vadd.f32 %v8145_v35, %v8126_v50 }
 0x799   : > { %v8357_v17 = vpack.c.bf16 %v8110_v55, %v8072_v57 }
 0x79b   : > { %8421 = vst [vmem:[%s13766_s26 + $0x160] sm:$0xff] %v8357_v17 }
 0x79c   : > { %v8112_v37 = vpop.f32.mrf.mxu3 }
 0x79d   : > { %v8147_v63 = vpop.f32.mrf.mxu1 }
 0x79e   : > { %v8093_v7 = vpop.f32.mrf.mxu2  ;;  %v8128_v21 = vpop.f32.mrf.mxu0 }
 0x79f   : > { %v8113_v5 = vadd.f32 %v8112_v37, %v8093_v7  ;;  %v8148_v15 = vadd.f32 %v8147_v63, %v8128_v21 }
 0x7a1   : > { %v8365_v28 = vpack.c.bf16 %v8113_v5, %v8075_v53 }
 0x7a3   : > { %8429 = vst [vmem:[%s13766_s26 + $0x1a0] sm:$0xff] %v8365_v28 }
 0x7a4   : > { %v8114_v25 = vpop.f32.mrf.mxu3 }
 0x7a5   : > { %v8150_v49 = vpop.f32.mrf.mxu1 }
 0x7a6   : > { %v8095_v30 = vpop.f32.mrf.mxu2  ;;  %v8131_v51 = vpop.f32.mrf.mxu0 }
 0x7a7   : > { %v8115_v4 = vadd.f32 %v8114_v25, %v8095_v30  ;;  %v8151_v39 = vadd.f32 %v8150_v49, %v8131_v51 }
 0x7a9   : > { %v8373_v31 = vpack.c.bf16 %v8115_v4, %v8077_v61 }
 0x7ab   : > { %8437 = vst [vmem:[%s13766_s26 + $0x1e0] sm:$0xff] %v8373_v31 }
 0x7ac   : > { %v8183_v11 = vpop.f32.mrf.mxu3 }
 0x7ad   : > { %v8152_v13 = vpop.f32.mrf.mxu1 }
 0x7ae   : > { %v8164_v48 = vpop.f32.mrf.mxu2  ;;  %v8133_v14 = vpop.f32.mrf.mxu0 }
 0x7af   : > { %v8184_v62 = vadd.f32 %v8183_v11, %v8164_v48  ;;  %v8153_v24 = vadd.f32 %v8152_v13, %v8133_v14 }
 0x7b1   : > { %v8350_v60 = vpack.c.bf16 %v8184_v62, %v8146_v9 }
 0x7b3   : > { %8414 = vst [vmem:[%s13766_s26 + $0x128] sm:$0xff] %v8350_v60 }
 0x7b4   : > { %v8185_v45 = vpop.f32.mrf.mxu3 }
 0x7b5   : > { %v8221_v22 = vpop.f32.mrf.mxu1 }
 0x7b6   : > { %v8166_v54 = vpop.f32.mrf.mxu2  ;;  %v8202_v41 = vpop.f32.mrf.mxu0 }
 0x7b7   : > { %v8186_v20 = vadd.f32 %v8185_v45, %v8166_v54  ;;  %v8222_v46 = vadd.f32 %v8221_v22, %v8202_v41 }
 0x7b9   : > { %v8358_v3 = vpack.c.bf16 %v8186_v20, %v8148_v15 }
 0x7bb   : > { %8422 = vst [vmem:[%s13766_s26 + $0x168] sm:$0xff] %v8358_v3 }
 0x7bc   : > { %v8188_v58 = vpop.f32.mrf.mxu3 }
 0x7bd   : > { %v8223_v42 = vpop.f32.mrf.mxu1 }
 0x7be   : > { %v8169_v44 = vpop.f32.mrf.mxu2  ;;  %v8204_v29 = vpop.f32.mrf.mxu0 }
 0x7bf   : > { %v8189_v18 = vadd.f32 %v8188_v58, %v8169_v44  ;;  %v8224_v26 = vadd.f32 %v8223_v42, %v8204_v29 }
 0x7c1   : > { %v8366_v32 = vpack.c.bf16 %v8189_v18, %v8151_v39 }
 0x7c3   : > { %8430 = vst [vmem:[%s13766_s26 + $0x1a8] sm:$0xff] %v8366_v32 }
 0x7c4   : > { %v8190_v56 = vpop.f32.mrf.mxu3 }
 0x7c5   : > { %v8226_v40 = vpop.f32.mrf.mxu1 }
 0x7c6   : > { %v8171_v34 = vpop.f32.mrf.mxu2  ;;  %v8207_v52 = vpop.f32.mrf.mxu0 }
 0x7c7   : > { %v8191_v16 = vadd.f32 %v8190_v56, %v8171_v34  ;;  %v8227_v2 = vadd.f32 %v8226_v40, %v8207_v52 }
 0x7c9   : > { %v8374_v38 = vpack.c.bf16 %v8191_v16, %v8153_v24 }
 0x7cb   : > { %8438 = vst [vmem:[%s13766_s26 + $0x1e8] sm:$0xff] %v8374_v38 }
 0x7cc   : > { %v8259_v8 = vpop.f32.mrf.mxu3 }
 0x7cd   : > { %v8228_v33 = vpop.f32.mrf.mxu1 }
 0x7ce   : > { %v8240_v47 = vpop.f32.mrf.mxu2  ;;  %v8209_v0 = vpop.f32.mrf.mxu0 }
 0x7cf   : > { %v8260_v12 = vadd.f32 %v8259_v8, %v8240_v47  ;;  %v8229_v17 = vadd.f32 %v8228_v33, %v8209_v0 }
 0x7d1   : > { %v8351_v10 = vpack.c.bf16 %v8260_v12, %v8222_v46 }
 0x7d3   : > { %8415 = vst [vmem:[%s13766_s26 + $0x130] sm:$0xff] %v8351_v10 }
 0x7d4   : > { %v8261_v59 = vpop.f32.mrf.mxu3 }
 0x7d5   : > { %v8297_v35 = vpop.f32.mrf.mxu1 }
 0x7d6   : > { %v8242_v36 = vpop.f32.mrf.mxu2  ;;  %v8278_v55 = vpop.f32.mrf.mxu0 }
 0x7d7   : > { %v8262_v27 = vadd.f32 %v8261_v59, %v8242_v36  ;;  %v8298_v5 = vadd.f32 %v8297_v35, %v8278_v55 }
 0x7d9   : > { %v8359_v43 = vpack.c.bf16 %v8262_v27, %v8224_v26 }
 0x7db   : > { %8423 = vst [vmem:[%s13766_s26 + $0x170] sm:$0xff] %v8359_v43 }
 0x7dc   : > { %v8264_v19 = vpop.f32.mrf.mxu3 }
 0x7dd   : > { %v8299_v63 = vpop.f32.mrf.mxu1 }
 0x7de   : > { %v8245_v23 = vpop.f32.mrf.mxu2  ;;  %v8280_v25 = vpop.f32.mrf.mxu0 }
 0x7df   : > { %v8265_v6 = vadd.f32 %v8264_v19, %v8245_v23  ;;  %v8300_v31 = vadd.f32 %v8299_v63, %v8280_v25 }
 0x7e1   : > { %v8367_v57 = vpack.c.bf16 %v8265_v6, %v8227_v2 }
 0x7e3   : > { %8431 = vst [vmem:[%s13766_s26 + $0x1b0] sm:$0xff] %v8367_v57 }
 0x7e4   : > { %v8266_v1 = vpop.f32.mrf.mxu3 }
 0x7e5   : > { %v8302_v9 = vpop.f32.mrf.mxu1 }
 0x7e6   : > { %v8247_v50 = vpop.f32.mrf.mxu2  ;;  %v8283_v49 = vpop.f32.mrf.mxu0 }
 0x7e7   : > { %v8267_v37 = vadd.f32 %v8266_v1, %v8247_v50  ;;  %v8303_v62 = vadd.f32 %v8302_v9, %v8283_v49 }
 0x7e9   : > { %v8375_v7 = vpack.c.bf16 %v8267_v37, %v8229_v17 }
 0x7eb   : > { %8439 = vst [vmem:[%s13766_s26 + $0x1f0] sm:$0xff] %v8375_v7 }
 0x7ec   : > { %v8335_v53 = vpop.f32.mrf.mxu3 }
 0x7ed   : > { %v8304_v54 = vpop.f32.mrf.mxu1 }
 0x7ee   : > { %v8316_v21 = vpop.f32.mrf.mxu2  ;;  %v8285_v13 = vpop.f32.mrf.mxu0 }
 0x7ef   : > { %v8336_v28 = vadd.f32 %v8335_v53, %v8316_v21  ;;  %v8305_v3 = vadd.f32 %v8304_v54, %v8285_v13 }
 0x7f1   : > { %v8352_v61 = vpack.c.bf16 %v8336_v28, %v8298_v5 }
 0x7f3   : > { %8416 = vst [vmem:[%s13766_s26 + $0x138] sm:$0xff] %v8352_v61 }
 0x7f4   : > { %v8337_v30 = vpop.f32.mrf.mxu3 }
 0x7f6   : > { %v8318_v4 = vpop.f32.mrf.mxu2 }
 0x7f7   : > { %v8338_v11 = vadd.f32 %v8337_v30, %v8318_v4 }
 0x7f9   : > { %v8360_v51 = vpack.c.bf16 %v8338_v11, %v8300_v31 }
 0x7fb   : > { %8424 = vst [vmem:[%s13766_s26 + $0x178] sm:$0xff] %v8360_v51 }
 0x7fc   : > { %v8340_v48 = vpop.f32.mrf.mxu3 }
 0x7fe   : > { %v8321_v60 = vpop.f32.mrf.mxu2 }
 0x7ff   : > { %v8341_v45 = vadd.f32 %v8340_v48, %v8321_v60 }
 0x801   : > { %v8368_v14 = vpack.c.bf16 %v8341_v45, %v8303_v62 }
 0x803   : > { %8432 = vst [vmem:[%s13766_s26 + $0x1b8] sm:$0xff] %v8368_v14 }
 0x804   : > { %v8342_v15 = vpop.f32.mrf.mxu3 }
 0x806   : > { %v8323_v20 = vpop.f32.mrf.mxu2 }
 0x807   : > { %v8343_v58 = vadd.f32 %v8342_v15, %v8323_v20 }
 0x809   : > { %v8376_v39 = vpack.c.bf16 %v8343_v58, %v8305_v3 }
 0x80b   : > { %8440 = vst [vmem:[%s13766_s26 + $0x1f8] sm:$0xff] %v8376_v39 }
 0x80c   : > { %11950 = shalt.err (!%p11947_p11)
}
 0x80d   : > { %s12006_s10 = smov 1024   ;;  %s12007_s23 = smov 2048  }
 0x80e   : > { %s12008_s24 = smov 64  }
 0x80f   : > { %11665 = dma.vmem_to_hbm [thread:$0]  (%p12098_p5), %s8455_s4, 8192, %s8457_s6, %s8442_s16, %s12006_s10, %s12007_s23, %s12008_s24  }
 0x810 PF: > { %s8471_s25 = sand.u32 1, %s11985_s12   ;;  %p14174_p12 = scmp.ge.s32.totalorder %s11997_s15, 2 }
 0x811   : > { %s8472_s26 = scalar_lea.sflag [#allocation5], %s8471_s25 }
 0x812   : > { %p11679_p13 = pnand %p14174_p12, %p12064_p6 }
 0x814   : > { %p11680_p0 = pneg %p11679_p13 }
 0x816   : > { %11980 = dma.done.wait (%p11680_p0), %s8472_s26, 8192  }
 0x817   : > { %11982 = vsyncadd (%p11680_p0), %s8472_s26, 4294959104  ;;  %p18_p3 = scmp.ge.s32.totalorder %s12085_s5, 4   ;;  %s14175_s12 = smov %s11989_s13 }
 0x818   : > { %s14176_s13 = smov %s11993_s14  ;;  %s14177_s14 = smov %s12094_s8 }
 0x819   : > { %s14178_s15 = smov %s12085_s5  ;;  %20 = sbr.rel (!%p18_p3) target bundleno = 7 (0x7), region = 86 }
 0x81e   :  { %8478 = vsyncpa [#allocation4], 1 }
 0x81f   :  { %8480 = vsyncpa [#allocation4 + $0x1], 1 }
 0x820   :  { %8481 = vsyncpa [#allocation9], 1 }
 0x821   :  { %8482 = vsyncpa [#allocation5], 1 }
 0x822   :  { %8484 = vsyncpa [#allocation5 + $0x1], 1 }
 0x823   :  { %8485 = vsyncpa [#allocation6], 1 }
 0x824   :  { %8487 = vsyncpa [#allocation6 + $0x1], 1 }

</bundles_post_ra>
